<compile_context>
chip_gen: v5e
topology: v5e:2x2
jax: 0.10.0
libtpu: 0.0.40
codegen_flags: <defaults>
</compile_context>

<pallas_src>
import functools

import jax
import jax.numpy as jnp
import numpy as np
from jax import lax
from jax.experimental import pallas as pl
from jax.experimental.pallas import tpu as pltpu


# ----------------------------- Pallas kernel -------------------------------

def _conv3x3_same(pad_ref, col_ref, w, bias, H, W, Cin, Cout, relu):
    """3x3 / stride-1 / pad-1 conv over a zero-haloed (H+2, W+2, Cin) buffer.

    The 9 taps are packed into an im2col scratch (H*W, 9*Cin) and contracted
    in a single MXU matmul with f32 accumulation; bias added once, ReLU fused.
    """
    for dy in range(3):
        for dx in range(3):
            t = dy * 3 + dx
            col_ref[:, t * Cin:(t + 1) * Cin] = (
                pad_ref[dy:dy + H, dx:dx + W, :].reshape(H * W, Cin))
    acc = jnp.dot(col_ref[...], w, preferred_element_type=jnp.float32)
    acc = acc + bias                       # (1, Cout) broadcast, added once
    if relu:
        acc = jnp.maximum(acc, 0.0)
    return acc


def _decoder_kernel(x_ref, w1_ref, b1_ref, w2_ref, b2_ref, w3_ref, b3_ref,
                    o_ref, pad_ref, col_ref, *, H, W, C, E):
    # One grid step == one (depth index, batch element) pair.  All three convs
    # (+ ReLUs) of one ShapePropDecoder are fused here; intermediates never
    # leave VMEM.
    pad_ref[...] = jnp.zeros_like(pad_ref)             # zero halo / borders

    # conv1 + ReLU
    pad_ref[1:H + 1, 1:W + 1, :] = x_ref[0].astype(jnp.float32)
    y = _conv3x3_same(pad_ref, col_ref, w1_ref[0], b1_ref[0],
                      H, W, C, C, relu=True)

    # conv2 + ReLU
    pad_ref[1:H + 1, 1:W + 1, :] = y.reshape(H, W, C)
    y = _conv3x3_same(pad_ref, col_ref, w2_ref[0], b2_ref[0],
                      H, W, C, C, relu=True)

    # conv3 (no activation)
    pad_ref[1:H + 1, 1:W + 1, :] = y.reshape(H, W, C)
    y = _conv3x3_same(pad_ref, col_ref, w3_ref[0], b3_ref[0],
                      H, W, C, E, relu=False)

    o_ref[0, 0] = y.reshape(H, W, E).astype(o_ref.dtype)


# ----------------------------- Module forward ------------------------------

def prompt_decoder_forward(embedding, params, *, depth):
    """Pallas forward of prompt_decoder: returns a list of `depth` prompts."""
    B, H, W, C = embedding.shape
    E = params["w3"].shape[-1]

    flops = 2 * depth * B * H * W * 9 * (C * C + C * C + C * E)
    bytes_accessed = 4 * (
        depth * B * H * W * E + B * H * W * C
        + depth * (9 * (2 * C * C + C * E) + 2 * C + E))

    stacked = pl.pallas_call(
        functools.partial(_decoder_kernel, H=H, W=W, C=C, E=E),
        out_shape=jax.ShapeDtypeStruct((depth, B, H, W, E), embedding.dtype),
        grid_spec=pltpu.PrefetchScalarGridSpec(
            num_scalar_prefetch=0,
            grid=(depth, B),
            in_specs=[
                pl.BlockSpec((1, H, W, C), lambda d, b: (b, 0, 0, 0)),
                pl.BlockSpec((1, 9 * C, C), lambda d, b: (d, 0, 0)),
                pl.BlockSpec((1, 1, C), lambda d, b: (d, 0, 0)),
                pl.BlockSpec((1, 9 * C, C), lambda d, b: (d, 0, 0)),
                pl.BlockSpec((1, 1, C), lambda d, b: (d, 0, 0)),
                pl.BlockSpec((1, 9 * C, E), lambda d, b: (d, 0, 0)),
                pl.BlockSpec((1, 1, E), lambda d, b: (d, 0, 0)),
            ],
            out_specs=pl.BlockSpec((1, 1, H, W, E),
                                   lambda d, b: (d, b, 0, 0, 0)),
            scratch_shapes=[
                pltpu.VMEM((H + 2, W + 2, C), jnp.float32),   # halo buffer
                pltpu.VMEM((H * W, 9 * C), jnp.float32),      # im2col buffer
            ],
        ),
        compiler_params=pltpu.CompilerParams(
            dimension_semantics=("parallel", "parallel")),
        cost_estimate=pl.CostEstimate(
            flops=flops, transcendentals=0, bytes_accessed=bytes_accessed),
    )(embedding, params["w1"], params["b1"], params["w2"], params["b2"],
      params["w3"], params["b3"])

    return [stacked[d] for d in range(depth)]


# ----------------------------- Params --------------------------------------

def init_params(key, depth, latent_dim, embed_dim):
    # TODO(synk): PyTorch's exact kaiming_uniform(a=sqrt(5)) init is not
    # replicated; forward semantics do not depend on the init distribution.
    ks = jax.random.split(key, 6)
    C, E = latent_dim, embed_dim

    def conv_w(k, cin, cout):
        fan_in = 9 * cin
        w = jax.random.normal(k, (depth, 3, 3, cin, cout), jnp.float32)
        # im2col layout: (depth, 9*cin, cout), tap-major / cin-minor (HWIO).
        return (w / np.sqrt(fan_in)).reshape(depth, 9 * cin, cout)

    return {
        "w1": conv_w(ks[0], C, C),
        "b1": jax.random.normal(ks[1], (depth, 1, C), jnp.float32) * 0.05,
        "w2": conv_w(ks[2], C, C),
        "b2": jax.random.normal(ks[3], (depth, 1, C), jnp.float32) * 0.05,
        "w3": conv_w(ks[4], C, E),
        "b3": jax.random.normal(ks[5], (depth, 1, E), jnp.float32) * 0.05,
    }


# ----------------------------- Pure-JAX reference ---------------------------

def prompt_decoder_reference(embedding, params, *, depth):
    B, H, W, C = embedding.shape
    E = params["w3"].shape[-1]
    dn = ("NHWC", "HWIO", "NHWC")
    outs = []
    for d in range(depth):
        w1 = params["w1"][d].reshape(3, 3, C, C)
        w2 = params["w2"][d].reshape(3, 3, C, C)
        w3 = params["w3"][d].reshape(3, 3, C, E)
        b1, b2, b3 = params["b1"][d, 0], params["b2"][d, 0], params["b3"][d, 0]
        y = lax.conv_general_dilated(embedding, w1, (1, 1), "SAME",
                                     dimension_numbers=dn) + b1
        y = jnp.maximum(y, 0.0)
        y = lax.conv_general_dilated(y, w2, (1, 1), "SAME",
                                     dimension_numbers=dn) + b2
        y = jnp.maximum(y, 0.0)
        y = lax.conv_general_dilated(y, w3, (1, 1), "SAME",
                                     dimension_numbers=dn) + b3
        outs.append(y)
    return outs


# ---------------------------------- Main ------------------------------------

if __name__ == "__main__":
    B, H, W = 2, 16, 16
    latent_dim = 24      # fixed inside prompt_decoder (ShapePropDecoder(E, 24))
    embed_dim = 32
    depth = 2

    key = jax.random.PRNGKey(0)
    kx, kp = jax.random.split(key)
    embedding = jax.random.normal(kx, (B, H, W, latent_dim), jnp.float32)
    params = init_params(kp, depth, latent_dim, embed_dim)

    prompts = prompt_decoder_forward(embedding, params, depth=depth)
    prompts = jax.block_until_ready(prompts)

    refs = jax.block_until_ready(
        prompt_decoder_reference(embedding, params, depth=depth))

    assert len(prompts) == depth
    for p_out, p_ref in zip(prompts, refs):
        assert p_out.shape == (B, H, W, embed_dim)
        np.testing.assert_allclose(np.asarray(p_out), np.asarray(p_ref),
                                   rtol=2e-3, atol=2e-3)
    print("KERNEL_OK")
</pallas_src>

<mosaic_0001>
module attributes {stable_mosaic.version = 11 : i64} {
  func.func @_decoder_kernel(%arg0: i32, %arg1: i32, %arg2: memref<1x16x16x24xf32, #tpu.memory_space<vmem>>, %arg3: memref<1x216x24xf32, #tpu.memory_space<vmem>>, %arg4: memref<1x1x24xf32, #tpu.memory_space<vmem>>, %arg5: memref<1x216x24xf32, #tpu.memory_space<vmem>>, %arg6: memref<1x1x24xf32, #tpu.memory_space<vmem>>, %arg7: memref<1x216x32xf32, #tpu.memory_space<vmem>>, %arg8: memref<1x1x32xf32, #tpu.memory_space<vmem>>, %arg9: memref<1x1x16x16x32xf32, #tpu.memory_space<vmem>>, %arg10: memref<18x18x24xf32, #tpu.memory_space<vmem>>, %arg11: memref<256x216xf32, #tpu.memory_space<vmem>>) attributes {dimension_semantics = [#tpu.dimension_semantics<parallel>, #tpu.dimension_semantics<parallel>], iteration_bounds = array<i64: 2, 2>, scalar_prefetch = 0 : i64, scratch_operands = 2 : i64, tpu.core_type = #tpu.core_type<tc>, window_params = [{transform_indices = @transform_0, window_bounds = array<i64: 1, 16, 16, 24>}, {transform_indices = @transform_1, window_bounds = array<i64: 1, 216, 24>}, {transform_indices = @transform_2, window_bounds = array<i64: 1, 1, 24>}, {transform_indices = @transform_3, window_bounds = array<i64: 1, 216, 24>}, {transform_indices = @transform_4, window_bounds = array<i64: 1, 1, 24>}, {transform_indices = @transform_5, window_bounds = array<i64: 1, 216, 32>}, {transform_indices = @transform_6, window_bounds = array<i64: 1, 1, 32>}, {transform_indices = @transform_7, window_bounds = array<i64: 1, 1, 16, 16, 32>}]} {
    %cst = arith.constant 0.000000e+00 : f32
    %0 = vector.broadcast %cst : f32 to vector<18x18x24xf32>
    %c0 = arith.constant 0 : index
    %c0_0 = arith.constant 0 : index
    %c0_1 = arith.constant 0 : index
    %1 = vector.load %arg10[%c0, %c0_0, %c0_1] : memref<18x18x24xf32, #tpu.memory_space<vmem>>, vector<18x18x24xf32>
    tpu.vector_store %arg10[%c0, %c0_0, %c0_1], %0 {strides = array<i32>} : memref<18x18x24xf32, #tpu.memory_space<vmem>>, vector<18x18x24xf32>,
    %c0_2 = arith.constant 0 : index
    %c0_3 = arith.constant 0 : index
    %c0_4 = arith.constant 0 : index
    %c0_5 = arith.constant 0 : index
    %2 = vector.load %arg2[%c0_2, %c0_3, %c0_4, %c0_5] : memref<1x16x16x24xf32, #tpu.memory_space<vmem>>, vector<1x16x16x24xf32>
    %3 = vector.shape_cast %2 : vector<1x16x16x24xf32> to vector<16x16x24xf32>
    %c1 = arith.constant 1 : index
    %c1_6 = arith.constant 1 : index
    %c0_7 = arith.constant 0 : index
    %4 = vector.load %arg10[%c1, %c1_6, %c0_7] : memref<18x18x24xf32, #tpu.memory_space<vmem>>, vector<16x16x24xf32>
    tpu.vector_store %arg10[%c1, %c1_6, %c0_7], %3 {strides = array<i32>} : memref<18x18x24xf32, #tpu.memory_space<vmem>>, vector<16x16x24xf32>,
    %c0_8 = arith.constant 0 : index
    %c0_9 = arith.constant 0 : index
    %c0_10 = arith.constant 0 : index
    %5 = vector.load %arg3[%c0_8, %c0_9, %c0_10] : memref<1x216x24xf32, #tpu.memory_space<vmem>>, vector<1x216x24xf32>
    %6 = vector.shape_cast %5 : vector<1x216x24xf32> to vector<216x24xf32>
    %c0_11 = arith.constant 0 : index
    %c0_12 = arith.constant 0 : index
    %c0_13 = arith.constant 0 : index
    %7 = vector.load %arg4[%c0_11, %c0_12, %c0_13] : memref<1x1x24xf32, #tpu.memory_space<vmem>>, vector<1x1x24xf32>
    %8 = vector.shape_cast %7 : vector<1x1x24xf32> to vector<1x24xf32>
    %c0_14 = arith.constant 0 : index
    %c0_15 = arith.constant 0 : index
    %c0_16 = arith.constant 0 : index
    %9 = vector.load %arg10[%c0_14, %c0_15, %c0_16] : memref<18x18x24xf32, #tpu.memory_space<vmem>>, vector<16x16x24xf32>
    %10 = vector.shape_cast %9 : vector<16x16x24xf32> to vector<256x24xf32>
    %c0_17 = arith.constant 0 : index
    %c0_18 = arith.constant 0 : index
    %11 = vector.load %arg11[%c0_17, %c0_18] : memref<256x216xf32, #tpu.memory_space<vmem>>, vector<256x24xf32>
    tpu.vector_store %arg11[%c0_17, %c0_18], %10 {strides = array<i32>} : memref<256x216xf32, #tpu.memory_space<vmem>>, vector<256x24xf32>,
    %c0_19 = arith.constant 0 : index
    %c1_20 = arith.constant 1 : index
    %c0_21 = arith.constant 0 : index
    %12 = vector.load %arg10[%c0_19, %c1_20, %c0_21] : memref<18x18x24xf32, #tpu.memory_space<vmem>>, vector<16x16x24xf32>
    %13 = vector.shape_cast %12 : vector<16x16x24xf32> to vector<256x24xf32>
    %c0_22 = arith.constant 0 : index
    %c24 = arith.constant 24 : index
    %14 = vector.load %arg11[%c0_22, %c24] : memref<256x216xf32, #tpu.memory_space<vmem>>, vector<256x24xf32>
    tpu.vector_store %arg11[%c0_22, %c24], %13 {strides = array<i32>} : memref<256x216xf32, #tpu.memory_space<vmem>>, vector<256x24xf32>,
    %c0_23 = arith.constant 0 : index
    %c2 = arith.constant 2 : index
    %c0_24 = arith.constant 0 : index
    %15 = vector.load %arg10[%c0_23, %c2, %c0_24] : memref<18x18x24xf32, #tpu.memory_space<vmem>>, vector<16x16x24xf32>
    %16 = vector.shape_cast %15 : vector<16x16x24xf32> to vector<256x24xf32>
    %c0_25 = arith.constant 0 : index
    %c48 = arith.constant 48 : index
    %17 = vector.load %arg11[%c0_25, %c48] : memref<256x216xf32, #tpu.memory_space<vmem>>, vector<256x24xf32>
    tpu.vector_store %arg11[%c0_25, %c48], %16 {strides = array<i32>} : memref<256x216xf32, #tpu.memory_space<vmem>>, vector<256x24xf32>,
    %c1_26 = arith.constant 1 : index
    %c0_27 = arith.constant 0 : index
    %c0_28 = arith.constant 0 : index
    %18 = vector.load %arg10[%c1_26, %c0_27, %c0_28] : memref<18x18x24xf32, #tpu.memory_space<vmem>>, vector<16x16x24xf32>
    %19 = vector.shape_cast %18 : vector<16x16x24xf32> to vector<256x24xf32>
    %c0_29 = arith.constant 0 : index
    %c72 = arith.constant 72 : index
    %20 = vector.load %arg11[%c0_29, %c72] : memref<256x216xf32, #tpu.memory_space<vmem>>, vector<256x24xf32>
    tpu.vector_store %arg11[%c0_29, %c72], %19 {strides = array<i32>} : memref<256x216xf32, #tpu.memory_space<vmem>>, vector<256x24xf32>,
    %c1_30 = arith.constant 1 : index
    %c1_31 = arith.constant 1 : index
    %c0_32 = arith.constant 0 : index
    %21 = vector.load %arg10[%c1_30, %c1_31, %c0_32] : memref<18x18x24xf32, #tpu.memory_space<vmem>>, vector<16x16x24xf32>
    %22 = vector.shape_cast %21 : vector<16x16x24xf32> to vector<256x24xf32>
    %c0_33 = arith.constant 0 : index
    %c96 = arith.constant 96 : index
    %23 = vector.load %arg11[%c0_33, %c96] : memref<256x216xf32, #tpu.memory_space<vmem>>, vector<256x24xf32>
    tpu.vector_store %arg11[%c0_33, %c96], %22 {strides = array<i32>} : memref<256x216xf32, #tpu.memory_space<vmem>>, vector<256x24xf32>,
    %c1_34 = arith.constant 1 : index
    %c2_35 = arith.constant 2 : index
    %c0_36 = arith.constant 0 : index
    %24 = vector.load %arg10[%c1_34, %c2_35, %c0_36] : memref<18x18x24xf32, #tpu.memory_space<vmem>>, vector<16x16x24xf32>
    %25 = vector.shape_cast %24 : vector<16x16x24xf32> to vector<256x24xf32>
    %c0_37 = arith.constant 0 : index
    %c120 = arith.constant 120 : index
    %26 = vector.load %arg11[%c0_37, %c120] : memref<256x216xf32, #tpu.memory_space<vmem>>, vector<256x24xf32>
    tpu.vector_store %arg11[%c0_37, %c120], %25 {strides = array<i32>} : memref<256x216xf32, #tpu.memory_space<vmem>>, vector<256x24xf32>,
    %c2_38 = arith.constant 2 : index
    %c0_39 = arith.constant 0 : index
    %c0_40 = arith.constant 0 : index
    %27 = vector.load %arg10[%c2_38, %c0_39, %c0_40] : memref<18x18x24xf32, #tpu.memory_space<vmem>>, vector<16x16x24xf32>
    %28 = vector.shape_cast %27 : vector<16x16x24xf32> to vector<256x24xf32>
    %c0_41 = arith.constant 0 : index
    %c144 = arith.constant 144 : index
    %29 = vector.load %arg11[%c0_41, %c144] : memref<256x216xf32, #tpu.memory_space<vmem>>, vector<256x24xf32>
    tpu.vector_store %arg11[%c0_41, %c144], %28 {strides = array<i32>} : memref<256x216xf32, #tpu.memory_space<vmem>>, vector<256x24xf32>,
    %c2_42 = arith.constant 2 : index
    %c1_43 = arith.constant 1 : index
    %c0_44 = arith.constant 0 : index
    %30 = vector.load %arg10[%c2_42, %c1_43, %c0_44] : memref<18x18x24xf32, #tpu.memory_space<vmem>>, vector<16x16x24xf32>
    %31 = vector.shape_cast %30 : vector<16x16x24xf32> to vector<256x24xf32>
    %c0_45 = arith.constant 0 : index
    %c168 = arith.constant 168 : index
    %32 = vector.load %arg11[%c0_45, %c168] : memref<256x216xf32, #tpu.memory_space<vmem>>, vector<256x24xf32>
    tpu.vector_store %arg11[%c0_45, %c168], %31 {strides = array<i32>} : memref<256x216xf32, #tpu.memory_space<vmem>>, vector<256x24xf32>,
    %c2_46 = arith.constant 2 : index
    %c2_47 = arith.constant 2 : index
    %c0_48 = arith.constant 0 : index
    %33 = vector.load %arg10[%c2_46, %c2_47, %c0_48] : memref<18x18x24xf32, #tpu.memory_space<vmem>>, vector<16x16x24xf32>
    %34 = vector.shape_cast %33 : vector<16x16x24xf32> to vector<256x24xf32>
    %c0_49 = arith.constant 0 : index
    %c192 = arith.constant 192 : index
    %35 = vector.load %arg11[%c0_49, %c192] : memref<256x216xf32, #tpu.memory_space<vmem>>, vector<256x24xf32>
    tpu.vector_store %arg11[%c0_49, %c192], %34 {strides = array<i32>} : memref<256x216xf32, #tpu.memory_space<vmem>>, vector<256x24xf32>,
    %c0_50 = arith.constant 0 : index
    %c0_51 = arith.constant 0 : index
    %36 = vector.load %arg11[%c0_50, %c0_51] : memref<256x216xf32, #tpu.memory_space<vmem>>, vector<256x216xf32>
    %cst_52 = arith.constant dense<0.000000e+00> : vector<256x24xf32>
    %37 = tpu.matmul %36, %6, %cst_52 {dimension_numbers = #tpu.dot_dimension_numbers<[1], [0], [0], [1], [0, 0, 1, 1], [], []>} : vector<256x216xf32>, vector<216x24xf32>, vector<256x24xf32> -> vector<256x24xf32>
    %38 = vector.broadcast %8 : vector<1x24xf32> to vector<256x24xf32>
    %39 = arith.addf %37, %38 : vector<256x24xf32>
    %cst_53 = arith.constant 0.000000e+00 : f32
    %40 = vector.broadcast %cst_53 : f32 to vector<256x24xf32>
    %41 = arith.maximumf %39, %40 : vector<256x24xf32>
    %42 = vector.shape_cast %41 : vector<256x24xf32> to vector<16x16x24xf32>
    %c1_54 = arith.constant 1 : index
    %c1_55 = arith.constant 1 : index
    %c0_56 = arith.constant 0 : index
    %43 = vector.load %arg10[%c1_54, %c1_55, %c0_56] : memref<18x18x24xf32, #tpu.memory_space<vmem>>, vector<16x16x24xf32>
    tpu.vector_store %arg10[%c1_54, %c1_55, %c0_56], %42 {strides = array<i32>} : memref<18x18x24xf32, #tpu.memory_space<vmem>>, vector<16x16x24xf32>,
    %c0_57 = arith.constant 0 : index
    %c0_58 = arith.constant 0 : index
    %c0_59 = arith.constant 0 : index
    %44 = vector.load %arg5[%c0_57, %c0_58, %c0_59] : memref<1x216x24xf32, #tpu.memory_space<vmem>>, vector<1x216x24xf32>
    %45 = vector.shape_cast %44 : vector<1x216x24xf32> to vector<216x24xf32>
    %c0_60 = arith.constant 0 : index
    %c0_61 = arith.constant 0 : index
    %c0_62 = arith.constant 0 : index
    %46 = vector.load %arg6[%c0_60, %c0_61, %c0_62] : memref<1x1x24xf32, #tpu.memory_space<vmem>>, vector<1x1x24xf32>
    %47 = vector.shape_cast %46 : vector<1x1x24xf32> to vector<1x24xf32>
    %c0_63 = arith.constant 0 : index
    %c0_64 = arith.constant 0 : index
    %c0_65 = arith.constant 0 : index
    %48 = vector.load %arg10[%c0_63, %c0_64, %c0_65] : memref<18x18x24xf32, #tpu.memory_space<vmem>>, vector<16x16x24xf32>
    %49 = vector.shape_cast %48 : vector<16x16x24xf32> to vector<256x24xf32>
    %c0_66 = arith.constant 0 : index
    %c0_67 = arith.constant 0 : index
    %50 = vector.load %arg11[%c0_66, %c0_67] : memref<256x216xf32, #tpu.memory_space<vmem>>, vector<256x24xf32>
    tpu.vector_store %arg11[%c0_66, %c0_67], %49 {strides = array<i32>} : memref<256x216xf32, #tpu.memory_space<vmem>>, vector<256x24xf32>,
    %c0_68 = arith.constant 0 : index
    %c1_69 = arith.constant 1 : index
    %c0_70 = arith.constant 0 : index
    %51 = vector.load %arg10[%c0_68, %c1_69, %c0_70] : memref<18x18x24xf32, #tpu.memory_space<vmem>>, vector<16x16x24xf32>
    %52 = vector.shape_cast %51 : vector<16x16x24xf32> to vector<256x24xf32>
    %c0_71 = arith.constant 0 : index
    %c24_72 = arith.constant 24 : index
    %53 = vector.load %arg11[%c0_71, %c24_72] : memref<256x216xf32, #tpu.memory_space<vmem>>, vector<256x24xf32>
    tpu.vector_store %arg11[%c0_71, %c24_72], %52 {strides = array<i32>} : memref<256x216xf32, #tpu.memory_space<vmem>>, vector<256x24xf32>,
    %c0_73 = arith.constant 0 : index
    %c2_74 = arith.constant 2 : index
    %c0_75 = arith.constant 0 : index
    %54 = vector.load %arg10[%c0_73, %c2_74, %c0_75] : memref<18x18x24xf32, #tpu.memory_space<vmem>>, vector<16x16x24xf32>
    %55 = vector.shape_cast %54 : vector<16x16x24xf32> to vector<256x24xf32>
    %c0_76 = arith.constant 0 : index
    %c48_77 = arith.constant 48 : index
    %56 = vector.load %arg11[%c0_76, %c48_77] : memref<256x216xf32, #tpu.memory_space<vmem>>, vector<256x24xf32>
    tpu.vector_store %arg11[%c0_76, %c48_77], %55 {strides = array<i32>} : memref<256x216xf32, #tpu.memory_space<vmem>>, vector<256x24xf32>,
    %c1_78 = arith.constant 1 : index
    %c0_79 = arith.constant 0 : index
    %c0_80 = arith.constant 0 : index
    %57 = vector.load %arg10[%c1_78, %c0_79, %c0_80] : memref<18x18x24xf32, #tpu.memory_space<vmem>>, vector<16x16x24xf32>
    %58 = vector.shape_cast %57 : vector<16x16x24xf32> to vector<256x24xf32>
    %c0_81 = arith.constant 0 : index
    %c72_82 = arith.constant 72 : index
    %59 = vector.load %arg11[%c0_81, %c72_82] : memref<256x216xf32, #tpu.memory_space<vmem>>, vector<256x24xf32>
    tpu.vector_store %arg11[%c0_81, %c72_82], %58 {strides = array<i32>} : memref<256x216xf32, #tpu.memory_space<vmem>>, vector<256x24xf32>,
    %c1_83 = arith.constant 1 : index
    %c1_84 = arith.constant 1 : index
    %c0_85 = arith.constant 0 : index
    %60 = vector.load %arg10[%c1_83, %c1_84, %c0_85] : memref<18x18x24xf32, #tpu.memory_space<vmem>>, vector<16x16x24xf32>
    %61 = vector.shape_cast %60 : vector<16x16x24xf32> to vector<256x24xf32>
    %c0_86 = arith.constant 0 : index
    %c96_87 = arith.constant 96 : index
    %62 = vector.load %arg11[%c0_86, %c96_87] : memref<256x216xf32, #tpu.memory_space<vmem>>, vector<256x24xf32>
    tpu.vector_store %arg11[%c0_86, %c96_87], %61 {strides = array<i32>} : memref<256x216xf32, #tpu.memory_space<vmem>>, vector<256x24xf32>,
    %c1_88 = arith.constant 1 : index
    %c2_89 = arith.constant 2 : index
    %c0_90 = arith.constant 0 : index
    %63 = vector.load %arg10[%c1_88, %c2_89, %c0_90] : memref<18x18x24xf32, #tpu.memory_space<vmem>>, vector<16x16x24xf32>
    %64 = vector.shape_cast %63 : vector<16x16x24xf32> to vector<256x24xf32>
    %c0_91 = arith.constant 0 : index
    %c120_92 = arith.constant 120 : index
    %65 = vector.load %arg11[%c0_91, %c120_92] : memref<256x216xf32, #tpu.memory_space<vmem>>, vector<256x24xf32>
    tpu.vector_store %arg11[%c0_91, %c120_92], %64 {strides = array<i32>} : memref<256x216xf32, #tpu.memory_space<vmem>>, vector<256x24xf32>,
    %c2_93 = arith.constant 2 : index
    %c0_94 = arith.constant 0 : index
    %c0_95 = arith.constant 0 : index
    %66 = vector.load %arg10[%c2_93, %c0_94, %c0_95] : memref<18x18x24xf32, #tpu.memory_space<vmem>>, vector<16x16x24xf32>
    %67 = vector.shape_cast %66 : vector<16x16x24xf32> to vector<256x24xf32>
    %c0_96 = arith.constant 0 : index
    %c144_97 = arith.constant 144 : index
    %68 = vector.load %arg11[%c0_96, %c144_97] : memref<256x216xf32, #tpu.memory_space<vmem>>, vector<256x24xf32>
    tpu.vector_store %arg11[%c0_96, %c144_97], %67 {strides = array<i32>} : memref<256x216xf32, #tpu.memory_space<vmem>>, vector<256x24xf32>,
    %c2_98 = arith.constant 2 : index
    %c1_99 = arith.constant 1 : index
    %c0_100 = arith.constant 0 : index
    %69 = vector.load %arg10[%c2_98, %c1_99, %c0_100] : memref<18x18x24xf32, #tpu.memory_space<vmem>>, vector<16x16x24xf32>
    %70 = vector.shape_cast %69 : vector<16x16x24xf32> to vector<256x24xf32>
    %c0_101 = arith.constant 0 : index
    %c168_102 = arith.constant 168 : index
    %71 = vector.load %arg11[%c0_101, %c168_102] : memref<256x216xf32, #tpu.memory_space<vmem>>, vector<256x24xf32>
    tpu.vector_store %arg11[%c0_101, %c168_102], %70 {strides = array<i32>} : memref<256x216xf32, #tpu.memory_space<vmem>>, vector<256x24xf32>,
    %c2_103 = arith.constant 2 : index
    %c2_104 = arith.constant 2 : index
    %c0_105 = arith.constant 0 : index
    %72 = vector.load %arg10[%c2_103, %c2_104, %c0_105] : memref<18x18x24xf32, #tpu.memory_space<vmem>>, vector<16x16x24xf32>
    %73 = vector.shape_cast %72 : vector<16x16x24xf32> to vector<256x24xf32>
    %c0_106 = arith.constant 0 : index
    %c192_107 = arith.constant 192 : index
    %74 = vector.load %arg11[%c0_106, %c192_107] : memref<256x216xf32, #tpu.memory_space<vmem>>, vector<256x24xf32>
    tpu.vector_store %arg11[%c0_106, %c192_107], %73 {strides = array<i32>} : memref<256x216xf32, #tpu.memory_space<vmem>>, vector<256x24xf32>,
    %c0_108 = arith.constant 0 : index
    %c0_109 = arith.constant 0 : index
    %75 = vector.load %arg11[%c0_108, %c0_109] : memref<256x216xf32, #tpu.memory_space<vmem>>, vector<256x216xf32>
    %cst_110 = arith.constant dense<0.000000e+00> : vector<256x24xf32>
    %76 = tpu.matmul %75, %45, %cst_110 {dimension_numbers = #tpu.dot_dimension_numbers<[1], [0], [0], [1], [0, 0, 1, 1], [], []>} : vector<256x216xf32>, vector<216x24xf32>, vector<256x24xf32> -> vector<256x24xf32>
    %77 = vector.broadcast %47 : vector<1x24xf32> to vector<256x24xf32>
    %78 = arith.addf %76, %77 : vector<256x24xf32>
    %cst_111 = arith.constant 0.000000e+00 : f32
    %79 = vector.broadcast %cst_111 : f32 to vector<256x24xf32>
    %80 = arith.maximumf %78, %79 : vector<256x24xf32>
    %81 = vector.shape_cast %80 : vector<256x24xf32> to vector<16x16x24xf32>
    %c1_112 = arith.constant 1 : index
    %c1_113 = arith.constant 1 : index
    %c0_114 = arith.constant 0 : index
    %82 = vector.load %arg10[%c1_112, %c1_113, %c0_114] : memref<18x18x24xf32, #tpu.memory_space<vmem>>, vector<16x16x24xf32>
    tpu.vector_store %arg10[%c1_112, %c1_113, %c0_114], %81 {strides = array<i32>} : memref<18x18x24xf32, #tpu.memory_space<vmem>>, vector<16x16x24xf32>,
    %c0_115 = arith.constant 0 : index
    %c0_116 = arith.constant 0 : index
    %c0_117 = arith.constant 0 : index
    %83 = vector.load %arg7[%c0_115, %c0_116, %c0_117] : memref<1x216x32xf32, #tpu.memory_space<vmem>>, vector<1x216x32xf32>
    %84 = vector.shape_cast %83 : vector<1x216x32xf32> to vector<216x32xf32>
    %c0_118 = arith.constant 0 : index
    %c0_119 = arith.constant 0 : index
    %c0_120 = arith.constant 0 : index
    %85 = vector.load %arg8[%c0_118, %c0_119, %c0_120] : memref<1x1x32xf32, #tpu.memory_space<vmem>>, vector<1x1x32xf32>
    %86 = vector.shape_cast %85 : vector<1x1x32xf32> to vector<1x32xf32>
    %c0_121 = arith.constant 0 : index
    %c0_122 = arith.constant 0 : index
    %c0_123 = arith.constant 0 : index
    %87 = vector.load %arg10[%c0_121, %c0_122, %c0_123] : memref<18x18x24xf32, #tpu.memory_space<vmem>>, vector<16x16x24xf32>
    %88 = vector.shape_cast %87 : vector<16x16x24xf32> to vector<256x24xf32>
    %c0_124 = arith.constant 0 : index
    %c0_125 = arith.constant 0 : index
    %89 = vector.load %arg11[%c0_124, %c0_125] : memref<256x216xf32, #tpu.memory_space<vmem>>, vector<256x24xf32>
    tpu.vector_store %arg11[%c0_124, %c0_125], %88 {strides = array<i32>} : memref<256x216xf32, #tpu.memory_space<vmem>>, vector<256x24xf32>,
    %c0_126 = arith.constant 0 : index
    %c1_127 = arith.constant 1 : index
    %c0_128 = arith.constant 0 : index
    %90 = vector.load %arg10[%c0_126, %c1_127, %c0_128] : memref<18x18x24xf32, #tpu.memory_space<vmem>>, vector<16x16x24xf32>
    %91 = vector.shape_cast %90 : vector<16x16x24xf32> to vector<256x24xf32>
    %c0_129 = arith.constant 0 : index
    %c24_130 = arith.constant 24 : index
    %92 = vector.load %arg11[%c0_129, %c24_130] : memref<256x216xf32, #tpu.memory_space<vmem>>, vector<256x24xf32>
    tpu.vector_store %arg11[%c0_129, %c24_130], %91 {strides = array<i32>} : memref<256x216xf32, #tpu.memory_space<vmem>>, vector<256x24xf32>,
    %c0_131 = arith.constant 0 : index
    %c2_132 = arith.constant 2 : index
    %c0_133 = arith.constant 0 : index
    %93 = vector.load %arg10[%c0_131, %c2_132, %c0_133] : memref<18x18x24xf32, #tpu.memory_space<vmem>>, vector<16x16x24xf32>
    %94 = vector.shape_cast %93 : vector<16x16x24xf32> to vector<256x24xf32>
    %c0_134 = arith.constant 0 : index
    %c48_135 = arith.constant 48 : index
    %95 = vector.load %arg11[%c0_134, %c48_135] : memref<256x216xf32, #tpu.memory_space<vmem>>, vector<256x24xf32>
    tpu.vector_store %arg11[%c0_134, %c48_135], %94 {strides = array<i32>} : memref<256x216xf32, #tpu.memory_space<vmem>>, vector<256x24xf32>,
    %c1_136 = arith.constant 1 : index
    %c0_137 = arith.constant 0 : index
    %c0_138 = arith.constant 0 : index
    %96 = vector.load %arg10[%c1_136, %c0_137, %c0_138] : memref<18x18x24xf32, #tpu.memory_space<vmem>>, vector<16x16x24xf32>
    %97 = vector.shape_cast %96 : vector<16x16x24xf32> to vector<256x24xf32>
    %c0_139 = arith.constant 0 : index
    %c72_140 = arith.constant 72 : index
    %98 = vector.load %arg11[%c0_139, %c72_140] : memref<256x216xf32, #tpu.memory_space<vmem>>, vector<256x24xf32>
    tpu.vector_store %arg11[%c0_139, %c72_140], %97 {strides = array<i32>} : memref<256x216xf32, #tpu.memory_space<vmem>>, vector<256x24xf32>,
    %c1_141 = arith.constant 1 : index
    %c1_142 = arith.constant 1 : index
    %c0_143 = arith.constant 0 : index
    %99 = vector.load %arg10[%c1_141, %c1_142, %c0_143] : memref<18x18x24xf32, #tpu.memory_space<vmem>>, vector<16x16x24xf32>
    %100 = vector.shape_cast %99 : vector<16x16x24xf32> to vector<256x24xf32>
    %c0_144 = arith.constant 0 : index
    %c96_145 = arith.constant 96 : index
    %101 = vector.load %arg11[%c0_144, %c96_145] : memref<256x216xf32, #tpu.memory_space<vmem>>, vector<256x24xf32>
    tpu.vector_store %arg11[%c0_144, %c96_145], %100 {strides = array<i32>} : memref<256x216xf32, #tpu.memory_space<vmem>>, vector<256x24xf32>,
    %c1_146 = arith.constant 1 : index
    %c2_147 = arith.constant 2 : index
    %c0_148 = arith.constant 0 : index
    %102 = vector.load %arg10[%c1_146, %c2_147, %c0_148] : memref<18x18x24xf32, #tpu.memory_space<vmem>>, vector<16x16x24xf32>
    %103 = vector.shape_cast %102 : vector<16x16x24xf32> to vector<256x24xf32>
    %c0_149 = arith.constant 0 : index
    %c120_150 = arith.constant 120 : index
    %104 = vector.load %arg11[%c0_149, %c120_150] : memref<256x216xf32, #tpu.memory_space<vmem>>, vector<256x24xf32>
    tpu.vector_store %arg11[%c0_149, %c120_150], %103 {strides = array<i32>} : memref<256x216xf32, #tpu.memory_space<vmem>>, vector<256x24xf32>,
    %c2_151 = arith.constant 2 : index
    %c0_152 = arith.constant 0 : index
    %c0_153 = arith.constant 0 : index
    %105 = vector.load %arg10[%c2_151, %c0_152, %c0_153] : memref<18x18x24xf32, #tpu.memory_space<vmem>>, vector<16x16x24xf32>
    %106 = vector.shape_cast %105 : vector<16x16x24xf32> to vector<256x24xf32>
    %c0_154 = arith.constant 0 : index
    %c144_155 = arith.constant 144 : index
    %107 = vector.load %arg11[%c0_154, %c144_155] : memref<256x216xf32, #tpu.memory_space<vmem>>, vector<256x24xf32>
    tpu.vector_store %arg11[%c0_154, %c144_155], %106 {strides = array<i32>} : memref<256x216xf32, #tpu.memory_space<vmem>>, vector<256x24xf32>,
    %c2_156 = arith.constant 2 : index
    %c1_157 = arith.constant 1 : index
    %c0_158 = arith.constant 0 : index
    %108 = vector.load %arg10[%c2_156, %c1_157, %c0_158] : memref<18x18x24xf32, #tpu.memory_space<vmem>>, vector<16x16x24xf32>
    %109 = vector.shape_cast %108 : vector<16x16x24xf32> to vector<256x24xf32>
    %c0_159 = arith.constant 0 : index
    %c168_160 = arith.constant 168 : index
    %110 = vector.load %arg11[%c0_159, %c168_160] : memref<256x216xf32, #tpu.memory_space<vmem>>, vector<256x24xf32>
    tpu.vector_store %arg11[%c0_159, %c168_160], %109 {strides = array<i32>} : memref<256x216xf32, #tpu.memory_space<vmem>>, vector<256x24xf32>,
    %c2_161 = arith.constant 2 : index
    %c2_162 = arith.constant 2 : index
    %c0_163 = arith.constant 0 : index
    %111 = vector.load %arg10[%c2_161, %c2_162, %c0_163] : memref<18x18x24xf32, #tpu.memory_space<vmem>>, vector<16x16x24xf32>
    %112 = vector.shape_cast %111 : vector<16x16x24xf32> to vector<256x24xf32>
    %c0_164 = arith.constant 0 : index
    %c192_165 = arith.constant 192 : index
    %113 = vector.load %arg11[%c0_164, %c192_165] : memref<256x216xf32, #tpu.memory_space<vmem>>, vector<256x24xf32>
    tpu.vector_store %arg11[%c0_164, %c192_165], %112 {strides = array<i32>} : memref<256x216xf32, #tpu.memory_space<vmem>>, vector<256x24xf32>,
    %c0_166 = arith.constant 0 : index
    %c0_167 = arith.constant 0 : index
    %114 = vector.load %arg11[%c0_166, %c0_167] : memref<256x216xf32, #tpu.memory_space<vmem>>, vector<256x216xf32>
    %cst_168 = arith.constant dense<0.000000e+00> : vector<256x32xf32>
    %115 = tpu.matmul %114, %84, %cst_168 {dimension_numbers = #tpu.dot_dimension_numbers<[1], [0], [0], [1], [0, 0, 1, 1], [], []>} : vector<256x216xf32>, vector<216x32xf32>, vector<256x32xf32> -> vector<256x32xf32>
    %116 = vector.broadcast %86 : vector<1x32xf32> to vector<256x32xf32>
    %117 = arith.addf %115, %116 : vector<256x32xf32>
    %118 = vector.shape_cast %117 : vector<256x32xf32> to vector<16x16x32xf32>
    %c0_169 = arith.constant 0 : index
    %c0_170 = arith.constant 0 : index
    %c0_171 = arith.constant 0 : index
    %c0_172 = arith.constant 0 : index
    %c0_173 = arith.constant 0 : index
    %119 = vector.load %arg9[%c0_169, %c0_170, %c0_171, %c0_172, %c0_173] : memref<1x1x16x16x32xf32, #tpu.memory_space<vmem>>, vector<1x1x16x16x32xf32>
    %120 = vector.shape_cast %119 : vector<1x1x16x16x32xf32> to vector<16x16x32xf32>
    %121 = vector.shape_cast %118 : vector<16x16x32xf32> to vector<1x1x16x16x32xf32>
    tpu.vector_store %arg9[%c0_169, %c0_170, %c0_171, %c0_172, %c0_173], %121 {strides = array<i32>} : memref<1x1x16x16x32xf32, #tpu.memory_space<vmem>>, vector<1x1x16x16x32xf32>,
    return
  }
  func.func @transform_0(%arg0: i32, %arg1: i32) -> (i32, i32, i32, i32) {
    %c0_i32 = arith.constant 0 : i32
    %c0_i32_0 = arith.constant 0 : i32
    %c0_i32_1 = arith.constant 0 : i32
    %c0_i32_2 = arith.constant 0 : i32
    return %arg1, %c0_i32, %c0_i32_0, %c0_i32_1 : i32, i32, i32, i32
  }
  func.func @transform_1(%arg0: i32, %arg1: i32) -> (i32, i32, i32) {
    %c0_i32 = arith.constant 0 : i32
    %c0_i32_0 = arith.constant 0 : i32
    %c0_i32_1 = arith.constant 0 : i32
    return %arg0, %c0_i32, %c0_i32_0 : i32, i32, i32
  }
  func.func @transform_2(%arg0: i32, %arg1: i32) -> (i32, i32, i32) {
    %c0_i32 = arith.constant 0 : i32
    %c0_i32_0 = arith.constant 0 : i32
    %c0_i32_1 = arith.constant 0 : i32
    return %arg0, %c0_i32, %c0_i32_0 : i32, i32, i32
  }
  func.func @transform_3(%arg0: i32, %arg1: i32) -> (i32, i32, i32) {
    %c0_i32 = arith.constant 0 : i32
    %c0_i32_0 = arith.constant 0 : i32
    %c0_i32_1 = arith.constant 0 : i32
    return %arg0, %c0_i32, %c0_i32_0 : i32, i32, i32
  }
  func.func @transform_4(%arg0: i32, %arg1: i32) -> (i32, i32, i32) {
    %c0_i32 = arith.constant 0 : i32
    %c0_i32_0 = arith.constant 0 : i32
    %c0_i32_1 = arith.constant 0 : i32
    return %arg0, %c0_i32, %c0_i32_0 : i32, i32, i32
  }
  func.func @transform_5(%arg0: i32, %arg1: i32) -> (i32, i32, i32) {
    %c0_i32 = arith.constant 0 : i32
    %c0_i32_0 = arith.constant 0 : i32
    %c0_i32_1 = arith.constant 0 : i32
    return %arg0, %c0_i32, %c0_i32_0 : i32, i32, i32
  }
  func.func @transform_6(%arg0: i32, %arg1: i32) -> (i32, i32, i32) {
    %c0_i32 = arith.constant 0 : i32
    %c0_i32_0 = arith.constant 0 : i32
    %c0_i32_1 = arith.constant 0 : i32
    return %arg0, %c0_i32, %c0_i32_0 : i32, i32, i32
  }
  func.func @transform_7(%arg0: i32, %arg1: i32) -> (i32, i32, i32, i32, i32) {
    %c0_i32 = arith.constant 0 : i32
    %c0_i32_0 = arith.constant 0 : i32
    %c0_i32_1 = arith.constant 0 : i32
    %c0_i32_2 = arith.constant 0 : i32
    return %arg0, %arg1, %c0_i32, %c0_i32_0, %c0_i32_1 : i32, i32, i32, i32, i32
  }
}

</mosaic_0001>

<bundles_post_ra>
// kernel: tpu_custom_call.1
= control target key start
LH: loop header
LB: loop body
LE: loop exit
PB: predicated region body
PF: predicated region fallthrough
CT: control target
= control target key end

     0   :  { %s11099_s0 = inlined_call_operand.vmem [shape: f32[2,16,16,24], index: 0, kind: input, shape index: {}]   ;;  %s11100_s1 = inlined_call_operand.vmem [shape: f32[2,216,24], index: 1, kind: input, shape index: {}]   ;;  %s11101_s2 = inlined_call_operand.vmem [shape: f32[2,1,24], index: 2, kind: input, shape index: {}]   ;;  %s11102_s3 = inlined_call_operand.vmem [shape: f32[2,216,24], index: 3, kind: input, shape index: {}]   ;;  %s11103_s4 = inlined_call_operand.vmem [shape: f32[2,1,24], index: 4, kind: input, shape index: {}]   ;;  %s11104_s5 = inlined_call_operand.vmem [shape: f32[2,216,32], index: 5, kind: input, shape index: {}]   ;;  %s11105_s6 = inlined_call_operand.vmem [shape: f32[2,1,32], index: 6, kind: input, shape index: {}]   ;;  %s11106_s7 = inlined_call_operand.hbm [shape: f32[2,2,16,16,32], index: 7, kind: output, shape index: {}]  }
   0x1   :  { %11184 = sst [smem:[#allocation38_spill]] %s11099_s0 }
   0x2   :  { %12 = vsyncpa [#allocation5], 0 }
   0x3   :  { %14 = vsyncpa [#allocation5 + $0x1], 0  ;;  %s7359_s24 = smov 0   ;;  %s7361_s25 = smov 0  }
   0x4   :  { %s7363_s26 = smov 0   ;;  %s7365_s27 = smov 0  }
   0x5   :  { %s7367_s28 = smov 0   ;;  %s7369_s29 = smov 0  }
   0x6   :  { %s7371_s30 = smov 0   ;;  %s7373_s8 = smov 0  }
   0x7 LB: > { %s6990_s9 = sadd.s32 4294967295, %s7306_s8   ;;  %s6991_s10 = sadd.s32 4294967294, %s7306_s8   ;;  %s7306_s8 = sphi %s7373_s8, %s20_s8   ;;  %s7302_s30 = sphi %s7371_s30, %s11328_s30   ;;  %s7298_s29 = sphi %s7369_s29, %s11327_s29   ;;  %s7294_s28 = sphi %s7367_s28, %s11326_s28   ;;  %s7290_s27 = sphi %s7365_s27, %s11325_s27   ;;  %s7286_s26 = sphi %s7363_s26, %s11324_s26   ;;  %s7282_s25 = sphi %s7361_s25, %s11323_s25   ;;  %s7278_s24 = sphi %s7359_s24, %s11322_s24  }
   0x8   : > { %s29_s11 = sadd.s32 1, %s7298_s29  ;;  %s32_s12 = sadd.s32 1, %s7302_s30 }
   0x9   : > { %p30_p0 = scmp.ge.s32.totalorder %s29_s11, 2  ;;  %p233_p1 = scmp.ne.s32.totalorder %s7286_s26, %s7282_s25 }
   0xa   : > { %p234_p2 = scmp.eq.s32.totalorder %s6990_s9, 3  ;;  %p239_p5 = scmp.ne.s32.totalorder %s7282_s25, %s7278_s24 }
   0xb   : > { %s11330_s11 = smov (%p30_p0, %s29_s11), 0  ;;  %s11332_s12 = smov (!%p30_p0, %s32_s12), %s7302_s30 }
   0xc   : > { %s219_s13 = ssub.s32 %s7298_s29, %s11330_s11  ;;  %p7410_p3 = por %p234_p2, %p233_p1 }
   0xd   : > { %p34_p4 = scmp.ge.s32.totalorder %s11332_s12, 2  ;;  %p240_p6 = scmp.eq.s32.totalorder %s6991_s10, 3 }
   0xe   : > { %p6994_p7 = scmp.ge.s32.totalorder %s7306_s8, 1  ;;  %p308_p9 = scmp.lt.s32.totalorder %s7306_s8, 5 }
   0xf   : > { %s11334_s12 = smov (%p34_p4, %s11332_s12), 0  ;;  %p7419_p8 = por %p240_p6, %p239_p5 }
  0x10   : > { %s218_s16 = ssub.s32 %s7302_s30, %s11334_s12  ;;  %s223_s17 = sadd.s32 1, %s7286_s26 }
  0x11   : > { %s220_s18 = sor.u32 %s219_s13, %s218_s16  ;;  %p309_p10 = pnand %p6994_p7, %p308_p9 }
  0x12   : > { %p221_p11 = scmp.eq.s32.totalorder %s220_s18, 0 }
  0x13   : > { %312 = sbr.rel (%p309_p10) target bundleno = 2864 (0xb30), region = 48 }
  0x14   : > { %s7428_s19 = scalar_select %p221_p11, %s7286_s26, %s223_s17  }
  0x18   : > { %vm393_vm0 = vcmask 195584   ;;  %v7308_v0 = vmov 0.0   ;;  %s11140_s20 = smov 24   ;;  %p364_p12 = scmp.lt.s32.totalorder %s7290_s27, 1  ;;  %vm396_vm1 = vcmask 189440   ;;  %vm766_vm2 = vcmask 392384  }
  0x19   : > { %394 = vst.msk [vmem:[#allocation2] sm:$0xff] %vm393_vm0, %v7308_v0  ;;  %s11187_s0 = sld [smem:[#allocation38_spill]]  ;;  %s11138_s13 = smov 48   ;;  %vm959_vm3 = vcmask 589184   ;;  %vm1152_vm4 = vcmask 785984   ;;  %vm1345_vm5 = vcmask 982784  }
  0x1a   : > { %395 = vst.msk [vmem:[#allocation2 + $0x8] sm:$0xff] %vm393_vm0, %v7308_v0  ;;  %s365_s21 = scalar_select %p364_p12, %s7290_s27, 1  ;;  %vm1538_vm6 = vcmask 1048512   ;;  %vm1540_vm7 = vcmask 130048   ;;  %vm1765_vm8 = vcmask 326784   ;;  %vm1958_vm9 = vcmask 523584  }
  0x1b   : > { %398 = vst.msk [vmem:[#allocation2 + $0x18] sm:$0xff] %vm393_vm0, %v7308_v0  ;;  %s11136_s16 = smov 72   ;;  %s11173_s17 = smov 96   ;;  %vm2151_vm10 = vcmask 720384   ;;  %vm2251_vm11 = vcmask 719872   ;;  %vm6800_vm12 = vcmask 261120  }
  0x1c   : > { %399 = vst.msk [vmem:[#allocation2 + $0x20] sm:$0xff] %vm393_vm0, %v7308_v0  ;;  %s7103_s22 = sshll.u32 %s365_s21, 8  ;;  %p369_p13 = scmp.lt.s32.totalorder %s7294_s28, 1 }
  0x1d   : > { %401 = vst.msk [vmem:[#allocation2 + $0x30] sm:$0xff] %vm393_vm0, %v7308_v0  ;;  %s11177_s21 = smov 40  }
  0x1e   : > { %402 = vst.msk [vmem:[#allocation2 + $0x38] sm:$0xff] %vm393_vm0, %v7308_v0  ;;  %s8151_s18 = scalar_select %p369_p13, %s7294_s28, 1 }
  0x1f   : > { %404 = vst.msk [vmem:[#allocation2 + $0x48] sm:$0xff] %vm393_vm0, %v7308_v0  ;;  %s7498_s10 = scalar_lea.vmem %s11187_s0, %s7103_s22  ;;  %s11175_s22 = smov 64  }
  0x20   : > { %405 = vst.msk [vmem:[#allocation2 + $0x50] sm:$0xff] %vm393_vm0, %v7308_v0  ;;  %v451_v2 = vld [vmem:[%s7498_s10 + $0x10] sm:$0xff]  ;;  %v449_v5 = vld [vmem:[%s7498_s10] sm:$0xff]  ;;  %v452_v6 = vld [vmem:[%s7498_s10 + $0x18] sm:$0xff]  ;;  %s376_s23 = scalar_lea.vmem %s11101_s2, %s8151_s18  ;;  %s11252_s0 = smov 48  }
  0x21   : > { %v606_v1 = vld [vmem:[#allocation2 + $0x1] sm:$0xff]  ;;  %407 = vst.msk [vmem:[#allocation2 + $0x60] sm:$0xff] %vm393_vm0, %v7308_v0  ;;  %v455_v9 = vld [vmem:[%s7498_s10 + $0x30] sm:$0xff]  ;;  %v456_v10 = vld [vmem:[%s7498_s10 + $0x38] sm:$0xff] }
  0x22   : > { %670 = vrot.lane.b32.xlu0 %v606_v1, %s11140_s20  ;;  %408 = vst.msk [vmem:[#allocation2 + $0x68] sm:$0xff] %vm393_vm0, %v7308_v0  ;;  %v453_v7 = vld [vmem:[%s7498_s10 + $0x20] sm:$0xff]  ;;  %v450_v8 = vld [vmem:[%s7498_s10 + $0x8] sm:$0xff]  ;;  %v459_v13 = vld [vmem:[%s7498_s10 + $0x50] sm:$0xff] }
  0x23   : > { %410 = vst.msk [vmem:[#allocation2 + $0x78] sm:$0xff] %vm393_vm0, %v7308_v0  ;;  %v454_v11 = vld [vmem:[%s7498_s10 + $0x28] sm:$0xff]  ;;  %v457_v14 = vld [vmem:[%s7498_s10 + $0x40] sm:$0xff]  ;;  %v460_v20 = vld [vmem:[%s7498_s10 + $0x58] sm:$0xff] }
  0x24   : > { %411 = vst.msk [vmem:[#allocation2 + $0x80] sm:$0xff] %vm393_vm0, %v7308_v0  ;;  %v458_v12 = vld [vmem:[%s7498_s10 + $0x48] sm:$0xff]  ;;  %v461_v16 = vld [vmem:[%s7498_s10 + $0x60] sm:$0xff]  ;;  %v464_v21 = vld [vmem:[%s7498_s10 + $0x78] sm:$0xff] }
  0x25   : > { %413 = vst.msk [vmem:[#allocation2 + $0x90] sm:$0xff] %vm393_vm0, %v7308_v0  ;;  %v462_v18 = vld [vmem:[%s7498_s10 + $0x68] sm:$0xff]  ;;  %v465_v22 = vld [vmem:[%s7498_s10 + $0x80] sm:$0xff]  ;;  %v463_v23 = vld [vmem:[%s7498_s10 + $0x70] sm:$0xff] }
  0x26   : > { %414 = vst.msk [vmem:[#allocation2 + $0x98] sm:$0xff] %vm393_vm0, %v7308_v0  ;;  %v467_v25 = vld [vmem:[%s7498_s10 + $0x90] sm:$0xff]  ;;  %v468_v28 = vld [vmem:[%s7498_s10 + $0x98] sm:$0xff]  ;;  %v466_v29 = vld [vmem:[%s7498_s10 + $0x88] sm:$0xff] }
  0x27   : > { %416 = vst.msk [vmem:[#allocation2 + $0xa8] sm:$0xff] %vm393_vm0, %v7308_v0  ;;  %v470_v31 = vld [vmem:[%s7498_s10 + $0xa8] sm:$0xff]  ;;  %v471_v34 = vld [vmem:[%s7498_s10 + $0xb0] sm:$0xff]  ;;  %v469_v35 = vld [vmem:[%s7498_s10 + $0xa0] sm:$0xff] }
  0x28   : > { %417 = vst.msk [vmem:[#allocation2 + $0xb0] sm:$0xff] %vm393_vm0, %v7308_v0  ;;  %v473_v37 = vld [vmem:[%s7498_s10 + $0xc0] sm:$0xff]  ;;  %v474_v40 = vld [vmem:[%s7498_s10 + $0xc8] sm:$0xff]  ;;  %v472_v41 = vld [vmem:[%s7498_s10 + $0xb8] sm:$0xff] }
  0x29   : > { %419 = vst.msk [vmem:[#allocation2 + $0xc0] sm:$0xff] %vm393_vm0, %v7308_v0  ;;  %v476_v43 = vld [vmem:[%s7498_s10 + $0xd8] sm:$0xff]  ;;  %v477_v46 = vld [vmem:[%s7498_s10 + $0xe0] sm:$0xff]  ;;  %v475_v47 = vld [vmem:[%s7498_s10 + $0xd0] sm:$0xff] }
  0x2a   : > { %420 = vst.msk [vmem:[#allocation2 + $0xc8] sm:$0xff] %vm393_vm0, %v7308_v0  ;;  %v478_v51 = vld [vmem:[%s7498_s10 + $0xe8] sm:$0xff] }
  0x2b   : > { %422 = vst.msk [vmem:[#allocation2 + $0xd8] sm:$0xff] %vm393_vm0, %v7308_v0  ;;  %v799_v1 = vld [vmem:[#allocation2 + $0x2] sm:$0xff] }
  0x2c   : > { %423 = vst.msk [vmem:[#allocation2 + $0xe0] sm:$0xff] %vm393_vm0, %v7308_v0 }
  0x2d   : > { %425 = vst.msk [vmem:[#allocation2 + $0xf0] sm:$0xff] %vm393_vm0, %v7308_v0 }
  0x2e   : > { %426 = vst.msk [vmem:[#allocation2 + $0xf8] sm:$0xff] %vm393_vm0, %v7308_v0 }
  0x2f   : > { %428 = vst.msk [vmem:[#allocation2 + $0x108] sm:$0xff] %vm393_vm0, %v7308_v0 }
  0x30   : > { %429 = vst.msk [vmem:[#allocation2 + $0x110] sm:$0xff] %vm393_vm0, %v7308_v0 }
  0x31   : > { %431 = vst.msk [vmem:[#allocation2 + $0x120] sm:$0xff] %vm393_vm0, %v7308_v0 }
  0x32   : > { %432 = vst.msk [vmem:[#allocation2 + $0x128] sm:$0xff] %vm393_vm0, %v7308_v0 }
  0x33   : > { %434 = vst.msk [vmem:[#allocation2 + $0x138] sm:$0xff] %vm393_vm0, %v7308_v0 }
  0x34   : > { %435 = vst.msk [vmem:[#allocation2 + $0x140] sm:$0xff] %vm393_vm0, %v7308_v0 }
  0x35   : > { %437 = vst.msk [vmem:[#allocation2 + $0x150] sm:$0xff] %vm393_vm0, %v7308_v0 }
  0x36   : > { %438 = vst.msk [vmem:[#allocation2 + $0x158] sm:$0xff] %vm393_vm0, %v7308_v0 }
  0x37   : > { %440 = vst.msk [vmem:[#allocation2 + $0x168] sm:$0xff] %vm393_vm0, %v7308_v0 }
  0x38   : > { %441 = vst.msk [vmem:[#allocation2 + $0x170] sm:$0xff] %vm393_vm0, %v7308_v0 }
  0x39   : > { %443 = vst.msk [vmem:[#allocation2 + $0x180] sm:$0xff] %vm393_vm0, %v7308_v0 }
  0x3a   : > { %444 = vst.msk [vmem:[#allocation2 + $0x188] sm:$0xff] %vm393_vm0, %v7308_v0 }
  0x3b   : > { %446 = vst.msk [vmem:[#allocation2 + $0x198] sm:$0xff] %vm393_vm0, %v7308_v0 }
  0x3c   : > { %447 = vst.msk [vmem:[#allocation2 + $0x1a0] sm:$0xff] %vm393_vm0, %v7308_v0 }
  0x3d   : > { %484 = vst.msk [vmem:[#allocation2 + $0x31] sm:$0xff] %vm393_vm0, %v451_v2 }
  0x3e   : > { %397 = vst.msk [vmem:[#allocation2 + $0x10] sm:$0x3] %vm396_vm1, %v7308_v0 }
  0x3f   : > { %400 = vst.msk [vmem:[#allocation2 + $0x28] sm:$0x3] %vm396_vm1, %v7308_v0 }
  0x40   : > { %403 = vst.msk [vmem:[#allocation2 + $0x40] sm:$0x3] %vm396_vm1, %v7308_v0 }
  0x41   : > { %406 = vst.msk [vmem:[#allocation2 + $0x58] sm:$0x3] %vm396_vm1, %v7308_v0 }
  0x42   : > { %409 = vst.msk [vmem:[#allocation2 + $0x70] sm:$0x3] %vm396_vm1, %v7308_v0 }
  0x43   : > { %412 = vst.msk [vmem:[#allocation2 + $0x88] sm:$0x3] %vm396_vm1, %v7308_v0 }
  0x44   : > { %v7524_v3 = vld [vmem:[#allocation2 + $0x31] sm:$0xff]  ;;  %415 = vst.msk [vmem:[#allocation2 + $0xa0] sm:$0x3] %vm396_vm1, %v7308_v0 }
  0x45   : > { %678 = vrot.lane.b32.xlu2 %v7524_v3, %s11140_s20  ;;  %v607_v4 = vld [vmem:[#allocation2 + $0x9] sm:$0xff]  ;;  %418 = vst.msk [vmem:[#allocation2 + $0xb8] sm:$0x3] %vm396_vm1, %v7308_v0 }
  0x46   : > { %672 = vrot.lane.b32.xlu0 %v607_v4, %s11140_s20  ;;  %421 = vst.msk [vmem:[#allocation2 + $0xd0] sm:$0x3] %vm396_vm1, %v7308_v0  ;;  %v7695_v55 = vld [vmem:[#allocation2 + $0x30] sm:$0xff] }
  0x47   : > { %424 = vst.msk [vmem:[#allocation2 + $0xe8] sm:$0x3] %vm396_vm1, %v7308_v0  ;;  %v800_v2 = vld [vmem:[#allocation2 + $0xa] sm:$0xff] }
  0x48   : > { %427 = vst.msk [vmem:[#allocation2 + $0x100] sm:$0x3] %vm396_vm1, %v7308_v0 }
  0x49   : > { %430 = vst.msk [vmem:[#allocation2 + $0x118] sm:$0x3] %vm396_vm1, %v7308_v0 }
  0x4a   : > { %433 = vst.msk [vmem:[#allocation2 + $0x130] sm:$0x3] %vm396_vm1, %v7308_v0 }
  0x4b   : > { %436 = vst.msk [vmem:[#allocation2 + $0x148] sm:$0x3] %vm396_vm1, %v7308_v0 }
  0x4c   : > { %439 = vst.msk [vmem:[#allocation2 + $0x160] sm:$0x3] %vm396_vm1, %v7308_v0 }
  0x4d   : > { %442 = vst.msk [vmem:[#allocation2 + $0x178] sm:$0x3] %vm396_vm1, %v7308_v0 }
  0x4e   : > { %445 = vst.msk [vmem:[#allocation2 + $0x190] sm:$0x3] %vm396_vm1, %v7308_v0 }
  0x4f   : > { %448 = vst.msk [vmem:[#allocation2 + $0x1a8] sm:$0x3] %vm396_vm1, %v7308_v0 }
  0x50   : > { %482 = vst.msk [vmem:[#allocation2 + $0x19] sm:$0xff] %vm393_vm0, %v449_v5 }
  0x51   : > { %485 = vst.msk [vmem:[#allocation2 + $0x39] sm:$0xff] %vm393_vm0, %v452_v6  ;;  %v542_v6 = vld [vmem:[#allocation2] sm:$0xff] }
  0x52   : > { %486 = vst.msk [vmem:[#allocation2 + $0x49] sm:$0xff] %vm393_vm0, %v453_v7 }
  0x53   : > { %483 = vst.msk [vmem:[#allocation2 + $0x21] sm:$0xff] %vm393_vm0, %v450_v8 }
  0x54   : > { %488 = vst.msk [vmem:[#allocation2 + $0x61] sm:$0xff] %vm393_vm0, %v455_v9 }
  0x55   : > { %489 = vst.msk [vmem:[#allocation2 + $0x69] sm:$0xff] %vm393_vm0, %v456_v10 }
  0x56   : > { %487 = vst.msk [vmem:[#allocation2 + $0x51] sm:$0xff] %vm393_vm0, %v454_v11  ;;  %v543_v11 = vld [vmem:[#allocation2 + $0x8] sm:$0xff] }
  0x57   : > { %v7570_v15 = vld [vmem:[#allocation2 + $0x19] sm:$0xff]  ;;  %491 = vst.msk [vmem:[#allocation2 + $0x81] sm:$0xff] %vm393_vm0, %v458_v12 }
  0x58   : > { %674 = vrot.lane.b32.xlu1 %v7570_v15, %s11140_s20  ;;  %v7576_v17 = vld [vmem:[#allocation2 + $0x39] sm:$0xff]  ;;  %492 = vst.msk [vmem:[#allocation2 + $0x91] sm:$0xff] %vm393_vm0, %v459_v13 }
  0x59   : > { %680 = vrot.lane.b32.xlu2 %v7576_v17, %s11140_s20  ;;  %v7582_v19 = vld [vmem:[#allocation2 + $0x49] sm:$0xff]  ;;  %490 = vst.msk [vmem:[#allocation2 + $0x79] sm:$0xff] %vm393_vm0, %v457_v14  ;;  %v7711_v59 = vld [vmem:[#allocation2 + $0x38] sm:$0xff] }
  0x5a   : > { %682 = vrot.lane.b32.xlu0 %v7582_v19, %s11140_s20  ;;  %494 = vst.msk [vmem:[#allocation2 + $0xa9] sm:$0xff] %vm393_vm0, %v461_v16  ;;  %v7594_v24 = vld [vmem:[#allocation2 + $0x21] sm:$0xff]  ;;  %v7748_v10 = vld [vmem:[#allocation2 + $0x32] sm:$0xff] }
  0x5b   : > { %495 = vst.msk [vmem:[#allocation2 + $0xb1] sm:$0xff] %vm393_vm0, %v462_v18  ;;  %v7598_v26 = vld [vmem:[#allocation2 + $0x61] sm:$0xff]  ;;  %v7755_v12 = vld [vmem:[#allocation2 + $0x18] sm:$0xff] }
  0x5c   : > { %493 = vst.msk [vmem:[#allocation2 + $0x99] sm:$0xff] %vm393_vm0, %v460_v20  ;;  %v7601_v27 = vld [vmem:[#allocation2 + $0x69] sm:$0xff]  ;;  %v7727_v63 = vld [vmem:[#allocation2 + $0x60] sm:$0xff] }
  0x5d   : > { %497 = vst.msk [vmem:[#allocation2 + $0xc9] sm:$0xff] %vm393_vm0, %v464_v21  ;;  %v7615_v30 = vld [vmem:[#allocation2 + $0x51] sm:$0xff]  ;;  %v7746_v9 = vld [vmem:[#allocation2 + $0x22] sm:$0xff]  ;;  %v7765_v14 = vld [vmem:[#allocation2 + $0x1a] sm:$0xff] }
  0x5e   : > { %498 = vst.msk [vmem:[#allocation2 + $0xd9] sm:$0xff] %vm393_vm0, %v465_v22  ;;  %v7618_v32 = vld [vmem:[#allocation2 + $0x81] sm:$0xff]  ;;  %v7767_v16 = vld [vmem:[#allocation2 + $0x4a] sm:$0xff]  ;;  %v7769_v18 = vld [vmem:[#allocation2 + $0x52] sm:$0xff] }
  0x5f   : > { %496 = vst.msk [vmem:[#allocation2 + $0xc1] sm:$0xff] %vm393_vm0, %v463_v23  ;;  %v7621_v33 = vld [vmem:[#allocation2 + $0x91] sm:$0xff]  ;;  %v7773_v20 = vld [vmem:[#allocation2 + $0x48] sm:$0xff]  ;;  %v7779_v21 = vld [vmem:[#allocation2 + $0x20] sm:$0xff] }
  0x60   : > { %676 = vrot.lane.b32.xlu1 %v7594_v24, %s11140_s20  ;;  %500 = vst.msk [vmem:[#allocation2 + $0xf1] sm:$0xff] %vm393_vm0, %v467_v25  ;;  %v7633_v36 = vld [vmem:[#allocation2 + $0x79] sm:$0xff] }
  0x61   : > { %686 = vrot.lane.b32.xlu2 %v7598_v26, %s11140_s20  ;;  %501 = vst.msk [vmem:[#allocation2 + $0xf9] sm:$0xff] %vm393_vm0, %v468_v28  ;;  %v7636_v38 = vld [vmem:[#allocation2 + $0xa9] sm:$0xff]  ;;  %v7740_v7 = vld [vmem:[#allocation2 + $0x80] sm:$0xff] }
  0x62   : > { %688 = vrot.lane.b32.xlu0 %v7601_v27, %s11140_s20  ;;  %499 = vst.msk [vmem:[#allocation2 + $0xe1] sm:$0xff] %vm393_vm0, %v466_v29  ;;  %v7639_v39 = vld [vmem:[#allocation2 + $0xb1] sm:$0xff]  ;;  %v7761_v13 = vld [vmem:[#allocation2 + $0xa8] sm:$0xff]  ;;  %v7788_v25 = vld [vmem:[#allocation2 + $0x3a] sm:$0xff] }
  0x63   : > { %503 = vst.msk [vmem:[#allocation2 + $0x111] sm:$0xff] %vm393_vm0, %v470_v31  ;;  %v7651_v42 = vld [vmem:[#allocation2 + $0x99] sm:$0xff]  ;;  %v7792_v28 = vld [vmem:[#allocation2 + $0x6a] sm:$0xff] }
  0x64   : > { %504 = vst.msk [vmem:[#allocation2 + $0x121] sm:$0xff] %vm393_vm0, %v471_v34  ;;  %v7654_v44 = vld [vmem:[#allocation2 + $0xc9] sm:$0xff]  ;;  %v7794_v29 = vld [vmem:[#allocation2 + $0x7a] sm:$0xff] }
  0x65   : > { %502 = vst.msk [vmem:[#allocation2 + $0x109] sm:$0xff] %vm393_vm0, %v469_v35  ;;  %v7657_v45 = vld [vmem:[#allocation2 + $0xd9] sm:$0xff]  ;;  %v7798_v34 = vld [vmem:[#allocation2 + $0x68] sm:$0xff]  ;;  %v7800_v35 = vld [vmem:[#allocation2 + $0x50] sm:$0xff] }
  0x66   : > { %506 = vst.msk [vmem:[#allocation2 + $0x139] sm:$0xff] %vm393_vm0, %v473_v37  ;;  %v7669_v48 = vld [vmem:[#allocation2 + $0xc1] sm:$0xff] }
  0x67   : > { %507 = vst.msk [vmem:[#allocation2 + $0x141] sm:$0xff] %vm393_vm0, %v474_v40  ;;  %v7671_v49 = vld [vmem:[#allocation2 + $0xf1] sm:$0xff]  ;;  %v7785_v23 = vld [vmem:[#allocation2 + $0xc8] sm:$0xff] }
  0x68   : > { %684 = vrot.lane.b32.xlu1 %v7615_v30, %s11140_s20  ;;  %505 = vst.msk [vmem:[#allocation2 + $0x129] sm:$0xff] %vm393_vm0, %v472_v41  ;;  %v7673_v50 = vld [vmem:[#allocation2 + $0xf9] sm:$0xff]  ;;  %v7811_v40 = vld [vmem:[#allocation2 + $0xf0] sm:$0xff]  ;;  %v7814_v41 = vld [vmem:[#allocation2 + $0x62] sm:$0xff] }
  0x69   : > { %692 = vrot.lane.b32.xlu2 %v7618_v32, %s11140_s20  ;;  %509 = vst.msk [vmem:[#allocation2 + $0x159] sm:$0xff] %vm393_vm0, %v476_v43  ;;  %v7683_v52 = vld [vmem:[#allocation2 + $0xe1] sm:$0xff]  ;;  %v7818_v43 = vld [vmem:[#allocation2 + $0x92] sm:$0xff] }
  0x6a   : > { %694 = vrot.lane.b32.xlu0 %v7621_v33, %s11140_s20  ;;  %510 = vst.msk [vmem:[#allocation2 + $0x169] sm:$0xff] %vm393_vm0, %v477_v46  ;;  %v7685_v53 = vld [vmem:[#allocation2 + $0x111] sm:$0xff]  ;;  %v7820_v46 = vld [vmem:[#allocation2 + $0x9a] sm:$0xff] }
  0x6b   : > { %508 = vst.msk [vmem:[#allocation2 + $0x151] sm:$0xff] %vm393_vm0, %v475_v47  ;;  %v7687_v54 = vld [vmem:[#allocation2 + $0x121] sm:$0xff]  ;;  %v7824_v47 = vld [vmem:[#allocation2 + $0x90] sm:$0xff] }
  0x6c   : > { %511 = vst.msk [vmem:[#allocation2 + $0x171] sm:$0xff] %vm393_vm0, %v478_v51  ;;  %v7699_v56 = vld [vmem:[#allocation2 + $0x109] sm:$0xff]  ;;  %v7826_v51 = vld [vmem:[#allocation2 + $0x78] sm:$0xff] }
  0x6d   : > { %578 = vst.msk [vmem:[#allocation3 + $0x40] sm:$0xff] %vm393_vm0, %v7695_v55  ;;  %v7701_v57 = vld [vmem:[#allocation2 + $0x139] sm:$0xff] }
  0x6e   : > { %v7703_v58 = vld [vmem:[#allocation2 + $0x141] sm:$0xff]  ;;  %579 = vst.msk [vmem:[#allocation3 + $0x50] sm:$0xff] %vm393_vm0, %v7711_v59 }
  0x6f   : > { %v7715_v60 = vld [vmem:[#allocation2 + $0x129] sm:$0xff]  ;;  %582 = vst.msk [vmem:[#allocation3 + $0x80] sm:$0xff] %vm393_vm0, %v7727_v63 }
  0x70   : > { %690 = vrot.lane.b32.xlu1 %v7633_v36, %s11140_s20  ;;  %v7717_v61 = vld [vmem:[#allocation2 + $0x159] sm:$0xff]  ;;  %574 = vst.msk [vmem:[#allocation3] sm:$0xff] %vm393_vm0, %v542_v6  ;;  %v7845_v6 = vld [vmem:[#allocation2 + $0xc2] sm:$0xff] }
  0x71   : > { %698 = vrot.lane.b32.xlu2 %v7636_v38, %s11140_s20  ;;  %v7719_v62 = vld [vmem:[#allocation2 + $0x169] sm:$0xff]  ;;  %585 = vst.msk [vmem:[#allocation3 + $0xb0] sm:$0xff] %vm393_vm0, %v7740_v7 }
  0x72   : > { %700 = vrot.lane.b32.xlu0 %v7639_v39, %s11140_s20  ;;  %11188 = vst [vmem:[#allocation7_spill] sm:$0xff] %v7719_v62  ;;  %v7731_v0 = vld [vmem:[#allocation2 + $0x151] sm:$0xff] }
  0x73   : > { %v7744_v8 = vld [vmem:[#allocation2 + $0x171] sm:$0xff]  ;;  %11189 = vst [vmem:[#allocation8_spill] sm:$0xff] %v7746_v9 }
  0x74   : > { %11190 = vst [vmem:[#allocation9_spill] sm:$0xff] %v7748_v10 }
  0x75   : > { %575 = vst.msk [vmem:[#allocation3 + $0x10] sm:$0xff] %vm393_vm0, %v543_v11  ;;  %v7849_v11 = vld [vmem:[#allocation2 + $0xb0] sm:$0xff] }
  0x76   : > { %576 = vst.msk [vmem:[#allocation3 + $0x20] sm:$0xff] %vm393_vm0, %v7755_v12 }
  0x77   : > { %588 = vst.msk [vmem:[#allocation3 + $0xe0] sm:$0xff] %vm393_vm0, %v7761_v13 }
  0x78   : > { %696 = vrot.lane.b32.xlu1 %v7651_v42, %s11140_s20  ;;  %11191 = vst [vmem:[#allocation10_spill] sm:$0xff] %v7765_v14 }
  0x79   : > { %704 = vrot.lane.b32.xlu2 %v7654_v44, %s11140_s20  ;;  %11192 = vst [vmem:[#allocation11_spill] sm:$0xff] %v7767_v16 }
  0x7a   : > { %706 = vrot.lane.b32.xlu0 %v7657_v45, %s11140_s20  ;;  %11193 = vst [vmem:[#allocation12_spill] sm:$0xff] %v7769_v18 }
  0x7b   : > { %580 = vst.msk [vmem:[#allocation3 + $0x60] sm:$0xff] %vm393_vm0, %v7773_v20 }
  0x7c   : > { %577 = vst.msk [vmem:[#allocation3 + $0x30] sm:$0xff] %vm393_vm0, %v7779_v21 }
  0x7d   : > { %11194 = vst [vmem:[#allocation13_spill] sm:$0xff] %v7788_v25 }
  0x7e   : > { %591 = vst.msk [vmem:[#allocation3 + $0x110] sm:$0xff] %vm393_vm0, %v7785_v23 }
  0x7f   : > { %11195 = vst [vmem:[#allocation14_spill] sm:$0xff] %v7792_v28 }
  0x80   : > { %702 = vrot.lane.b32.xlu1 %v7669_v48, %s11140_s20  ;;  %11196 = vst [vmem:[#allocation15_spill] sm:$0xff] %v7794_v29 }
  0x81   : > { %710 = vrot.lane.b32.xlu2 %v7671_v49, %s11140_s20  ;;  %583 = vst.msk [vmem:[#allocation3 + $0x90] sm:$0xff] %vm393_vm0, %v7798_v34 }
  0x82   : > { %712 = vrot.lane.b32.xlu0 %v7673_v50, %s11140_s20  ;;  %581 = vst.msk [vmem:[#allocation3 + $0x70] sm:$0xff] %vm393_vm0, %v7800_v35 }
  0x83   : > { %11197 = vst [vmem:[#allocation16_spill] sm:$0xff] %v7814_v41 }
  0x84   : > { %594 = vst.msk [vmem:[#allocation3 + $0x140] sm:$0xff] %vm393_vm0, %v7811_v40 }
  0x85   : > { %11198 = vst [vmem:[#allocation17_spill] sm:$0xff] %v7818_v43 }
  0x86   : > { %11199 = vst [vmem:[#allocation18_spill] sm:$0xff] %v7820_v46 }
  0x87   : > { %586 = vst.msk [vmem:[#allocation3 + $0xc0] sm:$0xff] %vm393_vm0, %v7824_v47 }
  0x88   : > { %708 = vrot.lane.b32.xlu1 %v7683_v52, %s11140_s20  ;;  %584 = vst.msk [vmem:[#allocation3 + $0xa0] sm:$0xff] %vm393_vm0, %v7826_v51 }
  0x89   : > { %716 = vrot.lane.b32.xlu2 %v7685_v53, %s11140_s20  ;;  %11202 = vst [vmem:[#allocation21_spill] sm:$0xff] %v7845_v6 }
  0x8a   : > { %718 = vrot.lane.b32.xlu0 %v7687_v54, %s11140_s20  ;;  %589 = vst.msk [vmem:[#allocation3 + $0xf0] sm:$0xff] %vm393_vm0, %v7849_v11 }
  0x90   : > { %714 = vrot.lane.b32.xlu1 %v7699_v56, %s11140_s20 }
  0x91   : > { %722 = vrot.lane.b32.xlu2 %v7701_v57, %s11140_s20 }
  0x92   : > { %724 = vrot.lane.b32.xlu0 %v7703_v58, %s11140_s20 }
  0x94   : > { %v671_v5 = vpop.permute.xlu0 %670 }
  0x95   : > { %767 = vst.msk [vmem:[#allocation3] sm:$0xff] %vm766_vm2, %v671_v5  ;;  %v7843_v5 = vld [vmem:[#allocation2 + $0xb2] sm:$0xff] }
  0x96   : > { %11201 = vst [vmem:[#allocation20_spill] sm:$0xff] %v7843_v5 }
  0x98   : > { %720 = vrot.lane.b32.xlu1 %v7715_v60, %s11140_s20 }
  0x99   : > { %728 = vrot.lane.b32.xlu2 %v7717_v61, %s11140_s20 }
  0x9a   : > { %730 = vrot.lane.b32.xlu0 %v7719_v62, %s11140_s20  ;;  %v7974_v62 = vld [vmem:[#allocation2 + $0x150] sm:$0xff] }
  0x9b   : > { %602 = vst.msk [vmem:[#allocation3 + $0x1c0] sm:$0xff] %vm393_vm0, %v7974_v62 }
  0x9f   : > { %v679_v4 = vpop.permute.xlu2 %678 }
  0xa0   : > { %726 = vrot.lane.b32.xlu1 %v7731_v0, %s11140_s20  ;;  %771 = vst.msk [vmem:[#allocation3 + $0x40] sm:$0xff] %vm766_vm2, %v679_v4  ;;  %v7839_v4 = vld [vmem:[#allocation2 + $0x82] sm:$0xff] }
  0xa1   : > { %863 = vrot.lane.b32.xlu2 %v799_v1, %s11138_s13  ;;  %11200 = vst [vmem:[#allocation19_spill] sm:$0xff] %v7839_v4 }
  0xa2   : > { %865 = vrot.lane.b32.xlu0 %v800_v2, %s11138_s13  ;;  %v7836_v2 = vld [vmem:[#allocation2 + $0x110] sm:$0xff] }
  0xa3   : > { %597 = vst.msk [vmem:[#allocation3 + $0x170] sm:$0xff] %vm393_vm0, %v7836_v2 }
  0xa8   : > { %732 = vrot.lane.b32.xlu1 %v7744_v8, %s11140_s20  ;;  %s7313_s20 = smov 120  }
  0xa9   : > { %869 = vrot.lane.b32.xlu2 %v7746_v9, %s11138_s13  ;;  %v7951_v9 = vld [vmem:[#allocation2 + $0x128] sm:$0xff] }
  0xaa   : > { %871 = vrot.lane.b32.xlu0 %v7748_v10, %s11138_s13  ;;  %v7922_v10 = vld [vmem:[#allocation2 + $0x12a] sm:$0xff]  ;;  %599 = vst.msk [vmem:[#allocation3 + $0x190] sm:$0xff] %vm393_vm0, %v7951_v9 }
  0xab   : > { %11211 = vst [vmem:[#allocation30_spill] sm:$0xff] %v7922_v10 }
  0xb0   : > { %867 = vrot.lane.b32.xlu1 %v7765_v14, %s11138_s13  ;;  %v7968_v14 = vld [vmem:[#allocation2 + $0x172] sm:$0xff] }
  0xb1   : > { %875 = vrot.lane.b32.xlu2 %v7767_v16, %s11138_s13  ;;  %v7928_v16 = vld [vmem:[#allocation2 + $0x108] sm:$0xff] }
  0xb2   : > { %877 = vrot.lane.b32.xlu0 %v7769_v18, %s11138_s13  ;;  %v7892_v18 = vld [vmem:[#allocation2 + $0xca] sm:$0xff]  ;;  %596 = vst.msk [vmem:[#allocation3 + $0x160] sm:$0xff] %vm393_vm0, %v7928_v16 }
  0xb3   : > { %v681_v22 = vpop.permute.xlu2 %680  ;;  %11206 = vst [vmem:[#allocation25_spill] sm:$0xff] %v7892_v18 }
  0xb4   : > { %772 = vst.msk [vmem:[#allocation3 + $0x50] sm:$0xff] %vm766_vm2, %v681_v22  ;;  %v7851_v22 = vld [vmem:[#allocation2 + $0x98] sm:$0xff] }
  0xb5   : > { %587 = vst.msk [vmem:[#allocation3 + $0xd0] sm:$0xff] %vm393_vm0, %v7851_v22 }
  0xb8   : > { %873 = vrot.lane.b32.xlu1 %v7788_v25, %s11138_s13  ;;  %v673_v31 = vpop.permute.xlu0 %672  ;;  %v7945_v25 = vld [vmem:[#allocation2 + $0x152] sm:$0xff] }
  0xb9   : > { %881 = vrot.lane.b32.xlu2 %v7792_v28, %s11138_s13  ;;  %768 = vst.msk [vmem:[#allocation3 + $0x10] sm:$0xff] %vm766_vm2, %v673_v31  ;;  %v7905_v28 = vld [vmem:[#allocation2 + $0xe0] sm:$0xff] }
  0xba   : > { %883 = vrot.lane.b32.xlu0 %v7794_v29, %s11138_s13  ;;  %v7865_v29 = vld [vmem:[#allocation2 + $0xaa] sm:$0xff]  ;;  %593 = vst.msk [vmem:[#allocation3 + $0x130] sm:$0xff] %vm393_vm0, %v7905_v28 }
  0xbb   : > { %v687_v37 = vpop.permute.xlu2 %686  ;;  %11203 = vst [vmem:[#allocation22_spill] sm:$0xff] %v7865_v29 }
  0xbc   : > { %775 = vst.msk [vmem:[#allocation3 + $0x80] sm:$0xff] %vm766_vm2, %v687_v37 }
  0xbd   : > { %11214 = vst [vmem:[#allocation33_spill] sm:$0xff] %v7945_v25 }
  0xc0   : > { %879 = vrot.lane.b32.xlu1 %v7814_v41, %s11138_s13  ;;  %v7917_v41 = vld [vmem:[#allocation2 + $0xf2] sm:$0xff] }
  0xc1   : > { %887 = vrot.lane.b32.xlu2 %v7818_v43, %s11138_s13  ;;  %v7878_v43 = vld [vmem:[#allocation2 + $0xc0] sm:$0xff]  ;;  %11209 = vst [vmem:[#allocation28_spill] sm:$0xff] %v7917_v41 }
  0xc2   : > { %889 = vrot.lane.b32.xlu0 %v7820_v46, %s11138_s13  ;;  %590 = vst.msk [vmem:[#allocation3 + $0x100] sm:$0xff] %vm393_vm0, %v7878_v43 }
  0xc3   : > { %v693_v1 = vpop.permute.xlu2 %692 }
  0xc4   : > { %778 = vst.msk [vmem:[#allocation3 + $0xb0] sm:$0xff] %vm766_vm2, %v693_v1  ;;  %v7862_v1 = vld [vmem:[#allocation2 + $0x138] sm:$0xff] }
  0xc5   : > { %600 = vst.msk [vmem:[#allocation3 + $0x1a0] sm:$0xff] %vm393_vm0, %v7862_v1 }
  0xc8   : > { %885 = vrot.lane.b32.xlu1 %v7839_v4, %s11138_s13 }
  0xc9   : > { %893 = vrot.lane.b32.xlu2 %v7843_v5, %s11138_s13  ;;  %v7868_v5 = vld [vmem:[#allocation2 + $0xda] sm:$0xff] }
  0xca   : > { %v675_v31 = vpop.permute.xlu1 %674  ;;  %895 = vrot.lane.b32.xlu0 %v7845_v6, %s11138_s13  ;;  %11204 = vst [vmem:[#allocation23_spill] sm:$0xff] %v7868_v5  ;;  %v7872_v6 = vld [vmem:[#allocation2 + $0xe2] sm:$0xff] }
  0xcb   : > { %769 = vst.msk [vmem:[#allocation3 + $0x20] sm:$0xff] %vm766_vm2, %v675_v31  ;;  %v699_v37 = vpop.permute.xlu2 %698  ;;  %v7876_v31 = vld [vmem:[#allocation2 + $0xd8] sm:$0xff] }
  0xcc   : > { %781 = vst.msk [vmem:[#allocation3 + $0xe0] sm:$0xff] %vm766_vm2, %v699_v37  ;;  %v683_v46 = vpop.permute.xlu0 %682 }
  0xcd   : > { %773 = vst.msk [vmem:[#allocation3 + $0x60] sm:$0xff] %vm766_vm2, %v683_v46 }
  0xce   : > { %11205 = vst [vmem:[#allocation24_spill] sm:$0xff] %v7872_v6 }
  0xcf   : > { %592 = vst.msk [vmem:[#allocation3 + $0x120] sm:$0xff] %vm393_vm0, %v7876_v31 }
  0xd0   : > { %891 = vrot.lane.b32.xlu1 %v7865_v29, %s11138_s13  ;;  %v7889_v29 = vld [vmem:[#allocation2 + $0x158] sm:$0xff] }
  0xd1   : > { %899 = vrot.lane.b32.xlu2 %v7868_v5, %s11138_s13  ;;  %v7895_v5 = vld [vmem:[#allocation2 + $0xfa] sm:$0xff]  ;;  %603 = vst.msk [vmem:[#allocation3 + $0x1d0] sm:$0xff] %vm393_vm0, %v7889_v29 }
  0xd2   : > { %v677_v46 = vpop.permute.xlu1 %676  ;;  %901 = vrot.lane.b32.xlu0 %v7872_v6, %s11138_s13  ;;  %11207 = vst [vmem:[#allocation26_spill] sm:$0xff] %v7895_v5  ;;  %v7899_v6 = vld [vmem:[#allocation2 + $0x10a] sm:$0xff] }
  0xd3   : > { %770 = vst.msk [vmem:[#allocation3 + $0x30] sm:$0xff] %vm766_vm2, %v677_v46  ;;  %v705_v37 = vpop.permute.xlu2 %704  ;;  %v7903_v46 = vld [vmem:[#allocation2 + $0xf8] sm:$0xff] }
  0xd4   : > { %784 = vst.msk [vmem:[#allocation3 + $0x110] sm:$0xff] %vm766_vm2, %v705_v37  ;;  %v689_v4 = vpop.permute.xlu0 %688 }
  0xd5   : > { %776 = vst.msk [vmem:[#allocation3 + $0x90] sm:$0xff] %vm766_vm2, %v689_v4 }
  0xd6   : > { %11208 = vst [vmem:[#allocation27_spill] sm:$0xff] %v7899_v6 }
  0xd7   : > { %595 = vst.msk [vmem:[#allocation3 + $0x150] sm:$0xff] %vm393_vm0, %v7903_v46 }
  0xd8   : > { %897 = vrot.lane.b32.xlu1 %v7892_v18, %s11138_s13 }
  0xd9   : > { %905 = vrot.lane.b32.xlu2 %v7895_v5, %s11138_s13  ;;  %v7920_v5 = vld [vmem:[#allocation2 + $0x122] sm:$0xff] }
  0xda   : > { %v685_v4 = vpop.permute.xlu1 %684  ;;  %907 = vrot.lane.b32.xlu0 %v7899_v6, %s11138_s13  ;;  %11210 = vst [vmem:[#allocation29_spill] sm:$0xff] %v7920_v5  ;;  %v7926_v6 = vld [vmem:[#allocation2 + $0x120] sm:$0xff] }
  0xdb   : > { %774 = vst.msk [vmem:[#allocation3 + $0x70] sm:$0xff] %vm766_vm2, %v685_v4  ;;  %v711_v37 = vpop.permute.xlu2 %710 }
  0xdc   : > { %787 = vst.msk [vmem:[#allocation3 + $0x140] sm:$0xff] %vm766_vm2, %v711_v37  ;;  %v695_v18 = vpop.permute.xlu0 %694 }
  0xdd   : > { %779 = vst.msk [vmem:[#allocation3 + $0xc0] sm:$0xff] %vm766_vm2, %v695_v18 }
  0xde   : > { %598 = vst.msk [vmem:[#allocation3 + $0x180] sm:$0xff] %vm393_vm0, %v7926_v6 }
  0xe0   : > { %903 = vrot.lane.b32.xlu1 %v7917_v41, %s11138_s13  ;;  %v7940_v41 = vld [vmem:[#allocation2 + $0x112] sm:$0xff] }
  0xe1   : > { %911 = vrot.lane.b32.xlu2 %v7920_v5, %s11138_s13  ;;  %11212 = vst [vmem:[#allocation31_spill] sm:$0xff] %v7940_v41  ;;  %v7943_v5 = vld [vmem:[#allocation2 + $0x142] sm:$0xff] }
  0xe2   : > { %v691_v4 = vpop.permute.xlu1 %690  ;;  %913 = vrot.lane.b32.xlu0 %v7922_v10, %s11138_s13  ;;  %11213 = vst [vmem:[#allocation32_spill] sm:$0xff] %v7943_v5  ;;  %v7949_v10 = vld [vmem:[#allocation2 + $0x140] sm:$0xff] }
  0xe3   : > { %777 = vst.msk [vmem:[#allocation3 + $0xa0] sm:$0xff] %vm766_vm2, %v691_v4  ;;  %v717_v18 = vpop.permute.xlu2 %716 }
  0xe4   : > { %790 = vst.msk [vmem:[#allocation3 + $0x170] sm:$0xff] %vm766_vm2, %v717_v18  ;;  %v701_v37 = vpop.permute.xlu0 %700 }
  0xe5   : > { %782 = vst.msk [vmem:[#allocation3 + $0xf0] sm:$0xff] %vm766_vm2, %v701_v37 }
  0xe6   : > { %601 = vst.msk [vmem:[#allocation3 + $0x1b0] sm:$0xff] %vm393_vm0, %v7949_v10 }
  0xe8   : > { %909 = vrot.lane.b32.xlu1 %v7940_v41, %s11138_s13  ;;  %v7963_v41 = vld [vmem:[#allocation2 + $0x13a] sm:$0xff] }
  0xe9   : > { %917 = vrot.lane.b32.xlu2 %v7943_v5, %s11138_s13  ;;  %11215 = vst [vmem:[#allocation34_spill] sm:$0xff] %v7963_v41  ;;  %v7966_v5 = vld [vmem:[#allocation2 + $0x16a] sm:$0xff] }
  0xea   : > { %v697_v4 = vpop.permute.xlu1 %696  ;;  %919 = vrot.lane.b32.xlu0 %v7945_v25, %s11138_s13  ;;  %11216 = vst [vmem:[#allocation35_spill] sm:$0xff] %v7966_v5  ;;  %v7972_v25 = vld [vmem:[#allocation2 + $0x168] sm:$0xff] }
  0xeb   : > { %780 = vst.msk [vmem:[#allocation3 + $0xd0] sm:$0xff] %vm766_vm2, %v697_v4  ;;  %v723_v18 = vpop.permute.xlu2 %722 }
  0xec   : > { %793 = vst.msk [vmem:[#allocation3 + $0x1a0] sm:$0xff] %vm766_vm2, %v723_v18  ;;  %v707_v37 = vpop.permute.xlu0 %706 }
  0xed   : > { %785 = vst.msk [vmem:[#allocation3 + $0x120] sm:$0xff] %vm766_vm2, %v707_v37 }
  0xee   : > { %604 = vst.msk [vmem:[#allocation3 + $0x1e0] sm:$0xff] %vm393_vm0, %v7972_v25 }
  0xf0   : > { %915 = vrot.lane.b32.xlu1 %v7963_v41, %s11138_s13  ;;  %v7986_v41 = vld [vmem:[#allocation2 + $0x15a] sm:$0xff] }
  0xf1   : > { %923 = vrot.lane.b32.xlu2 %v7966_v5, %s11138_s13  ;;  %v7991_v5 = vld [vmem:[#allocation2 + $0x170] sm:$0xff] }
  0xf2   : > { %v703_v4 = vpop.permute.xlu1 %702  ;;  %925 = vrot.lane.b32.xlu0 %v7968_v14, %s11138_s13  ;;  %605 = vst.msk [vmem:[#allocation3 + $0x1f0] sm:$0xff] %vm393_vm0, %v7991_v5 }
  0xf3   : > { %783 = vst.msk [vmem:[#allocation3 + $0x100] sm:$0xff] %vm766_vm2, %v703_v4  ;;  %v729_v18 = vpop.permute.xlu2 %728 }
  0xf4   : > { %796 = vst.msk [vmem:[#allocation3 + $0x1d0] sm:$0xff] %vm766_vm2, %v729_v18  ;;  %v713_v37 = vpop.permute.xlu0 %712 }
  0xf5   : > { %788 = vst.msk [vmem:[#allocation3 + $0x150] sm:$0xff] %vm766_vm2, %v713_v37 }
  0xf8   : > { %921 = vrot.lane.b32.xlu1 %v7986_v41, %s11138_s13  ;;  %s8270_s13 = smul.u32 216, %s8151_s18 }
  0xf9   : > { %1058 = vrot.lane.b32.xlu2 %v7779_v21, %s11136_s16 }
  0xfa   : > { %v709_v4 = vpop.permute.xlu1 %708  ;;  %1060 = vrot.lane.b32.xlu0 %v7695_v55, %s11136_s16  ;;  %s8279_s9 = scalar_lea.vmem %s11100_s1, %s8270_s13 }
  0xfb   : > { %786 = vst.msk [vmem:[#allocation3 + $0x130] sm:$0xff] %vm766_vm2, %v709_v4  ;;  %v864_v18 = vpop.permute.xlu2 %863 }
  0xfc   : > { %960 = vst.msk [vmem:[#allocation3] sm:$0xff] %vm959_vm3, %v864_v18  ;;  %v719_v37 = vpop.permute.xlu0 %718  ;;  %v479_v18 = vld [vmem:[%s7498_s10 + $0xf0] sm:$0xff] }
  0xfd   : > { %791 = vst.msk [vmem:[#allocation3 + $0x180] sm:$0xff] %vm766_vm2, %v719_v37  ;;  %v480_v37 = vld [vmem:[%s7498_s10 + $0xf8] sm:$0xff]  ;;  %s7314_s10 = smov 16  }
  0xfe   : > { %512 = vst.msk [vmem:[#allocation2 + $0x181] sm:$0xff] %vm393_vm0, %v479_v18  ;;  %v11222_v18 = vld [vmem:[#allocation9_spill] sm:$0xff] }
  0xff   : > { %513 = vst.msk [vmem:[#allocation2 + $0x189] sm:$0xff] %vm393_vm0, %v480_v37  ;;  %v11223_v37 = vld [vmem:[#allocation16_spill] sm:$0xff] }
 0x100   : > { %1056 = vrot.lane.b32.xlu1 %v7755_v12, %s11136_s16 }
 0x101   : > { %1064 = vrot.lane.b32.xlu2 %v7773_v20, %s11136_s16 }
 0x102   : > { %v715_v21 = vpop.permute.xlu1 %714  ;;  %1066 = vrot.lane.b32.xlu0 %v7800_v35, %s11136_s16 }
 0x103   : > { %789 = vst.msk [vmem:[#allocation3 + $0x160] sm:$0xff] %vm766_vm2, %v715_v21  ;;  %v870_v55 = vpop.permute.xlu2 %869 }
 0x104   : > { %963 = vst.msk [vmem:[#allocation3 + $0x30] sm:$0xff] %vm959_vm3, %v870_v55  ;;  %v725_v4 = vpop.permute.xlu0 %724 }
 0x105   : > { %794 = vst.msk [vmem:[#allocation3 + $0x1b0] sm:$0xff] %vm766_vm2, %v725_v4  ;;  %v8097_v55 = vld [vmem:[#allocation2 + $0x180] sm:$0xff] }
 0x106   : > { %v8087_v21 = vld [vmem:[#allocation2 + $0x188] sm:$0xff] }
 0x108   : > { %1062 = vrot.lane.b32.xlu1 %v7711_v59, %s11136_s16 }
 0x109   : > { %1070 = vrot.lane.b32.xlu2 %v7798_v34, %s11136_s16 }
 0x10a   : > { %v721_v12 = vpop.permute.xlu1 %720  ;;  %1072 = vrot.lane.b32.xlu0 %v7826_v51, %s11136_s16 }
 0x10b   : > { %792 = vst.msk [vmem:[#allocation3 + $0x190] sm:$0xff] %vm766_vm2, %v721_v12  ;;  %v876_v20 = vpop.permute.xlu2 %875 }
 0x10c   : > { %966 = vst.msk [vmem:[#allocation3 + $0x60] sm:$0xff] %vm959_vm3, %v876_v20  ;;  %v731_v35 = vpop.permute.xlu0 %730  ;;  %v1215_v20 = vld [vmem:[#allocation2 + $0x181] sm:$0xff] }
 0x10d   : > { %797 = vst.msk [vmem:[#allocation3 + $0x1e0] sm:$0xff] %vm766_vm2, %v731_v35  ;;  %v11217_v35 = vld [vmem:[#allocation7_spill] sm:$0xff] }
 0x110   : > { %1068 = vrot.lane.b32.xlu1 %v7727_v63, %s11136_s16 }
 0x111   : > { %1076 = vrot.lane.b32.xlu2 %v7824_v47, %s11136_s16 }
 0x112   : > { %v727_v59 = vpop.permute.xlu1 %726  ;;  %1078 = vrot.lane.b32.xlu0 %v7851_v22, %s11136_s16 }
 0x113   : > { %795 = vst.msk [vmem:[#allocation3 + $0x1c0] sm:$0xff] %vm766_vm2, %v727_v59  ;;  %v882_v34 = vpop.permute.xlu2 %881 }
 0x114   : > { %969 = vst.msk [vmem:[#allocation3 + $0x90] sm:$0xff] %vm959_vm3, %v882_v34  ;;  %v866_v51 = vpop.permute.xlu0 %865 }
 0x115   : > { %961 = vst.msk [vmem:[#allocation3 + $0x10] sm:$0xff] %vm959_vm3, %v866_v51 }
 0x118   : > { %1074 = vrot.lane.b32.xlu1 %v7740_v7, %s11136_s16 }
 0x119   : > { %1082 = vrot.lane.b32.xlu2 %v7849_v11, %s11136_s16 }
 0x11a   : > { %v733_v63 = vpop.permute.xlu1 %732  ;;  %1084 = vrot.lane.b32.xlu0 %v7878_v43, %s11136_s16 }
 0x11b   : > { %798 = vst.msk [vmem:[#allocation3 + $0x1f0] sm:$0xff] %vm766_vm2, %v733_v63  ;;  %v888_v47 = vpop.permute.xlu2 %887  ;;  %v8213_v63 = vld [vmem:[#allocation2 + $0x189] sm:$0xff] }
 0x11c   : > { %972 = vst.msk [vmem:[#allocation3 + $0xc0] sm:$0xff] %vm959_vm3, %v888_v47  ;;  %v872_v22 = vpop.permute.xlu0 %871  ;;  %v11220_v47 = vld [vmem:[#allocation13_spill] sm:$0xff] }
 0x11d   : > { %964 = vst.msk [vmem:[#allocation3 + $0x40] sm:$0xff] %vm959_vm3, %v872_v22 }
 0x120   : > { %1080 = vrot.lane.b32.xlu1 %v7761_v13, %s11136_s16 }
 0x121   : > { %1088 = vrot.lane.b32.xlu2 %v7876_v31, %s11136_s16 }
 0x122   : > { %v868_v7 = vpop.permute.xlu1 %867  ;;  %1090 = vrot.lane.b32.xlu0 %v7905_v28, %s11136_s16 }
 0x123   : > { %962 = vst.msk [vmem:[#allocation3 + $0x20] sm:$0xff] %vm959_vm3, %v868_v7  ;;  %v894_v43 = vpop.permute.xlu2 %893  ;;  %v11221_v7 = vld [vmem:[#allocation11_spill] sm:$0xff] }
 0x124   : > { %975 = vst.msk [vmem:[#allocation3 + $0xf0] sm:$0xff] %vm959_vm3, %v894_v43  ;;  %v878_v11 = vpop.permute.xlu0 %877 }
 0x125   : > { %967 = vst.msk [vmem:[#allocation3 + $0x70] sm:$0xff] %vm959_vm3, %v878_v11 }
 0x128   : > { %1086 = vrot.lane.b32.xlu1 %v7785_v23, %s11136_s16 }
 0x129   : > { %1094 = vrot.lane.b32.xlu2 %v7903_v46, %s11136_s16 }
 0x12a   : > { %v874_v13 = vpop.permute.xlu1 %873  ;;  %1096 = vrot.lane.b32.xlu0 %v7928_v16, %s11136_s16 }
 0x12b   : > { %965 = vst.msk [vmem:[#allocation3 + $0x50] sm:$0xff] %vm959_vm3, %v874_v13  ;;  %v900_v28 = vpop.permute.xlu2 %899 }
 0x12c   : > { %978 = vst.msk [vmem:[#allocation3 + $0x120] sm:$0xff] %vm959_vm3, %v900_v28  ;;  %v884_v31 = vpop.permute.xlu0 %883  ;;  %v11224_v28 = vld [vmem:[#allocation14_spill] sm:$0xff] }
 0x12d   : > { %970 = vst.msk [vmem:[#allocation3 + $0xa0] sm:$0xff] %vm959_vm3, %v884_v31 }
 0x130   : > { %1092 = vrot.lane.b32.xlu1 %v7811_v40, %s11136_s16 }
 0x131   : > { %1100 = vrot.lane.b32.xlu2 %v7926_v6, %s11136_s16 }
 0x132   : > { %v880_v23 = vpop.permute.xlu1 %879  ;;  %1102 = vrot.lane.b32.xlu0 %v7951_v9, %s11136_s16 }
 0x133   : > { %968 = vst.msk [vmem:[#allocation3 + $0x80] sm:$0xff] %vm959_vm3, %v880_v23  ;;  %v906_v16 = vpop.permute.xlu2 %905 }
 0x134   : > { %981 = vst.msk [vmem:[#allocation3 + $0x150] sm:$0xff] %vm959_vm3, %v906_v16  ;;  %v890_v46 = vpop.permute.xlu0 %889  ;;  %v11225_v16 = vld [vmem:[#allocation12_spill] sm:$0xff] }
 0x135   : > { %973 = vst.msk [vmem:[#allocation3 + $0xd0] sm:$0xff] %vm959_vm3, %v890_v46  ;;  %v11226_v46 = vld [vmem:[#allocation19_spill] sm:$0xff] }
 0x138   : > { %1098 = vrot.lane.b32.xlu1 %v7836_v2, %s11136_s16 }
 0x139   : > { %1106 = vrot.lane.b32.xlu2 %v7949_v10, %s11136_s16 }
 0x13a   : > { %v886_v40 = vpop.permute.xlu1 %885  ;;  %1108 = vrot.lane.b32.xlu0 %v7974_v62, %s11136_s16 }
 0x13b   : > { %971 = vst.msk [vmem:[#allocation3 + $0xb0] sm:$0xff] %vm959_vm3, %v886_v40  ;;  %v912_v9 = vpop.permute.xlu2 %911 }
 0x13c   : > { %984 = vst.msk [vmem:[#allocation3 + $0x180] sm:$0xff] %vm959_vm3, %v912_v9  ;;  %v896_v6 = vpop.permute.xlu0 %895  ;;  %v11227_v9 = vld [vmem:[#allocation17_spill] sm:$0xff] }
 0x13d   : > { %976 = vst.msk [vmem:[#allocation3 + $0x100] sm:$0xff] %vm959_vm3, %v896_v6 }
 0x140   : > { %1104 = vrot.lane.b32.xlu1 %v7862_v1, %s11136_s16 }
 0x141   : > { %1112 = vrot.lane.b32.xlu2 %v7972_v25, %s11136_s16 }
 0x142   : > { %v892_v2 = vpop.permute.xlu1 %891  ;;  %1114 = vrot.lane.b32.xlu0 %v7991_v5, %s11136_s16 }
 0x143   : > { %974 = vst.msk [vmem:[#allocation3 + $0xe0] sm:$0xff] %vm959_vm3, %v892_v2  ;;  %v918_v62 = vpop.permute.xlu2 %917 }
 0x144   : > { %987 = vst.msk [vmem:[#allocation3 + $0x1b0] sm:$0xff] %vm959_vm3, %v918_v62  ;;  %v902_v10 = vpop.permute.xlu0 %901  ;;  %v11228_v62 = vld [vmem:[#allocation15_spill] sm:$0xff] }
 0x145   : > { %979 = vst.msk [vmem:[#allocation3 + $0x130] sm:$0xff] %vm959_vm3, %v902_v10  ;;  %v11229_v10 = vld [vmem:[#allocation22_spill] sm:$0xff] }
 0x148   : > { %1110 = vrot.lane.b32.xlu1 %v7889_v29, %s11136_s16 }
 0x149   : > { %1118 = vrot.lane.b32.xlu2 %v8087_v21, %s11136_s16 }
 0x14a   : > { %v898_v25 = vpop.permute.xlu1 %897  ;;  %1249 = vrot.lane.b32.xlu0 %v7570_v15, %s11173_s17 }
 0x14b   : > { %977 = vst.msk [vmem:[#allocation3 + $0x110] sm:$0xff] %vm959_vm3, %v898_v25  ;;  %v924_v5 = vpop.permute.xlu2 %923 }
 0x14c   : > { %990 = vst.msk [vmem:[#allocation3 + $0x1e0] sm:$0xff] %vm959_vm3, %v924_v5  ;;  %v908_v1 = vpop.permute.xlu0 %907  ;;  %v11230_v5 = vld [vmem:[#allocation20_spill] sm:$0xff] }
 0x14d   : > { %982 = vst.msk [vmem:[#allocation3 + $0x160] sm:$0xff] %vm959_vm3, %v908_v1 }
 0x150   : > { %1116 = vrot.lane.b32.xlu1 %v8097_v55, %s11136_s16  ;;  %s11279_s16 = smov 72  }
 0x151   : > { %1253 = vrot.lane.b32.xlu2 %v7524_v3, %s11173_s17 }
 0x152   : > { %v904_v29 = vpop.permute.xlu1 %903  ;;  %1255 = vrot.lane.b32.xlu0 %v7576_v17, %s11173_s17 }
 0x153   : > { %980 = vst.msk [vmem:[#allocation3 + $0x140] sm:$0xff] %vm959_vm3, %v904_v29  ;;  %v1059_v15 = vpop.permute.xlu2 %1058 }
 0x154   : > { %1154 = vst.msk [vmem:[#allocation3 + $0x10] sm:$0xff] %vm1152_vm4, %v1059_v15  ;;  %v914_v4 = vpop.permute.xlu0 %913  ;;  %v11231_v15 = vld [vmem:[#allocation18_spill] sm:$0xff] }
 0x155   : > { %985 = vst.msk [vmem:[#allocation3 + $0x190] sm:$0xff] %vm959_vm3, %v914_v4  ;;  %v11232_v4 = vld [vmem:[#allocation25_spill] sm:$0xff] }
 0x158   : > { %1251 = vrot.lane.b32.xlu1 %v7594_v24, %s11173_s17 }
 0x159   : > { %1259 = vrot.lane.b32.xlu2 %v7615_v30, %s11173_s17 }
 0x15a   : > { %v910_v3 = vpop.permute.xlu1 %909  ;;  %1261 = vrot.lane.b32.xlu0 %v7598_v26, %s11173_s17 }
 0x15b   : > { %983 = vst.msk [vmem:[#allocation3 + $0x170] sm:$0xff] %vm959_vm3, %v910_v3  ;;  %v1065_v17 = vpop.permute.xlu2 %1064 }
 0x15c   : > { %1157 = vst.msk [vmem:[#allocation3 + $0x40] sm:$0xff] %vm1152_vm4, %v1065_v17  ;;  %v920_v12 = vpop.permute.xlu0 %919  ;;  %v11233_v17 = vld [vmem:[#allocation23_spill] sm:$0xff] }
 0x15d   : > { %988 = vst.msk [vmem:[#allocation3 + $0x1c0] sm:$0xff] %vm959_vm3, %v920_v12 }
 0x160   : > { %1257 = vrot.lane.b32.xlu1 %v7582_v19, %s11173_s17 }
 0x161   : > { %1265 = vrot.lane.b32.xlu2 %v7633_v36, %s11173_s17 }
 0x162   : > { %v916_v24 = vpop.permute.xlu1 %915  ;;  %1267 = vrot.lane.b32.xlu0 %v7618_v32, %s11173_s17 }
 0x163   : > { %986 = vst.msk [vmem:[#allocation3 + $0x1a0] sm:$0xff] %vm959_vm3, %v916_v24  ;;  %v1071_v26 = vpop.permute.xlu2 %1070 }
 0x164   : > { %1160 = vst.msk [vmem:[#allocation3 + $0x70] sm:$0xff] %vm1152_vm4, %v1071_v26  ;;  %v926_v30 = vpop.permute.xlu0 %925  ;;  %v11234_v26 = vld [vmem:[#allocation21_spill] sm:$0xff] }
 0x165   : > { %991 = vst.msk [vmem:[#allocation3 + $0x1f0] sm:$0xff] %vm959_vm3, %v926_v30  ;;  %v11235_v30 = vld [vmem:[#allocation28_spill] sm:$0xff] }
 0x168   : > { %1263 = vrot.lane.b32.xlu1 %v7601_v27, %s11173_s17 }
 0x169   : > { %1271 = vrot.lane.b32.xlu2 %v7651_v42, %s11173_s17 }
 0x16a   : > { %v922_v19 = vpop.permute.xlu1 %921  ;;  %1273 = vrot.lane.b32.xlu0 %v7636_v38, %s11173_s17 }
 0x16b   : > { %989 = vst.msk [vmem:[#allocation3 + $0x1d0] sm:$0xff] %vm959_vm3, %v922_v19  ;;  %v1077_v32 = vpop.permute.xlu2 %1076 }
 0x16c   : > { %1163 = vst.msk [vmem:[#allocation3 + $0xa0] sm:$0xff] %vm1152_vm4, %v1077_v32  ;;  %v1061_v36 = vpop.permute.xlu0 %1060  ;;  %v11236_v32 = vld [vmem:[#allocation26_spill] sm:$0xff] }
 0x16d   : > { %1155 = vst.msk [vmem:[#allocation3 + $0x20] sm:$0xff] %vm1152_vm4, %v1061_v36 }
 0x170   : > { %1269 = vrot.lane.b32.xlu1 %v7621_v33, %s11173_s17 }
 0x171   : > { %1277 = vrot.lane.b32.xlu2 %v7669_v48, %s11173_s17 }
 0x172   : > { %v1057_v27 = vpop.permute.xlu1 %1056  ;;  %1279 = vrot.lane.b32.xlu0 %v7654_v44, %s11173_s17 }
 0x173   : > { %1153 = vst.msk [vmem:[#allocation3] sm:$0xff] %vm1152_vm4, %v1057_v27  ;;  %v1083_v38 = vpop.permute.xlu2 %1082 }
 0x174   : > { %1166 = vst.msk [vmem:[#allocation3 + $0xd0] sm:$0xff] %vm1152_vm4, %v1083_v38  ;;  %v1067_v42 = vpop.permute.xlu0 %1066  ;;  %v11237_v38 = vld [vmem:[#allocation24_spill] sm:$0xff] }
 0x175   : > { %1158 = vst.msk [vmem:[#allocation3 + $0x50] sm:$0xff] %vm1152_vm4, %v1067_v42  ;;  %v11238_v42 = vld [vmem:[#allocation31_spill] sm:$0xff] }
 0x178   : > { %1275 = vrot.lane.b32.xlu1 %v7639_v39, %s11173_s17 }
 0x179   : > { %1283 = vrot.lane.b32.xlu2 %v7683_v52, %s11173_s17 }
 0x17a   : > { %v1063_v33 = vpop.permute.xlu1 %1062  ;;  %1285 = vrot.lane.b32.xlu0 %v7671_v49, %s11173_s17 }
 0x17b   : > { %1156 = vst.msk [vmem:[#allocation3 + $0x30] sm:$0xff] %vm1152_vm4, %v1063_v33  ;;  %v1089_v44 = vpop.permute.xlu2 %1088 }
 0x17c   : > { %1169 = vst.msk [vmem:[#allocation3 + $0x100] sm:$0xff] %vm1152_vm4, %v1089_v44  ;;  %v1073_v39 = vpop.permute.xlu0 %1072  ;;  %v11239_v44 = vld [vmem:[#allocation29_spill] sm:$0xff] }
 0x17d   : > { %1161 = vst.msk [vmem:[#allocation3 + $0x80] sm:$0xff] %vm1152_vm4, %v1073_v39 }
 0x180   : > { %1281 = vrot.lane.b32.xlu1 %v7657_v45, %s11173_s17 }
 0x181   : > { %1289 = vrot.lane.b32.xlu2 %v7699_v56, %s11173_s17 }
 0x182   : > { %v1069_v48 = vpop.permute.xlu1 %1068  ;;  %1291 = vrot.lane.b32.xlu0 %v7685_v53, %s11173_s17 }
 0x183   : > { %1159 = vst.msk [vmem:[#allocation3 + $0x60] sm:$0xff] %vm1152_vm4, %v1069_v48  ;;  %v1095_v49 = vpop.permute.xlu2 %1094  ;;  %v529_v48 = vld [vmem:[%s8279_s9 + $0x78] sm:$0xff] }
 0x184   : > { %1172 = vst.msk [vmem:[#allocation3 + $0x130] sm:$0xff] %vm1152_vm4, %v1095_v49  ;;  %v1079_v52 = vpop.permute.xlu0 %1078  ;;  %2348 = vmatpush.msra.mxu0 %v529_v48  ;;  %v1618_v48 = vld [vmem:[#allocation2 + $0xc8] sm:$0xff] }
 0x185   : > { %1164 = vst.msk [vmem:[#allocation3 + $0xb0] sm:$0xff] %vm1152_vm4, %v1079_v52  ;;  %v528_v52 = vld [vmem:[%s8279_s9 + $0x70] sm:$0xff] }
 0x186   : > { %2349 = vmatpush.msra.mxu0 %v528_v52 }
 0x188   : > { %1287 = vrot.lane.b32.xlu1 %v7673_v50, %s11173_s17 }
 0x189   : > { %1295 = vrot.lane.b32.xlu2 %v7715_v60, %s11173_s17 }
 0x18a   : > { %v1075_v45 = vpop.permute.xlu1 %1074  ;;  %1297 = vrot.lane.b32.xlu0 %v7701_v57, %s11173_s17 }
 0x18b   : > { %1162 = vst.msk [vmem:[#allocation3 + $0x90] sm:$0xff] %vm1152_vm4, %v1075_v45  ;;  %v1101_v53 = vpop.permute.xlu2 %1100  ;;  %v527_v45 = vld [vmem:[%s8279_s9 + $0x68] sm:$0xff] }
 0x18c   : > { %1175 = vst.msk [vmem:[#allocation3 + $0x160] sm:$0xff] %vm1152_vm4, %v1101_v53  ;;  %v1085_v56 = vpop.permute.xlu0 %1084  ;;  %v11240_v53 = vld [vmem:[#allocation27_spill] sm:$0xff]  ;;  %2350 = vmatpush.msra.mxu0 %v527_v45 }
 0x18d   : > { %1167 = vst.msk [vmem:[#allocation3 + $0xe0] sm:$0xff] %vm1152_vm4, %v1085_v56  ;;  %v526_v56 = vld [vmem:[%s8279_s9 + $0x60] sm:$0xff] }
 0x18e   : > { %2351 = vmatpush.msra.mxu0 %v526_v56  ;;  %v1617_v56 = vld [vmem:[#allocation2 + $0xc0] sm:$0xff] }
 0x190   : > { %1293 = vrot.lane.b32.xlu1 %v7687_v54, %s11173_s17 }
 0x191   : > { %1301 = vrot.lane.b32.xlu2 %v7731_v0, %s11173_s17 }
 0x192   : > { %v1081_v50 = vpop.permute.xlu1 %1080  ;;  %1303 = vrot.lane.b32.xlu0 %v7717_v61, %s11173_s17 }
 0x193   : > { %1165 = vst.msk [vmem:[#allocation3 + $0xc0] sm:$0xff] %vm1152_vm4, %v1081_v50  ;;  %v1107_v57 = vpop.permute.xlu2 %1106  ;;  %v11241_v50 = vld [vmem:[#allocation34_spill] sm:$0xff] }
 0x194   : > { %1178 = vst.msk [vmem:[#allocation3 + $0x190] sm:$0xff] %vm1152_vm4, %v1107_v57  ;;  %v1091_v60 = vpop.permute.xlu0 %1090 }
 0x195   : > { %1170 = vst.msk [vmem:[#allocation3 + $0x110] sm:$0xff] %vm1152_vm4, %v1091_v60  ;;  %v11242_v60 = vld [vmem:[#allocation32_spill] sm:$0xff] }
 0x198   : > { %1299 = vrot.lane.b32.xlu1 %v7703_v58, %s11173_s17  ;;  %v11218_v58 = vld [vmem:[#allocation10_spill] sm:$0xff] }
 0x199   : > { %1307 = vrot.lane.b32.xlu2 %v7744_v8, %s11173_s17  ;;  %v11219_v8 = vld [vmem:[#allocation8_spill] sm:$0xff] }
 0x19a   : > { %v1087_v54 = vpop.permute.xlu1 %1086  ;;  %1309 = vrot.lane.b32.xlu0 %v1215_v20, %s11173_s17 }
 0x19b   : > { %1168 = vst.msk [vmem:[#allocation3 + $0xf0] sm:$0xff] %vm1152_vm4, %v1087_v54  ;;  %v1113_v61 = vpop.permute.xlu2 %1112  ;;  %v525_v54 = vld [vmem:[%s8279_s9 + $0x58] sm:$0xff] }
 0x19c   : > { %1181 = vst.msk [vmem:[#allocation3 + $0x1c0] sm:$0xff] %vm1152_vm4, %v1113_v61  ;;  %v1097_v0 = vpop.permute.xlu0 %1096  ;;  %v524_v61 = vld [vmem:[%s8279_s9 + $0x50] sm:$0xff]  ;;  %2352 = vmatpush.msra.mxu0 %v525_v54 }
 0x19d   : > { %1173 = vst.msk [vmem:[#allocation3 + $0x140] sm:$0xff] %vm1152_vm4, %v1097_v0 }
 0x19e   : > { %2353 = vmatpush.msra.mxu0 %v524_v61 }
 0x1a0   : > { %1305 = vrot.lane.b32.xlu1 %v11217_v35, %s11173_s17  ;;  %v523_v35 = vld [vmem:[%s8279_s9 + $0x48] sm:$0xff] }
 0x1a1   : > { %1442 = vrot.lane.b32.xlu2 %v11218_v58, %s7313_s20  ;;  %v11243_v58 = vld [vmem:[#allocation30_spill] sm:$0xff]  ;;  %2354 = vmatpush.msra.mxu0 %v523_v35  ;;  %v1624_v35 = vld [vmem:[#allocation2 + $0x110] sm:$0xff] }
 0x1a2   : > { %v1093_v59 = vpop.permute.xlu1 %1092  ;;  %1444 = vrot.lane.b32.xlu0 %v11219_v8, %s7313_s20 }
 0x1a3   : > { %1171 = vst.msk [vmem:[#allocation3 + $0x120] sm:$0xff] %vm1152_vm4, %v1093_v59  ;;  %v1119_v34 = vpop.permute.xlu2 %1118  ;;  %v522_v59 = vld [vmem:[%s8279_s9 + $0x40] sm:$0xff] }
 0x1a4   : > { %1184 = vst.msk [vmem:[#allocation3 + $0x1f0] sm:$0xff] %vm1152_vm4, %v1119_v34  ;;  %v1103_v51 = vpop.permute.xlu0 %1102  ;;  %v11244_v34 = vld [vmem:[#allocation35_spill] sm:$0xff]  ;;  %2355 = vmatpush.msra.mxu0 %v522_v59  ;;  %v538_v59 = vld [vmem:[%s8279_s9 + $0xc0] sm:$0xff] }
 0x1a5   : > { %1176 = vst.msk [vmem:[#allocation3 + $0x170] sm:$0xff] %vm1152_vm4, %v1103_v51 }
 0x1a8   : > { %1311 = vrot.lane.b32.xlu1 %v8213_v63, %s11173_s17 }
 0x1a9   : > { %1448 = vrot.lane.b32.xlu2 %v11220_v47, %s7313_s20  ;;  %v521_v47 = vld [vmem:[%s8279_s9 + $0x38] sm:$0xff] }
 0x1aa   : > { %v1099_v22 = vpop.permute.xlu1 %1098  ;;  %1450 = vrot.lane.b32.xlu0 %v11221_v7, %s7313_s20  ;;  %2356 = vmatpush.msra.mxu0 %v521_v47 }
 0x1ab   : > { %1174 = vst.msk [vmem:[#allocation3 + $0x150] sm:$0xff] %vm1152_vm4, %v1099_v22  ;;  %v1254_v43 = vpop.permute.xlu2 %1253  ;;  %v520_v22 = vld [vmem:[%s8279_s9 + $0x30] sm:$0xff] }
 0x1ac   : > { %1348 = vst.msk [vmem:[#allocation3 + $0x20] sm:$0xff] %vm1345_vm5, %v1254_v43  ;;  %v1109_v11 = vpop.permute.xlu0 %1108  ;;  %v1408_v43 = vld [vmem:[#allocation2 + $0x182] sm:$0xff]  ;;  %2357 = vmatpush.msra.mxu0 %v520_v22 }
 0x1ad   : > { %1179 = vst.msk [vmem:[#allocation3 + $0x1a0] sm:$0xff] %vm1152_vm4, %v1109_v11  ;;  %v1409_v11 = vld [vmem:[#allocation2 + $0x18a] sm:$0xff] }
 0x1ae   : > { %v1623_v22 = vld [vmem:[#allocation2 + $0x108] sm:$0xff] }
 0x1b0   : > { %1446 = vrot.lane.b32.xlu1 %v11222_v18, %s7313_s20  ;;  %v11245_v18 = vld [vmem:[#allocation33_spill] sm:$0xff] }
 0x1b1   : > { %1454 = vrot.lane.b32.xlu2 %v11223_v37, %s7313_s20  ;;  %v518_v37 = vld [vmem:[%s8279_s9 + $0x20] sm:$0xff] }
 0x1b2   : > { %v1105_v13 = vpop.permute.xlu1 %1104  ;;  %1456 = vrot.lane.b32.xlu0 %v11224_v28, %s7313_s20 }
 0x1b3   : > { %1177 = vst.msk [vmem:[#allocation3 + $0x180] sm:$0xff] %vm1152_vm4, %v1105_v13  ;;  %v1260_v31 = vpop.permute.xlu2 %1259 }
 0x1b4   : > { %1351 = vst.msk [vmem:[#allocation3 + $0x50] sm:$0xff] %vm1345_vm5, %v1260_v31  ;;  %v1115_v23 = vpop.permute.xlu0 %1114  ;;  %v517_v31 = vld [vmem:[%s8279_s9 + $0x18] sm:$0xff] }
 0x1b5   : > { %1182 = vst.msk [vmem:[#allocation3 + $0x1d0] sm:$0xff] %vm1152_vm4, %v1115_v23  ;;  %v516_v23 = vld [vmem:[%s8279_s9 + $0x10] sm:$0xff] }
 0x1b8   : > { %1452 = vrot.lane.b32.xlu1 %v11225_v16, %s7313_s20 }
 0x1b9   : > { %1460 = vrot.lane.b32.xlu2 %v11226_v46, %s7313_s20  ;;  %v515_v46 = vld [vmem:[%s8279_s9 + $0x8] sm:$0xff] }
 0x1ba   : > { %v1111_v40 = vpop.permute.xlu1 %1110  ;;  %1462 = vrot.lane.b32.xlu0 %v11227_v9, %s7313_s20  ;;  %v1607_v9 = vld [vmem:[#allocation2 + $0x48] sm:$0xff] }
 0x1bb   : > { %1180 = vst.msk [vmem:[#allocation3 + $0x1b0] sm:$0xff] %vm1152_vm4, %v1111_v40  ;;  %v1266_v6 = vpop.permute.xlu2 %1265  ;;  %v1606_v40 = vld [vmem:[#allocation2 + $0x38] sm:$0xff] }
 0x1bc   : > { %1354 = vst.msk [vmem:[#allocation3 + $0x80] sm:$0xff] %vm1345_vm5, %v1266_v6  ;;  %v1250_v2 = vpop.permute.xlu0 %1249  ;;  %v514_v6 = vld [vmem:[%s8279_s9] sm:$0xff] }
 0x1bd   : > { %1346 = vst.msk [vmem:[#allocation3] sm:$0xff] %vm1345_vm5, %v1250_v2 }
 0x1c0   : > { %1458 = vrot.lane.b32.xlu1 %v11228_v62, %s7313_s20 }
 0x1c1   : > { %1466 = vrot.lane.b32.xlu2 %v11229_v10, %s7313_s20  ;;  %v540_v10 = vld [vmem:[%s8279_s9 + $0xd0] sm:$0xff] }
 0x1c2   : > { %v1117_v25 = vpop.permute.xlu1 %1116  ;;  %1468 = vrot.lane.b32.xlu0 %v11230_v5, %s7313_s20  ;;  %7104 = vmatpush.msra.mxu1 %v540_v10  ;;  %v1609_v5 = vld [vmem:[#allocation2 + $0x60] sm:$0xff] }
 0x1c3   : > { %1183 = vst.msk [vmem:[#allocation3 + $0x1e0] sm:$0xff] %vm1152_vm4, %v1117_v25  ;;  %v1272_v1 = vpop.permute.xlu2 %1271 }
 0x1c4   : > { %1357 = vst.msk [vmem:[#allocation3 + $0xb0] sm:$0xff] %vm1345_vm5, %v1272_v1  ;;  %v1256_v29 = vpop.permute.xlu0 %1255  ;;  %v1610_v1 = vld [vmem:[#allocation2 + $0x68] sm:$0xff] }
 0x1c5   : > { %1349 = vst.msk [vmem:[#allocation3 + $0x30] sm:$0xff] %vm1345_vm5, %v1256_v29 }
 0x1c8   : > { %1464 = vrot.lane.b32.xlu1 %v11231_v15, %s7313_s20 }
 0x1c9   : > { %1472 = vrot.lane.b32.xlu2 %v11232_v4, %s7313_s20 }
 0x1ca   : > { %v1252_v3 = vpop.permute.xlu1 %1251  ;;  %1474 = vrot.lane.b32.xlu0 %v11233_v17, %s7313_s20  ;;  %v1608_v17 = vld [vmem:[#allocation2 + $0x50] sm:$0xff] }
 0x1cb   : > { %1347 = vst.msk [vmem:[#allocation3 + $0x10] sm:$0xff] %vm1345_vm5, %v1252_v3  ;;  %v1278_v12 = vpop.permute.xlu2 %1277 }
 0x1cc   : > { %1360 = vst.msk [vmem:[#allocation3 + $0xe0] sm:$0xff] %vm1345_vm5, %v1278_v12  ;;  %v1262_v24 = vpop.permute.xlu0 %1261  ;;  %v1612_v12 = vld [vmem:[#allocation2 + $0x80] sm:$0xff] }
 0x1cd   : > { %1352 = vst.msk [vmem:[#allocation3 + $0x60] sm:$0xff] %vm1345_vm5, %v1262_v24  ;;  %v1613_v24 = vld [vmem:[#allocation2 + $0x90] sm:$0xff] }
 0x1d0   : > { %1470 = vrot.lane.b32.xlu1 %v11234_v26, %s7313_s20 }
 0x1d1   : > { %1478 = vrot.lane.b32.xlu2 %v11235_v30, %s7313_s20 }
 0x1d2   : > { %v1258_v19 = vpop.permute.xlu1 %1257  ;;  %1480 = vrot.lane.b32.xlu0 %v11236_v32, %s7313_s20  ;;  %v1611_v32 = vld [vmem:[#allocation2 + $0x78] sm:$0xff] }
 0x1d3   : > { %1350 = vst.msk [vmem:[#allocation3 + $0x40] sm:$0xff] %vm1345_vm5, %v1258_v19  ;;  %v1284_v36 = vpop.permute.xlu2 %1283 }
 0x1d4   : > { %1363 = vst.msk [vmem:[#allocation3 + $0x110] sm:$0xff] %vm1345_vm5, %v1284_v36  ;;  %v1268_v27 = vpop.permute.xlu0 %1267  ;;  %v1615_v36 = vld [vmem:[#allocation2 + $0xa8] sm:$0xff] }
 0x1d5   : > { %1355 = vst.msk [vmem:[#allocation3 + $0x90] sm:$0xff] %vm1345_vm5, %v1268_v27  ;;  %v1616_v27 = vld [vmem:[#allocation2 + $0xb0] sm:$0xff] }
 0x1d8   : > { %1476 = vrot.lane.b32.xlu1 %v11237_v38, %s7313_s20 }
 0x1d9   : > { %1484 = vrot.lane.b32.xlu2 %v11238_v42, %s7313_s20 }
 0x1da   : > { %v1264_v33 = vpop.permute.xlu1 %1263  ;;  %1486 = vrot.lane.b32.xlu0 %v11239_v44, %s7313_s20  ;;  %v539_v44 = vld [vmem:[%s8279_s9 + $0xc8] sm:$0xff] }
 0x1db   : > { %1353 = vst.msk [vmem:[#allocation3 + $0x70] sm:$0xff] %vm1345_vm5, %v1264_v33  ;;  %v1290_v39 = vpop.permute.xlu2 %1289  ;;  %7105 = vmatpush.msra.mxu1 %v539_v44 }
 0x1dc   : > { %1366 = vst.msk [vmem:[#allocation3 + $0x140] sm:$0xff] %vm1345_vm5, %v1290_v39  ;;  %v1274_v49 = vpop.permute.xlu0 %1273  ;;  %v1614_v39 = vld [vmem:[#allocation2 + $0x98] sm:$0xff] }
 0x1dd   : > { %1358 = vst.msk [vmem:[#allocation3 + $0xc0] sm:$0xff] %vm1345_vm5, %v1274_v49  ;;  %v1619_v49 = vld [vmem:[#allocation2 + $0xd8] sm:$0xff]  ;;  %7106 = vmatpush.msra.mxu1 %v538_v59 }
 0x1e0   : > { %1482 = vrot.lane.b32.xlu1 %v11240_v53, %s7313_s20 }
 0x1e1   : > { %1490 = vrot.lane.b32.xlu2 %v11241_v50, %s7313_s20 }
 0x1e2   : > { %v1270_v57 = vpop.permute.xlu1 %1269  ;;  %1492 = vrot.lane.b32.xlu0 %v11242_v60, %s7313_s20  ;;  %v1622_v60 = vld [vmem:[#allocation2 + $0xf8] sm:$0xff] }
 0x1e3   : > { %1356 = vst.msk [vmem:[#allocation3 + $0xa0] sm:$0xff] %vm1345_vm5, %v1270_v57  ;;  %v1296_v20 = vpop.permute.xlu2 %1295  ;;  %v1621_v57 = vld [vmem:[#allocation2 + $0xf0] sm:$0xff] }
 0x1e4   : > { %1369 = vst.msk [vmem:[#allocation3 + $0x170] sm:$0xff] %vm1345_vm5, %v1296_v20  ;;  %v1280_v0 = vpop.permute.xlu0 %1279 }
 0x1e5   : > { %1361 = vst.msk [vmem:[#allocation3 + $0xf0] sm:$0xff] %vm1345_vm5, %v1280_v0  ;;  %v1620_v0 = vld [vmem:[#allocation2 + $0xe0] sm:$0xff] }
 0x1e8   : > { %1488 = vrot.lane.b32.xlu1 %v11243_v58, %s7313_s20  ;;  %v1625_v58 = vld [vmem:[#allocation2 + $0x120] sm:$0xff] }
 0x1e9   : > { %1496 = vrot.lane.b32.xlu2 %v7986_v41, %s7313_s20  ;;  %v519_v41 = vld [vmem:[%s8279_s9 + $0x28] sm:$0xff] }
 0x1ea   : > { %v1276_v8 = vpop.permute.xlu1 %1275  ;;  %1498 = vrot.lane.b32.xlu0 %v11244_v34, %s7313_s20  ;;  %2358 = vmatpush.msra.mxu0 %v519_v41  ;;  %v1628_v41 = vld [vmem:[#allocation2 + $0x140] sm:$0xff] }
 0x1eb   : > { %1359 = vst.msk [vmem:[#allocation3 + $0xd0] sm:$0xff] %vm1345_vm5, %v1276_v8  ;;  %v1302_v51 = vpop.permute.xlu2 %1301 }
 0x1ec   : > { %1372 = vst.msk [vmem:[#allocation3 + $0x1a0] sm:$0xff] %vm1345_vm5, %v1302_v51  ;;  %v1286_v7 = vpop.permute.xlu0 %1285  ;;  %2359 = vmatpush.msra.mxu0 %v518_v37 }
 0x1ed   : > { %1364 = vst.msk [vmem:[#allocation3 + $0x120] sm:$0xff] %vm1345_vm5, %v1286_v7  ;;  %v1627_v7 = vld [vmem:[#allocation2 + $0x138] sm:$0xff] }
 0x1ee   : > { %2360 = vmatpush.msra.mxu0 %v517_v31  ;;  %v1631_v31 = vld [vmem:[#allocation2 + $0x168] sm:$0xff] }
 0x1f0   : > { %1494 = vrot.lane.b32.xlu1 %v11245_v18, %s7313_s20  ;;  %2361 = vmatpush.msra.mxu0 %v516_v23 }
 0x1f1   : > { %1502 = vrot.lane.b32.xlu2 %v1408_v43, %s7313_s20 }
 0x1f2   : > { %v1282_v13 = vpop.permute.xlu1 %1281  ;;  %1504 = vrot.lane.b32.xlu0 %v1409_v11, %s7313_s20  ;;  %2362 = vmatpush.msra.mxu0 %v515_v46 }
 0x1f3   : > { %1362 = vst.msk [vmem:[#allocation3 + $0x100] sm:$0xff] %vm1345_vm5, %v1282_v13  ;;  %v1308_v28 = vpop.permute.xlu2 %1307  ;;  %v1626_v13 = vld [vmem:[#allocation2 + $0x128] sm:$0xff] }
 0x1f4   : > { %1375 = vst.msk [vmem:[#allocation3 + $0x1d0] sm:$0xff] %vm1345_vm5, %v1308_v28  ;;  %v1292_v16 = vpop.permute.xlu0 %1291  ;;  %2363 = vmatpush.msra.mxu0 %v514_v6  ;;  %v1630_v28 = vld [vmem:[#allocation2 + $0x158] sm:$0xff] }
 0x1f5   : > { %1367 = vst.msk [vmem:[#allocation3 + $0x150] sm:$0xff] %vm1345_vm5, %v1292_v16  ;;  %v537_v6 = vld [vmem:[%s8279_s9 + $0xb8] sm:$0xff] }
 0x1f6   : > { %2466 = vmatpush.msrb.mxu0 %v540_v10  ;;  %7107 = vmatpush.msra.mxu1 %v537_v6 }
 0x1f8   : > { %1500 = vrot.lane.b32.xlu1 %v7968_v14, %s7313_s20  ;;  %v1605_v14 = vld [vmem:[#allocation2 + $0x30] sm:$0xff]  ;;  %2467 = vmatpush.msrb.mxu0 %v539_v44 }
 0x1f9   : > { %1671 = vrot.lane.b32.xlu2 %v1606_v40, %s7314_s10 }
 0x1fa   : > { %v1288_v2 = vpop.permute.xlu1 %1287  ;;  %1673 = vrot.lane.b32.xlu0 %v1607_v9, %s7314_s10  ;;  %2468 = vmatpush.msrb.mxu0 %v538_v59  ;;  %v1629_v9 = vld [vmem:[#allocation2 + $0x150] sm:$0xff]  ;;  %v1812_v59 = vld [vmem:[#allocation2 + $0xd9] sm:$0xff] }
 0x1fb   : > { %1365 = vst.msk [vmem:[#allocation3 + $0x130] sm:$0xff] %vm1345_vm5, %v1288_v2  ;;  %v1443_v62 = vpop.permute.xlu2 %1442 }
 0x1fc   : > { %1539 = vst.msk [vmem:[#allocation3] sm:$0xff] %vm1538_vm6, %v1443_v62  ;;  %v1298_v25 = vpop.permute.xlu0 %1297  ;;  %2469 = vmatpush.msrb.mxu0 %v537_v6 }
 0x1fd   : > { %1541 = vst.msk [vmem:[#allocation3 + $0x8] sm:$0xff] %vm1540_vm7, %v1443_v62 }
 0x1fe   : > { %1370 = vst.msk [vmem:[#allocation3 + $0x180] sm:$0xff] %vm1345_vm5, %v1298_v25 }
 0x200   : > { %1669 = vrot.lane.b32.xlu1 %v1605_v14, %s7314_s10  ;;  %v1632_v14 = vld [vmem:[#allocation2 + $0x170] sm:$0xff] }
 0x201   : > { %1677 = vrot.lane.b32.xlu2 %v1609_v5, %s7314_s10  ;;  %v1798_v5 = vld [vmem:[#allocation2 + $0x31] sm:$0xff] }
 0x202   : > { %v1294_v29 = vpop.permute.xlu1 %1293  ;;  %1679 = vrot.lane.b32.xlu0 %v1610_v1, %s7314_s10 }
 0x203   : > { %1368 = vst.msk [vmem:[#allocation3 + $0x160] sm:$0xff] %vm1345_vm5, %v1294_v29  ;;  %v1449_v15 = vpop.permute.xlu2 %1448  ;;  %v2184_v4 = vld [vmem:[#allocation3] sm:$0xff] }
 0x204   : > { %1546 = vst.msk [vmem:[#allocation3 + $0x30] sm:$0xff] %vm1538_vm6, %v1449_v15  ;;  %v1304_v3 = vpop.permute.xlu0 %1303  ;;  %2364 = vmatmul.f32.vlgmr.msra.gmra.mxu0 %v2184_v4  ;;  %v1635_v4 = vld [vmem:[#allocation2 + $0x198] sm:$0xff] }
 0x205   : > { %1547 = vst.msk [vmem:[#allocation3 + $0x38] sm:$0xff] %vm1540_vm7, %v1449_v15 }
 0x206   : > { %1373 = vst.msk [vmem:[#allocation3 + $0x1b0] sm:$0xff] %vm1345_vm5, %v1304_v3  ;;  %v1800_v3 = vld [vmem:[#allocation2 + $0x49] sm:$0xff] }
 0x208   : > { %1675 = vrot.lane.b32.xlu1 %v1608_v17, %s7314_s10  ;;  %v1801_v17 = vld [vmem:[#allocation2 + $0x51] sm:$0xff] }
 0x209   : > { %1683 = vrot.lane.b32.xlu2 %v1612_v12, %s7314_s10 }
 0x20a   : > { %v1300_v26 = vpop.permute.xlu1 %1299  ;;  %1685 = vrot.lane.b32.xlu0 %v1613_v24, %s7314_s10 }
 0x20b   : > { %1371 = vst.msk [vmem:[#allocation3 + $0x190] sm:$0xff] %vm1345_vm5, %v1300_v26  ;;  %v1455_v30 = vpop.permute.xlu2 %1454  ;;  %v2190_v11 = vld [vmem:[#allocation3 + $0x30] sm:$0xff] }
 0x20c   : > { %1552 = vst.msk [vmem:[#allocation3 + $0x60] sm:$0xff] %vm1538_vm6, %v1455_v30  ;;  %v1310_v19 = vpop.permute.xlu0 %1309 }
 0x20d   : > { %1553 = vst.msk [vmem:[#allocation3 + $0x68] sm:$0xff] %vm1540_vm7, %v1455_v30 }
 0x20e   : > { %1376 = vst.msk [vmem:[#allocation3 + $0x1e0] sm:$0xff] %vm1345_vm5, %v1310_v19  ;;  %v1799_v19 = vld [vmem:[#allocation2 + $0x39] sm:$0xff] }
 0x210   : > { %1681 = vrot.lane.b32.xlu1 %v1611_v32, %s7314_s10  ;;  %v1803_v32 = vld [vmem:[#allocation2 + $0x69] sm:$0xff] }
 0x211   : > { %1689 = vrot.lane.b32.xlu2 %v1615_v36, %s7314_s10  ;;  %v1804_v36 = vld [vmem:[#allocation2 + $0x79] sm:$0xff] }
 0x212   : > { %v1306_v38 = vpop.permute.xlu1 %1305  ;;  %1691 = vrot.lane.b32.xlu0 %v1616_v27, %s7314_s10  ;;  %v536_v27 = vld [vmem:[%s8279_s9 + $0xb0] sm:$0xff] }
 0x213   : > { %1374 = vst.msk [vmem:[#allocation3 + $0x1c0] sm:$0xff] %vm1345_vm5, %v1306_v38  ;;  %v1461_v42 = vpop.permute.xlu2 %1460  ;;  %v2196_v1 = vld [vmem:[#allocation3 + $0x60] sm:$0xff]  ;;  %2470 = vmatpush.msrb.mxu0 %v536_v27  ;;  %7108 = vmatpush.msra.mxu1 %v536_v27 }
 0x214   : > { %1558 = vst.msk [vmem:[#allocation3 + $0x90] sm:$0xff] %vm1538_vm6, %v1461_v42  ;;  %v1445_v33 = vpop.permute.xlu0 %1444 }
 0x215   : > { %1559 = vst.msk [vmem:[#allocation3 + $0x98] sm:$0xff] %vm1540_vm7, %v1461_v42 }
 0x216   : > { %1542 = vst.msk [vmem:[#allocation3 + $0x10] sm:$0xff] %vm1538_vm6, %v1445_v33 }
 0x217   : > { %1543 = vst.msk [vmem:[#allocation3 + $0x18] sm:$0xff] %vm1540_vm7, %v1445_v33 }
 0x218   : > { %1687 = vrot.lane.b32.xlu1 %v1614_v39, %s7314_s10  ;;  %v1802_v39 = vld [vmem:[#allocation2 + $0x61] sm:$0xff] }
 0x219   : > { %1695 = vrot.lane.b32.xlu2 %v1618_v48, %s7314_s10  ;;  %v1806_v48 = vld [vmem:[#allocation2 + $0x91] sm:$0xff] }
 0x21a   : > { %v1312_v52 = vpop.permute.xlu1 %1311  ;;  %1697 = vrot.lane.b32.xlu0 %v1619_v49, %s7314_s10  ;;  %v1807_v49 = vld [vmem:[#allocation2 + $0x99] sm:$0xff] }
 0x21b   : > { %1377 = vst.msk [vmem:[#allocation3 + $0x1f0] sm:$0xff] %vm1345_vm5, %v1312_v52  ;;  %v1467_v45 = vpop.permute.xlu2 %1466 }
 0x21c   : > { %1564 = vst.msk [vmem:[#allocation3 + $0xc0] sm:$0xff] %vm1538_vm6, %v1467_v45  ;;  %v1451_v53 = vpop.permute.xlu0 %1450 }
 0x21d   : > { %1565 = vst.msk [vmem:[#allocation3 + $0xc8] sm:$0xff] %vm1540_vm7, %v1467_v45  ;;  %v2186_v50 = vld [vmem:[#allocation3 + $0x10] sm:$0xff] }
 0x21e   : > { %1548 = vst.msk [vmem:[#allocation3 + $0x40] sm:$0xff] %vm1538_vm6, %v1451_v53  ;;  %2367 = vmatmul.f32.gmra.mxu0 %v2186_v50  ;;  %v2202_v45 = vld [vmem:[#allocation3 + $0x90] sm:$0xff] }
 0x21f   : > { %1549 = vst.msk [vmem:[#allocation3 + $0x48] sm:$0xff] %vm1540_vm7, %v1451_v53  ;;  %v1805_v50 = vld [vmem:[#allocation2 + $0x81] sm:$0xff] }
 0x220   : > { %1693 = vrot.lane.b32.xlu1 %v1617_v56, %s7314_s10 }
 0x221   : > { %1701 = vrot.lane.b32.xlu2 %v1621_v57, %s7314_s10  ;;  %v1809_v57 = vld [vmem:[#allocation2 + $0xb1] sm:$0xff] }
 0x222   : > { %v1447_v20 = vpop.permute.xlu1 %1446  ;;  %1703 = vrot.lane.b32.xlu0 %v1622_v60, %s7314_s10  ;;  %v1810_v60 = vld [vmem:[#allocation2 + $0xc1] sm:$0xff] }
 0x223   : > { %1544 = vst.msk [vmem:[#allocation3 + $0x20] sm:$0xff] %vm1538_vm6, %v1447_v20  ;;  %v1473_v54 = vpop.permute.xlu2 %1472 }
 0x224   : > { %1545 = vst.msk [vmem:[#allocation3 + $0x28] sm:$0xff] %vm1540_vm7, %v1447_v20  ;;  %v1457_v61 = vpop.permute.xlu0 %1456 }
 0x225   : > { %1570 = vst.msk [vmem:[#allocation3 + $0xf0] sm:$0xff] %vm1538_vm6, %v1473_v54  ;;  %v2192_v16 = vld [vmem:[#allocation3 + $0x40] sm:$0xff] }
 0x226   : > { %1571 = vst.msk [vmem:[#allocation3 + $0xf8] sm:$0xff] %vm1540_vm7, %v1473_v54 }
 0x227   : > { %1554 = vst.msk [vmem:[#allocation3 + $0x70] sm:$0xff] %vm1538_vm6, %v1457_v61 }
 0x228   : > { %1699 = vrot.lane.b32.xlu1 %v1620_v0, %s7314_s10  ;;  %1555 = vst.msk [vmem:[#allocation3 + $0x78] sm:$0xff] %vm1540_vm7, %v1457_v61  ;;  %v535_v0 = vld [vmem:[%s8279_s9 + $0xa8] sm:$0xff] }
 0x229   : > { %1707 = vrot.lane.b32.xlu2 %v1624_v35, %s7314_s10  ;;  %2471 = vmatpush.msrb.mxu0 %v535_v0 }
 0x22a   : > { %v1453_v8 = vpop.permute.xlu1 %1452  ;;  %v2188_v34 = vld [vmem:[#allocation3 + $0x20] sm:$0xff]  ;;  %1709 = vrot.lane.b32.xlu0 %v1625_v58, %s7314_s10  ;;  %7109 = vmatpush.msra.mxu1 %v535_v0  ;;  %v1998_v0 = vld [vmem:[#allocation2 + $0x82] sm:$0xff] }
 0x22b   : > { %1550 = vst.msk [vmem:[#allocation3 + $0x50] sm:$0xff] %vm1538_vm6, %v1453_v8  ;;  %2370 = vmatmul.f32.gmra.mxu0 %v2188_v34  ;;  %v1479_v51 = vpop.permute.xlu2 %1478  ;;  %v1808_v58 = vld [vmem:[#allocation2 + $0xa9] sm:$0xff] }
 0x22c   : > { %1551 = vst.msk [vmem:[#allocation3 + $0x58] sm:$0xff] %vm1540_vm7, %v1453_v8  ;;  %v1463_v47 = vpop.permute.xlu0 %1462  ;;  %v1813_v8 = vld [vmem:[#allocation2 + $0xe1] sm:$0xff] }
 0x22d   : > { %1576 = vst.msk [vmem:[#allocation3 + $0x120] sm:$0xff] %vm1538_vm6, %v1479_v51 }
 0x22e   : > { %1577 = vst.msk [vmem:[#allocation3 + $0x128] sm:$0xff] %vm1540_vm7, %v1479_v51  ;;  %v2198_v24 = vld [vmem:[#allocation3 + $0x70] sm:$0xff] }
 0x22f   : > { %1560 = vst.msk [vmem:[#allocation3 + $0xa0] sm:$0xff] %vm1538_vm6, %v1463_v47 }
 0x230   : > { %1705 = vrot.lane.b32.xlu1 %v1623_v22, %s7314_s10  ;;  %1561 = vst.msk [vmem:[#allocation3 + $0xa8] sm:$0xff] %vm1540_vm7, %v1463_v47 }
 0x231   : > { %1713 = vrot.lane.b32.xlu2 %v1627_v7, %s7314_s10  ;;  %v1811_v7 = vld [vmem:[#allocation2 + $0xc9] sm:$0xff] }
 0x232   : > { %v1459_v43 = vpop.permute.xlu1 %1458  ;;  %1715 = vrot.lane.b32.xlu0 %v1628_v41, %s7314_s10  ;;  %v2194_v62 = vld [vmem:[#allocation3 + $0x50] sm:$0xff] }
 0x233   : > { %1556 = vst.msk [vmem:[#allocation3 + $0x80] sm:$0xff] %vm1538_vm6, %v1459_v43  ;;  %2373 = vmatmul.f32.gmra.mxu0 %v2190_v11  ;;  %v1485_v18 = vpop.permute.xlu2 %1484  ;;  %v1815_v41 = vld [vmem:[#allocation2 + $0xf9] sm:$0xff] }
 0x234   : > { %1557 = vst.msk [vmem:[#allocation3 + $0x88] sm:$0xff] %vm1540_vm7, %v1459_v43  ;;  %v1469_v37 = vpop.permute.xlu0 %1468  ;;  %v1816_v43 = vld [vmem:[#allocation2 + $0x109] sm:$0xff] }
 0x235   : > { %1582 = vst.msk [vmem:[#allocation3 + $0x150] sm:$0xff] %vm1538_vm6, %v1485_v18 }
 0x236   : > { %1583 = vst.msk [vmem:[#allocation3 + $0x158] sm:$0xff] %vm1540_vm7, %v1485_v18  ;;  %v2204_v54 = vld [vmem:[#allocation3 + $0xa0] sm:$0xff] }
 0x237   : > { %1566 = vst.msk [vmem:[#allocation3 + $0xd0] sm:$0xff] %vm1538_vm6, %v1469_v37  ;;  %v2208_v18 = vld [vmem:[#allocation3 + $0xc0] sm:$0xff] }
 0x238   : > { %1711 = vrot.lane.b32.xlu1 %v1626_v13, %s7314_s10  ;;  %1567 = vst.msk [vmem:[#allocation3 + $0xd8] sm:$0xff] %vm1540_vm7, %v1469_v37 }
 0x239   : > { %1719 = vrot.lane.b32.xlu2 %v1630_v28, %s7314_s10  ;;  %v1814_v28 = vld [vmem:[#allocation2 + $0xf1] sm:$0xff] }
 0x23a   : > { %v1465_v23 = vpop.permute.xlu1 %1464  ;;  %1721 = vrot.lane.b32.xlu0 %v1631_v31, %s7314_s10  ;;  %v2200_v42 = vld [vmem:[#allocation3 + $0x80] sm:$0xff]  ;;  %v1818_v31 = vld [vmem:[#allocation2 + $0x121] sm:$0xff] }
 0x23b   : > { %1562 = vst.msk [vmem:[#allocation3 + $0xb0] sm:$0xff] %vm1538_vm6, %v1465_v23  ;;  %2376 = vmatmul.f32.gmra.mxu0 %v2192_v16  ;;  %v1491_v46 = vpop.permute.xlu2 %1490 }
 0x23c   : > { %1563 = vst.msk [vmem:[#allocation3 + $0xb8] sm:$0xff] %vm1540_vm7, %v1465_v23  ;;  %v1475_v40 = vpop.permute.xlu0 %1474  ;;  %v1819_v23 = vld [vmem:[#allocation2 + $0x129] sm:$0xff] }
 0x23d   : > { %1588 = vst.msk [vmem:[#allocation3 + $0x180] sm:$0xff] %vm1538_vm6, %v1491_v46 }
 0x23e   : > { %1589 = vst.msk [vmem:[#allocation3 + $0x188] sm:$0xff] %vm1540_vm7, %v1491_v46  ;;  %v2210_v46 = vld [vmem:[#allocation3 + $0xd0] sm:$0xff] }
 0x23f   : > { %1572 = vst.msk [vmem:[#allocation3 + $0x100] sm:$0xff] %vm1538_vm6, %v1475_v40 }
 0x240   : > { %1717 = vrot.lane.b32.xlu1 %v1629_v9, %s7314_s10  ;;  %1573 = vst.msk [vmem:[#allocation3 + $0x108] sm:$0xff] %vm1540_vm7, %v1475_v40  ;;  %v534_v9 = vld [vmem:[%s8279_s9 + $0xa0] sm:$0xff] }
 0x241   : > { %1725 = vrot.lane.b32.xlu2 %v8097_v55, %s7314_s10  ;;  %v1636_v55 = vld [vmem:[#allocation2 + $0x1a0] sm:$0xff]  ;;  %2472 = vmatpush.msrb.mxu0 %v534_v9 }
 0x242   : > { %v1471_v2 = vpop.permute.xlu1 %1470  ;;  %1727 = vrot.lane.b32.xlu0 %v8087_v21, %s7314_s10  ;;  %v2206_v51 = vld [vmem:[#allocation3 + $0xb0] sm:$0xff]  ;;  %7110 = vmatpush.msra.mxu1 %v534_v9 }
 0x243   : > { %1568 = vst.msk [vmem:[#allocation3 + $0xe0] sm:$0xff] %vm1538_vm6, %v1471_v2  ;;  %2379 = vmatmul.f32.gmra.mxu0 %v2194_v62  ;;  %v1497_v10 = vpop.permute.xlu2 %1496  ;;  %v1821_v62 = vld [vmem:[#allocation2 + $0x141] sm:$0xff] }
 0x244   : > { %1569 = vst.msk [vmem:[#allocation3 + $0xe8] sm:$0xff] %vm1540_vm7, %v1471_v2  ;;  %v1481_v25 = vpop.permute.xlu0 %1480  ;;  %v1817_v2 = vld [vmem:[#allocation2 + $0x111] sm:$0xff] }
 0x245   : > { %1594 = vst.msk [vmem:[#allocation3 + $0x1b0] sm:$0xff] %vm1538_vm6, %v1497_v10 }
 0x246   : > { %1595 = vst.msk [vmem:[#allocation3 + $0x1b8] sm:$0xff] %vm1540_vm7, %v1497_v10  ;;  %v1822_v10 = vld [vmem:[#allocation2 + $0x151] sm:$0xff] }
 0x247   : > { %1578 = vst.msk [vmem:[#allocation3 + $0x130] sm:$0xff] %vm1538_vm6, %v1481_v25 }
 0x248   : > { %1723 = vrot.lane.b32.xlu1 %v1632_v14, %s7314_s10  ;;  %1579 = vst.msk [vmem:[#allocation3 + $0x138] sm:$0xff] %vm1540_vm7, %v1481_v25 }
 0x249   : > { %1731 = vrot.lane.b32.xlu2 %v1636_v55, %s7314_s10 }
 0x24a   : > { %v1477_v21 = vpop.permute.xlu1 %1476  ;;  %1862 = vrot.lane.b32.xlu0 %v1798_v5, %s11177_s21  ;;  %v2212_v14 = vld [vmem:[#allocation3 + $0xe0] sm:$0xff] }
 0x24b   : > { %1574 = vst.msk [vmem:[#allocation3 + $0x110] sm:$0xff] %vm1538_vm6, %v1477_v21  ;;  %2382 = vmatmul.f32.gmra.mxu0 %v2196_v1  ;;  %v1503_v29 = vpop.permute.xlu2 %1502  ;;  %v1824_v1 = vld [vmem:[#allocation2 + $0x169] sm:$0xff] }
 0x24c   : > { %1575 = vst.msk [vmem:[#allocation3 + $0x118] sm:$0xff] %vm1540_vm7, %v1477_v21  ;;  %v1487_v15 = vpop.permute.xlu0 %1486  ;;  %v1820_v21 = vld [vmem:[#allocation2 + $0x139] sm:$0xff] }
 0x24d   : > { %1600 = vst.msk [vmem:[#allocation3 + $0x1e0] sm:$0xff] %vm1538_vm6, %v1503_v29 }
 0x24e   : > { %1601 = vst.msk [vmem:[#allocation3 + $0x1e8] sm:$0xff] %vm1540_vm7, %v1503_v29  ;;  %v1825_v29 = vld [vmem:[#allocation2 + $0x171] sm:$0xff] }
 0x24f   : > { %1584 = vst.msk [vmem:[#allocation3 + $0x160] sm:$0xff] %vm1538_vm6, %v1487_v15 }
 0x250   : > { %1729 = vrot.lane.b32.xlu1 %v1635_v4, %s7314_s10  ;;  %1585 = vst.msk [vmem:[#allocation3 + $0x168] sm:$0xff] %vm1540_vm7, %v1487_v15  ;;  %v2214_v4 = vld [vmem:[#allocation3 + $0xf0] sm:$0xff] }
 0x251   : > { %1866 = vrot.lane.b32.xlu2 %v1800_v3, %s11177_s21 }
 0x252   : > { %v1483_v12 = vpop.permute.xlu1 %1482  ;;  %1868 = vrot.lane.b32.xlu0 %v1801_v17, %s11177_s21 }
 0x253   : > { %1580 = vst.msk [vmem:[#allocation3 + $0x140] sm:$0xff] %vm1538_vm6, %v1483_v12  ;;  %2385 = vmatmul.f32.gmra.mxu0 %v2198_v24  ;;  %v1672_v26 = vpop.permute.xlu2 %1671  ;;  %v1823_v24 = vld [vmem:[#allocation2 + $0x159] sm:$0xff] }
 0x254   : > { %1581 = vst.msk [vmem:[#allocation3 + $0x148] sm:$0xff] %vm1540_vm7, %v1483_v12  ;;  %v1493_v30 = vpop.permute.xlu0 %1492 }
 0x255   : > { %1767 = vst.msk [vmem:[#allocation3 + $0x18] sm:$0xff] %vm1765_vm8, %v1672_v26  ;;  %v1828_v26 = vld [vmem:[#allocation2 + $0x199] sm:$0xff] }
 0x256   : > { %1590 = vst.msk [vmem:[#allocation3 + $0x190] sm:$0xff] %vm1538_vm6, %v1493_v30 }
 0x257   : > { %1591 = vst.msk [vmem:[#allocation3 + $0x198] sm:$0xff] %vm1540_vm7, %v1493_v30 }
 0x258   : > { %1864 = vrot.lane.b32.xlu1 %v1799_v19, %s11177_s21  ;;  %v2216_v19 = vld [vmem:[#allocation3 + $0x100] sm:$0xff] }
 0x259   : > { %1872 = vrot.lane.b32.xlu2 %v1803_v32, %s11177_s21 }
 0x25a   : > { %v1489_v38 = vpop.permute.xlu1 %1488  ;;  %1874 = vrot.lane.b32.xlu0 %v1804_v36, %s11177_s21  ;;  %v533_v36 = vld [vmem:[%s8279_s9 + $0x98] sm:$0xff] }
 0x25b   : > { %1586 = vst.msk [vmem:[#allocation3 + $0x170] sm:$0xff] %vm1538_vm6, %v1489_v38  ;;  %2388 = vmatmul.f32.gmra.mxu0 %v2200_v42  ;;  %v1678_v33 = vpop.permute.xlu2 %1677  ;;  %7111 = vmatpush.msra.mxu1 %v533_v36 }
 0x25c   : > { %1587 = vst.msk [vmem:[#allocation3 + $0x178] sm:$0xff] %vm1540_vm7, %v1489_v38  ;;  %v1499_v44 = vpop.permute.xlu0 %1498  ;;  %2473 = vmatpush.msrb.mxu0 %v533_v36  ;;  %v1826_v38 = vld [vmem:[#allocation2 + $0x181] sm:$0xff]  ;;  %v2232_v36 = vld [vmem:[#allocation3 + $0x180] sm:$0xff] }
 0x25d   : > { %1770 = vst.msk [vmem:[#allocation3 + $0x48] sm:$0xff] %vm1765_vm8, %v1678_v33  ;;  %v1992_v33 = vld [vmem:[#allocation2 + $0x3a] sm:$0xff] }
 0x25e   : > { %1596 = vst.msk [vmem:[#allocation3 + $0x1c0] sm:$0xff] %vm1538_vm6, %v1499_v44 }
 0x25f   : > { %1597 = vst.msk [vmem:[#allocation3 + $0x1c8] sm:$0xff] %vm1540_vm7, %v1499_v44 }
 0x260   : > { %1870 = vrot.lane.b32.xlu1 %v1802_v39, %s11177_s21  ;;  %v2218_v39 = vld [vmem:[#allocation3 + $0x110] sm:$0xff] }
 0x261   : > { %1878 = vrot.lane.b32.xlu2 %v1806_v48, %s11177_s21 }
 0x262   : > { %v1495_v52 = vpop.permute.xlu1 %1494  ;;  %1880 = vrot.lane.b32.xlu0 %v1807_v49, %s11177_s21 }
 0x263   : > { %1592 = vst.msk [vmem:[#allocation3 + $0x1a0] sm:$0xff] %vm1538_vm6, %v1495_v52  ;;  %2391 = vmatmul.f32.gmra.mxu0 %v2202_v45  ;;  %v1684_v53 = vpop.permute.xlu2 %1683  ;;  %v1994_v45 = vld [vmem:[#allocation2 + $0x52] sm:$0xff] }
 0x264   : > { %1593 = vst.msk [vmem:[#allocation3 + $0x1a8] sm:$0xff] %vm1540_vm7, %v1495_v52  ;;  %v1505_v56 = vpop.permute.xlu0 %1504  ;;  %v1829_v52 = vld [vmem:[#allocation2 + $0x1a1] sm:$0xff] }
 0x265   : > { %1773 = vst.msk [vmem:[#allocation3 + $0x78] sm:$0xff] %vm1765_vm8, %v1684_v53  ;;  %v1995_v53 = vld [vmem:[#allocation2 + $0x62] sm:$0xff] }
 0x266   : > { %1602 = vst.msk [vmem:[#allocation3 + $0x1f0] sm:$0xff] %vm1538_vm6, %v1505_v56 }
 0x267   : > { %1603 = vst.msk [vmem:[#allocation3 + $0x1f8] sm:$0xff] %vm1540_vm7, %v1505_v56 }
 0x268   : > { %1876 = vrot.lane.b32.xlu1 %v1805_v50, %s11177_s21 }
 0x269   : > { %1884 = vrot.lane.b32.xlu2 %v1809_v57, %s11177_s21  ;;  %v2220_v57 = vld [vmem:[#allocation3 + $0x120] sm:$0xff] }
 0x26a   : > { %v1501_v20 = vpop.permute.xlu1 %1500  ;;  %1886 = vrot.lane.b32.xlu0 %v1810_v60, %s11177_s21 }
 0x26b   : > { %1598 = vst.msk [vmem:[#allocation3 + $0x1d0] sm:$0xff] %vm1538_vm6, %v1501_v20  ;;  %2394 = vmatmul.f32.gmra.mxu0 %v2204_v54  ;;  %v1690_v61 = vpop.permute.xlu2 %1689  ;;  %v1993_v54 = vld [vmem:[#allocation2 + $0x4a] sm:$0xff] }
 0x26c   : > { %1599 = vst.msk [vmem:[#allocation3 + $0x1d8] sm:$0xff] %vm1540_vm7, %v1501_v20  ;;  %v1674_v35 = vpop.permute.xlu0 %1673 }
 0x26d   : > { %1776 = vst.msk [vmem:[#allocation3 + $0xa8] sm:$0xff] %vm1765_vm8, %v1690_v61  ;;  %v1997_v61 = vld [vmem:[#allocation2 + $0x7a] sm:$0xff] }
 0x26e   : > { %1768 = vst.msk [vmem:[#allocation3 + $0x28] sm:$0xff] %vm1765_vm8, %v1674_v35 }
 0x270   : > { %1882 = vrot.lane.b32.xlu1 %v1808_v58, %s11177_s21 }
 0x271   : > { %1890 = vrot.lane.b32.xlu2 %v1812_v59, %s11177_s21  ;;  %v2222_v59 = vld [vmem:[#allocation3 + $0x130] sm:$0xff] }
 0x272   : > { %v1670_v34 = vpop.permute.xlu1 %1669  ;;  %1892 = vrot.lane.b32.xlu0 %v1813_v8, %s11177_s21 }
 0x273   : > { %1766 = vst.msk [vmem:[#allocation3 + $0x8] sm:$0xff] %vm1765_vm8, %v1670_v34  ;;  %2397 = vmatmul.f32.gmra.mxu0 %v2206_v51  ;;  %v1696_v47 = vpop.permute.xlu2 %1695  ;;  %v532_v34 = vld [vmem:[%s8279_s9 + $0x90] sm:$0xff] }
 0x274   : > { %1779 = vst.msk [vmem:[#allocation3 + $0xd8] sm:$0xff] %vm1765_vm8, %v1696_v47  ;;  %v1680_v22 = vpop.permute.xlu0 %1679  ;;  %2474 = vmatpush.msrb.mxu0 %v532_v34  ;;  %7112 = vmatpush.msra.mxu1 %v532_v34  ;;  %v1996_v47 = vld [vmem:[#allocation2 + $0x6a] sm:$0xff]  ;;  %v2016_v34 = vld [vmem:[#allocation2 + $0x15a] sm:$0xff] }
 0x275   : > { %1771 = vst.msk [vmem:[#allocation3 + $0x58] sm:$0xff] %vm1765_vm8, %v1680_v22  ;;  %v2000_v22 = vld [vmem:[#allocation2 + $0x9a] sm:$0xff] }
 0x278   : > { %1888 = vrot.lane.b32.xlu1 %v1811_v7, %s11177_s21  ;;  %v2001_v7 = vld [vmem:[#allocation2 + $0xaa] sm:$0xff] }
 0x279   : > { %1896 = vrot.lane.b32.xlu2 %v1815_v41, %s11177_s21 }
 0x27a   : > { %v1676_v11 = vpop.permute.xlu1 %1675  ;;  %1898 = vrot.lane.b32.xlu0 %v1816_v43, %s11177_s21 }
 0x27b   : > { %1769 = vst.msk [vmem:[#allocation3 + $0x38] sm:$0xff] %vm1765_vm8, %v1676_v11  ;;  %2400 = vmatmul.f32.gmra.mxu0 %v2208_v18  ;;  %v1702_v37 = vpop.permute.xlu2 %1701  ;;  %v2224_v11 = vld [vmem:[#allocation3 + $0x140] sm:$0xff] }
 0x27c   : > { %1782 = vst.msk [vmem:[#allocation3 + $0x108] sm:$0xff] %vm1765_vm8, %v1702_v37  ;;  %v1686_v13 = vpop.permute.xlu0 %1685 }
 0x27d   : > { %1774 = vst.msk [vmem:[#allocation3 + $0x88] sm:$0xff] %vm1765_vm8, %v1686_v13  ;;  %v1999_v13 = vld [vmem:[#allocation2 + $0x92] sm:$0xff] }
 0x280   : > { %1894 = vrot.lane.b32.xlu1 %v1814_v28, %s11177_s21  ;;  %v2003_v28 = vld [vmem:[#allocation2 + $0xc2] sm:$0xff] }
 0x281   : > { %1902 = vrot.lane.b32.xlu2 %v1818_v31, %s11177_s21  ;;  %v8490_v17 = vpop.f32.mrf.mxu0  ;;  %v2004_v31 = vld [vmem:[#allocation2 + $0xca] sm:$0xff] }
 0x282   : > { %v1682_v16 = vpop.permute.xlu1 %1681  ;;  %1904 = vrot.lane.b32.xlu0 %v1819_v23, %s11177_s21 }
 0x283   : > { %1772 = vst.msk [vmem:[#allocation3 + $0x68] sm:$0xff] %vm1765_vm8, %v1682_v16  ;;  %2403 = vmatmul.f32.gmra.mxu0 %v2210_v46  ;;  %v1708_v40 = vpop.permute.xlu2 %1707  ;;  %v2226_v46 = vld [vmem:[#allocation3 + $0x150] sm:$0xff] }
 0x284   : > { %1785 = vst.msk [vmem:[#allocation3 + $0x138] sm:$0xff] %vm1765_vm8, %v1708_v40  ;;  %v1692_v6 = vpop.permute.xlu0 %1691 }
 0x285   : > { %1777 = vst.msk [vmem:[#allocation3 + $0xb8] sm:$0xff] %vm1765_vm8, %v1692_v6  ;;  %v2002_v6 = vld [vmem:[#allocation2 + $0xb2] sm:$0xff] }
 0x288   : > { %1900 = vrot.lane.b32.xlu1 %v1817_v2, %s11177_s21  ;;  %v2006_v2 = vld [vmem:[#allocation2 + $0xe2] sm:$0xff] }
 0x289   : > { %1908 = vrot.lane.b32.xlu2 %v1821_v62, %s11177_s21  ;;  %v2007_v62 = vld [vmem:[#allocation2 + $0xf2] sm:$0xff] }
 0x28a   : > { %v1688_v25 = vpop.permute.xlu1 %1687  ;;  %1910 = vrot.lane.b32.xlu0 %v1822_v10, %s11177_s21 }
 0x28b   : > { %1775 = vst.msk [vmem:[#allocation3 + $0x98] sm:$0xff] %vm1765_vm8, %v1688_v25  ;;  %2406 = vmatmul.f32.gmra.mxu0 %v2212_v14  ;;  %v1714_v55 = vpop.permute.xlu2 %1713  ;;  %v2228_v14 = vld [vmem:[#allocation3 + $0x160] sm:$0xff] }
 0x28c   : > { %1788 = vst.msk [vmem:[#allocation3 + $0x168] sm:$0xff] %vm1765_vm8, %v1714_v55  ;;  %v1698_v5 = vpop.permute.xlu0 %1697 }
 0x28d   : > { %1780 = vst.msk [vmem:[#allocation3 + $0xe8] sm:$0xff] %vm1765_vm8, %v1698_v5  ;;  %v531_v5 = vld [vmem:[%s8279_s9 + $0x88] sm:$0xff] }
 0x28e   : > { %2475 = vmatpush.msrb.mxu0 %v531_v5  ;;  %7113 = vmatpush.msra.mxu1 %v531_v5  ;;  %v2246_v5 = vld [vmem:[#allocation3 + $0x1f0] sm:$0xff] }
 0x290   : > { %1906 = vrot.lane.b32.xlu1 %v1820_v21, %s11177_s21 }
 0x291   : > { %1914 = vrot.lane.b32.xlu2 %v1824_v1, %s11177_s21  ;;  %v2005_v1 = vld [vmem:[#allocation2 + $0xda] sm:$0xff] }
 0x292   : > { %v1694_v15 = vpop.permute.xlu1 %1693  ;;  %1916 = vrot.lane.b32.xlu0 %v1825_v29, %s11177_s21  ;;  %v2010_v29 = vld [vmem:[#allocation2 + $0x112] sm:$0xff] }
 0x293   : > { %1778 = vst.msk [vmem:[#allocation3 + $0xc8] sm:$0xff] %vm1765_vm8, %v1694_v15  ;;  %2409 = vmatmul.f32.gmra.mxu0 %v2214_v4  ;;  %v1720_v3 = vpop.permute.xlu2 %1719 }
 0x294   : > { %1791 = vst.msk [vmem:[#allocation3 + $0x198] sm:$0xff] %vm1765_vm8, %v1720_v3  ;;  %v1704_v12 = vpop.permute.xlu0 %1703  ;;  %v2230_v3 = vld [vmem:[#allocation3 + $0x170] sm:$0xff] }
 0x295   : > { %1783 = vst.msk [vmem:[#allocation3 + $0x118] sm:$0xff] %vm1765_vm8, %v1704_v12 }
 0x298   : > { %1912 = vrot.lane.b32.xlu1 %v1823_v24, %s11177_s21  ;;  %v2009_v24 = vld [vmem:[#allocation2 + $0x10a] sm:$0xff] }
 0x299   : > { %1920 = vrot.lane.b32.xlu2 %v8213_v63, %s11177_s21  ;;  %v1991_v63 = vld [vmem:[#allocation2 + $0x32] sm:$0xff] }
 0x29a   : > { %v1700_v30 = vpop.permute.xlu1 %1699  ;;  %1922 = vrot.lane.b32.xlu0 %v1828_v26, %s11177_s21 }
 0x29b   : > { %1781 = vst.msk [vmem:[#allocation3 + $0xf8] sm:$0xff] %vm1765_vm8, %v1700_v30  ;;  %2412 = vmatmul.f32.gmra.mxu0 %v2216_v19  ;;  %v1726_v32 = vpop.permute.xlu2 %1725  ;;  %v8501_v42 = vpop.f32.mrf.mxu0  ;;  %v2008_v30 = vld [vmem:[#allocation2 + $0xfa] sm:$0xff] }
 0x29c   : > { %1794 = vst.msk [vmem:[#allocation3 + $0x1c8] sm:$0xff] %vm1765_vm8, %v1726_v32  ;;  %v1710_v27 = vpop.permute.xlu0 %1709 }
 0x29d   : > { %1786 = vst.msk [vmem:[#allocation3 + $0x148] sm:$0xff] %vm1765_vm8, %v1710_v27 }
 0x2a0   : > { %1918 = vrot.lane.b32.xlu1 %v1826_v38, %s11177_s21  ;;  %v2013_v38 = vld [vmem:[#allocation2 + $0x13a] sm:$0xff] }
 0x2a1   : > { %2055 = vrot.lane.b32.xlu2 %v1991_v63, %s11175_s22 }
 0x2a2   : > { %v1706_v44 = vpop.permute.xlu1 %1705  ;;  %2057 = vrot.lane.b32.xlu0 %v1992_v33, %s11175_s22  ;;  %v2011_v33 = vld [vmem:[#allocation2 + $0x122] sm:$0xff] }
 0x2a3   : > { %1784 = vst.msk [vmem:[#allocation3 + $0x128] sm:$0xff] %vm1765_vm8, %v1706_v44  ;;  %2415 = vmatmul.f32.gmra.mxu0 %v2218_v39  ;;  %v1732_v48 = vpop.permute.xlu2 %1731 }
 0x2a4   : > { %1797 = vst.msk [vmem:[#allocation3 + $0x1f8] sm:$0xff] %vm1765_vm8, %v1732_v48  ;;  %v1716_v49 = vpop.permute.xlu0 %1715  ;;  %v2234_v48 = vld [vmem:[#allocation3 + $0x190] sm:$0xff] }
 0x2a5   : > { %1789 = vst.msk [vmem:[#allocation3 + $0x178] sm:$0xff] %vm1765_vm8, %v1716_v49 }
 0x2a8   : > { %1924 = vrot.lane.b32.xlu1 %v1829_v52, %s11177_s21  ;;  %v8510_v56 = vpop.f32.mrf.mxu0  ;;  %v530_v52 = vld [vmem:[%s8279_s9 + $0x80] sm:$0xff]  ;;  %s11246_s9 = smov 24  }
 0x2a9   : > { %2061 = vrot.lane.b32.xlu2 %v1994_v45, %s11175_s22  ;;  %2476 = vmatpush.msrb.mxu0 %v530_v52 }
 0x2aa   : > { %v1712_v50 = vpop.permute.xlu1 %1711  ;;  %2063 = vrot.lane.b32.xlu0 %v1995_v53, %s11175_s22  ;;  %7114 = vmatpush.msra.mxu1 %v530_v52  ;;  %v2014_v53 = vld [vmem:[#allocation2 + $0x142] sm:$0xff] }
 0x2ab   : > { %1787 = vst.msk [vmem:[#allocation3 + $0x158] sm:$0xff] %vm1765_vm8, %v1712_v50  ;;  %2418 = vmatmul.f32.gmra.mxu0 %v2220_v57  ;;  %v1867_v60 = vpop.permute.xlu2 %1866 }
 0x2ac   : > { %1961 = vst.msk [vmem:[#allocation3 + $0x28] sm:$0xff] %vm1958_vm9, %v1867_v60  ;;  %v1722_v20 = vpop.permute.xlu0 %1721  ;;  %v2236_v60 = vld [vmem:[#allocation3 + $0x1a0] sm:$0xff] }
 0x2ad   : > { %1792 = vst.msk [vmem:[#allocation3 + $0x1a8] sm:$0xff] %vm1765_vm8, %v1722_v20 }
 0x2b0   : > { %2059 = vrot.lane.b32.xlu1 %v1993_v54, %s11175_s22  ;;  %v8518_v35 = vpop.f32.mrf.mxu0  ;;  %v2012_v54 = vld [vmem:[#allocation2 + $0x12a] sm:$0xff] }
 0x2b1   : > { %2067 = vrot.lane.b32.xlu2 %v1997_v61, %s11175_s22 }
 0x2b2   : > { %v1718_v58 = vpop.permute.xlu1 %1717  ;;  %2069 = vrot.lane.b32.xlu0 %v1998_v0, %s11175_s22 }
 0x2b3   : > { %1790 = vst.msk [vmem:[#allocation3 + $0x188] sm:$0xff] %vm1765_vm8, %v1718_v58  ;;  %2421 = vmatmul.f32.gmra.mxu0 %v2222_v59  ;;  %v1873_v8 = vpop.permute.xlu2 %1872  ;;  %v2238_v59 = vld [vmem:[#allocation3 + $0x1b0] sm:$0xff] }
 0x2b4   : > { %1964 = vst.msk [vmem:[#allocation3 + $0x58] sm:$0xff] %vm1958_vm9, %v1873_v8  ;;  %v1728_v51 = vpop.permute.xlu0 %1727 }
 0x2b5   : > { %1795 = vst.msk [vmem:[#allocation3 + $0x1d8] sm:$0xff] %vm1765_vm8, %v1728_v51 }
 0x2b8   : > { %2065 = vrot.lane.b32.xlu1 %v1996_v47, %s11175_s22  ;;  %v8527_v41 = vpop.f32.mrf.mxu0 }
 0x2b9   : > { %2073 = vrot.lane.b32.xlu2 %v2000_v22, %s11175_s22 }
 0x2ba   : > { %v1724_v43 = vpop.permute.xlu1 %1723  ;;  %2075 = vrot.lane.b32.xlu0 %v2001_v7, %s11175_s22  ;;  %v2240_v7 = vld [vmem:[#allocation3 + $0x1c0] sm:$0xff] }
 0x2bb   : > { %1793 = vst.msk [vmem:[#allocation3 + $0x1b8] sm:$0xff] %vm1765_vm8, %v1724_v43  ;;  %2424 = vmatmul.f32.gmra.mxu0 %v2224_v11  ;;  %v1879_v18 = vpop.permute.xlu2 %1878 }
 0x2bc   : > { %1967 = vst.msk [vmem:[#allocation3 + $0x88] sm:$0xff] %vm1958_vm9, %v1879_v18  ;;  %v1863_v37 = vpop.permute.xlu0 %1862  ;;  %v2017_v18 = vld [vmem:[#allocation2 + $0x16a] sm:$0xff] }
 0x2bd   : > { %1959 = vst.msk [vmem:[#allocation3 + $0x8] sm:$0xff] %vm1958_vm9, %v1863_v37 }
 0x2c0   : > { %2071 = vrot.lane.b32.xlu1 %v1999_v13, %s11175_s22  ;;  %v8535_v23 = vpop.f32.mrf.mxu0 }
 0x2c1   : > { %2079 = vrot.lane.b32.xlu2 %v2003_v28, %s11175_s22  ;;  %v2242_v28 = vld [vmem:[#allocation3 + $0x1d0] sm:$0xff] }
 0x2c2   : > { %v1730_v16 = vpop.permute.xlu1 %1729  ;;  %2081 = vrot.lane.b32.xlu0 %v2004_v31, %s11175_s22 }
 0x2c3   : > { %1796 = vst.msk [vmem:[#allocation3 + $0x1e8] sm:$0xff] %vm1765_vm8, %v1730_v16  ;;  %2427 = vmatmul.f32.gmra.mxu0 %v2226_v46  ;;  %v1885_v40 = vpop.permute.xlu2 %1884  ;;  %v2015_v16 = vld [vmem:[#allocation2 + $0x152] sm:$0xff] }
 0x2c4   : > { %1970 = vst.msk [vmem:[#allocation3 + $0xb8] sm:$0xff] %vm1958_vm9, %v1885_v40  ;;  %v1869_v9 = vpop.permute.xlu0 %1868 }
 0x2c5   : > { %1962 = vst.msk [vmem:[#allocation3 + $0x38] sm:$0xff] %vm1958_vm9, %v1869_v9 }
 0x2c8   : > { %2077 = vrot.lane.b32.xlu1 %v2002_v6, %s11175_s22  ;;  %v8543_v10 = vpop.f32.mrf.mxu0  ;;  %v2244_v6 = vld [vmem:[#allocation3 + $0x1e0] sm:$0xff] }
 0x2c9   : > { %2085 = vrot.lane.b32.xlu2 %v2006_v2, %s11175_s22 }
 0x2ca   : > { %v1865_v25 = vpop.permute.xlu1 %1864  ;;  %2087 = vrot.lane.b32.xlu0 %v2007_v62, %s11175_s22  ;;  %v2019_v62 = vld [vmem:[#allocation2 + $0x182] sm:$0xff] }
 0x2cb   : > { %1960 = vst.msk [vmem:[#allocation3 + $0x18] sm:$0xff] %vm1958_vm9, %v1865_v25  ;;  %2430 = vmatmul.f32.gmra.mxu0 %v2228_v14  ;;  %v1891_v55 = vpop.permute.xlu2 %1890 }
 0x2cc   : > { %1973 = vst.msk [vmem:[#allocation3 + $0xe8] sm:$0xff] %vm1958_vm9, %v1891_v55  ;;  %v1875_v21 = vpop.permute.xlu0 %1874 }
 0x2cd   : > { %1965 = vst.msk [vmem:[#allocation3 + $0x68] sm:$0xff] %vm1958_vm9, %v1875_v21 }
 0x2d0   : > { %2083 = vrot.lane.b32.xlu1 %v2005_v1, %s11175_s22  ;;  %v8552_v15 = vpop.f32.mrf.mxu0  ;;  %v2020_v1 = vld [vmem:[#allocation2 + $0x18a] sm:$0xff] }
 0x2d1   : > { %2091 = vrot.lane.b32.xlu2 %v2009_v24, %s11175_s22 }
 0x2d2   : > { %v1871_v4 = vpop.permute.xlu1 %1870  ;;  %2093 = vrot.lane.b32.xlu0 %v2010_v29, %s11175_s22 }
 0x2d3   : > { %1963 = vst.msk [vmem:[#allocation3 + $0x48] sm:$0xff] %vm1958_vm9, %v1871_v4  ;;  %2433 = vmatmul.f32.gmra.mxu0 %v2230_v3  ;;  %v1897_v12 = vpop.permute.xlu2 %1896 }
 0x2d4   : > { %1976 = vst.msk [vmem:[#allocation3 + $0x118] sm:$0xff] %vm1958_vm9, %v1897_v12  ;;  %v1881_v26 = vpop.permute.xlu0 %1880 }
 0x2d5   : > { %1968 = vst.msk [vmem:[#allocation3 + $0x98] sm:$0xff] %vm1958_vm9, %v1881_v26  ;;  %v2018_v26 = vld [vmem:[#allocation2 + $0x172] sm:$0xff] }
 0x2d8   : > { %2089 = vrot.lane.b32.xlu1 %v2008_v30, %s11175_s22  ;;  %v8560_v19 = vpop.f32.mrf.mxu0 }
 0x2d9   : > { %2097 = vrot.lane.b32.xlu2 %v2012_v54, %s11175_s22  ;;  %v2021_v54 = vld [vmem:[#allocation2 + $0x19a] sm:$0xff] }
 0x2da   : > { %v1877_v32 = vpop.permute.xlu1 %1876  ;;  %2099 = vrot.lane.b32.xlu0 %v2013_v38, %s11175_s22 }
 0x2db   : > { %1966 = vst.msk [vmem:[#allocation3 + $0x78] sm:$0xff] %vm1958_vm9, %v1877_v32  ;;  %2436 = vmatmul.f32.gmra.mxu0 %v2232_v36  ;;  %v1903_v27 = vpop.permute.xlu2 %1902 }
 0x2dc   : > { %1979 = vst.msk [vmem:[#allocation3 + $0x148] sm:$0xff] %vm1958_vm9, %v1903_v27  ;;  %v1887_v63 = vpop.permute.xlu0 %1886 }
 0x2dd   : > { %1971 = vst.msk [vmem:[#allocation3 + $0xc8] sm:$0xff] %vm1958_vm9, %v1887_v63  ;;  %v2022_v63 = vld [vmem:[#allocation2 + $0x1a2] sm:$0xff] }
 0x2e0   : > { %v8566_v44 = vpop.f32.mrf.mxu0  ;;  %2095 = vrot.lane.b32.xlu1 %v2011_v33, %s11175_s22 }
 0x2e1   : > { %2103 = vrot.lane.b32.xlu2 %v2015_v16, %s11175_s22 }
 0x2e2   : > { %v1883_v39 = vpop.permute.xlu1 %1882  ;;  %2105 = vrot.lane.b32.xlu0 %v2016_v34, %s11175_s22 }
 0x2e3   : > { %1969 = vst.msk [vmem:[#allocation3 + $0xa8] sm:$0xff] %vm1958_vm9, %v1883_v39  ;;  %2439 = vmatmul.f32.gmra.mxu0 %v2234_v48  ;;  %v1909_v49 = vpop.permute.xlu2 %1908 }
 0x2e4   : > { %1982 = vst.msk [vmem:[#allocation3 + $0x178] sm:$0xff] %vm1958_vm9, %v1909_v49  ;;  %v1893_v45 = vpop.permute.xlu0 %1892 }
 0x2e5   : > { %1974 = vst.msk [vmem:[#allocation3 + $0xf8] sm:$0xff] %vm1958_vm9, %v1893_v45 }
 0x2e8   : > { %v8573_v50 = vpop.f32.mrf.mxu0  ;;  %2101 = vrot.lane.b32.xlu1 %v2014_v53, %s11175_s22 }
 0x2e9   : > { %2109 = vrot.lane.b32.xlu2 %v2018_v26, %s11175_s22 }
 0x2ea   : > { %v1889_v57 = vpop.permute.xlu1 %1888  ;;  %2111 = vrot.lane.b32.xlu0 %v2019_v62, %s11175_s22 }
 0x2eb   : > { %1972 = vst.msk [vmem:[#allocation3 + $0xd8] sm:$0xff] %vm1958_vm9, %v1889_v57  ;;  %2442 = vmatmul.f32.gmra.mxu0 %v2236_v60  ;;  %v1915_v20 = vpop.permute.xlu2 %1914 }
 0x2ec   : > { %1985 = vst.msk [vmem:[#allocation3 + $0x1a8] sm:$0xff] %vm1958_vm9, %v1915_v20  ;;  %v1899_v61 = vpop.permute.xlu0 %1898 }
 0x2ed   : > { %1977 = vst.msk [vmem:[#allocation3 + $0x128] sm:$0xff] %vm1958_vm9, %v1899_v61 }
 0x2f0   : > { %v8580_v0 = vpop.f32.mrf.mxu0  ;;  %2107 = vrot.lane.b32.xlu1 %v2017_v18, %s11175_s22 }
 0x2f1   : > { %2115 = vrot.lane.b32.xlu2 %v2021_v54, %s11175_s22  ;;  %v2730_v54 = vld [vmem:[#allocation2 + $0x1] sm:$0xff] }
 0x2f2   : > { %v1895_v58 = vpop.permute.xlu1 %1894  ;;  %2117 = vrot.lane.b32.xlu0 %v2022_v63, %s11175_s22 }
 0x2f3   : > { %1975 = vst.msk [vmem:[#allocation3 + $0x108] sm:$0xff] %vm1958_vm9, %v1895_v58  ;;  %2445 = vmatmul.f32.gmra.mxu0 %v2238_v59  ;;  %v1921_v8 = vpop.permute.xlu2 %1920 }
 0x2f4   : > { %1988 = vst.msk [vmem:[#allocation3 + $0x1d8] sm:$0xff] %vm1958_vm9, %v1921_v8  ;;  %v1905_v51 = vpop.permute.xlu0 %1904 }
 0x2f5   : > { %1980 = vst.msk [vmem:[#allocation3 + $0x158] sm:$0xff] %vm1958_vm9, %v1905_v51 }
 0x2f8   : > { %v8586_v47 = vpop.f32.mrf.mxu0  ;;  %2113 = vrot.lane.b32.xlu1 %v2020_v1, %s11175_s22  ;;  %s9463_s22 = scalar_lea.vmem %s11102_s3, %s8270_s13 }
 0x2fa   : > { %v1901_v22 = vpop.permute.xlu1 %1900 }
 0x2fb   : > { %1978 = vst.msk [vmem:[#allocation3 + $0x138] sm:$0xff] %vm1958_vm9, %v1901_v22  ;;  %2448 = vmatmul.f32.gmra.mxu0 %v2240_v7  ;;  %v2056_v43 = vpop.permute.xlu2 %2055 }
 0x2fc   : > { %2152 = vst.msk [vmem:[#allocation3 + $0x8] sm:$0xff] %vm2151_vm10, %v2056_v43  ;;  %v1911_v11 = vpop.permute.xlu0 %1910 }
 0x2fd   : > { %1983 = vst.msk [vmem:[#allocation3 + $0x188] sm:$0xff] %vm1958_vm9, %v1911_v11 }
 0x300   : > { %v8592_v37 = vpop.f32.mrf.mxu0  ;;  %2794 = vrot.lane.b32.xlu1 %v2730_v54, %s11246_s9 }
 0x302   : > { %v1907_v13 = vpop.permute.xlu1 %1906 }
 0x303   : > { %1981 = vst.msk [vmem:[#allocation3 + $0x168] sm:$0xff] %vm1958_vm9, %v1907_v13  ;;  %2451 = vmatmul.f32.gmra.mxu0 %v2242_v28  ;;  %v2062_v31 = vpop.permute.xlu2 %2061  ;;  %v2185_v3 = vld [vmem:[#allocation3 + $0x8] sm:$0xff] }
 0x304   : > { %2155 = vst.msk [vmem:[#allocation3 + $0x38] sm:$0xff] %vm2151_vm10, %v2062_v31  ;;  %v1917_v46 = vpop.permute.xlu0 %1916 }
 0x305   : > { %1986 = vst.msk [vmem:[#allocation3 + $0x1b8] sm:$0xff] %vm1958_vm9, %v1917_v46 }
 0x308   : > { %v8598_v40 = vpop.f32.mrf.mxu0 }
 0x30a   : > { %v1913_v9 = vpop.permute.xlu1 %1912 }
 0x30b   : > { %1984 = vst.msk [vmem:[#allocation3 + $0x198] sm:$0xff] %vm1958_vm9, %v1913_v9  ;;  %2454 = vmatmul.f32.gmra.mxu0 %v2244_v6  ;;  %v2068_v2 = vpop.permute.xlu2 %2067  ;;  %v2191_v20 = vld [vmem:[#allocation3 + $0x38] sm:$0xff] }
 0x30c   : > { %2158 = vst.msk [vmem:[#allocation3 + $0x68] sm:$0xff] %vm2151_vm10, %v2068_v2  ;;  %v1923_v25 = vpop.permute.xlu0 %1922 }
 0x30d   : > { %1989 = vst.msk [vmem:[#allocation3 + $0x1e8] sm:$0xff] %vm1958_vm9, %v1923_v25 }
 0x310   : > { %v8604_v14 = vpop.f32.mrf.mxu0 }
 0x312   : > { %v1919_v55 = vpop.permute.xlu1 %1918 }
 0x313   : > { %1987 = vst.msk [vmem:[#allocation3 + $0x1c8] sm:$0xff] %vm1958_vm9, %v1919_v55  ;;  %2457 = vmatmul.f32.gmra.mxu0 %v2246_v5  ;;  %v2074_v21 = vpop.permute.xlu2 %2073  ;;  %v2197_v31 = vld [vmem:[#allocation3 + $0x68] sm:$0xff] }
 0x314   : > { %2161 = vst.msk [vmem:[#allocation3 + $0x98] sm:$0xff] %vm2151_vm10, %v2074_v21  ;;  %v2058_v29 = vpop.permute.xlu0 %2057 }
 0x315   : > { %2153 = vst.msk [vmem:[#allocation3 + $0x18] sm:$0xff] %vm2151_vm10, %v2058_v29 }
 0x318   : > { %v8610_v4 = vpop.f32.mrf.mxu0 }
 0x31a   : > { %v1925_v12 = vpop.permute.xlu1 %1924 }
 0x31b   : > { %1990 = vst.msk [vmem:[#allocation3 + $0x1f8] sm:$0xff] %vm1958_vm9, %v1925_v12  ;;  %7001 = vmatmul.msk.f32.vlgmr.msrb.gmra.mxu0 %vm2251_vm11, %v2185_v3  ;;  %v2080_v24 = vpop.permute.xlu2 %2079  ;;  %v2203_v3 = vld [vmem:[#allocation3 + $0x98] sm:$0xff] }
 0x31c   : > { %2164 = vst.msk [vmem:[#allocation3 + $0xc8] sm:$0xff] %vm2151_vm10, %v2080_v24  ;;  %v2064_v30 = vpop.permute.xlu0 %2063  ;;  %v2187_v36 = vld [vmem:[#allocation3 + $0x18] sm:$0xff] }
 0x31d   : > { %2156 = vst.msk [vmem:[#allocation3 + $0x48] sm:$0xff] %vm2151_vm10, %v2064_v30 }
 0x320   : > { %v8617_v32 = vpop.f32.mrf.mxu0 }
 0x322   : > { %v2060_v27 = vpop.permute.xlu1 %2059 }
 0x323   : > { %2154 = vst.msk [vmem:[#allocation3 + $0x28] sm:$0xff] %vm2151_vm10, %v2060_v27  ;;  %7002 = vmatmul.msk.f32.gmra.mxu0 %vm2251_vm11, %v2187_v36  ;;  %v2086_v38 = vpop.permute.xlu2 %2085 }
 0x324   : > { %2167 = vst.msk [vmem:[#allocation3 + $0xf8] sm:$0xff] %vm2151_vm10, %v2086_v38  ;;  %v2070_v33 = vpop.permute.xlu0 %2069  ;;  %v2193_v8 = vld [vmem:[#allocation3 + $0x48] sm:$0xff] }
 0x325   : > { %2159 = vst.msk [vmem:[#allocation3 + $0x78] sm:$0xff] %vm2151_vm10, %v2070_v33 }
 0x328   : > { %v8624_v39 = vpop.f32.mrf.mxu0 }
 0x32a   : > { %v2066_v48 = vpop.permute.xlu1 %2065  ;;  %v2189_v49 = vld [vmem:[#allocation3 + $0x28] sm:$0xff] }
 0x32b   : > { %2157 = vst.msk [vmem:[#allocation3 + $0x58] sm:$0xff] %vm2151_vm10, %v2066_v48  ;;  %7003 = vmatmul.msk.f32.gmra.mxu0 %vm2251_vm11, %v2189_v49  ;;  %v2215_v52 = vld [vmem:[#allocation3 + $0xf8] sm:$0xff]  ;;  %v2092_v57 = vpop.permute.xlu2 %2091  ;;  %v2209_v49 = vld [vmem:[#allocation3 + $0xc8] sm:$0xff] }
 0x32c   : > { %7016 = vmatmul.msk.f32.vlgmr.msra.gmra.mxu1 %vm2251_vm11, %v2215_v52  ;;  %v2076_v45 = vpop.permute.xlu0 %2075  ;;  %2170 = vst.msk [vmem:[#allocation3 + $0x128] sm:$0xff] %vm2151_vm10, %v2092_v57  ;;  %v2199_v9 = vld [vmem:[#allocation3 + $0x78] sm:$0xff] }
 0x32d   : > { %2162 = vst.msk [vmem:[#allocation3 + $0xa8] sm:$0xff] %vm2151_vm10, %v2076_v45 }
 0x330   : > { %v8630_v53 = vpop.f32.mrf.mxu0 }
 0x332   : > { %v2072_v60 = vpop.permute.xlu1 %2071  ;;  %v2195_v7 = vld [vmem:[#allocation3 + $0x58] sm:$0xff] }
 0x333   : > { %2160 = vst.msk [vmem:[#allocation3 + $0x88] sm:$0xff] %vm2151_vm10, %v2072_v60  ;;  %7004 = vmatmul.msk.f32.gmra.mxu0 %vm2251_vm11, %v2191_v20  ;;  %v2098_v13 = vpop.permute.xlu2 %2097  ;;  %v2221_v25 = vld [vmem:[#allocation3 + $0x128] sm:$0xff] }
 0x334   : > { %v2082_v61 = vpop.permute.xlu0 %2081  ;;  %2173 = vst.msk [vmem:[#allocation3 + $0x158] sm:$0xff] %vm2151_vm10, %v2098_v13  ;;  %v2205_v30 = vld [vmem:[#allocation3 + $0xa8] sm:$0xff] }
 0x335   : > { %2165 = vst.msk [vmem:[#allocation3 + $0xd8] sm:$0xff] %vm2151_vm10, %v2082_v61 }
 0x338   : > { %v8637_v58 = vpop.f32.mrf.mxu0 }
 0x33a   : > { %v2078_v59 = vpop.permute.xlu1 %2077  ;;  %v2201_v55 = vld [vmem:[#allocation3 + $0x88] sm:$0xff] }
 0x33b   : > { %2163 = vst.msk [vmem:[#allocation3 + $0xb8] sm:$0xff] %vm2151_vm10, %v2078_v59  ;;  %7005 = vmatmul.msk.f32.gmra.mxu0 %vm2251_vm11, %v2193_v8  ;;  %v2104_v29 = vpop.permute.xlu2 %2103  ;;  %v2227_v27 = vld [vmem:[#allocation3 + $0x158] sm:$0xff] }
 0x33c   : > { %v2088_v34 = vpop.permute.xlu0 %2087  ;;  %2176 = vst.msk [vmem:[#allocation3 + $0x188] sm:$0xff] %vm2151_vm10, %v2104_v29  ;;  %v2211_v60 = vld [vmem:[#allocation3 + $0xd8] sm:$0xff] }
 0x33d   : > { %2168 = vst.msk [vmem:[#allocation3 + $0x108] sm:$0xff] %vm2151_vm10, %v2088_v34 }
 0x340   : > { %v8642_v51 = vpop.f32.mrf.mxu0 }
 0x342   : > { %v2084_v22 = vpop.permute.xlu1 %2083  ;;  %v2207_v63 = vld [vmem:[#allocation3 + $0xb8] sm:$0xff] }
 0x343   : > { %2166 = vst.msk [vmem:[#allocation3 + $0xe8] sm:$0xff] %vm2151_vm10, %v2084_v22  ;;  %7006 = vmatmul.msk.f32.gmra.mxu0 %vm2251_vm11, %v2195_v7  ;;  %v2110_v52 = vpop.permute.xlu2 %2109  ;;  %v2233_v59 = vld [vmem:[#allocation3 + $0x188] sm:$0xff]  ;;  %v2731_v22 = vld [vmem:[#allocation2 + $0x9] sm:$0xff] }
 0x344   : > { %v2217_v43 = vld [vmem:[#allocation3 + $0x108] sm:$0xff]  ;;  %v2094_v11 = vpop.permute.xlu0 %2093  ;;  %2179 = vst.msk [vmem:[#allocation3 + $0x1b8] sm:$0xff] %vm2151_vm10, %v2110_v52  ;;  %2796 = vrot.lane.b32.xlu2 %v2731_v22, %s11246_s9 }
 0x345   : > { %7017 = vmatmul.msk.f32.gmra.mxu1 %vm2251_vm11, %v2217_v43  ;;  %2171 = vst.msk [vmem:[#allocation3 + $0x138] sm:$0xff] %vm2151_vm10, %v2094_v11  ;;  %v8703_v11 = vld [vmem:[%s376_s23] ss:$0 sm:$0xff] }
 0x348   : > { %v8648_v18 = vpop.f32.mrf.mxu0 }
 0x34a   : > { %v2090_v28 = vpop.permute.xlu1 %2089  ;;  %v2213_v8 = vld [vmem:[#allocation3 + $0xe8] sm:$0xff] }
 0x34b   : > { %2169 = vst.msk [vmem:[#allocation3 + $0x118] sm:$0xff] %vm2151_vm10, %v2090_v28  ;;  %7007 = vmatmul.msk.f32.gmra.mxu0 %vm2251_vm11, %v2197_v31  ;;  %v2116_v13 = vpop.permute.xlu2 %2115  ;;  %v2366_v28 = vadd.f32 %v8703_v11, %v8490_v17 }
 0x34c   : > { %v2100_v46 = vpop.permute.xlu0 %2099  ;;  %v2223_v1 = vld [vmem:[#allocation3 + $0x138] sm:$0xff]  ;;  %2182 = vst.msk [vmem:[#allocation3 + $0x1e8] sm:$0xff] %vm2151_vm10, %v2116_v13 }
 0x34d   : > { %2174 = vst.msk [vmem:[#allocation3 + $0x168] sm:$0xff] %vm2151_vm10, %v2100_v46 }
 0x350   : > { %v8653_v16 = vpop.f32.mrf.mxu0 }
 0x352   : > { %v2219_v6 = vld [vmem:[#allocation3 + $0x118] sm:$0xff]  ;;  %v2096_v2 = vpop.permute.xlu1 %2095 }
 0x353   : > { %7008 = vmatmul.msk.f32.gmra.mxu0 %vm2251_vm11, %v2199_v9  ;;  %7018 = vmatmul.msk.f32.gmra.mxu1 %vm2251_vm11, %v2219_v6  ;;  %2172 = vst.msk [vmem:[#allocation3 + $0x148] sm:$0xff] %vm2151_vm10, %v2096_v2  ;;  %v2245_v22 = vld [vmem:[#allocation3 + $0x1e8] sm:$0xff] }
 0x354   : > { %v2106_v26 = vpop.permute.xlu0 %2105  ;;  %v2229_v48 = vld [vmem:[#allocation3 + $0x168] sm:$0xff] }
 0x355   : > { %2177 = vst.msk [vmem:[#allocation3 + $0x198] sm:$0xff] %vm2151_vm10, %v2106_v26 }
 0x358   : > { %v8659_v62 = vpop.f32.mrf.mxu0 }
 0x35a   : > { %v2102_v5 = vpop.permute.xlu1 %2101  ;;  %v2225_v24 = vld [vmem:[#allocation3 + $0x148] sm:$0xff] }
 0x35b   : > { %7009 = vmatmul.msk.f32.gmra.mxu0 %vm2251_vm11, %v2201_v55  ;;  %7019 = vmatmul.msk.f32.gmra.mxu1 %vm2251_vm11, %v2221_v25  ;;  %2175 = vst.msk [vmem:[#allocation3 + $0x178] sm:$0xff] %vm2151_vm10, %v2102_v5  ;;  %v2369_v25 = vadd.f32 %v8703_v11, %v8501_v42  ;;  %v2239_v5 = vld [vmem:[#allocation3 + $0x1b8] sm:$0xff]  ;;  %v2372_v42 = vadd.f32 %v8703_v11, %v8510_v56 }
 0x35c   : > { %v2112_v20 = vpop.permute.xlu0 %2111  ;;  %v2235_v43 = vld [vmem:[#allocation3 + $0x198] sm:$0xff]  ;;  %v2375_v56 = vadd.f32 %v8703_v11, %v8518_v35  ;;  %v2378_v35 = vadd.f32 %v8703_v11, %v8527_v41  ;;  %v2381_v41 = vadd.f32 %v8703_v11, %v8535_v23 }
 0x35d   : > { %2180 = vst.msk [vmem:[#allocation3 + $0x1c8] sm:$0xff] %vm2151_vm10, %v2112_v20 }
 0x360   : > { %v8664_v21 = vpop.f32.mrf.mxu0 }
 0x362   : > { %v2108_v38 = vpop.permute.xlu1 %2107  ;;  %v2231_v57 = vld [vmem:[#allocation3 + $0x178] sm:$0xff] }
 0x363   : > { %7010 = vmatmul.msk.f32.gmra.mxu0 %vm2251_vm11, %v2203_v3  ;;  %7020 = vmatmul.msk.f32.gmra.mxu1 %vm2251_vm11, %v2223_v1  ;;  %2178 = vst.msk [vmem:[#allocation3 + $0x1a8] sm:$0xff] %vm2151_vm10, %v2108_v38 }
 0x364   : > { %v2118_v2 = vpop.permute.xlu0 %2117 }
 0x365   : > { %2183 = vst.msk [vmem:[#allocation3 + $0x1f8] sm:$0xff] %vm2151_vm10, %v2118_v2 }
 0x368   : > { %v8669_v12 = vpop.f32.mrf.mxu0 }
 0x36a   : > { %v2114_v34 = vpop.permute.xlu1 %2113  ;;  %v2237_v46 = vld [vmem:[#allocation3 + $0x1a8] sm:$0xff] }
 0x36b   : > { %7011 = vmatmul.msk.f32.gmra.mxu0 %vm2251_vm11, %v2205_v30  ;;  %7021 = vmatmul.msk.f32.gmra.mxu1 %vm2251_vm11, %v2225_v24  ;;  %2181 = vst.msk [vmem:[#allocation3 + $0x1d8] sm:$0xff] %vm2151_vm10, %v2114_v34  ;;  %v2411_v24 = vadd.f32 %v8703_v11, %v8604_v14  ;;  %v2241_v30 = vld [vmem:[#allocation3 + $0x1c8] sm:$0xff] }
 0x370   : > { %v8674_v36 = vpop.f32.mrf.mxu0 }
 0x373   : > { %7012 = vmatmul.msk.f32.gmra.mxu0 %vm2251_vm11, %v2207_v63  ;;  %7022 = vmatmul.msk.f32.gmra.mxu1 %vm2251_vm11, %v2227_v27 }
 0x378   : > { %v8679_v33 = vpop.f32.mrf.mxu0 }
 0x37b   : > { %7013 = vmatmul.msk.f32.gmra.mxu0 %vm2251_vm11, %v2209_v49  ;;  %7023 = vmatmul.msk.f32.gmra.mxu1 %vm2251_vm11, %v2229_v48 }
 0x380   : > { %v8684_v45 = vpop.f32.mrf.mxu0 }
 0x383   : > { %7014 = vmatmul.msk.f32.gmra.mxu0 %vm2251_vm11, %v2211_v60  ;;  %7024 = vmatmul.msk.f32.gmra.mxu1 %vm2251_vm11, %v2231_v57  ;;  %v2243_v60 = vld [vmem:[#allocation3 + $0x1d8] sm:$0xff] }
 0x388   : > { %v8690_v61 = vpop.f32.mrf.mxu0 }
 0x38b   : > { %7015 = vmatmul.msk.f32.gmra.mxu0 %vm2251_vm11, %v2213_v8  ;;  %7025 = vmatmul.msk.f32.gmra.mxu1 %vm2251_vm11, %v2233_v59 }
 0x390   : > { %v8696_v7 = vpop.f32.mrf.mxu0 }
 0x393   : > { %7026 = vmatmul.msk.f32.gmra.mxu1 %vm2251_vm11, %v2235_v43 }
 0x398   : > { %v2478_v31 = vpop.f32.mrf.mxu0 }
 0x399   : > { %v2479_v9 = vadd.f32 %v2478_v31, %v2366_v28 }
 0x39b   : > { %v2574_v6 = vmax.f32 %v2479_v9, 0.0  ;;  %7027 = vmatmul.msk.f32.gmra.mxu1 %vm2251_vm11, %v2237_v46  ;;  %v2247_v9 = vld [vmem:[#allocation3 + $0x1f8] sm:$0xff] }
 0x39d   : > { %2606 = vst.msk [vmem:[#allocation2 + $0x19] sm:$0xff] %vm393_vm0, %v2574_v6  ;;  %v2414_v6 = vadd.f32 %v8703_v11, %v8610_v4  ;;  %v2384_v4 = vadd.f32 %v8703_v11, %v8543_v10  ;;  %v2387_v10 = vadd.f32 %v8703_v11, %v8552_v15  ;;  %v2390_v15 = vadd.f32 %v8703_v11, %v8560_v19 }
 0x3a0   : > { %v2481_v55 = vpop.f32.mrf.mxu0 }
 0x3a1   : > { %v2482_v1 = vadd.f32 %v2481_v55, %v2369_v25 }
 0x3a3   : > { %v2575_v29 = vmax.f32 %v2482_v1, 0.0  ;;  %7028 = vmatmul.msk.f32.gmra.mxu1 %vm2251_vm11, %v2239_v5 }
 0x3a4   : > { %v8715_v17 = vld [vmem:[#allocation2 + $0x19] sm:$0xff] }
 0x3a5   : > { %v8717_v3 = vld [vmem:[#allocation2 + $0x18] sm:$0xff]  ;;  %2607 = vst.msk [vmem:[#allocation2 + $0x21] sm:$0xff] %vm393_vm0, %v2575_v29  ;;  %2798 = vrot.lane.b32.xlu0 %v8715_v17, %s11246_s9 }
 0x3a6   : > { %2700 = vst.msk [vmem:[#allocation3 + $0x20] sm:$0xff] %vm393_vm0, %v8717_v3 }
 0x3a8   : > { %v2484_v26 = vpop.f32.mrf.mxu0 }
 0x3a9   : > { %v2485_v27 = vadd.f32 %v2484_v26, %v2372_v42  ;;  %v2523_v38 = vpop.f32.mrf.mxu1 }
 0x3aa   : > { %v2524_v63 = vadd.f32 %v2523_v38, %v2411_v24 }
 0x3ab   : > { %v2576_v48 = vmax.f32 %v2485_v27, 0.0  ;;  %7029 = vmatmul.msk.f32.gmra.mxu1 %vm2251_vm11, %v2241_v30 }
 0x3ac   : > { %v8729_v49 = vld [vmem:[#allocation2 + $0x21] sm:$0xff]  ;;  %v2589_v52 = vmax.f32 %v2524_v63, 0.0  ;;  %v2417_v63 = vadd.f32 %v8703_v11, %v8617_v32  ;;  %v2420_v32 = vadd.f32 %v8703_v11, %v8624_v39  ;;  %v2393_v39 = vadd.f32 %v8703_v11, %v8566_v44 }
 0x3ad   : > { %v8731_v57 = vld [vmem:[#allocation2 + $0x20] sm:$0xff]  ;;  %2608 = vst.msk [vmem:[#allocation2 + $0x31] sm:$0xff] %vm393_vm0, %v2576_v48  ;;  %2800 = vrot.lane.b32.xlu1 %v8729_v49, %s11246_s9 }
 0x3ae   : > { %2621 = vst.msk [vmem:[#allocation2 + $0xc9] sm:$0xff] %vm393_vm0, %v2589_v52 }
 0x3af   : > { %2701 = vst.msk [vmem:[#allocation3 + $0x30] sm:$0xff] %vm393_vm0, %v8731_v57 }
 0x3b0   : > { %v2487_v14 = vpop.f32.mrf.mxu0 }
 0x3b1   : > { %v2488_v20 = vadd.f32 %v2487_v14, %v2375_v56 }
 0x3b3   : > { %v2577_v54 = vmax.f32 %v2488_v20, 0.0  ;;  %7030 = vmatmul.msk.f32.gmra.mxu1 %vm2251_vm11, %v2243_v60 }
 0x3b4   : > { %v8742_v59 = vld [vmem:[#allocation2 + $0x31] sm:$0xff] }
 0x3b5   : > { %v8744_v8 = vld [vmem:[#allocation2 + $0x30] sm:$0xff]  ;;  %2609 = vst.msk [vmem:[#allocation2 + $0x39] sm:$0xff] %vm393_vm0, %v2577_v54  ;;  %2802 = vrot.lane.b32.xlu2 %v8742_v59, %s11246_s9 }
 0x3b6   : > { %2702 = vst.msk [vmem:[#allocation3 + $0x40] sm:$0xff] %vm393_vm0, %v8744_v8 }
 0x3b8   : > { %v2490_v34 = vpop.f32.mrf.mxu0 }
 0x3b9   : > { %v2491_v43 = vadd.f32 %v2490_v34, %v2378_v35 }
 0x3bb   : > { %v2578_v13 = vmax.f32 %v2491_v43, 0.0  ;;  %7031 = vmatmul.msk.f32.gmra.mxu1 %vm2251_vm11, %v2245_v22 }
 0x3bc   : > { %v8754_v28 = vld [vmem:[#allocation2 + $0x39] sm:$0xff] }
 0x3bd   : > { %v8756_v31 = vld [vmem:[#allocation2 + $0x38] sm:$0xff]  ;;  %2610 = vst.msk [vmem:[#allocation2 + $0x49] sm:$0xff] %vm393_vm0, %v2578_v13  ;;  %2804 = vrot.lane.b32.xlu0 %v8754_v28, %s11246_s9 }
 0x3be   : > { %2703 = vst.msk [vmem:[#allocation3 + $0x50] sm:$0xff] %vm393_vm0, %v8756_v31 }
 0x3c0   : > { %v2493_v46 = vpop.f32.mrf.mxu0 }
 0x3c1   : > { %v2494_v2 = vadd.f32 %v2493_v46, %v2381_v41 }
 0x3c2   : > { %v2526_v25 = vpop.f32.mrf.mxu1 }
 0x3c3   : > { %v2579_v55 = vmax.f32 %v2494_v2, 0.0  ;;  %7032 = vmatmul.msk.f32.gmra.mxu1 %vm2251_vm11, %v2247_v9  ;;  %v2527_v5 = vadd.f32 %v2526_v25, %v2414_v6  ;;  %v2423_v2 = vadd.f32 %v8703_v11, %v8630_v53  ;;  %v2667_v53 = vld [vmem:[#allocation2 + $0x8] sm:$0xff] }
 0x3c4   : > { %v8768_v1 = vld [vmem:[#allocation2 + $0x49] sm:$0xff]  ;;  %2699 = vst.msk [vmem:[#allocation3 + $0x10] sm:$0xff] %vm393_vm0, %v2667_v53 }
 0x3c5   : > { %v8770_v29 = vld [vmem:[#allocation2 + $0x48] sm:$0xff]  ;;  %2611 = vst.msk [vmem:[#allocation2 + $0x51] sm:$0xff] %vm393_vm0, %v2579_v55  ;;  %2806 = vrot.lane.b32.xlu1 %v8768_v1, %s11246_s9  ;;  %v2590_v23 = vmax.f32 %v2527_v5, 0.0 }
 0x3c6   : > { %2704 = vst.msk [vmem:[#allocation3 + $0x60] sm:$0xff] %vm393_vm0, %v8770_v29 }
 0x3c7   : > { %2622 = vst.msk [vmem:[#allocation2 + $0xd9] sm:$0xff] %vm393_vm0, %v2590_v23 }
 0x3c8   : > { %v2496_v42 = vpop.f32.mrf.mxu0 }
 0x3c9   : > { %v2497_v24 = vadd.f32 %v2496_v42, %v2384_v4 }
 0x3cb   : > { %v2580_v26 = vmax.f32 %v2497_v24, 0.0 }
 0x3cc   : > { %v8780_v30 = vld [vmem:[#allocation2 + $0x51] sm:$0xff] }
 0x3cd   : > { %v8782_v27 = vld [vmem:[#allocation2 + $0x50] sm:$0xff]  ;;  %2612 = vst.msk [vmem:[#allocation2 + $0x61] sm:$0xff] %vm393_vm0, %v2580_v26  ;;  %2808 = vrot.lane.b32.xlu2 %v8780_v30, %s11246_s9 }
 0x3ce   : > { %2705 = vst.msk [vmem:[#allocation3 + $0x70] sm:$0xff] %vm393_vm0, %v8782_v27  ;;  %v8789_v38 = vld [vmem:[#allocation2 + $0xd8] sm:$0xff] }
 0x3cf   : > { %2716 = vst.msk [vmem:[#allocation3 + $0x120] sm:$0xff] %vm393_vm0, %v8789_v38 }
 0x3d0   : > { %v2499_v48 = vpop.f32.mrf.mxu0  ;;  %v2529_v52 = vpop.f32.mrf.mxu1 }
 0x3d1   : > { %v2500_v56 = vadd.f32 %v2499_v48, %v2387_v10  ;;  %v2530_v14 = vadd.f32 %v2529_v52, %v2417_v63  ;;  %v2396_v10 = vadd.f32 %v8703_v11, %v8573_v50  ;;  %v2426_v63 = vadd.f32 %v8703_v11, %v8637_v58 }
 0x3d3   : > { %v2581_v60 = vmax.f32 %v2500_v56, 0.0  ;;  %v2591_v20 = vmax.f32 %v2530_v14, 0.0 }
 0x3d4   : > { %v8797_v54 = vld [vmem:[#allocation2 + $0x61] sm:$0xff] }
 0x3d5   : > { %v8799_v35 = vld [vmem:[#allocation2 + $0x60] sm:$0xff]  ;;  %2613 = vst.msk [vmem:[#allocation2 + $0x69] sm:$0xff] %vm393_vm0, %v2581_v60  ;;  %2810 = vrot.lane.b32.xlu0 %v8797_v54, %s11246_s9  ;;  %v2797_v60 = vpop.permute.xlu2 %2796 }
 0x3d6   : > { %2623 = vst.msk [vmem:[#allocation2 + $0xe1] sm:$0xff] %vm393_vm0, %v2591_v20 }
 0x3d7   : > { %2706 = vst.msk [vmem:[#allocation3 + $0x80] sm:$0xff] %vm393_vm0, %v8799_v35 }
 0x3d8   : > { %v2502_v34 = vpop.f32.mrf.mxu0  ;;  %v2532_v22 = vpop.f32.mrf.mxu1  ;;  %2891 = vst.msk [vmem:[#allocation3 + $0x10] sm:$0xff] %vm766_vm2, %v2797_v60  ;;  %v2435_v60 = vadd.f32 %v8703_v11, %v8653_v16  ;;  %v2408_v16 = vadd.f32 %v8703_v11, %v8598_v40 }
 0x3d9   : > { %v2503_v43 = vadd.f32 %v2502_v34, %v2390_v15  ;;  %v2533_v13 = vadd.f32 %v2532_v22, %v2420_v32  ;;  %v2399_v34 = vadd.f32 %v8703_v11, %v8580_v0  ;;  %v2429_v22 = vadd.f32 %v8703_v11, %v8642_v51  ;;  %v2666_v51 = vld [vmem:[#allocation2] sm:$0xff] }
 0x3da   : > { %2698 = vst.msk [vmem:[#allocation3] sm:$0xff] %vm393_vm0, %v2666_v51 }
 0x3db   : > { %v2582_v41 = vmax.f32 %v2503_v43, 0.0  ;;  %v2592_v46 = vmax.f32 %v2533_v13, 0.0 }
 0x3dc   : > { %v8811_v9 = vld [vmem:[#allocation2 + $0x69] sm:$0xff] }
 0x3dd   : > { %v8813_v6 = vld [vmem:[#allocation2 + $0x68] sm:$0xff]  ;;  %2614 = vst.msk [vmem:[#allocation2 + $0x79] sm:$0xff] %vm393_vm0, %v2582_v41  ;;  %2812 = vrot.lane.b32.xlu1 %v8811_v9, %s11246_s9  ;;  %v8819_v19 = vld [vmem:[#allocation2 + $0xe0] sm:$0xff] }
 0x3de   : > { %2624 = vst.msk [vmem:[#allocation2 + $0xf1] sm:$0xff] %vm393_vm0, %v2592_v46 }
 0x3df   : > { %2707 = vst.msk [vmem:[#allocation3 + $0x90] sm:$0xff] %vm393_vm0, %v8813_v6 }
 0x3e0   : > { %v2505_v25 = vpop.f32.mrf.mxu0  ;;  %v2535_v55 = vpop.f32.mrf.mxu1  ;;  %2717 = vst.msk [vmem:[#allocation3 + $0x130] sm:$0xff] %vm393_vm0, %v8819_v19 }
 0x3e1   : > { %v2506_v5 = vadd.f32 %v2505_v25, %v2393_v39  ;;  %v2536_v23 = vadd.f32 %v2535_v55, %v2423_v2 }
 0x3e3   : > { %v2583_v4 = vmax.f32 %v2506_v5, 0.0  ;;  %v2593_v42 = vmax.f32 %v2536_v23, 0.0  ;;  %v2402_v5 = vadd.f32 %v8703_v11, %v8586_v47  ;;  %v2432_v23 = vadd.f32 %v8703_v11, %v8648_v18 }
 0x3e4   : > { %v8829_v24 = vld [vmem:[#allocation2 + $0x79] sm:$0xff] }
 0x3e5   : > { %2615 = vst.msk [vmem:[#allocation2 + $0x81] sm:$0xff] %vm393_vm0, %v2583_v4  ;;  %2814 = vrot.lane.b32.xlu2 %v8829_v24, %s11246_s9  ;;  %v8834_v44 = vld [vmem:[#allocation2 + $0x78] sm:$0xff]  ;;  %v8837_v26 = vld [vmem:[#allocation2 + $0xf0] sm:$0xff] }
 0x3e6   : > { %2625 = vst.msk [vmem:[#allocation2 + $0xf9] sm:$0xff] %vm393_vm0, %v2593_v42 }
 0x3e7   : > { %2708 = vst.msk [vmem:[#allocation3 + $0xa0] sm:$0xff] %vm393_vm0, %v8834_v44 }
 0x3e8   : > { %v2508_v48 = vpop.f32.mrf.mxu0  ;;  %v2538_v52 = vpop.f32.mrf.mxu1  ;;  %2718 = vst.msk [vmem:[#allocation3 + $0x140] sm:$0xff] %vm393_vm0, %v8837_v26 }
 0x3e9   : > { %v2509_v56 = vadd.f32 %v2508_v48, %v2396_v10  ;;  %v2539_v14 = vadd.f32 %v2538_v52, %v2426_v63  ;;  %v2795_v63 = vpop.permute.xlu1 %2794 }
 0x3ea   : > { %2890 = vst.msk [vmem:[#allocation3] sm:$0xff] %vm766_vm2, %v2795_v63  ;;  %v2441_v63 = vadd.f32 %v8703_v11, %v8664_v21 }
 0x3eb   : > { %v2584_v20 = vmax.f32 %v2509_v56, 0.0  ;;  %v2594_v50 = vmax.f32 %v2539_v14, 0.0  ;;  %v2405_v14 = vadd.f32 %v8703_v11, %v8592_v37 }
 0x3ec   : > { %v8849_v15 = vld [vmem:[#allocation2 + $0x81] sm:$0xff] }
 0x3ed   : > { %2616 = vst.msk [vmem:[#allocation2 + $0x91] sm:$0xff] %vm393_vm0, %v2584_v20  ;;  %2816 = vrot.lane.b32.xlu0 %v8849_v15, %s11246_s9  ;;  %v8854_v58 = vld [vmem:[#allocation2 + $0x80] sm:$0xff]  ;;  %v8857_v32 = vld [vmem:[#allocation2 + $0xf8] sm:$0xff] }
 0x3ee   : > { %2626 = vst.msk [vmem:[#allocation2 + $0x109] sm:$0xff] %vm393_vm0, %v2594_v50 }
 0x3ef   : > { %2709 = vst.msk [vmem:[#allocation3 + $0xb0] sm:$0xff] %vm393_vm0, %v8854_v58 }
 0x3f0   : > { %v2511_v43 = vpop.f32.mrf.mxu0  ;;  %v2541_v13 = vpop.f32.mrf.mxu1  ;;  %2719 = vst.msk [vmem:[#allocation3 + $0x150] sm:$0xff] %vm393_vm0, %v8857_v32 }
 0x3f1   : > { %v2512_v41 = vadd.f32 %v2511_v43, %v2399_v34  ;;  %v2542_v46 = vadd.f32 %v2541_v13, %v2429_v22 }
 0x3f3   : > { %v2585_v39 = vmax.f32 %v2512_v41, 0.0  ;;  %v2595_v2 = vmax.f32 %v2542_v46, 0.0 }
 0x3f4   : > { %v8867_v25 = vld [vmem:[#allocation2 + $0x91] sm:$0xff] }
 0x3f5   : > { %2617 = vst.msk [vmem:[#allocation2 + $0x99] sm:$0xff] %vm393_vm0, %v2585_v39  ;;  %2818 = vrot.lane.b32.xlu1 %v8867_v25, %s11246_s9  ;;  %v8872_v0 = vld [vmem:[#allocation2 + $0x90] sm:$0xff]  ;;  %v8875_v55 = vld [vmem:[#allocation2 + $0x108] sm:$0xff]  ;;  %v2438_v39 = vadd.f32 %v8703_v11, %v8659_v62 }
 0x3f6   : > { %2627 = vst.msk [vmem:[#allocation2 + $0x111] sm:$0xff] %vm393_vm0, %v2595_v2 }
 0x3f7   : > { %2710 = vst.msk [vmem:[#allocation3 + $0xc0] sm:$0xff] %vm393_vm0, %v8872_v0 }
 0x3f8   : > { %v2514_v4 = vpop.f32.mrf.mxu0  ;;  %v2544_v42 = vpop.f32.mrf.mxu1  ;;  %2720 = vst.msk [vmem:[#allocation3 + $0x160] sm:$0xff] %vm393_vm0, %v8875_v55 }
 0x3f9   : > { %v2515_v53 = vadd.f32 %v2514_v4, %v2402_v5  ;;  %v2545_v10 = vadd.f32 %v2544_v42, %v2432_v23 }
 0x3fb   : > { %v2586_v48 = vmax.f32 %v2515_v53, 0.0  ;;  %v2596_v47 = vmax.f32 %v2545_v10, 0.0  ;;  %v8925_v10 = vld [vmem:[#allocation2 + $0xc9] sm:$0xff] }
 0x3fc   : > { %v8887_v52 = vld [vmem:[#allocation2 + $0x99] sm:$0xff] }
 0x3fd   : > { %v8889_v18 = vld [vmem:[#allocation2 + $0x98] sm:$0xff]  ;;  %2618 = vst.msk [vmem:[#allocation2 + $0xa9] sm:$0xff] %vm393_vm0, %v2586_v48  ;;  %2820 = vrot.lane.b32.xlu2 %v8887_v52, %s11246_s9  ;;  %v8895_v56 = vld [vmem:[#allocation2 + $0x110] sm:$0xff] }
 0x3fe   : > { %2628 = vst.msk [vmem:[#allocation2 + $0x121] sm:$0xff] %vm393_vm0, %v2596_v47 }
 0x3ff   : > { %2711 = vst.msk [vmem:[#allocation3 + $0xd0] sm:$0xff] %vm393_vm0, %v8889_v18 }
 0x400   : > { %v2517_v20 = vpop.f32.mrf.mxu0  ;;  %v2547_v50 = vpop.f32.mrf.mxu1  ;;  %2721 = vst.msk [vmem:[#allocation3 + $0x170] sm:$0xff] %vm393_vm0, %v8895_v56 }
 0x401   : > { %v2518_v34 = vadd.f32 %v2517_v20, %v2405_v14  ;;  %v2548_v22 = vadd.f32 %v2547_v50, %v2435_v60  ;;  %v8944_v20 = vld [vmem:[#allocation2 + $0xd9] sm:$0xff]  ;;  %v8946_v50 = vld [vmem:[#allocation2 + $0xf1] sm:$0xff] }
 0x403   : > { %v2587_v43 = vmax.f32 %v2518_v34, 0.0  ;;  %v2597_v13 = vmax.f32 %v2548_v22, 0.0 }
 0x404   : > { %v8905_v41 = vld [vmem:[#allocation2 + $0xa9] sm:$0xff] }
 0x405   : > { %v8907_v46 = vld [vmem:[#allocation2 + $0xa8] sm:$0xff]  ;;  %2619 = vst.msk [vmem:[#allocation2 + $0xb1] sm:$0xff] %vm393_vm0, %v2587_v43  ;;  %2822 = vrot.lane.b32.xlu0 %v8905_v41, %s11246_s9  ;;  %v8912_v37 = vld [vmem:[#allocation2 + $0x120] sm:$0xff] }
 0x406   : > { %2629 = vst.msk [vmem:[#allocation2 + $0x129] sm:$0xff] %vm393_vm0, %v2597_v13  ;;  %v2444_v13 = vadd.f32 %v8703_v11, %v8669_v12  ;;  %v8981_v12 = vld [vmem:[#allocation2 + $0xe1] sm:$0xff] }
 0x407   : > { %2712 = vst.msk [vmem:[#allocation3 + $0xe0] sm:$0xff] %vm393_vm0, %v8907_v46 }
 0x408   : > { %v2520_v2 = vpop.f32.mrf.mxu0  ;;  %v2550_v51 = vpop.f32.mrf.mxu1  ;;  %2722 = vst.msk [vmem:[#allocation3 + $0x180] sm:$0xff] %vm393_vm0, %v8912_v37 }
 0x409   : > { %v2521_v5 = vadd.f32 %v2520_v2, %v2408_v16  ;;  %v2551_v23 = vadd.f32 %v2550_v51, %v2438_v39 }
 0x40b   : > { %v2588_v4 = vmax.f32 %v2521_v5, 0.0  ;;  %v2598_v42 = vmax.f32 %v2551_v23, 0.0  ;;  %v8972_v5 = vld [vmem:[#allocation2 + $0xf9] sm:$0xff]  ;;  %v8974_v23 = vld [vmem:[#allocation2 + $0x111] sm:$0xff] }
 0x40c   : > { %v8923_v53 = vld [vmem:[#allocation2 + $0xb1] sm:$0xff] }
 0x40d   : > { %2620 = vst.msk [vmem:[#allocation2 + $0xc1] sm:$0xff] %vm393_vm0, %v2588_v4  ;;  %2824 = vrot.lane.b32.xlu1 %v8923_v53, %s11246_s9  ;;  %2828 = vrot.lane.b32.xlu0 %v8925_v10, %s11246_s9  ;;  %v8933_v40 = vld [vmem:[#allocation2 + $0xb0] sm:$0xff]  ;;  %v8935_v62 = vld [vmem:[#allocation2 + $0x128] sm:$0xff] }
 0x40e   : > { %2630 = vst.msk [vmem:[#allocation2 + $0x139] sm:$0xff] %vm393_vm0, %v2598_v42  ;;  %v2447_v42 = vadd.f32 %v8703_v11, %v8674_v36  ;;  %v9003_v36 = vld [vmem:[#allocation2 + $0x109] sm:$0xff] }
 0x40f   : > { %v2803_v48 = vpop.permute.xlu2 %2802  ;;  %2713 = vst.msk [vmem:[#allocation3 + $0xf0] sm:$0xff] %vm393_vm0, %v8933_v40 }
 0x410   : > { %2894 = vst.msk [vmem:[#allocation3 + $0x40] sm:$0xff] %vm766_vm2, %v2803_v48  ;;  %v2553_v47 = vpop.f32.mrf.mxu1 }
 0x411   : > { %v2554_v14 = vadd.f32 %v2553_v47, %v2441_v63  ;;  %2723 = vst.msk [vmem:[#allocation3 + $0x190] sm:$0xff] %vm393_vm0, %v8935_v62 }
 0x413   : > { %v2599_v60 = vmax.f32 %v2554_v14, 0.0 }
 0x414   : > { %v8948_v34 = vld [vmem:[#allocation2 + $0xc1] sm:$0xff] }
 0x415   : > { %v8950_v22 = vld [vmem:[#allocation2 + $0xc0] sm:$0xff]  ;;  %2631 = vst.msk [vmem:[#allocation2 + $0x141] sm:$0xff] %vm393_vm0, %v2599_v60  ;;  %2830 = vrot.lane.b32.xlu1 %v8944_v20, %s11246_s9  ;;  %2834 = vrot.lane.b32.xlu0 %v8946_v50, %s11246_s9  ;;  %v8957_v21 = vld [vmem:[#allocation2 + $0xc8] sm:$0xff]  ;;  %v8963_v43 = vld [vmem:[#allocation2 + $0x138] sm:$0xff] }
 0x416   : > { %2826 = vrot.lane.b32.xlu2 %v8948_v34, %s11246_s9  ;;  %2714 = vst.msk [vmem:[#allocation3 + $0x100] sm:$0xff] %vm393_vm0, %v8950_v22  ;;  %v8992_v60 = vld [vmem:[#allocation2 + $0x121] sm:$0xff] }
 0x417   : > { %v2799_v16 = vpop.permute.xlu0 %2798  ;;  %2715 = vst.msk [vmem:[#allocation3 + $0x110] sm:$0xff] %vm393_vm0, %v8957_v21 }
 0x418   : > { %2892 = vst.msk [vmem:[#allocation3 + $0x20] sm:$0xff] %vm766_vm2, %v2799_v16  ;;  %v2556_v39 = vpop.f32.mrf.mxu1 }
 0x419   : > { %v2557_v2 = vadd.f32 %v2556_v39, %v2444_v13  ;;  %2724 = vst.msk [vmem:[#allocation3 + $0x1a0] sm:$0xff] %vm393_vm0, %v8963_v43  ;;  %v8994_v13 = vld [vmem:[#allocation2 + $0x139] sm:$0xff]  ;;  %v2450_v39 = vadd.f32 %v8703_v11, %v8679_v33 }
 0x41a   : > { %11247 = vst [vmem:[#allocation7_spill] sm:$0xff] %v8992_v60 }
 0x41b   : > { %v2600_v51 = vmax.f32 %v2557_v2, 0.0  ;;  %11248 = vst [vmem:[#allocation10_spill] sm:$0xff] %v8994_v13 }
 0x41c   : > { %v8983_v4 = vld [vmem:[#allocation2 + $0x140] sm:$0xff] }
 0x41d   : > { %2632 = vst.msk [vmem:[#allocation2 + $0x151] sm:$0xff] %vm393_vm0, %v2600_v51  ;;  %2836 = vrot.lane.b32.xlu1 %v8972_v5, %s11246_s9  ;;  %2840 = vrot.lane.b32.xlu0 %v8974_v23, %s11246_s9 }
 0x41e   : > { %2832 = vrot.lane.b32.xlu2 %v8981_v12, %s11246_s9  ;;  %2725 = vst.msk [vmem:[#allocation3 + $0x1b0] sm:$0xff] %vm393_vm0, %v8983_v4 }
 0x41f   : > { %v2801_v63 = vpop.permute.xlu1 %2800 }
 0x420   : > { %2893 = vst.msk [vmem:[#allocation3 + $0x30] sm:$0xff] %vm766_vm2, %v2801_v63  ;;  %v2559_v48 = vpop.f32.mrf.mxu1 }
 0x421   : > { %v2560_v47 = vadd.f32 %v2559_v48, %v2447_v42  ;;  %v9012_v48 = vld [vmem:[#allocation2 + $0x141] sm:$0xff] }
 0x422   : > { %11249 = vst [vmem:[#allocation8_spill] sm:$0xff] %v9012_v48 }
 0x423   : > { %v2601_v14 = vmax.f32 %v2560_v47, 0.0 }
 0x424   : > { %v8996_v16 = vld [vmem:[#allocation2 + $0x150] sm:$0xff] }
 0x425   : > { %2633 = vst.msk [vmem:[#allocation2 + $0x159] sm:$0xff] %vm393_vm0, %v2601_v14  ;;  %2842 = vrot.lane.b32.xlu1 %v8992_v60, %s11246_s9  ;;  %2846 = vrot.lane.b32.xlu0 %v8994_v13, %s11246_s9  ;;  %v9021_v14 = vld [vmem:[#allocation2 + $0x129] sm:$0xff]  ;;  %v9040_v13 = vld [vmem:[#allocation2 + $0x151] sm:$0xff] }
 0x426   : > { %2838 = vrot.lane.b32.xlu2 %v9003_v36, %s11246_s9  ;;  %2726 = vst.msk [vmem:[#allocation3 + $0x1c0] sm:$0xff] %vm393_vm0, %v8996_v16 }
 0x427   : > { %v2809_v2 = vpop.permute.xlu2 %2808  ;;  %11253 = vst [vmem:[#allocation9_spill] sm:$0xff] %v9040_v13 }
 0x428   : > { %2897 = vst.msk [vmem:[#allocation3 + $0x70] sm:$0xff] %vm766_vm2, %v2809_v2  ;;  %v2562_v51 = vpop.f32.mrf.mxu1 }
 0x429   : > { %v2563_v42 = vadd.f32 %v2562_v51, %v2450_v39  ;;  %v2453_v39 = vadd.f32 %v8703_v11, %v8684_v45  ;;  %v2456_v45 = vadd.f32 %v8703_v11, %v8690_v61  ;;  %v2459_v61 = vadd.f32 %v8703_v11, %v8696_v7  ;;  %v9080_v11 = vld [vmem:[#allocation2 + $0x6a] sm:$0xff] }
 0x42a   : > { %11257 = vst [vmem:[#allocation19_spill] sm:$0xff] %v9080_v11 }
 0x42b   : > { %v2602_v63 = vmax.f32 %v2563_v42, 0.0 }
 0x42c   : > { %v9014_v47 = vld [vmem:[#allocation2 + $0x159] sm:$0xff] }
 0x42d   : > { %11250 = vst [vmem:[#allocation13_spill] sm:$0xff] %v9014_v47  ;;  %2848 = vrot.lane.b32.xlu1 %v9012_v48, %s11246_s9  ;;  %2852 = vrot.lane.b32.xlu0 %v9014_v47, %s11246_s9  ;;  %v9023_v33 = vld [vmem:[#allocation2 + $0x158] sm:$0xff] }
 0x42e   : > { %2634 = vst.msk [vmem:[#allocation2 + $0x169] sm:$0xff] %vm393_vm0, %v2602_v63  ;;  %2844 = vrot.lane.b32.xlu2 %v9021_v14, %s11246_s9  ;;  %v2922_v63 = vld [vmem:[#allocation2 + $0x2] sm:$0xff] }
 0x42f   : > { %2727 = vst.msk [vmem:[#allocation3 + $0x1d0] sm:$0xff] %vm393_vm0, %v9023_v33  ;;  %v2805_v2 = vpop.permute.xlu0 %2804 }
 0x430   : > { %2895 = vst.msk [vmem:[#allocation3 + $0x50] sm:$0xff] %vm766_vm2, %v2805_v2  ;;  %v2565_v51 = vpop.f32.mrf.mxu1 }
 0x431   : > { %v2566_v42 = vadd.f32 %v2565_v51, %v2453_v39  ;;  %v2923_v51 = vld [vmem:[#allocation2 + $0xa] sm:$0xff] }
 0x433   : > { %v2603_v48 = vmax.f32 %v2566_v42, 0.0 }
 0x435   : > { %v9032_v47 = vld [vmem:[#allocation2 + $0x169] sm:$0xff]  ;;  %2635 = vst.msk [vmem:[#allocation2 + $0x171] sm:$0xff] %vm393_vm0, %v2603_v48  ;;  %2986 = vrot.lane.b32.xlu0 %v2922_v63, %s11252_s0 }
 0x436   : > { %11251 = vst [vmem:[#allocation11_spill] sm:$0xff] %v9032_v47  ;;  %v9034_v60 = vld [vmem:[#allocation2 + $0x168] sm:$0xff]  ;;  %2854 = vrot.lane.b32.xlu1 %v9032_v47, %s11246_s9  ;;  %2850 = vrot.lane.b32.xlu2 %v9040_v13, %s11246_s9 }
 0x437   : > { %2728 = vst.msk [vmem:[#allocation3 + $0x1e0] sm:$0xff] %vm393_vm0, %v9034_v60  ;;  %v2807_v39 = vpop.permute.xlu1 %2806  ;;  %v9049_v47 = vld [vmem:[#allocation2 + $0x22] sm:$0xff] }
 0x438   : > { %2896 = vst.msk [vmem:[#allocation3 + $0x60] sm:$0xff] %vm766_vm2, %v2807_v39  ;;  %v2568_v48 = vpop.f32.mrf.mxu1 }
 0x439   : > { %v2569_v2 = vadd.f32 %v2568_v48, %v2456_v45  ;;  %11254 = vst [vmem:[#allocation16_spill] sm:$0xff] %v9049_v47 }
 0x43b   : > { %v2604_v42 = vmax.f32 %v2569_v2, 0.0 }
 0x43c   : > { %v9051_v63 = vld [vmem:[#allocation2 + $0x171] sm:$0xff] }
 0x43d   : > { %2636 = vst.msk [vmem:[#allocation2 + $0x181] sm:$0xff] %vm393_vm0, %v2604_v42  ;;  %2992 = vrot.lane.b32.xlu0 %v9049_v47, %s11252_s0  ;;  %v9057_v13 = vld [vmem:[#allocation2 + $0x170] sm:$0xff]  ;;  %v9075_v47 = vld [vmem:[#allocation2 + $0x1a] sm:$0xff] }
 0x43e   : > { %2988 = vrot.lane.b32.xlu1 %v2923_v51, %s11252_s0  ;;  %2856 = vrot.lane.b32.xlu2 %v9051_v63, %s11246_s9  ;;  %2729 = vst.msk [vmem:[#allocation3 + $0x1f0] sm:$0xff] %vm393_vm0, %v9057_v13  ;;  %v9066_v51 = vld [vmem:[#allocation2 + $0x4a] sm:$0xff]  ;;  %v9068_v42 = vld [vmem:[#allocation2 + $0x32] sm:$0xff] }
 0x43f   : > { %v2815_v45 = vpop.permute.xlu2 %2814  ;;  %11255 = vst [vmem:[#allocation14_spill] sm:$0xff] %v9066_v51 }
 0x440   : > { %2900 = vst.msk [vmem:[#allocation3 + $0xa0] sm:$0xff] %vm766_vm2, %v2815_v45  ;;  %v2571_v39 = vpop.f32.mrf.mxu1  ;;  %v9088_v45 = vld [vmem:[#allocation2 + $0x3a] sm:$0xff] }
 0x441   : > { %v2572_v48 = vadd.f32 %v2571_v39, %v2459_v61  ;;  %11256 = vst [vmem:[#allocation12_spill] sm:$0xff] %v9068_v42  ;;  %v9082_v61 = vld [vmem:[#allocation2 + $0x52] sm:$0xff] }
 0x442   : > { %11258 = vst [vmem:[#allocation17_spill] sm:$0xff] %v9082_v61 }
 0x443   : > { %v2605_v2 = vmax.f32 %v2572_v48, 0.0  ;;  %v9093_v48 = vld [vmem:[#allocation2 + $0x92] sm:$0xff] }
 0x444   : > { %11259 = vst [vmem:[#allocation15_spill] sm:$0xff] %v9093_v48 }
 0x445   : > { %2637 = vst.msk [vmem:[#allocation2 + $0x189] sm:$0xff] %vm393_vm0, %v2605_v2  ;;  %2998 = vrot.lane.b32.xlu0 %v9066_v51, %s11252_s0  ;;  %v9095_v2 = vld [vmem:[#allocation2 + $0x7a] sm:$0xff]  ;;  %v9161_v51 = vld [vmem:[#allocation2 + $0x12a] sm:$0xff] }
 0x446   : > { %2994 = vrot.lane.b32.xlu1 %v9068_v42, %s11252_s0  ;;  %2990 = vrot.lane.b32.xlu2 %v9075_v47, %s11252_s0  ;;  %11260 = vst [vmem:[#allocation22_spill] sm:$0xff] %v9095_v2  ;;  %v9119_v42 = vld [vmem:[#allocation2 + $0xda] sm:$0xff] }
 0x447   : > { %v2811_v7 = vpop.permute.xlu0 %2810  ;;  %11264 = vst [vmem:[#allocation23_spill] sm:$0xff] %v9119_v42 }
 0x448   : > { %2898 = vst.msk [vmem:[#allocation3 + $0x80] sm:$0xff] %vm766_vm2, %v2811_v7  ;;  %v9101_v7 = vld [vmem:[#allocation2 + $0x62] sm:$0xff] }
 0x449   : > { %11274 = vst [vmem:[#allocation30_spill] sm:$0xff] %v9161_v51 }
 0x44d   : > { %3004 = vrot.lane.b32.xlu0 %v9080_v11, %s11252_s0  ;;  %v9106_v11 = vld [vmem:[#allocation2 + $0xb2] sm:$0xff] }
 0x44e   : > { %3000 = vrot.lane.b32.xlu1 %v9082_v61, %s11252_s0  ;;  %2996 = vrot.lane.b32.xlu2 %v9088_v45, %s11252_s0  ;;  %11261 = vst [vmem:[#allocation20_spill] sm:$0xff] %v9106_v11 }
 0x44f   : > { %v2813_v39 = vpop.permute.xlu1 %2812 }
 0x450   : > { %2899 = vst.msk [vmem:[#allocation3 + $0x90] sm:$0xff] %vm766_vm2, %v2813_v39  ;;  %v9108_v39 = vld [vmem:[#allocation2 + $0x9a] sm:$0xff] }
 0x451   : > { %11262 = vst [vmem:[#allocation18_spill] sm:$0xff] %v9108_v39 }
 0x455   : > { %3010 = vrot.lane.b32.xlu0 %v9093_v48, %s11252_s0  ;;  %v9114_v48 = vld [vmem:[#allocation2 + $0x82] sm:$0xff] }
 0x456   : > { %3006 = vrot.lane.b32.xlu1 %v9095_v2, %s11252_s0  ;;  %3002 = vrot.lane.b32.xlu2 %v9101_v7, %s11252_s0  ;;  %11263 = vst [vmem:[#allocation25_spill] sm:$0xff] %v9114_v48 }
 0x457   : > { %v2821_v61 = vpop.permute.xlu2 %2820 }
 0x458   : > { %2903 = vst.msk [vmem:[#allocation3 + $0xd0] sm:$0xff] %vm766_vm2, %v2821_v61  ;;  %v9121_v61 = vld [vmem:[#allocation2 + $0xc2] sm:$0xff] }
 0x459   : > { %11265 = vst [vmem:[#allocation21_spill] sm:$0xff] %v9121_v61 }
 0x45d   : > { %3016 = vrot.lane.b32.xlu0 %v9106_v11, %s11252_s0  ;;  %v9127_v11 = vld [vmem:[#allocation2 + $0xaa] sm:$0xff] }
 0x45e   : > { %3012 = vrot.lane.b32.xlu1 %v9108_v39, %s11252_s0  ;;  %3008 = vrot.lane.b32.xlu2 %v9114_v48, %s11252_s0  ;;  %11266 = vst [vmem:[#allocation28_spill] sm:$0xff] %v9127_v11  ;;  %v9132_v48 = vld [vmem:[#allocation2 + $0xfa] sm:$0xff] }
 0x45f   : > { %v2817_v2 = vpop.permute.xlu0 %2816  ;;  %11267 = vst [vmem:[#allocation26_spill] sm:$0xff] %v9132_v48 }
 0x460   : > { %2901 = vst.msk [vmem:[#allocation3 + $0xb0] sm:$0xff] %vm766_vm2, %v2817_v2  ;;  %v9134_v2 = vld [vmem:[#allocation2 + $0xe2] sm:$0xff] }
 0x461   : > { %11268 = vst [vmem:[#allocation24_spill] sm:$0xff] %v9134_v2 }
 0x465   : > { %3022 = vrot.lane.b32.xlu0 %v9119_v42, %s11252_s0  ;;  %v9140_v42 = vld [vmem:[#allocation2 + $0xca] sm:$0xff] }
 0x466   : > { %3018 = vrot.lane.b32.xlu1 %v9121_v61, %s11252_s0  ;;  %3014 = vrot.lane.b32.xlu2 %v9127_v11, %s11252_s0  ;;  %11269 = vst [vmem:[#allocation31_spill] sm:$0xff] %v9140_v42  ;;  %v9145_v11 = vld [vmem:[#allocation2 + $0x122] sm:$0xff] }
 0x467   : > { %v2819_v39 = vpop.permute.xlu1 %2818  ;;  %11270 = vst [vmem:[#allocation29_spill] sm:$0xff] %v9145_v11 }
 0x468   : > { %2902 = vst.msk [vmem:[#allocation3 + $0xc0] sm:$0xff] %vm766_vm2, %v2819_v39  ;;  %v9147_v39 = vld [vmem:[#allocation2 + $0x10a] sm:$0xff] }
 0x469   : > { %11271 = vst [vmem:[#allocation27_spill] sm:$0xff] %v9147_v39 }
 0x46d   : > { %3028 = vrot.lane.b32.xlu0 %v9132_v48, %s11252_s0  ;;  %v9153_v48 = vld [vmem:[#allocation2 + $0xf2] sm:$0xff] }
 0x46e   : > { %3024 = vrot.lane.b32.xlu1 %v9134_v2, %s11252_s0  ;;  %3020 = vrot.lane.b32.xlu2 %v9140_v42, %s11252_s0  ;;  %11272 = vst [vmem:[#allocation34_spill] sm:$0xff] %v9153_v48 }
 0x470   : > { %v2827_v61 = vpop.permute.xlu2 %2826 }
 0x471   : > { %2906 = vst.msk [vmem:[#allocation3 + $0x100] sm:$0xff] %vm766_vm2, %v2827_v61  ;;  %v9159_v61 = vld [vmem:[#allocation2 + $0x142] sm:$0xff] }
 0x472   : > { %11273 = vst [vmem:[#allocation32_spill] sm:$0xff] %v9159_v61 }
 0x475   : > { %3034 = vrot.lane.b32.xlu0 %v9145_v11, %s11252_s0 }
 0x476   : > { %3030 = vrot.lane.b32.xlu1 %v9147_v39, %s11252_s0  ;;  %3026 = vrot.lane.b32.xlu2 %v9153_v48, %s11252_s0  ;;  %v9167_v39 = vld [vmem:[#allocation2 + $0x112] sm:$0xff]  ;;  %v9174_v48 = vld [vmem:[#allocation2 + $0x16a] sm:$0xff] }
 0x477   : > { %v2823_v2 = vpop.permute.xlu0 %2822  ;;  %11275 = vst [vmem:[#allocation35_spill] sm:$0xff] %v9167_v39 }
 0x478   : > { %2904 = vst.msk [vmem:[#allocation3 + $0xe0] sm:$0xff] %vm766_vm2, %v2823_v2  ;;  %v2833_v42 = vpop.permute.xlu2 %2832 }
 0x479   : > { %2909 = vst.msk [vmem:[#allocation3 + $0x130] sm:$0xff] %vm766_vm2, %v2833_v42 }
 0x47a   : > { %11276 = vst [vmem:[#allocation33_spill] sm:$0xff] %v9174_v48 }
 0x47d   : > { %3040 = vrot.lane.b32.xlu0 %v9159_v61, %s11252_s0  ;;  %v9176_v61 = vld [vmem:[#allocation2 + $0x152] sm:$0xff] }
 0x47e   : > { %3036 = vrot.lane.b32.xlu1 %v9161_v51, %s11252_s0  ;;  %3032 = vrot.lane.b32.xlu2 %v9167_v39, %s11252_s0  ;;  %11277 = vst [vmem:[#allocation36_spill] sm:$0xff] %v9176_v61  ;;  %v9182_v51 = vld [vmem:[#allocation2 + $0x13a] sm:$0xff] }
 0x47f   : > { %v2825_v11 = vpop.permute.xlu1 %2824  ;;  %v2829_v2 = vpop.permute.xlu0 %2828 }
 0x480   : > { %2905 = vst.msk [vmem:[#allocation3 + $0xf0] sm:$0xff] %vm766_vm2, %v2825_v11  ;;  %v2839_v42 = vpop.permute.xlu2 %2838 }
 0x481   : > { %2907 = vst.msk [vmem:[#allocation3 + $0x110] sm:$0xff] %vm766_vm2, %v2829_v2 }
 0x482   : > { %2912 = vst.msk [vmem:[#allocation3 + $0x160] sm:$0xff] %vm766_vm2, %v2839_v42  ;;  %v9189_v42 = vld [vmem:[#allocation2 + $0x172] sm:$0xff] }
 0x483   : > { %11278 = vst [vmem:[#allocation37_spill] sm:$0xff] %v9189_v42 }
 0x485   : > { %3046 = vrot.lane.b32.xlu0 %v9174_v48, %s11252_s0 }
 0x486   : > { %3042 = vrot.lane.b32.xlu1 %v9176_v61, %s11252_s0  ;;  %3038 = vrot.lane.b32.xlu2 %v9182_v51, %s11252_s0  ;;  %v9195_v61 = vld [vmem:[#allocation2 + $0x15a] sm:$0xff] }
 0x487   : > { %v2831_v11 = vpop.permute.xlu1 %2830  ;;  %v2835_v39 = vpop.permute.xlu0 %2834 }
 0x488   : > { %2908 = vst.msk [vmem:[#allocation3 + $0x120] sm:$0xff] %vm766_vm2, %v2831_v11  ;;  %v2845_v2 = vpop.permute.xlu2 %2844 }
 0x489   : > { %2910 = vst.msk [vmem:[#allocation3 + $0x140] sm:$0xff] %vm766_vm2, %v2835_v39 }
 0x48a   : > { %2915 = vst.msk [vmem:[#allocation3 + $0x190] sm:$0xff] %vm766_vm2, %v2845_v2 }
 0x48d   : > { %3180 = vrot.lane.b32.xlu0 %v8731_v57, %s11279_s16 }
 0x48e   : > { %3048 = vrot.lane.b32.xlu1 %v9189_v42, %s11252_s0  ;;  %3044 = vrot.lane.b32.xlu2 %v9195_v61, %s11252_s0 }
 0x48f   : > { %v2837_v48 = vpop.permute.xlu1 %2836  ;;  %v2841_v11 = vpop.permute.xlu0 %2840 }
 0x490   : > { %2911 = vst.msk [vmem:[#allocation3 + $0x150] sm:$0xff] %vm766_vm2, %v2837_v48  ;;  %v2851_v39 = vpop.permute.xlu2 %2850 }
 0x491   : > { %2913 = vst.msk [vmem:[#allocation3 + $0x170] sm:$0xff] %vm766_vm2, %v2841_v11 }
 0x492   : > { %2918 = vst.msk [vmem:[#allocation3 + $0x1c0] sm:$0xff] %vm766_vm2, %v2851_v39  ;;  %v9283_v39 = vld [vmem:[#allocation2 + $0x188] sm:$0xff] }
 0x495   : > { %3186 = vrot.lane.b32.xlu0 %v8770_v29, %s11279_s16 }
 0x496   : > { %3182 = vrot.lane.b32.xlu1 %v8744_v8, %s11279_s16  ;;  %3178 = vrot.lane.b32.xlu2 %v8717_v3, %s11279_s16 }
 0x497   : > { %v2843_v57 = vpop.permute.xlu1 %2842  ;;  %v2847_v2 = vpop.permute.xlu0 %2846 }
 0x498   : > { %2914 = vst.msk [vmem:[#allocation3 + $0x180] sm:$0xff] %vm766_vm2, %v2843_v57  ;;  %v2857_v42 = vpop.permute.xlu2 %2856 }
 0x499   : > { %2916 = vst.msk [vmem:[#allocation3 + $0x1a0] sm:$0xff] %vm766_vm2, %v2847_v2  ;;  %v9298_v2 = vld [vmem:[#allocation2 + $0x180] sm:$0xff] }
 0x49a   : > { %2921 = vst.msk [vmem:[#allocation3 + $0x1f0] sm:$0xff] %vm766_vm2, %v2857_v42 }
 0x49d   : > { %3192 = vrot.lane.b32.xlu0 %v8813_v6, %s11279_s16 }
 0x49e   : > { %3188 = vrot.lane.b32.xlu1 %v8782_v27, %s11279_s16  ;;  %3184 = vrot.lane.b32.xlu2 %v8756_v31, %s11279_s16 }
 0x49f   : > { %v2849_v8 = vpop.permute.xlu1 %2848  ;;  %v2853_v3 = vpop.permute.xlu0 %2852 }
 0x4a0   : > { %2917 = vst.msk [vmem:[#allocation3 + $0x1b0] sm:$0xff] %vm766_vm2, %v2849_v8  ;;  %v2991_v29 = vpop.permute.xlu2 %2990 }
 0x4a1   : > { %2919 = vst.msk [vmem:[#allocation3 + $0x1d0] sm:$0xff] %vm766_vm2, %v2853_v3 }
 0x4a2   : > { %3084 = vst.msk [vmem:[#allocation3 + $0x20] sm:$0xff] %vm959_vm3, %v2991_v29 }
 0x4a5   : > { %3198 = vrot.lane.b32.xlu0 %v8872_v0, %s11279_s16 }
 0x4a6   : > { %3194 = vrot.lane.b32.xlu1 %v8834_v44, %s11279_s16  ;;  %3190 = vrot.lane.b32.xlu2 %v8799_v35, %s11279_s16 }
 0x4a7   : > { %v2987_v31 = vpop.permute.xlu0 %2986 }
 0x4a8   : > { %v2855_v27 = vpop.permute.xlu1 %2854  ;;  %v2997_v6 = vpop.permute.xlu2 %2996  ;;  %3082 = vst.msk [vmem:[#allocation3] sm:$0xff] %vm959_vm3, %v2987_v31 }
 0x4a9   : > { %2920 = vst.msk [vmem:[#allocation3 + $0x1e0] sm:$0xff] %vm766_vm2, %v2855_v27  ;;  %v11280_v27 = vld [vmem:[#allocation9_spill] sm:$0xff] }
 0x4aa   : > { %3087 = vst.msk [vmem:[#allocation3 + $0x50] sm:$0xff] %vm959_vm3, %v2997_v6 }
 0x4ad   : > { %3204 = vrot.lane.b32.xlu0 %v8933_v40, %s11279_s16 }
 0x4ae   : > { %3200 = vrot.lane.b32.xlu1 %v8889_v18, %s11279_s16  ;;  %3196 = vrot.lane.b32.xlu2 %v8854_v58, %s11279_s16 }
 0x4af   : > { %v2993_v35 = vpop.permute.xlu0 %2992 }
 0x4b0   : > { %v2989_v44 = vpop.permute.xlu1 %2988  ;;  %v3003_v0 = vpop.permute.xlu2 %3002  ;;  %3085 = vst.msk [vmem:[#allocation3 + $0x30] sm:$0xff] %vm959_vm3, %v2993_v35  ;;  %v11284_v35 = vld [vmem:[#allocation8_spill] sm:$0xff] }
 0x4b1   : > { %3083 = vst.msk [vmem:[#allocation3 + $0x10] sm:$0xff] %vm959_vm3, %v2989_v44  ;;  %v11283_v44 = vld [vmem:[#allocation13_spill] sm:$0xff] }
 0x4b2   : > { %3090 = vst.msk [vmem:[#allocation3 + $0x80] sm:$0xff] %vm959_vm3, %v3003_v0 }
 0x4b5   : > { %3210 = vrot.lane.b32.xlu0 %v8789_v38, %s11279_s16 }
 0x4b6   : > { %3206 = vrot.lane.b32.xlu1 %v8950_v22, %s11279_s16  ;;  %3202 = vrot.lane.b32.xlu2 %v8907_v46, %s11279_s16 }
 0x4b7   : > { %v2999_v18 = vpop.permute.xlu0 %2998 }
 0x4b8   : > { %v2995_v58 = vpop.permute.xlu1 %2994  ;;  %3088 = vst.msk [vmem:[#allocation3 + $0x60] sm:$0xff] %vm959_vm3, %v2999_v18  ;;  %v3009_v40 = vpop.permute.xlu2 %3008 }
 0x4b9   : > { %3086 = vst.msk [vmem:[#allocation3 + $0x40] sm:$0xff] %vm959_vm3, %v2995_v58 }
 0x4ba   : > { %3093 = vst.msk [vmem:[#allocation3 + $0xb0] sm:$0xff] %vm959_vm3, %v3009_v40  ;;  %v9386_v40 = vld [vmem:[#allocation2 + $0x181] sm:$0xff] }
 0x4bd   : > { %3216 = vrot.lane.b32.xlu0 %v8857_v32, %s11279_s16 }
 0x4be   : > { %3212 = vrot.lane.b32.xlu1 %v8819_v19, %s11279_s16  ;;  %3208 = vrot.lane.b32.xlu2 %v8957_v21, %s11279_s16 }
 0x4bf   : > { %v3005_v38 = vpop.permute.xlu0 %3004 }
 0x4c0   : > { %v3001_v22 = vpop.permute.xlu1 %3000  ;;  %3091 = vst.msk [vmem:[#allocation3 + $0x90] sm:$0xff] %vm959_vm3, %v3005_v38  ;;  %v3015_v48 = vpop.permute.xlu2 %3014 }
 0x4c1   : > { %3089 = vst.msk [vmem:[#allocation3 + $0x70] sm:$0xff] %vm959_vm3, %v3001_v22 }
 0x4c2   : > { %3096 = vst.msk [vmem:[#allocation3 + $0xe0] sm:$0xff] %vm959_vm3, %v3015_v48 }
 0x4c5   : > { %3222 = vrot.lane.b32.xlu0 %v8912_v37, %s11279_s16 }
 0x4c6   : > { %3218 = vrot.lane.b32.xlu1 %v8875_v55, %s11279_s16  ;;  %3214 = vrot.lane.b32.xlu2 %v8837_v26, %s11279_s16 }
 0x4c7   : > { %v3011_v19 = vpop.permute.xlu0 %3010 }
 0x4c8   : > { %v3007_v32 = vpop.permute.xlu1 %3006  ;;  %3094 = vst.msk [vmem:[#allocation3 + $0xc0] sm:$0xff] %vm959_vm3, %v3011_v19  ;;  %v3021_v42 = vpop.permute.xlu2 %3020  ;;  %v9401_v19 = vld [vmem:[#allocation2 + $0x189] sm:$0xff] }
 0x4c9   : > { %3092 = vst.msk [vmem:[#allocation3 + $0xa0] sm:$0xff] %vm959_vm3, %v3007_v32 }
 0x4ca   : > { %3099 = vst.msk [vmem:[#allocation3 + $0x110] sm:$0xff] %vm959_vm3, %v3021_v42 }
 0x4cd   : > { %3228 = vrot.lane.b32.xlu0 %v8983_v4, %s11279_s16 }
 0x4ce   : > { %3224 = vrot.lane.b32.xlu1 %v8935_v62, %s11279_s16  ;;  %3220 = vrot.lane.b32.xlu2 %v8895_v56, %s11279_s16 }
 0x4cf   : > { %v3017_v55 = vpop.permute.xlu0 %3016 }
 0x4d0   : > { %v3013_v26 = vpop.permute.xlu1 %3012  ;;  %3097 = vst.msk [vmem:[#allocation3 + $0xf0] sm:$0xff] %vm959_vm3, %v3017_v55  ;;  %v3027_v37 = vpop.permute.xlu2 %3026 }
 0x4d1   : > { %3095 = vst.msk [vmem:[#allocation3 + $0xd0] sm:$0xff] %vm959_vm3, %v3013_v26  ;;  %v11288_v26 = vld [vmem:[#allocation12_spill] sm:$0xff] }
 0x4d2   : > { %3102 = vst.msk [vmem:[#allocation3 + $0x140] sm:$0xff] %vm959_vm3, %v3027_v37 }
 0x4d5   : > { %3234 = vrot.lane.b32.xlu0 %v9034_v60, %s11279_s16 }
 0x4d6   : > { %3230 = vrot.lane.b32.xlu1 %v8996_v16, %s11279_s16  ;;  %3226 = vrot.lane.b32.xlu2 %v8963_v43, %s11279_s16 }
 0x4d7   : > { %v3023_v62 = vpop.permute.xlu0 %3022 }
 0x4d8   : > { %v3019_v4 = vpop.permute.xlu1 %3018  ;;  %3100 = vst.msk [vmem:[#allocation3 + $0x120] sm:$0xff] %vm959_vm3, %v3023_v62  ;;  %v3033_v11 = vpop.permute.xlu2 %3032 }
 0x4d9   : > { %3098 = vst.msk [vmem:[#allocation3 + $0x100] sm:$0xff] %vm959_vm3, %v3019_v4 }
 0x4da   : > { %3105 = vst.msk [vmem:[#allocation3 + $0x170] sm:$0xff] %vm959_vm3, %v3033_v11  ;;  %v11289_v11 = vld [vmem:[#allocation25_spill] sm:$0xff] }
 0x4dd   : > { %3240 = vrot.lane.b32.xlu0 %v9283_v39, %s11279_s16 }
 0x4de   : > { %3236 = vrot.lane.b32.xlu1 %v9057_v13, %s11279_s16  ;;  %3232 = vrot.lane.b32.xlu2 %v9023_v33, %s11279_s16 }
 0x4df   : > { %v3029_v60 = vpop.permute.xlu0 %3028 }
 0x4e0   : > { %v3025_v16 = vpop.permute.xlu1 %3024  ;;  %3103 = vst.msk [vmem:[#allocation3 + $0x150] sm:$0xff] %vm959_vm3, %v3029_v60  ;;  %v3039_v57 = vpop.permute.xlu2 %3038  ;;  %v11291_v60 = vld [vmem:[#allocation17_spill] sm:$0xff] }
 0x4e1   : > { %3101 = vst.msk [vmem:[#allocation3 + $0x130] sm:$0xff] %vm959_vm3, %v3025_v16 }
 0x4e2   : > { %3108 = vst.msk [vmem:[#allocation3 + $0x1a0] sm:$0xff] %vm959_vm3, %v3039_v57 }
 0x4e5   : > { %3374 = vrot.lane.b32.xlu0 %v8742_v59, %s11173_s17 }
 0x4e6   : > { %3370 = vrot.lane.b32.xlu1 %v8715_v17, %s11173_s17  ;;  %3238 = vrot.lane.b32.xlu2 %v9298_v2, %s11279_s16 }
 0x4e7   : > { %v3035_v13 = vpop.permute.xlu0 %3034 }
 0x4e8   : > { %v3031_v8 = vpop.permute.xlu1 %3030  ;;  %3106 = vst.msk [vmem:[#allocation3 + $0x180] sm:$0xff] %vm959_vm3, %v3035_v13  ;;  %v3045_v3 = vpop.permute.xlu2 %3044 }
 0x4e9   : > { %3104 = vst.msk [vmem:[#allocation3 + $0x160] sm:$0xff] %vm959_vm3, %v3031_v8  ;;  %v11292_v8 = vld [vmem:[#allocation28_spill] sm:$0xff] }
 0x4ea   : > { %3111 = vst.msk [vmem:[#allocation3 + $0x1d0] sm:$0xff] %vm959_vm3, %v3045_v3  ;;  %v11293_v3 = vld [vmem:[#allocation15_spill] sm:$0xff] }
 0x4ed   : > { %3380 = vrot.lane.b32.xlu0 %v8780_v30, %s11173_s17 }
 0x4ee   : > { %3376 = vrot.lane.b32.xlu1 %v8754_v28, %s11173_s17  ;;  %3372 = vrot.lane.b32.xlu2 %v8729_v49, %s11173_s17 }
 0x4ef   : > { %v3041_v17 = vpop.permute.xlu0 %3040 }
 0x4f0   : > { %v3037_v59 = vpop.permute.xlu1 %3036  ;;  %3109 = vst.msk [vmem:[#allocation3 + $0x1b0] sm:$0xff] %vm959_vm3, %v3041_v17  ;;  %v3179_v29 = vpop.permute.xlu2 %3178  ;;  %v11294_v17 = vld [vmem:[#allocation22_spill] sm:$0xff] }
 0x4f1   : > { %3107 = vst.msk [vmem:[#allocation3 + $0x190] sm:$0xff] %vm959_vm3, %v3037_v59 }
 0x4f2   : > { %3274 = vst.msk [vmem:[#allocation3] sm:$0xff] %vm1152_vm4, %v3179_v29 }
 0x4f5   : > { %3386 = vrot.lane.b32.xlu0 %v8829_v24, %s11173_s17 }
 0x4f6   : > { %3382 = vrot.lane.b32.xlu1 %v8797_v54, %s11173_s17  ;;  %3378 = vrot.lane.b32.xlu2 %v8768_v1, %s11173_s17 }
 0x4f7   : > { %v3047_v28 = vpop.permute.xlu0 %3046 }
 0x4f8   : > { %v3043_v49 = vpop.permute.xlu1 %3042  ;;  %3112 = vst.msk [vmem:[#allocation3 + $0x1e0] sm:$0xff] %vm959_vm3, %v3047_v28  ;;  %v3185_v30 = vpop.permute.xlu2 %3184 }
 0x4f9   : > { %3110 = vst.msk [vmem:[#allocation3 + $0x1c0] sm:$0xff] %vm959_vm3, %v3043_v49  ;;  %v11295_v49 = vld [vmem:[#allocation31_spill] sm:$0xff] }
 0x4fa   : > { %3277 = vst.msk [vmem:[#allocation3 + $0x30] sm:$0xff] %vm1152_vm4, %v3185_v30  ;;  %v11296_v30 = vld [vmem:[#allocation20_spill] sm:$0xff] }
 0x4fd   : > { %3392 = vrot.lane.b32.xlu0 %v8887_v52, %s11173_s17 }
 0x4fe   : > { %3388 = vrot.lane.b32.xlu1 %v8849_v15, %s11173_s17  ;;  %3384 = vrot.lane.b32.xlu2 %v8811_v9, %s11173_s17 }
 0x4ff   : > { %v3181_v54 = vpop.permute.xlu0 %3180 }
 0x500   : > { %v3049_v1 = vpop.permute.xlu1 %3048  ;;  %3275 = vst.msk [vmem:[#allocation3 + $0x10] sm:$0xff] %vm1152_vm4, %v3181_v54  ;;  %v3191_v24 = vpop.permute.xlu2 %3190  ;;  %v11297_v54 = vld [vmem:[#allocation18_spill] sm:$0xff] }
 0x501   : > { %3113 = vst.msk [vmem:[#allocation3 + $0x1f0] sm:$0xff] %vm959_vm3, %v3049_v1 }
 0x502   : > { %3280 = vst.msk [vmem:[#allocation3 + $0x60] sm:$0xff] %vm1152_vm4, %v3191_v24 }
 0x505   : > { %3398 = vrot.lane.b32.xlu0 %v8948_v34, %s11173_s17 }
 0x506   : > { %3394 = vrot.lane.b32.xlu1 %v8905_v41, %s11173_s17  ;;  %3390 = vrot.lane.b32.xlu2 %v8867_v25, %s11173_s17 }
 0x507   : > { %v3187_v15 = vpop.permute.xlu0 %3186 }
 0x508   : > { %v3183_v9 = vpop.permute.xlu1 %3182  ;;  %3278 = vst.msk [vmem:[#allocation3 + $0x40] sm:$0xff] %vm1152_vm4, %v3187_v15  ;;  %v3197_v52 = vpop.permute.xlu2 %3196 }
 0x509   : > { %3276 = vst.msk [vmem:[#allocation3 + $0x20] sm:$0xff] %vm1152_vm4, %v3183_v9  ;;  %v11298_v9 = vld [vmem:[#allocation34_spill] sm:$0xff] }
 0x50a   : > { %3283 = vst.msk [vmem:[#allocation3 + $0x90] sm:$0xff] %vm1152_vm4, %v3197_v52  ;;  %v11299_v52 = vld [vmem:[#allocation23_spill] sm:$0xff] }
 0x50d   : > { %3404 = vrot.lane.b32.xlu0 %v8981_v12, %s11173_s17 }
 0x50e   : > { %3400 = vrot.lane.b32.xlu1 %v8925_v10, %s11173_s17  ;;  %3396 = vrot.lane.b32.xlu2 %v8923_v53, %s11173_s17 }
 0x50f   : > { %v3193_v41 = vpop.permute.xlu0 %3192 }
 0x510   : > { %v3189_v25 = vpop.permute.xlu1 %3188  ;;  %3281 = vst.msk [vmem:[#allocation3 + $0x70] sm:$0xff] %vm1152_vm4, %v3193_v41  ;;  %v3203_v34 = vpop.permute.xlu2 %3202  ;;  %v11300_v41 = vld [vmem:[#allocation21_spill] sm:$0xff] }
 0x511   : > { %3279 = vst.msk [vmem:[#allocation3 + $0x50] sm:$0xff] %vm1152_vm4, %v3189_v25 }
 0x512   : > { %3286 = vst.msk [vmem:[#allocation3 + $0xc0] sm:$0xff] %vm1152_vm4, %v3203_v34 }
 0x515   : > { %3410 = vrot.lane.b32.xlu0 %v9003_v36, %s11173_s17 }
 0x516   : > { %3406 = vrot.lane.b32.xlu1 %v8946_v50, %s11173_s17  ;;  %3402 = vrot.lane.b32.xlu2 %v8944_v20, %s11173_s17 }
 0x517   : > { %v3199_v10 = vpop.permute.xlu0 %3198 }
 0x518   : > { %v3195_v53 = vpop.permute.xlu1 %3194  ;;  %3284 = vst.msk [vmem:[#allocation3 + $0xa0] sm:$0xff] %vm1152_vm4, %v3199_v10  ;;  %v3209_v12 = vpop.permute.xlu2 %3208 }
 0x519   : > { %3282 = vst.msk [vmem:[#allocation3 + $0x80] sm:$0xff] %vm1152_vm4, %v3195_v53  ;;  %v11301_v53 = vld [vmem:[#allocation35_spill] sm:$0xff] }
 0x51a   : > { %3289 = vst.msk [vmem:[#allocation3 + $0xf0] sm:$0xff] %vm1152_vm4, %v3209_v12  ;;  %v11302_v12 = vld [vmem:[#allocation26_spill] sm:$0xff] }
 0x51d   : > { %3416 = vrot.lane.b32.xlu0 %v9021_v14, %s11173_s17  ;;  %v11281_v14 = vld [vmem:[#allocation10_spill] sm:$0xff] }
 0x51e   : > { %3412 = vrot.lane.b32.xlu1 %v8974_v23, %s11173_s17  ;;  %3408 = vrot.lane.b32.xlu2 %v8972_v5, %s11173_s17  ;;  %v11282_v23 = vld [vmem:[#allocation7_spill] sm:$0xff] }
 0x51f   : > { %v3205_v50 = vpop.permute.xlu0 %3204 }
 0x520   : > { %v3201_v20 = vpop.permute.xlu1 %3200  ;;  %3287 = vst.msk [vmem:[#allocation3 + $0xd0] sm:$0xff] %vm1152_vm4, %v3205_v50  ;;  %v3215_v36 = vpop.permute.xlu2 %3214  ;;  %v11303_v50 = vld [vmem:[#allocation24_spill] sm:$0xff] }
 0x521   : > { %3285 = vst.msk [vmem:[#allocation3 + $0xb0] sm:$0xff] %vm1152_vm4, %v3201_v20 }
 0x522   : > { %3292 = vst.msk [vmem:[#allocation3 + $0x120] sm:$0xff] %vm1152_vm4, %v3215_v36 }
 0x525   : > { %3422 = vrot.lane.b32.xlu0 %v11280_v27, %s11173_s17 }
 0x526   : > { %3418 = vrot.lane.b32.xlu1 %v11281_v14, %s11173_s17  ;;  %3414 = vrot.lane.b32.xlu2 %v11282_v23, %s11173_s17  ;;  %v2653_v14 = vld [vmem:[%s9463_s22 + $0x78] sm:$0xff]  ;;  %v2652_v23 = vld [vmem:[%s9463_s22 + $0x70] sm:$0xff] }
 0x527   : > { %v3211_v31 = vpop.permute.xlu0 %3210  ;;  %4461 = vmatpush.msra.mxu2 %v2653_v14 }
 0x528   : > { %v3207_v5 = vpop.permute.xlu1 %3206  ;;  %3290 = vst.msk [vmem:[#allocation3 + $0x100] sm:$0xff] %vm1152_vm4, %v3211_v31  ;;  %v3221_v6 = vpop.permute.xlu2 %3220  ;;  %v11304_v31 = vld [vmem:[#allocation29_spill] sm:$0xff] }
 0x529   : > { %3288 = vst.msk [vmem:[#allocation3 + $0xe0] sm:$0xff] %vm1152_vm4, %v3207_v5  ;;  %v2651_v5 = vld [vmem:[%s9463_s22 + $0x68] sm:$0xff]  ;;  %4462 = vmatpush.msra.mxu2 %v2652_v23  ;;  %v3731_v23 = vld [vmem:[#allocation2 + $0x98] sm:$0xff] }
 0x52a   : > { %3295 = vst.msk [vmem:[#allocation3 + $0x150] sm:$0xff] %vm1152_vm4, %v3221_v6  ;;  %v11305_v6 = vld [vmem:[#allocation27_spill] sm:$0xff] }
 0x52b   : > { %4463 = vmatpush.msra.mxu2 %v2651_v5 }
 0x52d   : > { %3428 = vrot.lane.b32.xlu0 %v9051_v63, %s11173_s17  ;;  %v11285_v63 = vld [vmem:[#allocation11_spill] sm:$0xff] }
 0x52e   : > { %3424 = vrot.lane.b32.xlu1 %v11283_v44, %s11173_s17  ;;  %3420 = vrot.lane.b32.xlu2 %v11284_v35, %s11173_s17 }
 0x52f   : > { %v3217_v0 = vpop.permute.xlu0 %3216 }
 0x530   : > { %v3213_v18 = vpop.permute.xlu1 %3212  ;;  %3293 = vst.msk [vmem:[#allocation3 + $0x130] sm:$0xff] %vm1152_vm4, %v3217_v0  ;;  %v3227_v58 = vpop.permute.xlu2 %3226  ;;  %v2650_v0 = vld [vmem:[%s9463_s22 + $0x60] sm:$0xff] }
 0x531   : > { %3291 = vst.msk [vmem:[#allocation3 + $0x110] sm:$0xff] %vm1152_vm4, %v3213_v18  ;;  %4464 = vmatpush.msra.mxu2 %v2650_v0  ;;  %v3736_v0 = vld [vmem:[#allocation2 + $0xd8] sm:$0xff] }
 0x532   : > { %3298 = vst.msk [vmem:[#allocation3 + $0x180] sm:$0xff] %vm1152_vm4, %v3227_v58  ;;  %v2648_v58 = vld [vmem:[%s9463_s22 + $0x50] sm:$0xff] }
 0x535   : > { %3562 = vrot.lane.b32.xlu0 %v9075_v47, %s7313_s20  ;;  %v11286_v47 = vld [vmem:[#allocation16_spill] sm:$0xff] }
 0x536   : > { %3430 = vrot.lane.b32.xlu1 %v9386_v40, %s11173_s17  ;;  %3426 = vrot.lane.b32.xlu2 %v11285_v63, %s11173_s17  ;;  %v11306_v63 = vld [vmem:[#allocation32_spill] sm:$0xff] }
 0x537   : > { %v3223_v38 = vpop.permute.xlu0 %3222 }
 0x538   : > { %v3219_v22 = vpop.permute.xlu1 %3218  ;;  %3296 = vst.msk [vmem:[#allocation3 + $0x160] sm:$0xff] %vm1152_vm4, %v3223_v38  ;;  %v3233_v48 = vpop.permute.xlu2 %3232  ;;  %v2647_v38 = vld [vmem:[%s9463_s22 + $0x48] sm:$0xff] }
 0x539   : > { %3294 = vst.msk [vmem:[#allocation3 + $0x140] sm:$0xff] %vm1152_vm4, %v3219_v22  ;;  %v11307_v22 = vld [vmem:[#allocation30_spill] sm:$0xff] }
 0x53a   : > { %3301 = vst.msk [vmem:[#allocation3 + $0x1b0] sm:$0xff] %vm1152_vm4, %v3233_v48 }
 0x53d   : > { %3568 = vrot.lane.b32.xlu0 %v9088_v45, %s7313_s20  ;;  %v11287_v45 = vld [vmem:[#allocation14_spill] sm:$0xff] }
 0x53e   : > { %3564 = vrot.lane.b32.xlu1 %v11286_v47, %s7313_s20  ;;  %3432 = vrot.lane.b32.xlu2 %v9401_v19, %s11173_s17  ;;  %s11311_s17 = smov 64  }
 0x53f   : > { %v3229_v32 = vpop.permute.xlu0 %3228 }
 0x540   : > { %v3225_v42 = vpop.permute.xlu1 %3224  ;;  %3299 = vst.msk [vmem:[#allocation3 + $0x190] sm:$0xff] %vm1152_vm4, %v3229_v32  ;;  %v3239_v55 = vpop.permute.xlu2 %3238  ;;  %v2646_v32 = vld [vmem:[%s9463_s22 + $0x40] sm:$0xff] }
 0x541   : > { %3297 = vst.msk [vmem:[#allocation3 + $0x170] sm:$0xff] %vm1152_vm4, %v3225_v42 }
 0x542   : > { %3304 = vst.msk [vmem:[#allocation3 + $0x1e0] sm:$0xff] %vm1152_vm4, %v3239_v55  ;;  %v2644_v55 = vld [vmem:[%s9463_s22 + $0x30] sm:$0xff] }
 0x545   : > { %3574 = vrot.lane.b32.xlu0 %v9101_v7, %s7313_s20  ;;  %v11290_v7 = vld [vmem:[#allocation19_spill] sm:$0xff] }
 0x546   : > { %3570 = vrot.lane.b32.xlu1 %v11287_v45, %s7313_s20  ;;  %3566 = vrot.lane.b32.xlu2 %v11288_v26, %s7313_s20  ;;  %v3528_v45 = vld [vmem:[#allocation2 + $0x182] sm:$0xff] }
 0x547   : > { %v3235_v37 = vpop.permute.xlu0 %3234  ;;  %v11308_v26 = vld [vmem:[#allocation33_spill] sm:$0xff] }
 0x548   : > { %v3231_v62 = vpop.permute.xlu1 %3230  ;;  %3302 = vst.msk [vmem:[#allocation3 + $0x1c0] sm:$0xff] %vm1152_vm4, %v3235_v37  ;;  %v3373_v4 = vpop.permute.xlu2 %3372  ;;  %v2643_v37 = vld [vmem:[%s9463_s22 + $0x28] sm:$0xff] }
 0x549   : > { %3300 = vst.msk [vmem:[#allocation3 + $0x1a0] sm:$0xff] %vm1152_vm4, %v3231_v62  ;;  %v11309_v62 = vld [vmem:[#allocation36_spill] sm:$0xff] }
 0x54a   : > { %3467 = vst.msk [vmem:[#allocation3 + $0x10] sm:$0xff] %vm1345_vm5, %v3373_v4 }
 0x54d   : > { %3580 = vrot.lane.b32.xlu0 %v11289_v11, %s7313_s20 }
 0x54e   : > { %3576 = vrot.lane.b32.xlu1 %v11290_v7, %s7313_s20  ;;  %3572 = vrot.lane.b32.xlu2 %v11291_v60, %s7313_s20  ;;  %v2642_v7 = vld [vmem:[%s9463_s22 + $0x20] sm:$0xff] }
 0x54f   : > { %v3241_v16 = vpop.permute.xlu0 %3240 }
 0x550   : > { %v3237_v57 = vpop.permute.xlu1 %3236  ;;  %3305 = vst.msk [vmem:[#allocation3 + $0x1f0] sm:$0xff] %vm1152_vm4, %v3241_v16  ;;  %v3379_v13 = vpop.permute.xlu2 %3378  ;;  %v3723_v16 = vld [vmem:[#allocation2 + $0x38] sm:$0xff] }
 0x551   : > { %3303 = vst.msk [vmem:[#allocation3 + $0x1d0] sm:$0xff] %vm1152_vm4, %v3237_v57  ;;  %v3529_v57 = vld [vmem:[#allocation2 + $0x18a] sm:$0xff] }
 0x552   : > { %3470 = vst.msk [vmem:[#allocation3 + $0x40] sm:$0xff] %vm1345_vm5, %v3379_v13  ;;  %v2641_v13 = vld [vmem:[%s9463_s22 + $0x18] sm:$0xff] }
 0x555   : > { %3586 = vrot.lane.b32.xlu0 %v11292_v8, %s7313_s20  ;;  %v2640_v8 = vld [vmem:[%s9463_s22 + $0x10] sm:$0xff] }
 0x556   : > { %3582 = vrot.lane.b32.xlu1 %v11293_v3, %s7313_s20  ;;  %3578 = vrot.lane.b32.xlu2 %v11294_v17, %s7313_s20  ;;  %v11310_v3 = vld [vmem:[#allocation37_spill] sm:$0xff] }
 0x557   : > { %v3375_v59 = vpop.permute.xlu0 %3374 }
 0x558   : > { %v3371_v29 = vpop.permute.xlu1 %3370  ;;  %3468 = vst.msk [vmem:[#allocation3 + $0x20] sm:$0xff] %vm1345_vm5, %v3375_v59  ;;  %v3385_v28 = vpop.permute.xlu2 %3384 }
 0x559   : > { %3466 = vst.msk [vmem:[#allocation3] sm:$0xff] %vm1345_vm5, %v3371_v29  ;;  %v2639_v29 = vld [vmem:[%s9463_s22 + $0x8] sm:$0xff] }
 0x55a   : > { %3473 = vst.msk [vmem:[#allocation3 + $0x70] sm:$0xff] %vm1345_vm5, %v3385_v28 }
 0x55d   : > { %3592 = vrot.lane.b32.xlu0 %v11295_v49, %s7313_s20  ;;  %v2638_v49 = vld [vmem:[%s9463_s22] sm:$0xff] }
 0x55e   : > { %3588 = vrot.lane.b32.xlu1 %v11296_v30, %s7313_s20  ;;  %3584 = vrot.lane.b32.xlu2 %v11297_v54, %s7313_s20  ;;  %v3726_v30 = vld [vmem:[#allocation2 + $0x60] sm:$0xff]  ;;  %v3724_v54 = vld [vmem:[#allocation2 + $0x48] sm:$0xff] }
 0x55f   : > { %v3381_v1 = vpop.permute.xlu0 %3380 }
 0x560   : > { %v3377_v24 = vpop.permute.xlu1 %3376  ;;  %3471 = vst.msk [vmem:[#allocation3 + $0x50] sm:$0xff] %vm1345_vm5, %v3381_v1  ;;  %v3391_v15 = vpop.permute.xlu2 %3390  ;;  %v3722_v1 = vld [vmem:[#allocation2 + $0x30] sm:$0xff] }
 0x561   : > { %3469 = vst.msk [vmem:[#allocation3 + $0x30] sm:$0xff] %vm1345_vm5, %v3377_v24  ;;  %v2664_v24 = vld [vmem:[%s9463_s22 + $0xd0] sm:$0xff] }
 0x562   : > { %3476 = vst.msk [vmem:[#allocation3 + $0xa0] sm:$0xff] %vm1345_vm5, %v3391_v15  ;;  %7115 = vmatpush.msra.mxu3 %v2664_v24 }
 0x565   : > { %3598 = vrot.lane.b32.xlu0 %v11298_v9, %s7313_s20 }
 0x566   : > { %3594 = vrot.lane.b32.xlu1 %v11299_v52, %s7313_s20  ;;  %3590 = vrot.lane.b32.xlu2 %v11300_v41, %s7313_s20  ;;  %v3729_v41 = vld [vmem:[#allocation2 + $0x80] sm:$0xff] }
 0x567   : > { %v3387_v25 = vpop.permute.xlu0 %3386 }
 0x568   : > { %v3383_v34 = vpop.permute.xlu1 %3382  ;;  %3474 = vst.msk [vmem:[#allocation3 + $0x80] sm:$0xff] %vm1345_vm5, %v3387_v25  ;;  %v3397_v10 = vpop.permute.xlu2 %3396  ;;  %v3727_v25 = vld [vmem:[#allocation2 + $0x68] sm:$0xff] }
 0x569   : > { %3472 = vst.msk [vmem:[#allocation3 + $0x60] sm:$0xff] %vm1345_vm5, %v3383_v34  ;;  %v3725_v34 = vld [vmem:[#allocation2 + $0x50] sm:$0xff] }
 0x56a   : > { %3479 = vst.msk [vmem:[#allocation3 + $0xd0] sm:$0xff] %vm1345_vm5, %v3397_v10 }
 0x56d   : > { %3604 = vrot.lane.b32.xlu0 %v11301_v53, %s7313_s20 }
 0x56e   : > { %3600 = vrot.lane.b32.xlu1 %v11302_v12, %s7313_s20  ;;  %3596 = vrot.lane.b32.xlu2 %v11303_v50, %s7313_s20  ;;  %v3730_v50 = vld [vmem:[#allocation2 + $0x90] sm:$0xff] }
 0x56f   : > { %v3393_v20 = vpop.permute.xlu0 %3392 }
 0x570   : > { %v3389_v36 = vpop.permute.xlu1 %3388  ;;  %3477 = vst.msk [vmem:[#allocation3 + $0xb0] sm:$0xff] %vm1345_vm5, %v3393_v20  ;;  %v3403_v27 = vpop.permute.xlu2 %3402  ;;  %v3728_v20 = vld [vmem:[#allocation2 + $0x78] sm:$0xff] }
 0x571   : > { %3475 = vst.msk [vmem:[#allocation3 + $0x90] sm:$0xff] %vm1345_vm5, %v3389_v36 }
 0x572   : > { %3482 = vst.msk [vmem:[#allocation3 + $0x100] sm:$0xff] %vm1345_vm5, %v3403_v27 }
 0x575   : > { %3610 = vrot.lane.b32.xlu0 %v9182_v51, %s7313_s20  ;;  %v2649_v51 = vld [vmem:[%s9463_s22 + $0x58] sm:$0xff] }
 0x576   : > { %3606 = vrot.lane.b32.xlu1 %v11304_v31, %s7313_s20  ;;  %3602 = vrot.lane.b32.xlu2 %v11305_v6, %s7313_s20  ;;  %v2663_v31 = vld [vmem:[%s9463_s22 + $0xc8] sm:$0xff] }
 0x577   : > { %v3399_v44 = vpop.permute.xlu0 %3398  ;;  %4465 = vmatpush.msra.mxu2 %v2649_v51  ;;  %7116 = vmatpush.msra.mxu3 %v2663_v31 }
 0x578   : > { %v3395_v35 = vpop.permute.xlu1 %3394  ;;  %3480 = vst.msk [vmem:[#allocation3 + $0xe0] sm:$0xff] %vm1345_vm5, %v3399_v44  ;;  %v3409_v18 = vpop.permute.xlu2 %3408 }
 0x579   : > { %3478 = vst.msk [vmem:[#allocation3 + $0xc0] sm:$0xff] %vm1345_vm5, %v3395_v35  ;;  %4466 = vmatpush.msra.mxu2 %v2648_v58 }
 0x57a   : > { %3485 = vst.msk [vmem:[#allocation3 + $0x130] sm:$0xff] %vm1345_vm5, %v3409_v18  ;;  %v3734_v18 = vld [vmem:[#allocation2 + $0xc0] sm:$0xff] }
 0x57b   : > { %4467 = vmatpush.msra.mxu2 %v2647_v38 }
 0x57d   : > { %3616 = vrot.lane.b32.xlu0 %v9195_v61, %s7313_s20  ;;  %4468 = vmatpush.msra.mxu2 %v2646_v32  ;;  %v2645_v61 = vld [vmem:[%s9463_s22 + $0x38] sm:$0xff] }
 0x57e   : > { %3612 = vrot.lane.b32.xlu1 %v11306_v63, %s7313_s20  ;;  %3608 = vrot.lane.b32.xlu2 %v11307_v22, %s7313_s20  ;;  %v3739_v22 = vld [vmem:[#allocation2 + $0xf8] sm:$0xff] }
 0x57f   : > { %v3405_v48 = vpop.permute.xlu0 %3404  ;;  %4469 = vmatpush.msra.mxu2 %v2645_v61 }
 0x580   : > { %v3401_v47 = vpop.permute.xlu1 %3400  ;;  %3483 = vst.msk [vmem:[#allocation3 + $0x110] sm:$0xff] %vm1345_vm5, %v3405_v48  ;;  %v3415_v42 = vpop.permute.xlu2 %3414  ;;  %v3737_v48 = vld [vmem:[#allocation2 + $0xe0] sm:$0xff] }
 0x581   : > { %3481 = vst.msk [vmem:[#allocation3 + $0xf0] sm:$0xff] %vm1345_vm5, %v3401_v47  ;;  %4470 = vmatpush.msra.mxu2 %v2644_v55  ;;  %v2662_v47 = vld [vmem:[%s9463_s22 + $0xc0] sm:$0xff] }
 0x582   : > { %3488 = vst.msk [vmem:[#allocation3 + $0x160] sm:$0xff] %vm1345_vm5, %v3415_v42  ;;  %7117 = vmatpush.msra.mxu3 %v2662_v47 }
 0x583   : > { %4471 = vmatpush.msra.mxu2 %v2643_v37 }
 0x585   : > { %3622 = vrot.lane.b32.xlu0 %v3528_v45, %s7313_s20  ;;  %4472 = vmatpush.msra.mxu2 %v2642_v7  ;;  %v3740_v45 = vld [vmem:[#allocation2 + $0x108] sm:$0xff] }
 0x586   : > { %3618 = vrot.lane.b32.xlu1 %v11308_v26, %s7313_s20  ;;  %3614 = vrot.lane.b32.xlu2 %v11309_v62, %s7313_s20 }
 0x587   : > { %v3411_v4 = vpop.permute.xlu0 %3410  ;;  %4473 = vmatpush.msra.mxu2 %v2641_v13  ;;  %v3746_v13 = vld [vmem:[#allocation2 + $0x150] sm:$0xff] }
 0x588   : > { %v3407_v11 = vpop.permute.xlu1 %3406  ;;  %3486 = vst.msk [vmem:[#allocation3 + $0x140] sm:$0xff] %vm1345_vm5, %v3411_v4  ;;  %v3421_v60 = vpop.permute.xlu2 %3420 }
 0x589   : > { %3484 = vst.msk [vmem:[#allocation3 + $0x120] sm:$0xff] %vm1345_vm5, %v3407_v11  ;;  %4474 = vmatpush.msra.mxu2 %v2640_v8  ;;  %v3743_v11 = vld [vmem:[#allocation2 + $0x128] sm:$0xff]  ;;  %v2661_v8 = vld [vmem:[%s9463_s22 + $0xb8] sm:$0xff] }
 0x58a   : > { %3491 = vst.msk [vmem:[#allocation3 + $0x190] sm:$0xff] %vm1345_vm5, %v3421_v60  ;;  %7118 = vmatpush.msra.mxu3 %v2661_v8 }
 0x58b   : > { %4475 = vmatpush.msra.mxu2 %v2639_v29 }
 0x58d   : > { %3788 = vrot.lane.b32.xlu0 %v3723_v16, %s7314_s10  ;;  %4476 = vmatpush.msra.mxu2 %v2638_v49 }
 0x58e   : > { %3624 = vrot.lane.b32.xlu1 %v3529_v57, %s7313_s20  ;;  %3620 = vrot.lane.b32.xlu2 %v11310_v3, %s7313_s20 }
 0x58f   : > { %v3417_v17 = vpop.permute.xlu0 %3416  ;;  %4579 = vmatpush.msrb.mxu2 %v2664_v24  ;;  %v3752_v24 = vld [vmem:[#allocation2 + $0x198] sm:$0xff] }
 0x590   : > { %v3413_v59 = vpop.permute.xlu1 %3412  ;;  %3489 = vst.msk [vmem:[#allocation3 + $0x170] sm:$0xff] %vm1345_vm5, %v3417_v17  ;;  %v3427_v28 = vpop.permute.xlu2 %3426 }
 0x591   : > { %3487 = vst.msk [vmem:[#allocation3 + $0x150] sm:$0xff] %vm1345_vm5, %v3413_v59  ;;  %4580 = vmatpush.msrb.mxu2 %v2663_v31 }
 0x592   : > { %3494 = vst.msk [vmem:[#allocation3 + $0x1c0] sm:$0xff] %vm1345_vm5, %v3427_v28  ;;  %v3749_v28 = vld [vmem:[#allocation2 + $0x170] sm:$0xff] }
 0x593   : > { %4581 = vmatpush.msrb.mxu2 %v2662_v47  ;;  %v3924_v47 = vld [vmem:[#allocation2 + $0xa9] sm:$0xff] }
 0x595   : > { %3794 = vrot.lane.b32.xlu0 %v3726_v30, %s7314_s10  ;;  %4582 = vmatpush.msrb.mxu2 %v2661_v8  ;;  %v3937_v8 = vld [vmem:[#allocation2 + $0x141] sm:$0xff] }
 0x596   : > { %3790 = vrot.lane.b32.xlu1 %v3724_v54, %s7314_s10  ;;  %3786 = vrot.lane.b32.xlu2 %v3722_v1, %s7314_s10 }
 0x597   : > { %v3423_v15 = vpop.permute.xlu0 %3422 }
 0x598   : > { %v3419_v9 = vpop.permute.xlu1 %3418  ;;  %3492 = vst.msk [vmem:[#allocation3 + $0x1a0] sm:$0xff] %vm1345_vm5, %v3423_v15  ;;  %v3433_v52 = vpop.permute.xlu2 %3432  ;;  %v3914_v15 = vld [vmem:[#allocation2 + $0x31] sm:$0xff] }
 0x599   : > { %3490 = vst.msk [vmem:[#allocation3 + $0x180] sm:$0xff] %vm1345_vm5, %v3419_v9 }
 0x59a   : > { %3497 = vst.msk [vmem:[#allocation3 + $0x1f0] sm:$0xff] %vm1345_vm5, %v3433_v52 }
 0x59d   : > { %3800 = vrot.lane.b32.xlu0 %v3729_v41, %s7314_s10 }
 0x59e   : > { %3796 = vrot.lane.b32.xlu1 %v3727_v25, %s7314_s10  ;;  %3792 = vrot.lane.b32.xlu2 %v3725_v34, %s7314_s10  ;;  %v3919_v34 = vld [vmem:[#allocation2 + $0x69] sm:$0xff] }
 0x59f   : > { %v3429_v10 = vpop.permute.xlu0 %3428 }
 0x5a0   : > { %v3425_v53 = vpop.permute.xlu1 %3424  ;;  %3495 = vst.msk [vmem:[#allocation3 + $0x1d0] sm:$0xff] %vm1345_vm5, %v3429_v10  ;;  %v3567_v12 = vpop.permute.xlu2 %3566  ;;  %v3917_v10 = vld [vmem:[#allocation2 + $0x51] sm:$0xff] }
 0x5a1   : > { %3493 = vst.msk [vmem:[#allocation3 + $0x1b0] sm:$0xff] %vm1345_vm5, %v3425_v53  ;;  %v3915_v53 = vld [vmem:[#allocation2 + $0x39] sm:$0xff] }
 0x5a2   : > { %3662 = vst.msk [vmem:[#allocation3 + $0x20] sm:$0xff] %vm1538_vm6, %v3567_v12 }
 0x5a3   : > { %3663 = vst.msk [vmem:[#allocation3 + $0x28] sm:$0xff] %vm1540_vm7, %v3567_v12  ;;  %v2660_v12 = vld [vmem:[%s9463_s22 + $0xb0] sm:$0xff] }
 0x5a4   : > { %4583 = vmatpush.msrb.mxu2 %v2660_v12  ;;  %7119 = vmatpush.msra.mxu3 %v2660_v12  ;;  %v3944_v12 = vld [vmem:[#allocation2 + $0x199] sm:$0xff] }
 0x5a5   : > { %3806 = vrot.lane.b32.xlu0 %v8907_v46, %s7314_s10  ;;  %v3733_v46 = vld [vmem:[#allocation2 + $0xb0] sm:$0xff] }
 0x5a6   : > { %3802 = vrot.lane.b32.xlu1 %v3730_v50, %s7314_s10  ;;  %3798 = vrot.lane.b32.xlu2 %v3728_v20, %s7314_s10 }
 0x5a7   : > { %v3563_v36 = vpop.permute.xlu0 %3562 }
 0x5a8   : > { %v3431_v27 = vpop.permute.xlu1 %3430  ;;  %3658 = vst.msk [vmem:[#allocation3] sm:$0xff] %vm1538_vm6, %v3563_v36  ;;  %v3573_v14 = vpop.permute.xlu2 %3572 }
 0x5a9   : > { %3659 = vst.msk [vmem:[#allocation3 + $0x8] sm:$0xff] %vm1540_vm7, %v3563_v36  ;;  %v4302_v55 = vld [vmem:[#allocation3 + $0x20] sm:$0xff] }
 0x5aa   : > { %3496 = vst.msk [vmem:[#allocation3 + $0x1e0] sm:$0xff] %vm1345_vm5, %v3431_v27 }
 0x5ab   : > { %3668 = vst.msk [vmem:[#allocation3 + $0x50] sm:$0xff] %vm1538_vm6, %v3573_v14 }
 0x5ac   : > { %3669 = vst.msk [vmem:[#allocation3 + $0x58] sm:$0xff] %vm1540_vm7, %v3573_v14  ;;  %v3922_v14 = vld [vmem:[#allocation2 + $0x91] sm:$0xff] }
 0x5ad   : > { %3812 = vrot.lane.b32.xlu0 %v8957_v21, %s7314_s10  ;;  %v3738_v21 = vld [vmem:[#allocation2 + $0xf0] sm:$0xff] }
 0x5ae   : > { %3808 = vrot.lane.b32.xlu1 %v3733_v46, %s7314_s10  ;;  %3804 = vrot.lane.b32.xlu2 %v3731_v23, %s7314_s10  ;;  %v3920_v46 = vld [vmem:[#allocation2 + $0x79] sm:$0xff]  ;;  %v3918_v23 = vld [vmem:[#allocation2 + $0x61] sm:$0xff] }
 0x5af   : > { %v3569_v5 = vpop.permute.xlu0 %3568  ;;  %v4298_v44 = vld [vmem:[#allocation3] sm:$0xff] }
 0x5b0   : > { %v3565_v6 = vpop.permute.xlu1 %3564  ;;  %3664 = vst.msk [vmem:[#allocation3 + $0x30] sm:$0xff] %vm1538_vm6, %v3569_v5  ;;  %v3579_v35 = vpop.permute.xlu2 %3578  ;;  %4477 = vmatmul.f32.vlgmr.msra.gmra.mxu2 %v4298_v44 }
 0x5b1   : > { %3665 = vst.msk [vmem:[#allocation3 + $0x38] sm:$0xff] %vm1540_vm7, %v3569_v5 }
 0x5b2   : > { %3660 = vst.msk [vmem:[#allocation3 + $0x10] sm:$0xff] %vm1538_vm6, %v3565_v6  ;;  %v4308_v29 = vld [vmem:[#allocation3 + $0x50] sm:$0xff] }
 0x5b3   : > { %3661 = vst.msk [vmem:[#allocation3 + $0x18] sm:$0xff] %vm1540_vm7, %v3565_v6 }
 0x5b4   : > { %3674 = vst.msk [vmem:[#allocation3 + $0x80] sm:$0xff] %vm1538_vm6, %v3579_v35 }
 0x5b5   : > { %3675 = vst.msk [vmem:[#allocation3 + $0x88] sm:$0xff] %vm1540_vm7, %v3579_v35  ;;  %3818 = vrot.lane.b32.xlu0 %v3738_v21, %s7314_s10  ;;  %v3925_v35 = vld [vmem:[#allocation2 + $0xb1] sm:$0xff]  ;;  %v3923_v21 = vld [vmem:[#allocation2 + $0x99] sm:$0xff] }
 0x5b6   : > { %3814 = vrot.lane.b32.xlu1 %v3736_v0, %s7314_s10  ;;  %3810 = vrot.lane.b32.xlu2 %v3734_v18, %s7314_s10  ;;  %v3921_v0 = vld [vmem:[#allocation2 + $0x81] sm:$0xff] }
 0x5b7   : > { %v3575_v51 = vpop.permute.xlu0 %3574  ;;  %v4304_v4 = vld [vmem:[#allocation3 + $0x30] sm:$0xff] }
 0x5b8   : > { %v3571_v58 = vpop.permute.xlu1 %3570  ;;  %3670 = vst.msk [vmem:[#allocation3 + $0x60] sm:$0xff] %vm1538_vm6, %v3575_v51  ;;  %v3585_v63 = vpop.permute.xlu2 %3584 }
 0x5b9   : > { %3671 = vst.msk [vmem:[#allocation3 + $0x68] sm:$0xff] %vm1540_vm7, %v3575_v51  ;;  %v4300_v38 = vld [vmem:[#allocation3 + $0x10] sm:$0xff] }
 0x5ba   : > { %3666 = vst.msk [vmem:[#allocation3 + $0x40] sm:$0xff] %vm1538_vm6, %v3571_v58  ;;  %4480 = vmatmul.f32.gmra.mxu2 %v4300_v38  ;;  %v2659_v38 = vld [vmem:[%s9463_s22 + $0xa8] sm:$0xff] }
 0x5bb   : > { %3667 = vst.msk [vmem:[#allocation3 + $0x48] sm:$0xff] %vm1540_vm7, %v3571_v58  ;;  %v4314_v27 = vld [vmem:[#allocation3 + $0x80] sm:$0xff]  ;;  %4584 = vmatpush.msrb.mxu2 %v2659_v38  ;;  %7120 = vmatpush.msra.mxu3 %v2659_v38 }
 0x5bc   : > { %3680 = vst.msk [vmem:[#allocation3 + $0xb0] sm:$0xff] %vm1538_vm6, %v3585_v63 }
 0x5bd   : > { %3681 = vst.msk [vmem:[#allocation3 + $0xb8] sm:$0xff] %vm1540_vm7, %v3585_v63  ;;  %3824 = vrot.lane.b32.xlu0 %v8895_v56, %s7314_s10  ;;  %v3742_v56 = vld [vmem:[#allocation2 + $0x120] sm:$0xff] }
 0x5be   : > { %3820 = vrot.lane.b32.xlu1 %v3739_v22, %s7314_s10  ;;  %3816 = vrot.lane.b32.xlu2 %v3737_v48, %s7314_s10  ;;  %v3928_v22 = vld [vmem:[#allocation2 + $0xd9] sm:$0xff]  ;;  %v3926_v48 = vld [vmem:[#allocation2 + $0xc1] sm:$0xff] }
 0x5bf   : > { %v3581_v32 = vpop.permute.xlu0 %3580  ;;  %v4310_v1 = vld [vmem:[#allocation3 + $0x60] sm:$0xff] }
 0x5c0   : > { %v3577_v42 = vpop.permute.xlu1 %3576  ;;  %3676 = vst.msk [vmem:[#allocation3 + $0x90] sm:$0xff] %vm1538_vm6, %v3581_v32  ;;  %v3591_v61 = vpop.permute.xlu2 %3590 }
 0x5c1   : > { %3677 = vst.msk [vmem:[#allocation3 + $0x98] sm:$0xff] %vm1540_vm7, %v3581_v32  ;;  %v4306_v57 = vld [vmem:[#allocation3 + $0x40] sm:$0xff] }
 0x5c2   : > { %3672 = vst.msk [vmem:[#allocation3 + $0x70] sm:$0xff] %vm1538_vm6, %v3577_v42  ;;  %4483 = vmatmul.f32.gmra.mxu2 %v4302_v55 }
 0x5c3   : > { %3673 = vst.msk [vmem:[#allocation3 + $0x78] sm:$0xff] %vm1540_vm7, %v3577_v42  ;;  %v4320_v55 = vld [vmem:[#allocation3 + $0xb0] sm:$0xff] }
 0x5c4   : > { %3686 = vst.msk [vmem:[#allocation3 + $0xe0] sm:$0xff] %vm1538_vm6, %v3591_v61 }
 0x5c5   : > { %3687 = vst.msk [vmem:[#allocation3 + $0xe8] sm:$0xff] %vm1540_vm7, %v3591_v61  ;;  %3830 = vrot.lane.b32.xlu0 %v8963_v43, %s7314_s10  ;;  %v3745_v43 = vld [vmem:[#allocation2 + $0x140] sm:$0xff] }
 0x5c6   : > { %3826 = vrot.lane.b32.xlu1 %v3742_v56, %s7314_s10  ;;  %3822 = vrot.lane.b32.xlu2 %v3740_v45, %s7314_s10  ;;  %v3931_v56 = vld [vmem:[#allocation2 + $0xf9] sm:$0xff]  ;;  %v3929_v45 = vld [vmem:[#allocation2 + $0xe1] sm:$0xff] }
 0x5c7   : > { %v3587_v26 = vpop.permute.xlu0 %3586  ;;  %v4316_v44 = vld [vmem:[#allocation3 + $0x90] sm:$0xff] }
 0x5c8   : > { %v3583_v37 = vpop.permute.xlu1 %3582  ;;  %3682 = vst.msk [vmem:[#allocation3 + $0xc0] sm:$0xff] %vm1538_vm6, %v3587_v26  ;;  %v3597_v62 = vpop.permute.xlu2 %3596 }
 0x5c9   : > { %3683 = vst.msk [vmem:[#allocation3 + $0xc8] sm:$0xff] %vm1540_vm7, %v3587_v26  ;;  %v4312_v25 = vld [vmem:[#allocation3 + $0x70] sm:$0xff]  ;;  %v3927_v26 = vld [vmem:[#allocation2 + $0xc9] sm:$0xff] }
 0x5ca   : > { %3678 = vst.msk [vmem:[#allocation3 + $0xa0] sm:$0xff] %vm1538_vm6, %v3583_v37  ;;  %4486 = vmatmul.f32.gmra.mxu2 %v4304_v4 }
 0x5cb   : > { %3679 = vst.msk [vmem:[#allocation3 + $0xa8] sm:$0xff] %vm1540_vm7, %v3583_v37 }
 0x5cc   : > { %3692 = vst.msk [vmem:[#allocation3 + $0x110] sm:$0xff] %vm1538_vm6, %v3597_v62 }
 0x5cd   : > { %3693 = vst.msk [vmem:[#allocation3 + $0x118] sm:$0xff] %vm1540_vm7, %v3597_v62  ;;  %3836 = vrot.lane.b32.xlu0 %v9023_v33, %s7314_s10  ;;  %v3748_v33 = vld [vmem:[#allocation2 + $0x168] sm:$0xff] }
 0x5ce   : > { %3832 = vrot.lane.b32.xlu1 %v3745_v43, %s7314_s10  ;;  %3828 = vrot.lane.b32.xlu2 %v3743_v11, %s7314_s10  ;;  %v3934_v11 = vld [vmem:[#allocation2 + $0x121] sm:$0xff] }
 0x5cf   : > { %v3593_v7 = vpop.permute.xlu0 %3592  ;;  %v4322_v43 = vld [vmem:[#allocation3 + $0xc0] sm:$0xff] }
 0x5d0   : > { %v3589_v60 = vpop.permute.xlu1 %3588  ;;  %3688 = vst.msk [vmem:[#allocation3 + $0xf0] sm:$0xff] %vm1538_vm6, %v3593_v7  ;;  %v3603_v16 = vpop.permute.xlu2 %3602 }
 0x5d1   : > { %3689 = vst.msk [vmem:[#allocation3 + $0xf8] sm:$0xff] %vm1540_vm7, %v3593_v7  ;;  %v4318_v63 = vld [vmem:[#allocation3 + $0xa0] sm:$0xff] }
 0x5d2   : > { %3684 = vst.msk [vmem:[#allocation3 + $0xd0] sm:$0xff] %vm1538_vm6, %v3589_v60  ;;  %4489 = vmatmul.f32.gmra.mxu2 %v4306_v57  ;;  %v3932_v7 = vld [vmem:[#allocation2 + $0x109] sm:$0xff] }
 0x5d3   : > { %3685 = vst.msk [vmem:[#allocation3 + $0xd8] sm:$0xff] %vm1540_vm7, %v3589_v60  ;;  %v3930_v60 = vld [vmem:[#allocation2 + $0xf1] sm:$0xff] }
 0x5d4   : > { %3698 = vst.msk [vmem:[#allocation3 + $0x140] sm:$0xff] %vm1538_vm6, %v3603_v16 }
 0x5d5   : > { %3699 = vst.msk [vmem:[#allocation3 + $0x148] sm:$0xff] %vm1540_vm7, %v3603_v16  ;;  %3842 = vrot.lane.b32.xlu0 %v9298_v2, %s7314_s10  ;;  %v3753_v2 = vld [vmem:[#allocation2 + $0x1a0] sm:$0xff] }
 0x5d6   : > { %3838 = vrot.lane.b32.xlu1 %v3748_v33, %s7314_s10  ;;  %3834 = vrot.lane.b32.xlu2 %v3746_v13, %s7314_s10 }
 0x5d7   : > { %v3599_v3 = vpop.permute.xlu0 %3598 }
 0x5d8   : > { %v3595_v17 = vpop.permute.xlu1 %3594  ;;  %3694 = vst.msk [vmem:[#allocation3 + $0x120] sm:$0xff] %vm1538_vm6, %v3599_v3  ;;  %v3609_v59 = vpop.permute.xlu2 %3608 }
 0x5d9   : > { %3695 = vst.msk [vmem:[#allocation3 + $0x128] sm:$0xff] %vm1540_vm7, %v3599_v3  ;;  %v4324_v13 = vld [vmem:[#allocation3 + $0xd0] sm:$0xff]  ;;  %v3935_v3 = vld [vmem:[#allocation2 + $0x129] sm:$0xff] }
 0x5da   : > { %3690 = vst.msk [vmem:[#allocation3 + $0x100] sm:$0xff] %vm1538_vm6, %v3595_v17  ;;  %4492 = vmatmul.f32.gmra.mxu2 %v4308_v29 }
 0x5db   : > { %3691 = vst.msk [vmem:[#allocation3 + $0x108] sm:$0xff] %vm1540_vm7, %v3595_v17  ;;  %v3933_v17 = vld [vmem:[#allocation2 + $0x111] sm:$0xff] }
 0x5dc   : > { %3704 = vst.msk [vmem:[#allocation3 + $0x170] sm:$0xff] %vm1538_vm6, %v3609_v59 }
 0x5dd   : > { %3705 = vst.msk [vmem:[#allocation3 + $0x178] sm:$0xff] %vm1540_vm7, %v3609_v59  ;;  %3848 = vrot.lane.b32.xlu0 %v3753_v2, %s7314_s10  ;;  %v2658_v59 = vld [vmem:[%s9463_s22 + $0xa0] sm:$0xff] }
 0x5de   : > { %3844 = vrot.lane.b32.xlu1 %v9283_v39, %s7314_s10  ;;  %3840 = vrot.lane.b32.xlu2 %v3749_v28, %s7314_s10  ;;  %v3916_v39 = vld [vmem:[#allocation2 + $0x49] sm:$0xff] }
 0x5df   : > { %v3605_v49 = vpop.permute.xlu0 %3604  ;;  %4585 = vmatpush.msrb.mxu2 %v2658_v59  ;;  %7121 = vmatpush.msra.mxu3 %v2658_v59 }
 0x5e0   : > { %v3601_v30 = vpop.permute.xlu1 %3600  ;;  %3700 = vst.msk [vmem:[#allocation3 + $0x150] sm:$0xff] %vm1538_vm6, %v3605_v49  ;;  %v3615_v54 = vpop.permute.xlu2 %3614 }
 0x5e1   : > { %3701 = vst.msk [vmem:[#allocation3 + $0x158] sm:$0xff] %vm1540_vm7, %v3605_v49  ;;  %v4326_v49 = vld [vmem:[#allocation3 + $0xe0] sm:$0xff] }
 0x5e2   : > { %3696 = vst.msk [vmem:[#allocation3 + $0x130] sm:$0xff] %vm1538_vm6, %v3601_v30  ;;  %4495 = vmatmul.f32.gmra.mxu2 %v4310_v1  ;;  %v3936_v1 = vld [vmem:[#allocation2 + $0x139] sm:$0xff] }
 0x5e3   : > { %3697 = vst.msk [vmem:[#allocation3 + $0x138] sm:$0xff] %vm1540_vm7, %v3601_v30  ;;  %v3940_v30 = vld [vmem:[#allocation2 + $0x169] sm:$0xff] }
 0x5e4   : > { %3710 = vst.msk [vmem:[#allocation3 + $0x1a0] sm:$0xff] %vm1538_vm6, %v3615_v54 }
 0x5e5   : > { %3711 = vst.msk [vmem:[#allocation3 + $0x1a8] sm:$0xff] %vm1540_vm7, %v3615_v54  ;;  %3982 = vrot.lane.b32.xlu0 %v3916_v39, %s11177_s21  ;;  %v3938_v54 = vld [vmem:[#allocation2 + $0x151] sm:$0xff] }
 0x5e6   : > { %3978 = vrot.lane.b32.xlu1 %v3914_v15, %s11177_s21  ;;  %3846 = vrot.lane.b32.xlu2 %v3752_v24, %s7314_s10 }
 0x5e7   : > { %v3611_v9 = vpop.permute.xlu0 %3610 }
 0x5e8   : > { %v3607_v52 = vpop.permute.xlu1 %3606  ;;  %3706 = vst.msk [vmem:[#allocation3 + $0x180] sm:$0xff] %vm1538_vm6, %v3611_v9  ;;  %v3621_v41 = vpop.permute.xlu2 %3620 }
 0x5e9   : > { %3707 = vst.msk [vmem:[#allocation3 + $0x188] sm:$0xff] %vm1540_vm7, %v3611_v9  ;;  %v4328_v9 = vld [vmem:[#allocation3 + $0xf0] sm:$0xff] }
 0x5ea   : > { %3702 = vst.msk [vmem:[#allocation3 + $0x160] sm:$0xff] %vm1538_vm6, %v3607_v52  ;;  %4498 = vmatmul.f32.gmra.mxu2 %v4312_v25 }
 0x5eb   : > { %3703 = vst.msk [vmem:[#allocation3 + $0x168] sm:$0xff] %vm1540_vm7, %v3607_v52  ;;  %v3941_v52 = vld [vmem:[#allocation2 + $0x171] sm:$0xff] }
 0x5ec   : > { %3716 = vst.msk [vmem:[#allocation3 + $0x1d0] sm:$0xff] %vm1538_vm6, %v3621_v41 }
 0x5ed   : > { %3717 = vst.msk [vmem:[#allocation3 + $0x1d8] sm:$0xff] %vm1540_vm7, %v3621_v41  ;;  %3988 = vrot.lane.b32.xlu0 %v3919_v34, %s11177_s21  ;;  %v3939_v41 = vld [vmem:[#allocation2 + $0x159] sm:$0xff] }
 0x5ee   : > { %3984 = vrot.lane.b32.xlu1 %v3917_v10, %s11177_s21  ;;  %3980 = vrot.lane.b32.xlu2 %v3915_v53, %s11177_s21  ;;  %v4330_v53 = vld [vmem:[#allocation3 + $0x100] sm:$0xff] }
 0x5ef   : > { %v3617_v50 = vpop.permute.xlu0 %3616 }
 0x5f0   : > { %v3613_v20 = vpop.permute.xlu1 %3612  ;;  %3712 = vst.msk [vmem:[#allocation3 + $0x1b0] sm:$0xff] %vm1538_vm6, %v3617_v50  ;;  %v3787_v36 = vpop.permute.xlu2 %3786 }
 0x5f1   : > { %3713 = vst.msk [vmem:[#allocation3 + $0x1b8] sm:$0xff] %vm1540_vm7, %v3617_v50 }
 0x5f2   : > { %3708 = vst.msk [vmem:[#allocation3 + $0x190] sm:$0xff] %vm1538_vm6, %v3613_v20  ;;  %4501 = vmatmul.f32.gmra.mxu2 %v4314_v27 }
 0x5f3   : > { %3709 = vst.msk [vmem:[#allocation3 + $0x198] sm:$0xff] %vm1540_vm7, %v3613_v20  ;;  %v2657_v20 = vld [vmem:[%s9463_s22 + $0x98] sm:$0xff] }
 0x5f4   : > { %3882 = vst.msk [vmem:[#allocation3 + $0x8] sm:$0xff] %vm1765_vm8, %v3787_v36  ;;  %4586 = vmatpush.msrb.mxu2 %v2657_v20  ;;  %7122 = vmatpush.msra.mxu3 %v2657_v20  ;;  %v4130_v20 = vld [vmem:[#allocation2 + $0x152] sm:$0xff] }
 0x5f5   : > { %3994 = vrot.lane.b32.xlu0 %v3922_v14, %s11177_s21 }
 0x5f6   : > { %3990 = vrot.lane.b32.xlu1 %v3920_v46, %s11177_s21  ;;  %3986 = vrot.lane.b32.xlu2 %v3918_v23, %s11177_s21  ;;  %v4332_v46 = vld [vmem:[#allocation3 + $0x110] sm:$0xff] }
 0x5f7   : > { %v3623_v31 = vpop.permute.xlu0 %3622  ;;  %v3945_v23 = vld [vmem:[#allocation2 + $0x1a1] sm:$0xff] }
 0x5f8   : > { %v3619_v5 = vpop.permute.xlu1 %3618  ;;  %3718 = vst.msk [vmem:[#allocation3 + $0x1e0] sm:$0xff] %vm1538_vm6, %v3623_v31  ;;  %v3793_v6 = vpop.permute.xlu2 %3792 }
 0x5f9   : > { %3719 = vst.msk [vmem:[#allocation3 + $0x1e8] sm:$0xff] %vm1540_vm7, %v3623_v31  ;;  %v4109_v31 = vld [vmem:[#allocation2 + $0x52] sm:$0xff] }
 0x5fa   : > { %3714 = vst.msk [vmem:[#allocation3 + $0x1c0] sm:$0xff] %vm1538_vm6, %v3619_v5  ;;  %4504 = vmatmul.f32.gmra.mxu2 %v4316_v44 }
 0x5fb   : > { %3715 = vst.msk [vmem:[#allocation3 + $0x1c8] sm:$0xff] %vm1540_vm7, %v3619_v5  ;;  %v4107_v5 = vld [vmem:[#allocation2 + $0x3a] sm:$0xff] }
 0x5fc   : > { %3885 = vst.msk [vmem:[#allocation3 + $0x38] sm:$0xff] %vm1765_vm8, %v3793_v6 }
 0x5fd   : > { %4000 = vrot.lane.b32.xlu0 %v3925_v35, %s11177_s21 }
 0x5fe   : > { %3996 = vrot.lane.b32.xlu1 %v3923_v21, %s11177_s21  ;;  %3992 = vrot.lane.b32.xlu2 %v3921_v0, %s11177_s21  ;;  %v4334_v21 = vld [vmem:[#allocation3 + $0x120] sm:$0xff]  ;;  %v4112_v0 = vld [vmem:[#allocation2 + $0x7a] sm:$0xff] }
 0x5ff   : > { %v3789_v18 = vpop.permute.xlu0 %3788 }
 0x600   : > { %v3625_v51 = vpop.permute.xlu1 %3624  ;;  %3883 = vst.msk [vmem:[#allocation3 + $0x18] sm:$0xff] %vm1765_vm8, %v3789_v18  ;;  %v3799_v58 = vpop.permute.xlu2 %3798  ;;  %v4110_v18 = vld [vmem:[#allocation2 + $0x62] sm:$0xff] }
 0x601   : > { %3720 = vst.msk [vmem:[#allocation3 + $0x1f0] sm:$0xff] %vm1538_vm6, %v3625_v51 }
 0x602   : > { %3721 = vst.msk [vmem:[#allocation3 + $0x1f8] sm:$0xff] %vm1540_vm7, %v3625_v51  ;;  %4507 = vmatmul.f32.gmra.mxu2 %v4318_v63 }
 0x603   : > { %3888 = vst.msk [vmem:[#allocation3 + $0x68] sm:$0xff] %vm1765_vm8, %v3799_v58  ;;  %v4108_v58 = vld [vmem:[#allocation2 + $0x4a] sm:$0xff] }
 0x605   : > { %4006 = vrot.lane.b32.xlu0 %v3928_v22, %s11177_s21 }
 0x606   : > { %4002 = vrot.lane.b32.xlu1 %v3926_v48, %s11177_s21  ;;  %3998 = vrot.lane.b32.xlu2 %v3924_v47, %s11177_s21  ;;  %v4336_v48 = vld [vmem:[#allocation3 + $0x130] sm:$0xff] }
 0x607   : > { %v3795_v32 = vpop.permute.xlu0 %3794  ;;  %v4115_v47 = vld [vmem:[#allocation2 + $0x9a] sm:$0xff] }
 0x608   : > { %v3791_v42 = vpop.permute.xlu1 %3790  ;;  %3886 = vst.msk [vmem:[#allocation3 + $0x48] sm:$0xff] %vm1765_vm8, %v3795_v32  ;;  %v3805_v61 = vpop.permute.xlu2 %3804  ;;  %v4113_v32 = vld [vmem:[#allocation2 + $0x82] sm:$0xff] }
 0x609   : > { %3884 = vst.msk [vmem:[#allocation3 + $0x28] sm:$0xff] %vm1765_vm8, %v3791_v42 }
 0x60a   : > { %3891 = vst.msk [vmem:[#allocation3 + $0x98] sm:$0xff] %vm1765_vm8, %v3805_v61  ;;  %4510 = vmatmul.f32.gmra.mxu2 %v4320_v55  ;;  %v4111_v61 = vld [vmem:[#allocation2 + $0x6a] sm:$0xff] }
 0x60b   : > { %v2656_v55 = vld [vmem:[%s9463_s22 + $0x90] sm:$0xff] }
 0x60c   : > { %4587 = vmatpush.msrb.mxu2 %v2656_v55  ;;  %7123 = vmatpush.msra.mxu3 %v2656_v55 }
 0x60d   : > { %4012 = vrot.lane.b32.xlu0 %v3931_v56, %s11177_s21 }
 0x60e   : > { %4008 = vrot.lane.b32.xlu1 %v3929_v45, %s11177_s21  ;;  %4004 = vrot.lane.b32.xlu2 %v3927_v26, %s11177_s21 }
 0x60f   : > { %v3801_v37 = vpop.permute.xlu0 %3800 }
 0x610   : > { %v3797_v62 = vpop.permute.xlu1 %3796  ;;  %3889 = vst.msk [vmem:[#allocation3 + $0x78] sm:$0xff] %vm1765_vm8, %v3801_v37  ;;  %v3811_v4 = vpop.permute.xlu2 %3810  ;;  %v4338_v37 = vld [vmem:[#allocation3 + $0x140] sm:$0xff] }
 0x611   : > { %3887 = vst.msk [vmem:[#allocation3 + $0x58] sm:$0xff] %vm1765_vm8, %v3797_v62  ;;  %v4118_v62 = vld [vmem:[#allocation2 + $0xc2] sm:$0xff] }
 0x612   : > { %3894 = vst.msk [vmem:[#allocation3 + $0xc8] sm:$0xff] %vm1765_vm8, %v3811_v4  ;;  %4513 = vmatmul.f32.gmra.mxu2 %v4322_v43  ;;  %v4116_v4 = vld [vmem:[#allocation2 + $0xaa] sm:$0xff] }
 0x615   : > { %4018 = vrot.lane.b32.xlu0 %v3934_v11, %s11177_s21  ;;  %v4114_v11 = vld [vmem:[#allocation2 + $0x92] sm:$0xff] }
 0x616   : > { %4014 = vrot.lane.b32.xlu1 %v3932_v7, %s11177_s21  ;;  %4010 = vrot.lane.b32.xlu2 %v3930_v60, %s11177_s21 }
 0x617   : > { %v3807_v16 = vpop.permute.xlu0 %3806 }
 0x618   : > { %v3803_v57 = vpop.permute.xlu1 %3802  ;;  %3892 = vst.msk [vmem:[#allocation3 + $0xa8] sm:$0xff] %vm1765_vm8, %v3807_v16  ;;  %v3817_v33 = vpop.permute.xlu2 %3816 }
 0x619   : > { %3890 = vst.msk [vmem:[#allocation3 + $0x88] sm:$0xff] %vm1765_vm8, %v3803_v57  ;;  %v4340_v57 = vld [vmem:[#allocation3 + $0x150] sm:$0xff] }
 0x61a   : > { %3897 = vst.msk [vmem:[#allocation3 + $0xf8] sm:$0xff] %vm1765_vm8, %v3817_v33  ;;  %4516 = vmatmul.f32.gmra.mxu2 %v4324_v13  ;;  %v4121_v33 = vld [vmem:[#allocation2 + $0xe2] sm:$0xff]  ;;  %v4119_v13 = vld [vmem:[#allocation2 + $0xca] sm:$0xff] }
 0x61d   : > { %4024 = vrot.lane.b32.xlu0 %v3937_v8, %s11177_s21 }
 0x61e   : > { %4020 = vrot.lane.b32.xlu1 %v3935_v3, %s11177_s21  ;;  %4016 = vrot.lane.b32.xlu2 %v3933_v17, %s11177_s21  ;;  %v4117_v3 = vld [vmem:[#allocation2 + $0xb2] sm:$0xff] }
 0x61f   : > { %v3813_v29 = vpop.permute.xlu0 %3812 }
 0x620   : > { %v3809_v2 = vpop.permute.xlu1 %3808  ;;  %3895 = vst.msk [vmem:[#allocation3 + $0xd8] sm:$0xff] %vm1765_vm8, %v3813_v29  ;;  %v3823_v28 = vpop.permute.xlu2 %3822 }
 0x621   : > { %3893 = vst.msk [vmem:[#allocation3 + $0xb8] sm:$0xff] %vm1765_vm8, %v3809_v2  ;;  %v4342_v2 = vld [vmem:[#allocation3 + $0x160] sm:$0xff] }
 0x622   : > { %3900 = vst.msk [vmem:[#allocation3 + $0x128] sm:$0xff] %vm1765_vm8, %v3823_v28  ;;  %4519 = vmatmul.f32.gmra.mxu2 %v4326_v49  ;;  %v2655_v28 = vld [vmem:[%s9463_s22 + $0x88] sm:$0xff] }
 0x623   : > { %4588 = vmatpush.msrb.mxu2 %v2655_v28  ;;  %7124 = vmatpush.msra.mxu3 %v2655_v28  ;;  %v4124_v49 = vld [vmem:[#allocation2 + $0x10a] sm:$0xff] }
 0x625   : > { %4030 = vrot.lane.b32.xlu0 %v3940_v30, %s11177_s21  ;;  %v4122_v30 = vld [vmem:[#allocation2 + $0xf2] sm:$0xff] }
 0x626   : > { %4026 = vrot.lane.b32.xlu1 %v3938_v54, %s11177_s21  ;;  %4022 = vrot.lane.b32.xlu2 %v3936_v1, %s11177_s21  ;;  %v4120_v1 = vld [vmem:[#allocation2 + $0xda] sm:$0xff] }
 0x627   : > { %v3819_v24 = vpop.permute.xlu0 %3818 }
 0x628   : > { %v3815_v39 = vpop.permute.xlu1 %3814  ;;  %3898 = vst.msk [vmem:[#allocation3 + $0x108] sm:$0xff] %vm1765_vm8, %v3819_v24  ;;  %v3829_v15 = vpop.permute.xlu2 %3828 }
 0x629   : > { %3896 = vst.msk [vmem:[#allocation3 + $0xe8] sm:$0xff] %vm1765_vm8, %v3815_v39 }
 0x62a   : > { %3903 = vst.msk [vmem:[#allocation3 + $0x158] sm:$0xff] %vm1765_vm8, %v3829_v15  ;;  %4522 = vmatmul.f32.gmra.mxu2 %v4328_v9  ;;  %v4344_v9 = vld [vmem:[#allocation3 + $0x170] sm:$0xff] }
 0x62d   : > { %4036 = vrot.lane.b32.xlu0 %v9401_v19, %s11177_s21  ;;  %v4106_v19 = vld [vmem:[#allocation2 + $0x32] sm:$0xff] }
 0x62e   : > { %4032 = vrot.lane.b32.xlu1 %v3941_v52, %s11177_s21  ;;  %4028 = vrot.lane.b32.xlu2 %v3939_v41, %s11177_s21  ;;  %v4127_v52 = vld [vmem:[#allocation2 + $0x12a] sm:$0xff]  ;;  %v4125_v41 = vld [vmem:[#allocation2 + $0x112] sm:$0xff] }
 0x62f   : > { %v3825_v25 = vpop.permute.xlu0 %3824 }
 0x630   : > { %v3821_v34 = vpop.permute.xlu1 %3820  ;;  %3901 = vst.msk [vmem:[#allocation3 + $0x138] sm:$0xff] %vm1765_vm8, %v3825_v25  ;;  %v3835_v10 = vpop.permute.xlu2 %3834 }
 0x631   : > { %3899 = vst.msk [vmem:[#allocation3 + $0x118] sm:$0xff] %vm1765_vm8, %v3821_v34  ;;  %v4123_v34 = vld [vmem:[#allocation2 + $0xfa] sm:$0xff] }
 0x632   : > { %3906 = vst.msk [vmem:[#allocation3 + $0x188] sm:$0xff] %vm1765_vm8, %v3835_v10  ;;  %4525 = vmatmul.f32.gmra.mxu2 %v4330_v53 }
 0x633   : > { %v9684_v50 = vpop.f32.mrf.mxu2 }
 0x635   : > { %4170 = vrot.lane.b32.xlu0 %v4106_v19, %s11311_s17  ;;  %v4346_v19 = vld [vmem:[#allocation3 + $0x180] sm:$0xff] }
 0x636   : > { %4038 = vrot.lane.b32.xlu1 %v3944_v12, %s11177_s21  ;;  %4034 = vrot.lane.b32.xlu2 %v9386_v40, %s11177_s21 }
 0x637   : > { %v3831_v36 = vpop.permute.xlu0 %3830 }
 0x638   : > { %v3827_v27 = vpop.permute.xlu1 %3826  ;;  %3904 = vst.msk [vmem:[#allocation3 + $0x168] sm:$0xff] %vm1765_vm8, %v3831_v36  ;;  %v3841_v14 = vpop.permute.xlu2 %3840  ;;  %v4128_v36 = vld [vmem:[#allocation2 + $0x13a] sm:$0xff] }
 0x639   : > { %3902 = vst.msk [vmem:[#allocation3 + $0x148] sm:$0xff] %vm1765_vm8, %v3827_v27 }
 0x63a   : > { %3909 = vst.msk [vmem:[#allocation3 + $0x1b8] sm:$0xff] %vm1765_vm8, %v3841_v14  ;;  %4528 = vmatmul.f32.gmra.mxu2 %v4332_v46  ;;  %v4126_v14 = vld [vmem:[#allocation2 + $0x122] sm:$0xff] }
 0x63d   : > { %v9694_v6 = vpop.f32.mrf.mxu2  ;;  %4176 = vrot.lane.b32.xlu0 %v4109_v31, %s11311_s17 }
 0x63e   : > { %4172 = vrot.lane.b32.xlu1 %v4107_v5, %s11311_s17  ;;  %4040 = vrot.lane.b32.xlu2 %v3945_v23, %s11177_s21  ;;  %v4348_v5 = vld [vmem:[#allocation3 + $0x190] sm:$0xff]  ;;  %s11312_s21 = scalar_lea.vmem %s11103_s4, %s8151_s18 }
 0x63f   : > { %v3837_v40 = vpop.permute.xlu0 %3836 }
 0x640   : > { %v3833_v44 = vpop.permute.xlu1 %3832  ;;  %3907 = vst.msk [vmem:[#allocation3 + $0x198] sm:$0xff] %vm1765_vm8, %v3837_v40  ;;  %v3847_v35 = vpop.permute.xlu2 %3846  ;;  %v2654_v40 = vld [vmem:[%s9463_s22 + $0x80] sm:$0xff]  ;;  %s10507_s22 = scalar_lea.vmem %s11104_s5, %s8270_s13  ;;  %s361_s13 = sand.u32 1, %s7282_s25  }
 0x641   : > { %3905 = vst.msk [vmem:[#allocation3 + $0x178] sm:$0xff] %vm1765_vm8, %v3833_v44  ;;  %4589 = vmatpush.msrb.mxu2 %v2654_v40  ;;  %7125 = vmatpush.msra.mxu3 %v2654_v40  ;;  %v4133_v44 = vld [vmem:[#allocation2 + $0x172] sm:$0xff] }
 0x642   : > { %3912 = vst.msk [vmem:[#allocation3 + $0x1e8] sm:$0xff] %vm1765_vm8, %v3847_v35  ;;  %4531 = vmatmul.f32.gmra.mxu2 %v4334_v21  ;;  %v4131_v35 = vld [vmem:[#allocation2 + $0x15a] sm:$0xff] }
 0x645   : > { %v9702_v51 = vpop.f32.mrf.mxu2  ;;  %4182 = vrot.lane.b32.xlu0 %v4112_v0, %s11311_s17  ;;  %v4129_v0 = vld [vmem:[#allocation2 + $0x142] sm:$0xff] }
 0x646   : > { %4178 = vrot.lane.b32.xlu1 %v4110_v18, %s11311_s17  ;;  %4174 = vrot.lane.b32.xlu2 %v4108_v58, %s11311_s17 }
 0x647   : > { %v3843_v63 = vpop.permute.xlu0 %3842 }
 0x648   : > { %v3839_v38 = vpop.permute.xlu1 %3838  ;;  %3910 = vst.msk [vmem:[#allocation3 + $0x1c8] sm:$0xff] %vm1765_vm8, %v3843_v63  ;;  %v3981_v22 = vpop.permute.xlu2 %3980 }
 0x649   : > { %3908 = vst.msk [vmem:[#allocation3 + $0x1a8] sm:$0xff] %vm1765_vm8, %v3839_v38  ;;  %v4350_v38 = vld [vmem:[#allocation3 + $0x1a0] sm:$0xff] }
 0x64a   : > { %4075 = vst.msk [vmem:[#allocation3 + $0x18] sm:$0xff] %vm1958_vm9, %v3981_v22  ;;  %4534 = vmatmul.f32.gmra.mxu2 %v4336_v48  ;;  %v4134_v22 = vld [vmem:[#allocation2 + $0x182] sm:$0xff] }
 0x64d   : > { %v9710_v42 = vpop.f32.mrf.mxu2  ;;  %4188 = vrot.lane.b32.xlu0 %v4115_v47, %s11311_s17  ;;  %v4132_v47 = vld [vmem:[#allocation2 + $0x16a] sm:$0xff] }
 0x64e   : > { %4184 = vrot.lane.b32.xlu1 %v4113_v32, %s11311_s17  ;;  %4180 = vrot.lane.b32.xlu2 %v4111_v61, %s11311_s17 }
 0x64f   : > { %v3849_v56 = vpop.permute.xlu0 %3848 }
 0x650   : > { %v3845_v45 = vpop.permute.xlu1 %3844  ;;  %3913 = vst.msk [vmem:[#allocation3 + $0x1f8] sm:$0xff] %vm1765_vm8, %v3849_v56  ;;  %v3987_v26 = vpop.permute.xlu2 %3986  ;;  %v4352_v56 = vld [vmem:[#allocation3 + $0x1b0] sm:$0xff] }
 0x651   : > { %3911 = vst.msk [vmem:[#allocation3 + $0x1d8] sm:$0xff] %vm1765_vm8, %v3845_v45 }
 0x652   : > { %4078 = vst.msk [vmem:[#allocation3 + $0x48] sm:$0xff] %vm1958_vm9, %v3987_v26  ;;  %4537 = vmatmul.f32.gmra.mxu2 %v4338_v37  ;;  %v4135_v26 = vld [vmem:[#allocation2 + $0x18a] sm:$0xff] }
 0x655   : > { %v9719_v43 = vpop.f32.mrf.mxu2  ;;  %4194 = vrot.lane.b32.xlu0 %v4118_v62, %s11311_s17 }
 0x656   : > { %4190 = vrot.lane.b32.xlu1 %v4116_v4, %s11311_s17  ;;  %4186 = vrot.lane.b32.xlu2 %v4114_v11, %s11311_s17  ;;  %v4354_v11 = vld [vmem:[#allocation3 + $0x1c0] sm:$0xff] }
 0x657   : > { %v3983_v7 = vpop.permute.xlu0 %3982 }
 0x658   : > { %v3979_v60 = vpop.permute.xlu1 %3978  ;;  %4076 = vst.msk [vmem:[#allocation3 + $0x28] sm:$0xff] %vm1958_vm9, %v3983_v7  ;;  %v3993_v16 = vpop.permute.xlu2 %3992 }
 0x659   : > { %4074 = vst.msk [vmem:[#allocation3 + $0x8] sm:$0xff] %vm1958_vm9, %v3979_v60 }
 0x65a   : > { %4081 = vst.msk [vmem:[#allocation3 + $0x78] sm:$0xff] %vm1958_vm9, %v3993_v16  ;;  %4540 = vmatmul.f32.gmra.mxu2 %v4340_v57 }
 0x65d   : > { %v9727_v8 = vpop.f32.mrf.mxu2  ;;  %4200 = vrot.lane.b32.xlu0 %v4121_v33, %s11311_s17  ;;  %v4356_v33 = vld [vmem:[#allocation3 + $0x1d0] sm:$0xff] }
 0x65e   : > { %4196 = vrot.lane.b32.xlu1 %v4119_v13, %s11311_s17  ;;  %4192 = vrot.lane.b32.xlu2 %v4117_v3, %s11311_s17 }
 0x65f   : > { %v3989_v17 = vpop.permute.xlu0 %3988 }
 0x660   : > { %v3985_v59 = vpop.permute.xlu1 %3984  ;;  %4079 = vst.msk [vmem:[#allocation3 + $0x58] sm:$0xff] %vm1958_vm9, %v3989_v17  ;;  %v3999_v29 = vpop.permute.xlu2 %3998 }
 0x661   : > { %4077 = vst.msk [vmem:[#allocation3 + $0x38] sm:$0xff] %vm1958_vm9, %v3985_v59 }
 0x662   : > { %4084 = vst.msk [vmem:[#allocation3 + $0xa8] sm:$0xff] %vm1958_vm9, %v3999_v29  ;;  %4543 = vmatmul.f32.gmra.mxu2 %v4342_v2  ;;  %v4358_v29 = vld [vmem:[#allocation3 + $0x1e0] sm:$0xff] }
 0x665   : > { %v9736_v54 = vpop.f32.mrf.mxu2  ;;  %4206 = vrot.lane.b32.xlu0 %v4124_v49, %s11311_s17 }
 0x666   : > { %4202 = vrot.lane.b32.xlu1 %v4122_v30, %s11311_s17  ;;  %4198 = vrot.lane.b32.xlu2 %v4120_v1, %s11311_s17  ;;  %v4360_v1 = vld [vmem:[#allocation3 + $0x1f0] sm:$0xff] }
 0x667   : > { %v3995_v24 = vpop.permute.xlu0 %3994 }
 0x668   : > { %v3991_v39 = vpop.permute.xlu1 %3990  ;;  %4082 = vst.msk [vmem:[#allocation3 + $0x88] sm:$0xff] %vm1958_vm9, %v3995_v24  ;;  %v4005_v15 = vpop.permute.xlu2 %4004 }
 0x669   : > { %4080 = vst.msk [vmem:[#allocation3 + $0x68] sm:$0xff] %vm1958_vm9, %v3991_v39 }
 0x66a   : > { %4087 = vst.msk [vmem:[#allocation3 + $0xd8] sm:$0xff] %vm1958_vm9, %v4005_v15  ;;  %4546 = vmatmul.f32.gmra.mxu2 %v4344_v9 }
 0x66d   : > { %v9744_v25 = vpop.f32.mrf.mxu2  ;;  %4212 = vrot.lane.b32.xlu0 %v4127_v52, %s11311_s17 }
 0x66e   : > { %4208 = vrot.lane.b32.xlu1 %v4125_v41, %s11311_s17  ;;  %4204 = vrot.lane.b32.xlu2 %v4123_v34, %s11311_s17  ;;  %v4136_v34 = vld [vmem:[#allocation2 + $0x19a] sm:$0xff] }
 0x66f   : > { %v4001_v10 = vpop.permute.xlu0 %4000 }
 0x670   : > { %v3997_v53 = vpop.permute.xlu1 %3996  ;;  %4085 = vst.msk [vmem:[#allocation3 + $0xb8] sm:$0xff] %vm1958_vm9, %v4001_v10  ;;  %v4011_v12 = vpop.permute.xlu2 %4010 }
 0x671   : > { %4083 = vst.msk [vmem:[#allocation3 + $0x98] sm:$0xff] %vm1958_vm9, %v3997_v53 }
 0x672   : > { %4090 = vst.msk [vmem:[#allocation3 + $0x108] sm:$0xff] %vm1958_vm9, %v4011_v12  ;;  %4549 = vmatmul.f32.gmra.mxu2 %v4346_v19 }
 0x675   : > { %v9752_v27 = vpop.f32.mrf.mxu2  ;;  %4218 = vrot.lane.b32.xlu0 %v4130_v20, %s11311_s17 }
 0x676   : > { %4214 = vrot.lane.b32.xlu1 %v4128_v36, %s11311_s17  ;;  %4210 = vrot.lane.b32.xlu2 %v4126_v14, %s11311_s17  ;;  %v4137_v36 = vld [vmem:[#allocation2 + $0x1a2] sm:$0xff] }
 0x677   : > { %v4007_v46 = vpop.permute.xlu0 %4006 }
 0x678   : > { %v4003_v23 = vpop.permute.xlu1 %4002  ;;  %4088 = vst.msk [vmem:[#allocation3 + $0xe8] sm:$0xff] %vm1958_vm9, %v4007_v46  ;;  %v4017_v31 = vpop.permute.xlu2 %4016 }
 0x679   : > { %4086 = vst.msk [vmem:[#allocation3 + $0xc8] sm:$0xff] %vm1958_vm9, %v4003_v23 }
 0x67a   : > { %4093 = vst.msk [vmem:[#allocation3 + $0x138] sm:$0xff] %vm1958_vm9, %v4017_v31  ;;  %4552 = vmatmul.f32.gmra.mxu2 %v4348_v5 }
 0x67d   : > { %v9761_v21 = vpop.f32.mrf.mxu2  ;;  %4224 = vrot.lane.b32.xlu0 %v4133_v44, %s11311_s17 }
 0x67e   : > { %4220 = vrot.lane.b32.xlu1 %v4131_v35, %s11311_s17  ;;  %4216 = vrot.lane.b32.xlu2 %v4129_v0, %s11311_s17 }
 0x67f   : > { %v4013_v18 = vpop.permute.xlu0 %4012 }
 0x680   : > { %v4009_v58 = vpop.permute.xlu1 %4008  ;;  %4091 = vst.msk [vmem:[#allocation3 + $0x118] sm:$0xff] %vm1958_vm9, %v4013_v18  ;;  %v4023_v63 = vpop.permute.xlu2 %4022 }
 0x681   : > { %4089 = vst.msk [vmem:[#allocation3 + $0xf8] sm:$0xff] %vm1958_vm9, %v4009_v58 }
 0x682   : > { %4096 = vst.msk [vmem:[#allocation3 + $0x168] sm:$0xff] %vm1958_vm9, %v4023_v63  ;;  %4555 = vmatmul.f32.gmra.mxu2 %v4350_v38 }
 0x685   : > { %v9769_v48 = vpop.f32.mrf.mxu2  ;;  %4230 = vrot.lane.b32.xlu0 %v4136_v34, %s11311_s17 }
 0x686   : > { %4226 = vrot.lane.b32.xlu1 %v4134_v22, %s11311_s17  ;;  %4222 = vrot.lane.b32.xlu2 %v4132_v47, %s11311_s17 }
 0x687   : > { %v4019_v32 = vpop.permute.xlu0 %4018 }
 0x688   : > { %v4015_v61 = vpop.permute.xlu1 %4014  ;;  %4094 = vst.msk [vmem:[#allocation3 + $0x148] sm:$0xff] %vm1958_vm9, %v4019_v32  ;;  %v4029_v55 = vpop.permute.xlu2 %4028 }
 0x689   : > { %4092 = vst.msk [vmem:[#allocation3 + $0x128] sm:$0xff] %vm1958_vm9, %v4015_v61 }
 0x68a   : > { %4099 = vst.msk [vmem:[#allocation3 + $0x198] sm:$0xff] %vm1958_vm9, %v4029_v55  ;;  %4558 = vmatmul.f32.gmra.mxu2 %v4352_v56 }
 0x68d   : > { %v9776_v45 = vpop.f32.mrf.mxu2 }
 0x68e   : > { %4228 = vrot.lane.b32.xlu2 %v4135_v26, %s11311_s17  ;;  %4232 = vrot.lane.b32.xlu1 %v4137_v36, %s11311_s17 }
 0x68f   : > { %v4025_v37 = vpop.permute.xlu0 %4024 }
 0x690   : > { %v4021_v62 = vpop.permute.xlu1 %4020  ;;  %4097 = vst.msk [vmem:[#allocation3 + $0x178] sm:$0xff] %vm1958_vm9, %v4025_v37  ;;  %v4035_v4 = vpop.permute.xlu2 %4034 }
 0x691   : > { %4095 = vst.msk [vmem:[#allocation3 + $0x158] sm:$0xff] %vm1958_vm9, %v4021_v62 }
 0x692   : > { %4102 = vst.msk [vmem:[#allocation3 + $0x1c8] sm:$0xff] %vm1958_vm9, %v4035_v4  ;;  %4561 = vmatmul.f32.gmra.mxu2 %v4354_v11 }
 0x695   : > { %v9782_v7 = vpop.f32.mrf.mxu2 }
 0x697   : > { %v4031_v60 = vpop.permute.xlu0 %4030 }
 0x698   : > { %v4027_v16 = vpop.permute.xlu1 %4026  ;;  %4100 = vst.msk [vmem:[#allocation3 + $0x1a8] sm:$0xff] %vm1958_vm9, %v4031_v60  ;;  %v4041_v57 = vpop.permute.xlu2 %4040 }
 0x699   : > { %4098 = vst.msk [vmem:[#allocation3 + $0x188] sm:$0xff] %vm1958_vm9, %v4027_v16 }
 0x69a   : > { %4105 = vst.msk [vmem:[#allocation3 + $0x1f8] sm:$0xff] %vm1958_vm9, %v4041_v57  ;;  %4564 = vmatmul.f32.gmra.mxu2 %v4356_v33 }
 0x69d   : > { %v9787_v13 = vpop.f32.mrf.mxu2 }
 0x69f   : > { %v4037_v3 = vpop.permute.xlu0 %4036 }
 0x6a0   : > { %v4033_v17 = vpop.permute.xlu1 %4032  ;;  %4103 = vst.msk [vmem:[#allocation3 + $0x1d8] sm:$0xff] %vm1958_vm9, %v4037_v3  ;;  %v4175_v59 = vpop.permute.xlu2 %4174 }
 0x6a1   : > { %4101 = vst.msk [vmem:[#allocation3 + $0x1b8] sm:$0xff] %vm1958_vm9, %v4033_v17 }
 0x6a2   : > { %4268 = vst.msk [vmem:[#allocation3 + $0x28] sm:$0xff] %vm2151_vm10, %v4175_v59  ;;  %4567 = vmatmul.f32.gmra.mxu2 %v4358_v29 }
 0x6a5   : > { %v9792_v2 = vpop.f32.mrf.mxu2 }
 0x6a7   : > { %v4171_v28 = vpop.permute.xlu0 %4170 }
 0x6a8   : > { %v4039_v49 = vpop.permute.xlu1 %4038  ;;  %4266 = vst.msk [vmem:[#allocation3 + $0x8] sm:$0xff] %vm2151_vm10, %v4171_v28  ;;  %v4181_v30 = vpop.permute.xlu2 %4180 }
 0x6a9   : > { %4104 = vst.msk [vmem:[#allocation3 + $0x1e8] sm:$0xff] %vm1958_vm9, %v4039_v49  ;;  %v4303_v31 = vld [vmem:[#allocation3 + $0x28] sm:$0xff] }
 0x6aa   : > { %4271 = vst.msk [vmem:[#allocation3 + $0x58] sm:$0xff] %vm2151_vm10, %v4181_v30  ;;  %4570 = vmatmul.f32.gmra.mxu2 %v4360_v1 }
 0x6ad   : > { %v9797_v24 = vpop.f32.mrf.mxu2 }
 0x6af   : > { %v4177_v39 = vpop.permute.xlu0 %4176  ;;  %v4299_v9 = vld [vmem:[#allocation3 + $0x8] sm:$0xff] }
 0x6b0   : > { %v4173_v15 = vpop.permute.xlu1 %4172  ;;  %4269 = vst.msk [vmem:[#allocation3 + $0x38] sm:$0xff] %vm2151_vm10, %v4177_v39  ;;  %v4187_v52 = vpop.permute.xlu2 %4186 }
 0x6b1   : > { %4267 = vst.msk [vmem:[#allocation3 + $0x18] sm:$0xff] %vm2151_vm10, %v4173_v15  ;;  %v4309_v26 = vld [vmem:[#allocation3 + $0x58] sm:$0xff] }
 0x6b2   : > { %4274 = vst.msk [vmem:[#allocation3 + $0x88] sm:$0xff] %vm2151_vm10, %v4187_v52  ;;  %7033 = vmatmul.msk.f32.vlgmr.msrb.gmra.mxu2 %vm2251_vm11, %v4299_v9 }
 0x6b5   : > { %v9803_v41 = vpop.f32.mrf.mxu2 }
 0x6b7   : > { %v4183_v10 = vpop.permute.xlu0 %4182  ;;  %v4305_v0 = vld [vmem:[#allocation3 + $0x38] sm:$0xff] }
 0x6b8   : > { %v4179_v53 = vpop.permute.xlu1 %4178  ;;  %4272 = vst.msk [vmem:[#allocation3 + $0x68] sm:$0xff] %vm2151_vm10, %v4183_v10  ;;  %v4193_v12 = vpop.permute.xlu2 %4192  ;;  %v4301_v19 = vld [vmem:[#allocation3 + $0x18] sm:$0xff] }
 0x6b9   : > { %4270 = vst.msk [vmem:[#allocation3 + $0x48] sm:$0xff] %vm2151_vm10, %v4179_v53  ;;  %v4315_v39 = vld [vmem:[#allocation3 + $0x88] sm:$0xff] }
 0x6ba   : > { %4277 = vst.msk [vmem:[#allocation3 + $0xb8] sm:$0xff] %vm2151_vm10, %v4193_v12  ;;  %7034 = vmatmul.msk.f32.gmra.mxu2 %vm2251_vm11, %v4301_v19 }
 0x6bd   : > { %v9810_v20 = vpop.f32.mrf.mxu2 }
 0x6bf   : > { %v4189_v14 = vpop.permute.xlu0 %4188  ;;  %v4311_v16 = vld [vmem:[#allocation3 + $0x68] sm:$0xff] }
 0x6c0   : > { %v4185_v46 = vpop.permute.xlu1 %4184  ;;  %4275 = vst.msk [vmem:[#allocation3 + $0x98] sm:$0xff] %vm2151_vm10, %v4189_v14  ;;  %v4199_v23 = vpop.permute.xlu2 %4198  ;;  %v4307_v22 = vld [vmem:[#allocation3 + $0x48] sm:$0xff] }
 0x6c1   : > { %4273 = vst.msk [vmem:[#allocation3 + $0x78] sm:$0xff] %vm2151_vm10, %v4185_v46  ;;  %v4321_v14 = vld [vmem:[#allocation3 + $0xb8] sm:$0xff] }
 0x6c2   : > { %4280 = vst.msk [vmem:[#allocation3 + $0xe8] sm:$0xff] %vm2151_vm10, %v4199_v23  ;;  %7035 = vmatmul.msk.f32.gmra.mxu2 %vm2251_vm11, %v4303_v31 }
 0x6c5   : > { %v9817_v5 = vpop.f32.mrf.mxu2 }
 0x6c7   : > { %v4195_v40 = vpop.permute.xlu0 %4194  ;;  %v4317_v34 = vld [vmem:[#allocation3 + $0x98] sm:$0xff] }
 0x6c8   : > { %v4191_v44 = vpop.permute.xlu1 %4190  ;;  %4278 = vst.msk [vmem:[#allocation3 + $0xc8] sm:$0xff] %vm2151_vm10, %v4195_v40  ;;  %v4205_v35 = vpop.permute.xlu2 %4204  ;;  %v4313_v29 = vld [vmem:[#allocation3 + $0x78] sm:$0xff] }
 0x6c9   : > { %4276 = vst.msk [vmem:[#allocation3 + $0xa8] sm:$0xff] %vm2151_vm10, %v4191_v44 }
 0x6ca   : > { %4283 = vst.msk [vmem:[#allocation3 + $0x118] sm:$0xff] %vm2151_vm10, %v4205_v35  ;;  %7036 = vmatmul.msk.f32.gmra.mxu2 %vm2251_vm11, %v4305_v0 }
 0x6cd   : > { %v9823_v18 = vpop.f32.mrf.mxu2 }
 0x6cf   : > { %v4201_v58 = vpop.permute.xlu0 %4200  ;;  %v4323_v31 = vld [vmem:[#allocation3 + $0xc8] sm:$0xff] }
 0x6d0   : > { %v4197_v63 = vpop.permute.xlu1 %4196  ;;  %4281 = vst.msk [vmem:[#allocation3 + $0xf8] sm:$0xff] %vm2151_vm10, %v4201_v58  ;;  %v4211_v38 = vpop.permute.xlu2 %4210  ;;  %v4319_v12 = vld [vmem:[#allocation3 + $0xa8] sm:$0xff] }
 0x6d1   : > { %4279 = vst.msk [vmem:[#allocation3 + $0xd8] sm:$0xff] %vm2151_vm10, %v4197_v63  ;;  %v4333_v59 = vld [vmem:[#allocation3 + $0x118] sm:$0xff]  ;;  %v4327_v63 = vld [vmem:[#allocation3 + $0xe8] sm:$0xff] }
 0x6d2   : > { %4286 = vst.msk [vmem:[#allocation3 + $0x148] sm:$0xff] %vm2151_vm10, %v4211_v38  ;;  %7037 = vmatmul.msk.f32.gmra.mxu2 %vm2251_vm11, %v4307_v22  ;;  %v4843_v38 = vld [vmem:[#allocation2 + $0x1] sm:$0xff] }
 0x6d3   : > { %4907 = vrot.lane.b32.xlu2 %v4843_v38, %s11246_s9 }
 0x6d5   : > { %v9829_v47 = vpop.f32.mrf.mxu2 }
 0x6d7   : > { %v4207_v32 = vpop.permute.xlu0 %4206  ;;  %v4329_v55 = vld [vmem:[#allocation3 + $0xf8] sm:$0xff] }
 0x6d8   : > { %v4203_v61 = vpop.permute.xlu1 %4202  ;;  %4284 = vst.msk [vmem:[#allocation3 + $0x128] sm:$0xff] %vm2151_vm10, %v4207_v32  ;;  %v4217_v56 = vpop.permute.xlu2 %4216  ;;  %7048 = vmatmul.msk.f32.vlgmr.msra.gmra.mxu3 %vm2251_vm11, %v4329_v55  ;;  %v4325_v35 = vld [vmem:[#allocation3 + $0xd8] sm:$0xff] }
 0x6d9   : > { %4282 = vst.msk [vmem:[#allocation3 + $0x108] sm:$0xff] %vm2151_vm10, %v4203_v61  ;;  %v4339_v53 = vld [vmem:[#allocation3 + $0x148] sm:$0xff]  ;;  %v4844_v55 = vld [vmem:[#allocation2 + $0x9] sm:$0xff] }
 0x6da   : > { %4289 = vst.msk [vmem:[#allocation3 + $0x178] sm:$0xff] %vm2151_vm10, %v4217_v56  ;;  %7038 = vmatmul.msk.f32.gmra.mxu2 %vm2251_vm11, %v4309_v26  ;;  %4909 = vrot.lane.b32.xlu0 %v4844_v55, %s11246_s9  ;;  %v9894_v26 = vld [vmem:[%s11312_s21] ss:$0 sm:$0xff]  ;;  %s11316_s21 = smov 96  }
 0x6dd   : > { %v9836_v37 = vpop.f32.mrf.mxu2 }
 0x6df   : > { %v4213_v62 = vpop.permute.xlu0 %4212  ;;  %v4335_v1 = vld [vmem:[#allocation3 + $0x128] sm:$0xff] }
 0x6e0   : > { %v4209_v4 = vpop.permute.xlu1 %4208  ;;  %4287 = vst.msk [vmem:[#allocation3 + $0x158] sm:$0xff] %vm2151_vm10, %v4213_v62  ;;  %v4223_v11 = vpop.permute.xlu2 %4222  ;;  %v4331_v60 = vld [vmem:[#allocation3 + $0x108] sm:$0xff] }
 0x6e1   : > { %4285 = vst.msk [vmem:[#allocation3 + $0x138] sm:$0xff] %vm2151_vm10, %v4209_v4  ;;  %7049 = vmatmul.msk.f32.gmra.mxu3 %vm2251_vm11, %v4331_v60  ;;  %v4345_v44 = vld [vmem:[#allocation3 + $0x178] sm:$0xff] }
 0x6e2   : > { %4292 = vst.msk [vmem:[#allocation3 + $0x1a8] sm:$0xff] %vm2151_vm10, %v4223_v11  ;;  %7039 = vmatmul.msk.f32.gmra.mxu2 %vm2251_vm11, %v4311_v16  ;;  %v4479_v11 = vadd.f32 %v9894_v26, %v9684_v50 }
 0x6e5   : > { %v9843_v57 = vpop.f32.mrf.mxu2 }
 0x6e7   : > { %v4219_v33 = vpop.permute.xlu0 %4218  ;;  %v4341_v36 = vld [vmem:[#allocation3 + $0x158] sm:$0xff] }
 0x6e8   : > { %v4215_v3 = vpop.permute.xlu1 %4214  ;;  %4290 = vst.msk [vmem:[#allocation3 + $0x188] sm:$0xff] %vm2151_vm10, %v4219_v33  ;;  %v4229_v17 = vpop.permute.xlu2 %4228  ;;  %v4337_v52 = vld [vmem:[#allocation3 + $0x138] sm:$0xff] }
 0x6e9   : > { %4288 = vst.msk [vmem:[#allocation3 + $0x168] sm:$0xff] %vm2151_vm10, %v4215_v3  ;;  %7050 = vmatmul.msk.f32.gmra.mxu3 %vm2251_vm11, %v4333_v59  ;;  %v4351_v62 = vld [vmem:[#allocation3 + $0x1a8] sm:$0xff] }
 0x6ea   : > { %4295 = vst.msk [vmem:[#allocation3 + $0x1d8] sm:$0xff] %vm2151_vm10, %v4229_v17  ;;  %7040 = vmatmul.msk.f32.gmra.mxu2 %vm2251_vm11, %v4313_v29  ;;  %v4482_v17 = vadd.f32 %v9894_v26, %v9694_v6  ;;  %v4485_v6 = vadd.f32 %v9894_v26, %v9702_v51  ;;  %v4488_v51 = vadd.f32 %v9894_v26, %v9710_v42 }
 0x6eb   : > { %v4491_v42 = vadd.f32 %v9894_v26, %v9719_v43  ;;  %v4494_v43 = vadd.f32 %v9894_v26, %v9727_v8  ;;  %v4497_v8 = vadd.f32 %v9894_v26, %v9736_v54  ;;  %v4530_v54 = vadd.f32 %v9894_v26, %v9810_v20 }
 0x6ec   : > { %v4503_v20 = vadd.f32 %v9894_v26, %v9752_v27  ;;  %v4779_v27 = vld [vmem:[#allocation2] sm:$0xff] }
 0x6ed   : > { %v9850_v28 = vpop.f32.mrf.mxu2  ;;  %4811 = vst.msk [vmem:[#allocation3] sm:$0xff] %vm393_vm0, %v4779_v27 }
 0x6ef   : > { %v4225_v49 = vpop.permute.xlu0 %4224  ;;  %v4347_v58 = vld [vmem:[#allocation3 + $0x188] sm:$0xff] }
 0x6f0   : > { %v4221_v30 = vpop.permute.xlu1 %4220  ;;  %4293 = vst.msk [vmem:[#allocation3 + $0x1b8] sm:$0xff] %vm2151_vm10, %v4225_v49  ;;  %v4343_v23 = vld [vmem:[#allocation3 + $0x168] sm:$0xff] }
 0x6f1   : > { %4291 = vst.msk [vmem:[#allocation3 + $0x198] sm:$0xff] %vm2151_vm10, %v4221_v30  ;;  %7051 = vmatmul.msk.f32.gmra.mxu3 %vm2251_vm11, %v4335_v1 }
 0x6f2   : > { %7041 = vmatmul.msk.f32.gmra.mxu2 %vm2251_vm11, %v4315_v39 }
 0x6f5   : > { %v9856_v15 = vpop.f32.mrf.mxu2 }
 0x6f7   : > { %v4231_v61 = vpop.permute.xlu0 %4230  ;;  %v4353_v3 = vld [vmem:[#allocation3 + $0x1b8] sm:$0xff] }
 0x6f8   : > { %v4227_v9 = vpop.permute.xlu1 %4226  ;;  %v4349_v32 = vld [vmem:[#allocation3 + $0x198] sm:$0xff]  ;;  %4296 = vst.msk [vmem:[#allocation3 + $0x1e8] sm:$0xff] %vm2151_vm10, %v4231_v61 }
 0x6f9   : > { %4294 = vst.msk [vmem:[#allocation3 + $0x1c8] sm:$0xff] %vm2151_vm10, %v4227_v9  ;;  %7052 = vmatmul.msk.f32.gmra.mxu3 %vm2251_vm11, %v4337_v52 }
 0x6fa   : > { %7042 = vmatmul.msk.f32.gmra.mxu2 %vm2251_vm11, %v4317_v34  ;;  %v4357_v34 = vld [vmem:[#allocation3 + $0x1d8] sm:$0xff] }
 0x6fd   : > { %v9861_v10 = vpop.f32.mrf.mxu2 }
 0x700   : > { %v4233_v4 = vpop.permute.xlu1 %4232  ;;  %v4355_v30 = vld [vmem:[#allocation3 + $0x1c8] sm:$0xff] }
 0x701   : > { %7053 = vmatmul.msk.f32.gmra.mxu3 %vm2251_vm11, %v4339_v53  ;;  %4297 = vst.msk [vmem:[#allocation3 + $0x1f8] sm:$0xff] %vm2151_vm10, %v4233_v4 }
 0x702   : > { %7043 = vmatmul.msk.f32.gmra.mxu2 %vm2251_vm11, %v4319_v12 }
 0x705   : > { %v9865_v19 = vpop.f32.mrf.mxu2 }
 0x708   : > { %v4361_v38 = vld [vmem:[#allocation3 + $0x1f8] sm:$0xff] }
 0x709   : > { %7054 = vmatmul.msk.f32.gmra.mxu3 %vm2251_vm11, %v4341_v36 }
 0x70a   : > { %7044 = vmatmul.msk.f32.gmra.mxu2 %vm2251_vm11, %v4321_v14 }
 0x70d   : > { %v9869_v46 = vpop.f32.mrf.mxu2 }
 0x711   : > { %7055 = vmatmul.msk.f32.gmra.mxu3 %vm2251_vm11, %v4343_v23  ;;  %v4359_v23 = vld [vmem:[#allocation3 + $0x1e8] sm:$0xff] }
 0x712   : > { %7045 = vmatmul.msk.f32.gmra.mxu2 %vm2251_vm11, %v4323_v31 }
 0x715   : > { %v9873_v40 = vpop.f32.mrf.mxu2 }
 0x719   : > { %7056 = vmatmul.msk.f32.gmra.mxu3 %vm2251_vm11, %v4345_v44 }
 0x71a   : > { %7046 = vmatmul.msk.f32.gmra.mxu2 %vm2251_vm11, %v4325_v35 }
 0x71d   : > { %v9877_v0 = vpop.f32.mrf.mxu2 }
 0x721   : > { %7057 = vmatmul.msk.f32.gmra.mxu3 %vm2251_vm11, %v4347_v58 }
 0x722   : > { %7047 = vmatmul.msk.f32.gmra.mxu2 %vm2251_vm11, %v4327_v63 }
 0x725   : > { %v9882_v22 = vpop.f32.mrf.mxu2 }
 0x729   : > { %7058 = vmatmul.msk.f32.gmra.mxu3 %vm2251_vm11, %v4349_v32 }
 0x72d   : > { %v9887_v56 = vpop.f32.mrf.mxu2 }
 0x731   : > { %7059 = vmatmul.msk.f32.gmra.mxu3 %vm2251_vm11, %v4351_v62  ;;  %v4524_v62 = vadd.f32 %v9894_v26, %v9797_v24 }
 0x735   : > { %v4591_v60 = vpop.f32.mrf.mxu2 }
 0x736   : > { %v4592_v16 = vadd.f32 %v4591_v60, %v4479_v11 }
 0x738   : > { %v4687_v33 = vmax.f32 %v4592_v16, 0.0 }
 0x739   : > { %7060 = vmatmul.msk.f32.gmra.mxu3 %vm2251_vm11, %v4353_v3 }
 0x73a   : > { %4719 = vst.msk [vmem:[#allocation2 + $0x19] sm:$0xff] %vm393_vm0, %v4687_v33 }
 0x73d   : > { %v4594_v59 = vpop.f32.mrf.mxu2 }
 0x73e   : > { %v4595_v29 = vadd.f32 %v4594_v59, %v4482_v17  ;;  %v4527_v59 = vadd.f32 %v9894_v26, %v9803_v41  ;;  %v4500_v41 = vadd.f32 %v9894_v26, %v9744_v25  ;;  %v4533_v25 = vadd.f32 %v9894_v26, %v9817_v5 }
 0x740   : > { %v4688_v49 = vmax.f32 %v4595_v29, 0.0 }
 0x741   : > { %7061 = vmatmul.msk.f32.gmra.mxu3 %vm2251_vm11, %v4355_v30  ;;  %v9905_v1 = vld [vmem:[#allocation2 + $0x19] sm:$0xff] }
 0x742   : > { %v9907_v50 = vld [vmem:[#allocation2 + $0x18] sm:$0xff]  ;;  %4720 = vst.msk [vmem:[#allocation2 + $0x21] sm:$0xff] %vm393_vm0, %v4688_v49  ;;  %4911 = vrot.lane.b32.xlu1 %v9905_v1, %s11246_s9 }
 0x743   : > { %4813 = vst.msk [vmem:[#allocation3 + $0x20] sm:$0xff] %vm393_vm0, %v9907_v50 }
 0x745   : > { %v4597_v39 = vpop.f32.mrf.mxu2 }
 0x746   : > { %v4598_v9 = vadd.f32 %v4597_v39, %v4485_v6 }
 0x748   : > { %v4689_v52 = vmax.f32 %v4598_v9, 0.0 }
 0x749   : > { %7062 = vmatmul.msk.f32.gmra.mxu3 %vm2251_vm11, %v4357_v34  ;;  %v9917_v53 = vld [vmem:[#allocation2 + $0x21] sm:$0xff] }
 0x74a   : > { %v9919_v12 = vld [vmem:[#allocation2 + $0x20] sm:$0xff]  ;;  %4721 = vst.msk [vmem:[#allocation2 + $0x31] sm:$0xff] %vm393_vm0, %v4689_v52  ;;  %4913 = vrot.lane.b32.xlu2 %v9917_v53, %s11246_s9 }
 0x74b   : > { %4814 = vst.msk [vmem:[#allocation3 + $0x30] sm:$0xff] %vm393_vm0, %v9919_v12 }
 0x74d   : > { %v4600_v36 = vpop.f32.mrf.mxu2 }
 0x74e   : > { %v4601_v14 = vadd.f32 %v4600_v36, %v4488_v51 }
 0x750   : > { %v4690_v31 = vmax.f32 %v4601_v14, 0.0 }
 0x751   : > { %7063 = vmatmul.msk.f32.gmra.mxu3 %vm2251_vm11, %v4359_v23  ;;  %v9929_v44 = vld [vmem:[#allocation2 + $0x31] sm:$0xff] }
 0x752   : > { %v9931_v35 = vld [vmem:[#allocation2 + $0x30] sm:$0xff]  ;;  %4722 = vst.msk [vmem:[#allocation2 + $0x39] sm:$0xff] %vm393_vm0, %v4690_v31  ;;  %4915 = vrot.lane.b32.xlu0 %v9929_v44, %s11246_s9 }
 0x753   : > { %4815 = vst.msk [vmem:[#allocation3 + $0x40] sm:$0xff] %vm393_vm0, %v9931_v35 }
 0x755   : > { %v4603_v58 = vpop.f32.mrf.mxu2 }
 0x756   : > { %v4604_v63 = vadd.f32 %v4603_v58, %v4491_v42 }
 0x758   : > { %v4691_v32 = vmax.f32 %v4604_v63, 0.0 }
 0x759   : > { %7064 = vmatmul.msk.f32.gmra.mxu3 %vm2251_vm11, %v4361_v38  ;;  %v9941_v61 = vld [vmem:[#allocation2 + $0x39] sm:$0xff] }
 0x75a   : > { %v9943_v55 = vld [vmem:[#allocation2 + $0x38] sm:$0xff]  ;;  %4723 = vst.msk [vmem:[#allocation2 + $0x49] sm:$0xff] %vm393_vm0, %v4691_v32  ;;  %4917 = vrot.lane.b32.xlu1 %v9941_v61, %s11246_s9 }
 0x75b   : > { %v4636_v4 = vpop.f32.mrf.mxu3  ;;  %4816 = vst.msk [vmem:[#allocation3 + $0x50] sm:$0xff] %vm393_vm0, %v9943_v55 }
 0x75c   : > { %v4637_v11 = vadd.f32 %v4636_v4, %v4524_v62 }
 0x75d   : > { %v4606_v60 = vpop.f32.mrf.mxu2 }
 0x75e   : > { %v4607_v16 = vadd.f32 %v4606_v60, %v4494_v43  ;;  %v4702_v33 = vmax.f32 %v4637_v11, 0.0 }
 0x760   : > { %v4692_v3 = vmax.f32 %v4607_v16, 0.0  ;;  %4734 = vst.msk [vmem:[#allocation2 + $0xc9] sm:$0xff] %vm393_vm0, %v4702_v33 }
 0x761   : > { %v9955_v24 = vld [vmem:[#allocation2 + $0x49] sm:$0xff] }
 0x762   : > { %v9957_v17 = vld [vmem:[#allocation2 + $0x48] sm:$0xff]  ;;  %4724 = vst.msk [vmem:[#allocation2 + $0x51] sm:$0xff] %vm393_vm0, %v4692_v3  ;;  %4919 = vrot.lane.b32.xlu2 %v9955_v24, %s11246_s9  ;;  %v4536_v3 = vadd.f32 %v9894_v26, %v9823_v18 }
 0x763   : > { %4817 = vst.msk [vmem:[#allocation3 + $0x60] sm:$0xff] %vm393_vm0, %v9957_v17 }
 0x764   : > { %v4639_v29 = vpop.f32.mrf.mxu3 }
 0x765   : > { %v4609_v49 = vpop.f32.mrf.mxu2  ;;  %v4640_v30 = vadd.f32 %v4639_v29, %v4527_v59  ;;  %v4506_v59 = vadd.f32 %v9894_v26, %v9761_v21 }
 0x766   : > { %v4610_v6 = vadd.f32 %v4609_v49, %v4497_v8 }
 0x767   : > { %v4703_v39 = vmax.f32 %v4640_v30, 0.0  ;;  %v4908_v30 = vpop.permute.xlu2 %4907 }
 0x768   : > { %v4693_v9 = vmax.f32 %v4610_v6, 0.0  ;;  %5003 = vst.msk [vmem:[#allocation3] sm:$0xff] %vm766_vm2, %v4908_v30 }
 0x769   : > { %4735 = vst.msk [vmem:[#allocation2 + $0xd9] sm:$0xff] %vm393_vm0, %v4703_v39  ;;  %v9969_v52 = vld [vmem:[#allocation2 + $0x51] sm:$0xff] }
 0x76a   : > { %v9971_v34 = vld [vmem:[#allocation2 + $0x50] sm:$0xff]  ;;  %4725 = vst.msk [vmem:[#allocation2 + $0x61] sm:$0xff] %vm393_vm0, %v4693_v9  ;;  %4921 = vrot.lane.b32.xlu0 %v9969_v52, %s11246_s9 }
 0x76b   : > { %4818 = vst.msk [vmem:[#allocation3 + $0x70] sm:$0xff] %vm393_vm0, %v9971_v34 }
 0x76c   : > { %v4642_v51 = vpop.f32.mrf.mxu3 }
 0x76d   : > { %v4612_v36 = vpop.f32.mrf.mxu2  ;;  %v4643_v14 = vadd.f32 %v4642_v51, %v4530_v54  ;;  %v4509_v51 = vadd.f32 %v9894_v26, %v9769_v48 }
 0x76e   : > { %v4613_v23 = vadd.f32 %v4612_v36, %v4500_v41  ;;  %v4539_v41 = vadd.f32 %v9894_v26, %v9829_v47 }
 0x76f   : > { %v4704_v31 = vmax.f32 %v4643_v14, 0.0 }
 0x770   : > { %v4694_v42 = vmax.f32 %v4613_v23, 0.0  ;;  %v9987_v38 = vld [vmem:[#allocation2 + $0xd8] sm:$0xff] }
 0x771   : > { %4736 = vst.msk [vmem:[#allocation2 + $0xe1] sm:$0xff] %vm393_vm0, %v4704_v31  ;;  %v9983_v58 = vld [vmem:[#allocation2 + $0x61] sm:$0xff] }
 0x772   : > { %v9985_v63 = vld [vmem:[#allocation2 + $0x60] sm:$0xff]  ;;  %4726 = vst.msk [vmem:[#allocation2 + $0x69] sm:$0xff] %vm393_vm0, %v4694_v42  ;;  %4923 = vrot.lane.b32.xlu1 %v9983_v58, %s11246_s9 }
 0x773   : > { %4819 = vst.msk [vmem:[#allocation3 + $0x80] sm:$0xff] %vm393_vm0, %v9985_v63 }
 0x774   : > { %v4645_v32 = vpop.f32.mrf.mxu3  ;;  %4829 = vst.msk [vmem:[#allocation3 + $0x120] sm:$0xff] %vm393_vm0, %v9987_v38 }
 0x775   : > { %v4615_v62 = vpop.f32.mrf.mxu2  ;;  %v4646_v4 = vadd.f32 %v4645_v32, %v4533_v25  ;;  %v4542_v32 = vadd.f32 %v9894_v26, %v9836_v37 }
 0x776   : > { %v4616_v43 = vadd.f32 %v4615_v62, %v4503_v20  ;;  %v4512_v62 = vadd.f32 %v9894_v26, %v9776_v45  ;;  %v4545_v45 = vadd.f32 %v9894_v26, %v9843_v57 }
 0x777   : > { %v4705_v11 = vmax.f32 %v4646_v4, 0.0 }
 0x778   : > { %v4695_v60 = vmax.f32 %v4616_v43, 0.0  ;;  %v10008_v33 = vld [vmem:[#allocation2 + $0xe0] sm:$0xff] }
 0x779   : > { %4737 = vst.msk [vmem:[#allocation2 + $0xf1] sm:$0xff] %vm393_vm0, %v4705_v11  ;;  %v10001_v16 = vld [vmem:[#allocation2 + $0x69] sm:$0xff] }
 0x77a   : > { %v10003_v5 = vld [vmem:[#allocation2 + $0x68] sm:$0xff]  ;;  %4727 = vst.msk [vmem:[#allocation2 + $0x79] sm:$0xff] %vm393_vm0, %v4695_v60  ;;  %4925 = vrot.lane.b32.xlu2 %v10001_v16, %s11246_s9 }
 0x77b   : > { %4820 = vst.msk [vmem:[#allocation3 + $0x90] sm:$0xff] %vm393_vm0, %v10003_v5 }
 0x77c   : > { %v4648_v8 = vpop.f32.mrf.mxu3  ;;  %4830 = vst.msk [vmem:[#allocation3 + $0x130] sm:$0xff] %vm393_vm0, %v10008_v33 }
 0x77d   : > { %v4618_v29 = vpop.f32.mrf.mxu2  ;;  %v4649_v49 = vadd.f32 %v4648_v8, %v4536_v3 }
 0x77e   : > { %v4619_v6 = vadd.f32 %v4618_v29, %v4506_v59  ;;  %v4515_v29 = vadd.f32 %v9894_v26, %v9782_v7 }
 0x77f   : > { %v4706_v39 = vmax.f32 %v4649_v49, 0.0 }
 0x780   : > { %v4696_v18 = vmax.f32 %v4619_v6, 0.0  ;;  %v10025_v54 = vld [vmem:[#allocation2 + $0xf0] sm:$0xff] }
 0x781   : > { %4738 = vst.msk [vmem:[#allocation2 + $0xf9] sm:$0xff] %vm393_vm0, %v4706_v39  ;;  %v10021_v9 = vld [vmem:[#allocation2 + $0x79] sm:$0xff] }
 0x782   : > { %v10023_v21 = vld [vmem:[#allocation2 + $0x78] sm:$0xff]  ;;  %4728 = vst.msk [vmem:[#allocation2 + $0x81] sm:$0xff] %vm393_vm0, %v4696_v18  ;;  %4927 = vrot.lane.b32.xlu0 %v10021_v9, %s11246_s9 }
 0x783   : > { %4821 = vst.msk [vmem:[#allocation3 + $0xa0] sm:$0xff] %vm393_vm0, %v10023_v21 }
 0x784   : > { %v4651_v36 = vpop.f32.mrf.mxu3  ;;  %4831 = vst.msk [vmem:[#allocation3 + $0x140] sm:$0xff] %vm393_vm0, %v10025_v54 }
 0x785   : > { %v4621_v14 = vpop.f32.mrf.mxu2  ;;  %v4652_v23 = vadd.f32 %v4651_v36, %v4539_v41  ;;  %v4548_v36 = vadd.f32 %v9894_v26, %v9850_v28 }
 0x786   : > { %v4622_v31 = vadd.f32 %v4621_v14, %v4509_v51  ;;  %v4780_v14 = vld [vmem:[#allocation2 + $0x8] sm:$0xff] }
 0x787   : > { %v4707_v42 = vmax.f32 %v4652_v23, 0.0  ;;  %v4518_v23 = vadd.f32 %v9894_v26, %v9787_v13  ;;  %4812 = vst.msk [vmem:[#allocation3 + $0x10] sm:$0xff] %vm393_vm0, %v4780_v14 }
 0x788   : > { %v4697_v25 = vmax.f32 %v4622_v31, 0.0  ;;  %v10046_v48 = vld [vmem:[#allocation2 + $0xf8] sm:$0xff] }
 0x789   : > { %4739 = vst.msk [vmem:[#allocation2 + $0x109] sm:$0xff] %vm393_vm0, %v4707_v42  ;;  %v10039_v20 = vld [vmem:[#allocation2 + $0x81] sm:$0xff] }
 0x78a   : > { %4729 = vst.msk [vmem:[#allocation2 + $0x91] sm:$0xff] %vm393_vm0, %v4697_v25  ;;  %4929 = vrot.lane.b32.xlu1 %v10039_v20, %s11246_s9  ;;  %v10044_v47 = vld [vmem:[#allocation2 + $0x80] sm:$0xff] }
 0x78b   : > { %4822 = vst.msk [vmem:[#allocation3 + $0xb0] sm:$0xff] %vm393_vm0, %v10044_v47 }
 0x78c   : > { %v4654_v4 = vpop.f32.mrf.mxu3  ;;  %4832 = vst.msk [vmem:[#allocation3 + $0x150] sm:$0xff] %vm393_vm0, %v10046_v48 }
 0x78d   : > { %v4624_v43 = vpop.f32.mrf.mxu2  ;;  %v4655_v11 = vadd.f32 %v4654_v4, %v4542_v32  ;;  %v4910_v32 = vpop.permute.xlu0 %4909 }
 0x78e   : > { %v4625_v60 = vadd.f32 %v4624_v43, %v4512_v62  ;;  %5004 = vst.msk [vmem:[#allocation3 + $0x10] sm:$0xff] %vm766_vm2, %v4910_v32 }
 0x78f   : > { %v4708_v27 = vmax.f32 %v4655_v11, 0.0 }
 0x790   : > { %v4698_v3 = vmax.f32 %v4625_v60, 0.0  ;;  %v10061_v8 = vld [vmem:[#allocation2 + $0x108] sm:$0xff]  ;;  %v4551_v60 = vadd.f32 %v9894_v26, %v9856_v15 }
 0x791   : > { %4740 = vst.msk [vmem:[#allocation2 + $0x111] sm:$0xff] %vm393_vm0, %v4708_v27  ;;  %v10057_v59 = vld [vmem:[#allocation2 + $0x91] sm:$0xff]  ;;  %v4521_v27 = vadd.f32 %v9894_v26, %v9792_v2  ;;  %v10114_v15 = vld [vmem:[#allocation2 + $0xc9] sm:$0xff] }
 0x792   : > { %v10059_v37 = vld [vmem:[#allocation2 + $0x90] sm:$0xff]  ;;  %4730 = vst.msk [vmem:[#allocation2 + $0x99] sm:$0xff] %vm393_vm0, %v4698_v3  ;;  %4931 = vrot.lane.b32.xlu2 %v10057_v59, %s11246_s9 }
 0x793   : > { %4823 = vst.msk [vmem:[#allocation3 + $0xc0] sm:$0xff] %vm393_vm0, %v10059_v37 }
 0x794   : > { %v4657_v49 = vpop.f32.mrf.mxu3  ;;  %4833 = vst.msk [vmem:[#allocation3 + $0x160] sm:$0xff] %vm393_vm0, %v10061_v8 }
 0x795   : > { %v4627_v30 = vpop.f32.mrf.mxu2  ;;  %v4658_v6 = vadd.f32 %v4657_v49, %v4545_v45 }
 0x796   : > { %v4628_v39 = vadd.f32 %v4627_v30, %v4515_v29 }
 0x797   : > { %v4709_v18 = vmax.f32 %v4658_v6, 0.0 }
 0x798   : > { %v4699_v41 = vmax.f32 %v4628_v39, 0.0  ;;  %v10082_v7 = vld [vmem:[#allocation2 + $0x110] sm:$0xff] }
 0x799   : > { %4741 = vst.msk [vmem:[#allocation2 + $0x121] sm:$0xff] %vm393_vm0, %v4709_v18  ;;  %v10075_v51 = vld [vmem:[#allocation2 + $0x99] sm:$0xff] }
 0x79a   : > { %4731 = vst.msk [vmem:[#allocation2 + $0xa9] sm:$0xff] %vm393_vm0, %v4699_v41  ;;  %4933 = vrot.lane.b32.xlu0 %v10075_v51, %s11246_s9  ;;  %v10080_v57 = vld [vmem:[#allocation2 + $0x98] sm:$0xff] }
 0x79b   : > { %4824 = vst.msk [vmem:[#allocation3 + $0xd0] sm:$0xff] %vm393_vm0, %v10080_v57 }
 0x79c   : > { %v4660_v31 = vpop.f32.mrf.mxu3  ;;  %4834 = vst.msk [vmem:[#allocation3 + $0x170] sm:$0xff] %vm393_vm0, %v10082_v7 }
 0x79d   : > { %v4630_v42 = vpop.f32.mrf.mxu2  ;;  %v4661_v25 = vadd.f32 %v4660_v31, %v4548_v36  ;;  %v4554_v36 = vadd.f32 %v9894_v26, %v9861_v10  ;;  %v4861_v10 = vld [vmem:[#allocation2 + $0xd9] sm:$0xff] }
 0x79e   : > { %v4631_v62 = vadd.f32 %v4630_v42, %v4518_v23 }
 0x79f   : > { %v4710_v28 = vmax.f32 %v4661_v25, 0.0  ;;  %v4863_v25 = vld [vmem:[#allocation2 + $0xf1] sm:$0xff] }
 0x7a0   : > { %v4700_v4 = vmax.f32 %v4631_v62, 0.0  ;;  %v10099_v13 = vld [vmem:[#allocation2 + $0x120] sm:$0xff] }
 0x7a1   : > { %4742 = vst.msk [vmem:[#allocation2 + $0x129] sm:$0xff] %vm393_vm0, %v4710_v28  ;;  %v10095_v43 = vld [vmem:[#allocation2 + $0xa9] sm:$0xff] }
 0x7a2   : > { %v10097_v11 = vld [vmem:[#allocation2 + $0xa8] sm:$0xff]  ;;  %4732 = vst.msk [vmem:[#allocation2 + $0xb1] sm:$0xff] %vm393_vm0, %v4700_v4  ;;  %4935 = vrot.lane.b32.xlu1 %v10095_v43, %s11246_s9  ;;  %v4557_v4 = vadd.f32 %v9894_v26, %v9865_v19  ;;  %v4864_v19 = vld [vmem:[#allocation2 + $0xf9] sm:$0xff] }
 0x7a3   : > { %4825 = vst.msk [vmem:[#allocation3 + $0xe0] sm:$0xff] %vm393_vm0, %v10097_v11 }
 0x7a4   : > { %v4914_v3 = vpop.permute.xlu2 %4913  ;;  %v4663_v45 = vpop.f32.mrf.mxu3  ;;  %4835 = vst.msk [vmem:[#allocation3 + $0x180] sm:$0xff] %vm393_vm0, %v10099_v13 }
 0x7a5   : > { %5006 = vst.msk [vmem:[#allocation3 + $0x30] sm:$0xff] %vm766_vm2, %v4914_v3  ;;  %v4633_v29 = vpop.f32.mrf.mxu2  ;;  %v4664_v49 = vadd.f32 %v4663_v45, %v4551_v60 }
 0x7a6   : > { %v4634_v30 = vadd.f32 %v4633_v29, %v4521_v27  ;;  %v4866_v29 = vld [vmem:[#allocation2 + $0x111] sm:$0xff] }
 0x7a7   : > { %v4711_v6 = vmax.f32 %v4664_v49, 0.0  ;;  %v4862_v49 = vld [vmem:[#allocation2 + $0xe1] sm:$0xff] }
 0x7a8   : > { %v4701_v39 = vmax.f32 %v4634_v30, 0.0  ;;  %v10125_v41 = vld [vmem:[#allocation2 + $0x128] sm:$0xff] }
 0x7a9   : > { %4743 = vst.msk [vmem:[#allocation2 + $0x139] sm:$0xff] %vm393_vm0, %v4711_v6  ;;  %v10116_v18 = vld [vmem:[#allocation2 + $0xb1] sm:$0xff]  ;;  %v4560_v6 = vadd.f32 %v9894_v26, %v9869_v46  ;;  %v4563_v46 = vadd.f32 %v9894_v26, %v9873_v40  ;;  %v4566_v40 = vadd.f32 %v9894_v26, %v9877_v0  ;;  %v4569_v0 = vadd.f32 %v9894_v26, %v9882_v22 }
 0x7aa   : > { %4733 = vst.msk [vmem:[#allocation2 + $0xc1] sm:$0xff] %vm393_vm0, %v4701_v39  ;;  %4941 = vrot.lane.b32.xlu1 %v10114_v15, %s11246_s9  ;;  %4937 = vrot.lane.b32.xlu2 %v10116_v18, %s11246_s9  ;;  %v10123_v2 = vld [vmem:[#allocation2 + $0xb0] sm:$0xff]  ;;  %v4572_v22 = vadd.f32 %v9894_v26, %v9887_v56 }
 0x7ab   : > { %4826 = vst.msk [vmem:[#allocation3 + $0xf0] sm:$0xff] %vm393_vm0, %v10123_v2  ;;  %v10222_v56 = vld [vmem:[#allocation2 + $0x32] sm:$0xff] }
 0x7ac   : > { %v4666_v14 = vpop.f32.mrf.mxu3  ;;  %4836 = vst.msk [vmem:[#allocation3 + $0x190] sm:$0xff] %vm393_vm0, %v10125_v41 }
 0x7ad   : > { %v4667_v23 = vadd.f32 %v4666_v14, %v4554_v36 }
 0x7af   : > { %v4712_v31 = vmax.f32 %v4667_v23, 0.0 }
 0x7b0   : > { %v10133_v42 = vld [vmem:[#allocation2 + $0x138] sm:$0xff] }
 0x7b1   : > { %4744 = vst.msk [vmem:[#allocation2 + $0x141] sm:$0xff] %vm393_vm0, %v4712_v31  ;;  %v10136_v32 = vld [vmem:[#allocation2 + $0xc1] sm:$0xff] }
 0x7b2   : > { %4947 = vrot.lane.b32.xlu1 %v4863_v25, %s11246_s9  ;;  %4939 = vrot.lane.b32.xlu0 %v10136_v32, %s11246_s9  ;;  %v10141_v62 = vld [vmem:[#allocation2 + $0xc8] sm:$0xff]  ;;  %v10143_v28 = vld [vmem:[#allocation2 + $0xc0] sm:$0xff]  ;;  %4837 = vst.msk [vmem:[#allocation3 + $0x1a0] sm:$0xff] %vm393_vm0, %v10133_v42 }
 0x7b3   : > { %4943 = vrot.lane.b32.xlu2 %v4861_v10, %s11246_s9  ;;  %4828 = vst.msk [vmem:[#allocation3 + $0x110] sm:$0xff] %vm393_vm0, %v10141_v62  ;;  %v4869_v25 = vld [vmem:[#allocation2 + $0x139] sm:$0xff]  ;;  %v4865_v10 = vld [vmem:[#allocation2 + $0x109] sm:$0xff] }
 0x7b4   : > { %v4912_v60 = vpop.permute.xlu1 %4911  ;;  %v4669_v27 = vpop.f32.mrf.mxu3  ;;  %4827 = vst.msk [vmem:[#allocation3 + $0x100] sm:$0xff] %vm393_vm0, %v10143_v28 }
 0x7b5   : > { %5005 = vst.msk [vmem:[#allocation3 + $0x20] sm:$0xff] %vm766_vm2, %v4912_v60  ;;  %v4670_v3 = vadd.f32 %v4669_v27, %v4557_v4  ;;  %v4867_v4 = vld [vmem:[#allocation2 + $0x121] sm:$0xff] }
 0x7b7   : > { %v4713_v45 = vmax.f32 %v4670_v3, 0.0 }
 0x7b8   : > { %v10156_v30 = vld [vmem:[#allocation2 + $0x140] sm:$0xff] }
 0x7b9   : > { %4745 = vst.msk [vmem:[#allocation2 + $0x151] sm:$0xff] %vm393_vm0, %v4713_v45 }
 0x7ba   : > { %4953 = vrot.lane.b32.xlu1 %v4866_v29, %s11246_s9  ;;  %4945 = vrot.lane.b32.xlu0 %v4862_v49, %s11246_s9  ;;  %4838 = vst.msk [vmem:[#allocation3 + $0x1b0] sm:$0xff] %vm393_vm0, %v10156_v30  ;;  %v4868_v49 = vld [vmem:[#allocation2 + $0x129] sm:$0xff] }
 0x7bb   : > { %4949 = vrot.lane.b32.xlu2 %v4864_v19, %s11246_s9 }
 0x7bc   : > { %v4920_v39 = vpop.permute.xlu2 %4919  ;;  %v4672_v36 = vpop.f32.mrf.mxu3 }
 0x7bd   : > { %5009 = vst.msk [vmem:[#allocation3 + $0x60] sm:$0xff] %vm766_vm2, %v4920_v39  ;;  %v4673_v14 = vadd.f32 %v4672_v36, %v4560_v6  ;;  %v4870_v6 = vld [vmem:[#allocation2 + $0x141] sm:$0xff] }
 0x7bf   : > { %v4714_v23 = vmax.f32 %v4673_v14, 0.0 }
 0x7c0   : > { %v10166_v31 = vld [vmem:[#allocation2 + $0x150] sm:$0xff] }
 0x7c1   : > { %4746 = vst.msk [vmem:[#allocation2 + $0x159] sm:$0xff] %vm393_vm0, %v4714_v23 }
 0x7c2   : > { %4959 = vrot.lane.b32.xlu1 %v4869_v25, %s11246_s9  ;;  %4951 = vrot.lane.b32.xlu0 %v4865_v10, %s11246_s9  ;;  %4839 = vst.msk [vmem:[#allocation3 + $0x1c0] sm:$0xff] %vm393_vm0, %v10166_v31  ;;  %v5035_v25 = vld [vmem:[#allocation2 + $0x2] sm:$0xff] }
 0x7c3   : > { %4955 = vrot.lane.b32.xlu2 %v4867_v4, %s11246_s9 }
 0x7c4   : > { %v4916_v60 = vpop.permute.xlu0 %4915  ;;  %v4675_v27 = vpop.f32.mrf.mxu3 }
 0x7c5   : > { %5007 = vst.msk [vmem:[#allocation3 + $0x40] sm:$0xff] %vm766_vm2, %v4916_v60  ;;  %v4676_v3 = vadd.f32 %v4675_v27, %v4563_v46  ;;  %v4871_v46 = vld [vmem:[#allocation2 + $0x151] sm:$0xff] }
 0x7c7   : > { %v4715_v45 = vmax.f32 %v4676_v3, 0.0 }
 0x7c8   : > { %v4872_v29 = vld [vmem:[#allocation2 + $0x159] sm:$0xff] }
 0x7c9   : > { %4747 = vst.msk [vmem:[#allocation2 + $0x169] sm:$0xff] %vm393_vm0, %v4715_v45  ;;  %v10178_v19 = vld [vmem:[#allocation2 + $0x158] sm:$0xff] }
 0x7ca   : > { %4965 = vrot.lane.b32.xlu1 %v4872_v29, %s11246_s9  ;;  %4957 = vrot.lane.b32.xlu0 %v4868_v49, %s11246_s9  ;;  %4840 = vst.msk [vmem:[#allocation3 + $0x1d0] sm:$0xff] %vm393_vm0, %v10178_v19  ;;  %v5036_v49 = vld [vmem:[#allocation2 + $0xa] sm:$0xff] }
 0x7cb   : > { %4961 = vrot.lane.b32.xlu2 %v4870_v6, %s11246_s9  ;;  %v10200_v6 = vld [vmem:[#allocation2 + $0x22] sm:$0xff] }
 0x7cc   : > { %v4918_v39 = vpop.permute.xlu1 %4917  ;;  %v4678_v36 = vpop.f32.mrf.mxu3 }
 0x7cd   : > { %5008 = vst.msk [vmem:[#allocation3 + $0x50] sm:$0xff] %vm766_vm2, %v4918_v39  ;;  %v4679_v14 = vadd.f32 %v4678_v36, %v4566_v40 }
 0x7cf   : > { %v4716_v23 = vmax.f32 %v4679_v14, 0.0 }
 0x7d0   : > { %v4873_v10 = vld [vmem:[#allocation2 + $0x169] sm:$0xff] }
 0x7d1   : > { %v10188_v4 = vld [vmem:[#allocation2 + $0x168] sm:$0xff]  ;;  %4748 = vst.msk [vmem:[#allocation2 + $0x171] sm:$0xff] %vm393_vm0, %v4716_v23 }
 0x7d2   : > { %5099 = vrot.lane.b32.xlu1 %v5035_v25, %s11252_s0  ;;  %4963 = vrot.lane.b32.xlu0 %v4871_v46, %s11246_s9  ;;  %4841 = vst.msk [vmem:[#allocation3 + $0x1e0] sm:$0xff] %vm393_vm0, %v10188_v4  ;;  %v10214_v25 = vld [vmem:[#allocation2 + $0x1a] sm:$0xff] }
 0x7d3   : > { %4967 = vrot.lane.b32.xlu2 %v4873_v10, %s11246_s9  ;;  %v10216_v10 = vld [vmem:[#allocation2 + $0x4a] sm:$0xff]  ;;  %v10227_v46 = vld [vmem:[#allocation2 + $0x3a] sm:$0xff] }
 0x7d4   : > { %v4926_v60 = vpop.permute.xlu2 %4925  ;;  %v4681_v27 = vpop.f32.mrf.mxu3 }
 0x7d5   : > { %5012 = vst.msk [vmem:[#allocation3 + $0x90] sm:$0xff] %vm766_vm2, %v4926_v60  ;;  %v4682_v3 = vadd.f32 %v4681_v27, %v4569_v0  ;;  %v10229_v0 = vld [vmem:[#allocation2 + $0x6a] sm:$0xff]  ;;  %v10235_v60 = vld [vmem:[#allocation2 + $0x52] sm:$0xff] }
 0x7d7   : > { %v4717_v45 = vmax.f32 %v4682_v3, 0.0  ;;  %v10240_v3 = vld [vmem:[#allocation2 + $0x62] sm:$0xff] }
 0x7d8   : > { %v4874_v29 = vld [vmem:[#allocation2 + $0x171] sm:$0xff] }
 0x7d9   : > { %4749 = vst.msk [vmem:[#allocation2 + $0x181] sm:$0xff] %vm393_vm0, %v4717_v45  ;;  %v10202_v40 = vld [vmem:[#allocation2 + $0x170] sm:$0xff] }
 0x7da   : > { %5105 = vrot.lane.b32.xlu1 %v10200_v6, %s11252_s0  ;;  %4969 = vrot.lane.b32.xlu0 %v4874_v29, %s11246_s9  ;;  %4842 = vst.msk [vmem:[#allocation3 + $0x1f0] sm:$0xff] %vm393_vm0, %v10202_v40  ;;  %v10242_v45 = vld [vmem:[#allocation2 + $0x92] sm:$0xff]  ;;  %v10248_v29 = vld [vmem:[#allocation2 + $0x7a] sm:$0xff]  ;;  %s11317_s9 = smov 40  }
 0x7db   : > { %5101 = vrot.lane.b32.xlu2 %v5036_v49, %s11252_s0  ;;  %11313 = vst [vmem:[#allocation9_spill] sm:$0xff] %v10242_v45 }
 0x7dc   : > { %v4922_v39 = vpop.permute.xlu0 %4921  ;;  %v4684_v36 = vpop.f32.mrf.mxu3 }
 0x7dd   : > { %5010 = vst.msk [vmem:[#allocation3 + $0x70] sm:$0xff] %vm766_vm2, %v4922_v39  ;;  %v4685_v14 = vadd.f32 %v4684_v36, %v4572_v22  ;;  %v10253_v22 = vld [vmem:[#allocation2 + $0x82] sm:$0xff]  ;;  %v5050_v39 = vld [vmem:[#allocation2 + $0xb2] sm:$0xff]  ;;  %v10258_v36 = vld [vmem:[#allocation2 + $0x9a] sm:$0xff] }
 0x7de   : > { %11314 = vst [vmem:[#allocation10_spill] sm:$0xff] %v10258_v36 }
 0x7df   : > { %v4718_v23 = vmax.f32 %v4685_v14, 0.0 }
 0x7e1   : > { %4750 = vst.msk [vmem:[#allocation2 + $0x189] sm:$0xff] %vm393_vm0, %v4718_v23  ;;  %v10263_v23 = vld [vmem:[#allocation2 + $0xaa] sm:$0xff] }
 0x7e2   : > { %5103 = vrot.lane.b32.xlu0 %v10214_v25, %s11252_s0  ;;  %5111 = vrot.lane.b32.xlu1 %v10216_v10, %s11252_s0  ;;  %11315 = vst [vmem:[#allocation7_spill] sm:$0xff] %v10263_v23 }
 0x7e3   : > { %5107 = vrot.lane.b32.xlu2 %v10222_v56, %s11252_s0 }
 0x7e4   : > { %v4924_v26 = vpop.permute.xlu1 %4923 }
 0x7e5   : > { %5011 = vst.msk [vmem:[#allocation3 + $0x80] sm:$0xff] %vm766_vm2, %v4924_v26  ;;  %v5053_v26 = vld [vmem:[#allocation2 + $0xda] sm:$0xff] }
 0x7ea   : > { %5109 = vrot.lane.b32.xlu0 %v10227_v46, %s11252_s0  ;;  %5117 = vrot.lane.b32.xlu1 %v10229_v0, %s11252_s0 }
 0x7eb   : > { %5113 = vrot.lane.b32.xlu2 %v10235_v60, %s11252_s0 }
 0x7ec   : > { %v4932_v27 = vpop.permute.xlu2 %4931 }
 0x7ed   : > { %5015 = vst.msk [vmem:[#allocation3 + $0xc0] sm:$0xff] %vm766_vm2, %v4932_v27  ;;  %v5051_v27 = vld [vmem:[#allocation2 + $0xc2] sm:$0xff] }
 0x7f2   : > { %5115 = vrot.lane.b32.xlu0 %v10240_v3, %s11252_s0  ;;  %5123 = vrot.lane.b32.xlu1 %v10242_v45, %s11252_s0  ;;  %v5056_v45 = vld [vmem:[#allocation2 + $0xfa] sm:$0xff] }
 0x7f3   : > { %5119 = vrot.lane.b32.xlu2 %v10248_v29, %s11252_s0 }
 0x7f4   : > { %v4928_v49 = vpop.permute.xlu0 %4927 }
 0x7f5   : > { %5013 = vst.msk [vmem:[#allocation3 + $0xa0] sm:$0xff] %vm766_vm2, %v4928_v49 }
 0x7fa   : > { %5121 = vrot.lane.b32.xlu0 %v10253_v22, %s11252_s0  ;;  %5129 = vrot.lane.b32.xlu1 %v5050_v39, %s11252_s0  ;;  %v5052_v39 = vld [vmem:[#allocation2 + $0xca] sm:$0xff] }
 0x7fb   : > { %5125 = vrot.lane.b32.xlu2 %v10258_v36, %s11252_s0 }
 0x7fc   : > { %v4930_v14 = vpop.permute.xlu1 %4929 }
 0x7fd   : > { %5014 = vst.msk [vmem:[#allocation3 + $0xb0] sm:$0xff] %vm766_vm2, %v4930_v14  ;;  %v5054_v14 = vld [vmem:[#allocation2 + $0xe2] sm:$0xff] }
 0x802   : > { %5127 = vrot.lane.b32.xlu0 %v10263_v23, %s11252_s0  ;;  %5135 = vrot.lane.b32.xlu1 %v5053_v26, %s11252_s0  ;;  %v5055_v26 = vld [vmem:[#allocation2 + $0xf2] sm:$0xff] }
 0x803   : > { %5131 = vrot.lane.b32.xlu2 %v5051_v27, %s11252_s0  ;;  %v5059_v27 = vld [vmem:[#allocation2 + $0x122] sm:$0xff] }
 0x804   : > { %v4938_v49 = vpop.permute.xlu2 %4937 }
 0x805   : > { %5018 = vst.msk [vmem:[#allocation3 + $0xf0] sm:$0xff] %vm766_vm2, %v4938_v49  ;;  %v5057_v49 = vld [vmem:[#allocation2 + $0x10a] sm:$0xff] }
 0x80a   : > { %5133 = vrot.lane.b32.xlu0 %v5052_v39, %s11252_s0  ;;  %5141 = vrot.lane.b32.xlu1 %v5056_v45, %s11252_s0 }
 0x80b   : > { %5137 = vrot.lane.b32.xlu2 %v5054_v14, %s11252_s0  ;;  %v5058_v14 = vld [vmem:[#allocation2 + $0x112] sm:$0xff] }
 0x80c   : > { %v4934_v36 = vpop.permute.xlu0 %4933 }
 0x80d   : > { %5016 = vst.msk [vmem:[#allocation3 + $0xd0] sm:$0xff] %vm766_vm2, %v4934_v36  ;;  %v4944_v23 = vpop.permute.xlu2 %4943  ;;  %v5062_v36 = vld [vmem:[#allocation2 + $0x142] sm:$0xff] }
 0x80e   : > { %5021 = vst.msk [vmem:[#allocation3 + $0x120] sm:$0xff] %vm766_vm2, %v4944_v23  ;;  %v5060_v23 = vld [vmem:[#allocation2 + $0x12a] sm:$0xff] }
 0x812   : > { %5139 = vrot.lane.b32.xlu0 %v5055_v26, %s11252_s0  ;;  %5147 = vrot.lane.b32.xlu1 %v5059_v27, %s11252_s0 }
 0x813   : > { %5143 = vrot.lane.b32.xlu2 %v5057_v49, %s11252_s0  ;;  %v5061_v49 = vld [vmem:[#allocation2 + $0x13a] sm:$0xff] }
 0x814   : > { %v4936_v39 = vpop.permute.xlu1 %4935 }
 0x815   : > { %5017 = vst.msk [vmem:[#allocation3 + $0xe0] sm:$0xff] %vm766_vm2, %v4936_v39  ;;  %v4950_v45 = vpop.permute.xlu2 %4949  ;;  %v5065_v39 = vld [vmem:[#allocation2 + $0x16a] sm:$0xff] }
 0x816   : > { %5024 = vst.msk [vmem:[#allocation3 + $0x150] sm:$0xff] %vm766_vm2, %v4950_v45  ;;  %v5063_v45 = vld [vmem:[#allocation2 + $0x152] sm:$0xff] }
 0x81a   : > { %5145 = vrot.lane.b32.xlu0 %v5058_v14, %s11252_s0  ;;  %5153 = vrot.lane.b32.xlu1 %v5062_v36, %s11252_s0 }
 0x81b   : > { %5149 = vrot.lane.b32.xlu2 %v5060_v23, %s11252_s0 }
 0x81c   : > { %v4942_v26 = vpop.permute.xlu1 %4941 }
 0x81d   : > { %5020 = vst.msk [vmem:[#allocation3 + $0x110] sm:$0xff] %vm766_vm2, %v4942_v26  ;;  %v4956_v27 = vpop.permute.xlu2 %4955  ;;  %v5064_v26 = vld [vmem:[#allocation2 + $0x15a] sm:$0xff] }
 0x81e   : > { %5027 = vst.msk [vmem:[#allocation3 + $0x180] sm:$0xff] %vm766_vm2, %v4956_v27  ;;  %v5066_v27 = vld [vmem:[#allocation2 + $0x172] sm:$0xff] }
 0x822   : > { %5151 = vrot.lane.b32.xlu0 %v5061_v49, %s11252_s0  ;;  %5159 = vrot.lane.b32.xlu1 %v5065_v39, %s11252_s0 }
 0x823   : > { %5155 = vrot.lane.b32.xlu2 %v5063_v45, %s11252_s0 }
 0x824   : > { %v4948_v14 = vpop.permute.xlu1 %4947  ;;  %v4940_v36 = vpop.permute.xlu0 %4939 }
 0x825   : > { %5023 = vst.msk [vmem:[#allocation3 + $0x140] sm:$0xff] %vm766_vm2, %v4948_v14  ;;  %v4962_v23 = vpop.permute.xlu2 %4961 }
 0x826   : > { %5019 = vst.msk [vmem:[#allocation3 + $0x100] sm:$0xff] %vm766_vm2, %v4940_v36 }
 0x827   : > { %5030 = vst.msk [vmem:[#allocation3 + $0x1b0] sm:$0xff] %vm766_vm2, %v4962_v23 }
 0x82a   : > { %5157 = vrot.lane.b32.xlu0 %v5064_v26, %s11252_s0  ;;  %5293 = vrot.lane.b32.xlu1 %v9919_v12, %s11279_s16 }
 0x82b   : > { %5161 = vrot.lane.b32.xlu2 %v5066_v27, %s11252_s0 }
 0x82c   : > { %v4954_v49 = vpop.permute.xlu1 %4953  ;;  %v4946_v39 = vpop.permute.xlu0 %4945 }
 0x82d   : > { %5026 = vst.msk [vmem:[#allocation3 + $0x170] sm:$0xff] %vm766_vm2, %v4954_v49  ;;  %v4968_v45 = vpop.permute.xlu2 %4967 }
 0x82e   : > { %5022 = vst.msk [vmem:[#allocation3 + $0x130] sm:$0xff] %vm766_vm2, %v4946_v39 }
 0x82f   : > { %5033 = vst.msk [vmem:[#allocation3 + $0x1e0] sm:$0xff] %vm766_vm2, %v4968_v45 }
 0x832   : > { %5291 = vrot.lane.b32.xlu0 %v9907_v50, %s11279_s16  ;;  %5299 = vrot.lane.b32.xlu1 %v9957_v17, %s11279_s16 }
 0x833   : > { %5295 = vrot.lane.b32.xlu2 %v9931_v35, %s11279_s16 }
 0x834   : > { %v4960_v12 = vpop.permute.xlu1 %4959  ;;  %v4952_v14 = vpop.permute.xlu0 %4951 }
 0x835   : > { %5029 = vst.msk [vmem:[#allocation3 + $0x1a0] sm:$0xff] %vm766_vm2, %v4960_v12  ;;  %v5102_v36 = vpop.permute.xlu2 %5101 }
 0x836   : > { %5025 = vst.msk [vmem:[#allocation3 + $0x160] sm:$0xff] %vm766_vm2, %v4952_v14 }
 0x837   : > { %5196 = vst.msk [vmem:[#allocation3 + $0x10] sm:$0xff] %vm959_vm3, %v5102_v36 }
 0x83a   : > { %5297 = vrot.lane.b32.xlu0 %v9943_v55, %s11279_s16  ;;  %5305 = vrot.lane.b32.xlu1 %v10003_v5, %s11279_s16 }
 0x83b   : > { %5301 = vrot.lane.b32.xlu2 %v9971_v34, %s11279_s16 }
 0x83c   : > { %v4966_v50 = vpop.permute.xlu1 %4965  ;;  %v4958_v23 = vpop.permute.xlu0 %4957 }
 0x83d   : > { %5032 = vst.msk [vmem:[#allocation3 + $0x1d0] sm:$0xff] %vm766_vm2, %v4966_v50  ;;  %v5108_v26 = vpop.permute.xlu2 %5107 }
 0x83e   : > { %5028 = vst.msk [vmem:[#allocation3 + $0x190] sm:$0xff] %vm766_vm2, %v4958_v23 }
 0x83f   : > { %5199 = vst.msk [vmem:[#allocation3 + $0x40] sm:$0xff] %vm959_vm3, %v5108_v26 }
 0x842   : > { %5303 = vrot.lane.b32.xlu0 %v9985_v63, %s11279_s16  ;;  %5311 = vrot.lane.b32.xlu1 %v10059_v37, %s11279_s16 }
 0x843   : > { %5307 = vrot.lane.b32.xlu2 %v10023_v21, %s11279_s16 }
 0x844   : > { %v5100_v27 = vpop.permute.xlu1 %5099  ;;  %v4964_v49 = vpop.permute.xlu0 %4963 }
 0x845   : > { %5195 = vst.msk [vmem:[#allocation3] sm:$0xff] %vm959_vm3, %v5100_v27  ;;  %v5114_v39 = vpop.permute.xlu2 %5113 }
 0x846   : > { %5031 = vst.msk [vmem:[#allocation3 + $0x1c0] sm:$0xff] %vm766_vm2, %v4964_v49  ;;  %v5258_v49 = vld [vmem:[#allocation2 + $0x188] sm:$0xff] }
 0x847   : > { %5202 = vst.msk [vmem:[#allocation3 + $0x70] sm:$0xff] %vm959_vm3, %v5114_v39  ;;  %v5257_v39 = vld [vmem:[#allocation2 + $0x180] sm:$0xff] }
 0x84a   : > { %5309 = vrot.lane.b32.xlu0 %v10044_v47, %s11279_s16  ;;  %5317 = vrot.lane.b32.xlu1 %v10123_v2, %s11279_s16 }
 0x84b   : > { %5313 = vrot.lane.b32.xlu2 %v10080_v57, %s11279_s16 }
 0x84c   : > { %v5106_v45 = vpop.permute.xlu1 %5105  ;;  %v4970_v12 = vpop.permute.xlu0 %4969 }
 0x84d   : > { %5198 = vst.msk [vmem:[#allocation3 + $0x30] sm:$0xff] %vm959_vm3, %v5106_v45  ;;  %v5120_v14 = vpop.permute.xlu2 %5119 }
 0x84e   : > { %5034 = vst.msk [vmem:[#allocation3 + $0x1f0] sm:$0xff] %vm766_vm2, %v4970_v12 }
 0x84f   : > { %5205 = vst.msk [vmem:[#allocation3 + $0xa0] sm:$0xff] %vm959_vm3, %v5120_v14 }
 0x852   : > { %5315 = vrot.lane.b32.xlu0 %v10097_v11, %s11279_s16  ;;  %5323 = vrot.lane.b32.xlu1 %v9987_v38, %s11279_s16 }
 0x853   : > { %5319 = vrot.lane.b32.xlu2 %v10143_v28, %s11279_s16 }
 0x854   : > { %v5104_v36 = vpop.permute.xlu0 %5103  ;;  %v5112_v50 = vpop.permute.xlu1 %5111 }
 0x855   : > { %5197 = vst.msk [vmem:[#allocation3 + $0x20] sm:$0xff] %vm959_vm3, %v5104_v36  ;;  %v5126_v23 = vpop.permute.xlu2 %5125 }
 0x856   : > { %5201 = vst.msk [vmem:[#allocation3 + $0x60] sm:$0xff] %vm959_vm3, %v5112_v50  ;;  %v6028_v50 = vld [vmem:[#allocation2 + $0x39] sm:$0xff] }
 0x857   : > { %5208 = vst.msk [vmem:[#allocation3 + $0xd0] sm:$0xff] %vm959_vm3, %v5126_v23  ;;  %v6029_v23 = vld [vmem:[#allocation2 + $0x49] sm:$0xff] }
 0x85a   : > { %5321 = vrot.lane.b32.xlu0 %v10141_v62, %s11279_s16  ;;  %5329 = vrot.lane.b32.xlu1 %v10046_v48, %s11279_s16 }
 0x85b   : > { %5325 = vrot.lane.b32.xlu2 %v10008_v33, %s11279_s16 }
 0x85c   : > { %v5110_v38 = vpop.permute.xlu0 %5109  ;;  %v5118_v26 = vpop.permute.xlu1 %5117 }
 0x85d   : > { %5200 = vst.msk [vmem:[#allocation3 + $0x50] sm:$0xff] %vm959_vm3, %v5110_v38  ;;  %v5132_v27 = vpop.permute.xlu2 %5131 }
 0x85e   : > { %5204 = vst.msk [vmem:[#allocation3 + $0x90] sm:$0xff] %vm959_vm3, %v5118_v26 }
 0x85f   : > { %5211 = vst.msk [vmem:[#allocation3 + $0x100] sm:$0xff] %vm959_vm3, %v5132_v27 }
 0x862   : > { %5327 = vrot.lane.b32.xlu0 %v10025_v54, %s11279_s16  ;;  %5335 = vrot.lane.b32.xlu1 %v10099_v13, %s11279_s16 }
 0x863   : > { %5331 = vrot.lane.b32.xlu2 %v10061_v8, %s11279_s16 }
 0x864   : > { %v5116_v48 = vpop.permute.xlu0 %5115  ;;  %v5124_v33 = vpop.permute.xlu1 %5123 }
 0x865   : > { %5203 = vst.msk [vmem:[#allocation3 + $0x80] sm:$0xff] %vm959_vm3, %v5116_v48  ;;  %v5138_v62 = vpop.permute.xlu2 %5137 }
 0x866   : > { %5207 = vst.msk [vmem:[#allocation3 + $0xc0] sm:$0xff] %vm959_vm3, %v5124_v33 }
 0x867   : > { %5214 = vst.msk [vmem:[#allocation3 + $0x130] sm:$0xff] %vm959_vm3, %v5138_v62 }
 0x86a   : > { %5333 = vrot.lane.b32.xlu0 %v10082_v7, %s11279_s16  ;;  %5341 = vrot.lane.b32.xlu1 %v10156_v30, %s11279_s16 }
 0x86b   : > { %5337 = vrot.lane.b32.xlu2 %v10125_v41, %s11279_s16 }
 0x86c   : > { %v5122_v54 = vpop.permute.xlu0 %5121  ;;  %v5130_v8 = vpop.permute.xlu1 %5129 }
 0x86d   : > { %5206 = vst.msk [vmem:[#allocation3 + $0xb0] sm:$0xff] %vm959_vm3, %v5122_v54  ;;  %v5144_v13 = vpop.permute.xlu2 %5143 }
 0x86e   : > { %5210 = vst.msk [vmem:[#allocation3 + $0xf0] sm:$0xff] %vm959_vm3, %v5130_v8  ;;  %v6031_v8 = vld [vmem:[#allocation2 + $0x61] sm:$0xff] }
 0x86f   : > { %5217 = vst.msk [vmem:[#allocation3 + $0x160] sm:$0xff] %vm959_vm3, %v5144_v13  ;;  %v6032_v13 = vld [vmem:[#allocation2 + $0x69] sm:$0xff] }
 0x872   : > { %5339 = vrot.lane.b32.xlu0 %v10133_v42, %s11279_s16  ;;  %5347 = vrot.lane.b32.xlu1 %v10188_v4, %s11279_s16 }
 0x873   : > { %5343 = vrot.lane.b32.xlu2 %v10166_v31, %s11279_s16 }
 0x874   : > { %v5128_v7 = vpop.permute.xlu0 %5127  ;;  %v5136_v41 = vpop.permute.xlu1 %5135 }
 0x875   : > { %5209 = vst.msk [vmem:[#allocation3 + $0xe0] sm:$0xff] %vm959_vm3, %v5128_v7  ;;  %v5150_v30 = vpop.permute.xlu2 %5149 }
 0x876   : > { %5213 = vst.msk [vmem:[#allocation3 + $0x120] sm:$0xff] %vm959_vm3, %v5136_v41 }
 0x877   : > { %5220 = vst.msk [vmem:[#allocation3 + $0x190] sm:$0xff] %vm959_vm3, %v5150_v30 }
 0x87a   : > { %5345 = vrot.lane.b32.xlu0 %v10178_v19, %s11279_s16  ;;  %5353 = vrot.lane.b32.xlu1 %v5258_v49, %s11279_s16  ;;  %v4765_v49 = vld [vmem:[%s10507_s22 + $0x70] sm:$0xff] }
 0x87b   : > { %5349 = vrot.lane.b32.xlu2 %v10202_v40, %s11279_s16 }
 0x87c   : > { %v5134_v42 = vpop.permute.xlu0 %5133  ;;  %v5142_v31 = vpop.permute.xlu1 %5141 }
 0x87d   : > { %5212 = vst.msk [vmem:[#allocation3 + $0x110] sm:$0xff] %vm959_vm3, %v5134_v42  ;;  %v5156_v4 = vpop.permute.xlu2 %5155  ;;  %v4764_v42 = vld [vmem:[%s10507_s22 + $0x68] sm:$0xff] }
 0x87e   : > { %5216 = vst.msk [vmem:[#allocation3 + $0x150] sm:$0xff] %vm959_vm3, %v5142_v31  ;;  %v6033_v31 = vld [vmem:[#allocation2 + $0x79] sm:$0xff] }
 0x87f   : > { %5223 = vst.msk [vmem:[#allocation3 + $0x1c0] sm:$0xff] %vm959_vm3, %v5156_v4  ;;  %v4763_v4 = vld [vmem:[%s10507_s22 + $0x60] sm:$0xff] }
 0x882   : > { %5351 = vrot.lane.b32.xlu0 %v5257_v39, %s11279_s16  ;;  %5487 = vrot.lane.b32.xlu1 %v9929_v44, %s11316_s21  ;;  %s11321_s16 = scalar_lea.vmem %s11105_s6, %s8151_s18 }
 0x883   : > { %5483 = vrot.lane.b32.xlu2 %v9905_v1, %s11316_s21 }
 0x884   : > { %v5140_v19 = vpop.permute.xlu0 %5139  ;;  %v5148_v40 = vpop.permute.xlu1 %5147 }
 0x885   : > { %5215 = vst.msk [vmem:[#allocation3 + $0x140] sm:$0xff] %vm959_vm3, %v5140_v19  ;;  %v5162_v45 = vpop.permute.xlu2 %5161 }
 0x886   : > { %5219 = vst.msk [vmem:[#allocation3 + $0x180] sm:$0xff] %vm959_vm3, %v5148_v40 }
 0x887   : > { %5226 = vst.msk [vmem:[#allocation3 + $0x1f0] sm:$0xff] %vm959_vm3, %v5162_v45  ;;  %v4762_v45 = vld [vmem:[%s10507_s22 + $0x58] sm:$0xff] }
 0x88a   : > { %5485 = vrot.lane.b32.xlu0 %v9917_v53, %s11316_s21  ;;  %5493 = vrot.lane.b32.xlu1 %v9969_v52, %s11316_s21 }
 0x88b   : > { %5489 = vrot.lane.b32.xlu2 %v9941_v61, %s11316_s21 }
 0x88c   : > { %v5146_v44 = vpop.permute.xlu0 %5145  ;;  %v5154_v1 = vpop.permute.xlu1 %5153 }
 0x88d   : > { %5218 = vst.msk [vmem:[#allocation3 + $0x170] sm:$0xff] %vm959_vm3, %v5146_v44  ;;  %v5296_v12 = vpop.permute.xlu2 %5295  ;;  %v4759_v44 = vld [vmem:[%s10507_s22 + $0x40] sm:$0xff] }
 0x88e   : > { %5222 = vst.msk [vmem:[#allocation3 + $0x1b0] sm:$0xff] %vm959_vm3, %v5154_v1 }
 0x88f   : > { %5389 = vst.msk [vmem:[#allocation3 + $0x20] sm:$0xff] %vm1152_vm4, %v5296_v12 }
 0x892   : > { %5491 = vrot.lane.b32.xlu0 %v9955_v24, %s11316_s21  ;;  %5499 = vrot.lane.b32.xlu1 %v10021_v9, %s11316_s21 }
 0x893   : > { %5495 = vrot.lane.b32.xlu2 %v9983_v58, %s11316_s21 }
 0x894   : > { %v5152_v53 = vpop.permute.xlu0 %5151  ;;  %v5160_v61 = vpop.permute.xlu1 %5159 }
 0x895   : > { %5221 = vst.msk [vmem:[#allocation3 + $0x1a0] sm:$0xff] %vm959_vm3, %v5152_v53  ;;  %v5302_v52 = vpop.permute.xlu2 %5301 }
 0x896   : > { %5225 = vst.msk [vmem:[#allocation3 + $0x1e0] sm:$0xff] %vm959_vm3, %v5160_v61  ;;  %v4758_v61 = vld [vmem:[%s10507_s22 + $0x38] sm:$0xff] }
 0x897   : > { %5392 = vst.msk [vmem:[#allocation3 + $0x50] sm:$0xff] %vm1152_vm4, %v5302_v52  ;;  %v4777_v52 = vld [vmem:[%s10507_s22 + $0xd0] sm:$0xff] }
 0x898   : > { %6692 = vmatpush.msrb.mxu3 %v4777_v52 }
 0x89a   : > { %5497 = vrot.lane.b32.xlu0 %v10001_v16, %s11316_s21  ;;  %5505 = vrot.lane.b32.xlu1 %v10075_v51, %s11316_s21 }
 0x89b   : > { %5501 = vrot.lane.b32.xlu2 %v10039_v20, %s11316_s21 }
 0x89c   : > { %v5158_v24 = vpop.permute.xlu0 %5157  ;;  %v5294_v58 = vpop.permute.xlu1 %5293 }
 0x89d   : > { %5224 = vst.msk [vmem:[#allocation3 + $0x1d0] sm:$0xff] %vm959_vm3, %v5158_v24  ;;  %v5308_v9 = vpop.permute.xlu2 %5307  ;;  %v6034_v24 = vld [vmem:[#allocation2 + $0x81] sm:$0xff] }
 0x89e   : > { %5388 = vst.msk [vmem:[#allocation3 + $0x10] sm:$0xff] %vm1152_vm4, %v5294_v58  ;;  %v6035_v58 = vld [vmem:[#allocation2 + $0x91] sm:$0xff] }
 0x89f   : > { %5395 = vst.msk [vmem:[#allocation3 + $0x80] sm:$0xff] %vm1152_vm4, %v5308_v9  ;;  %v4776_v9 = vld [vmem:[%s10507_s22 + $0xc8] sm:$0xff] }
 0x8a0   : > { %6693 = vmatpush.msrb.mxu3 %v4776_v9  ;;  %v5850_v9 = vld [vmem:[#allocation2 + $0xe0] sm:$0xff] }
 0x8a2   : > { %5503 = vrot.lane.b32.xlu0 %v10057_v59, %s11316_s21  ;;  %5511 = vrot.lane.b32.xlu1 %v10136_v32, %s11316_s21 }
 0x8a3   : > { %5507 = vrot.lane.b32.xlu2 %v10095_v43, %s11316_s21 }
 0x8a4   : > { %v5292_v16 = vpop.permute.xlu0 %5291  ;;  %v5300_v20 = vpop.permute.xlu1 %5299 }
 0x8a5   : > { %5387 = vst.msk [vmem:[#allocation3] sm:$0xff] %vm1152_vm4, %v5292_v16  ;;  %v5314_v51 = vpop.permute.xlu2 %5313  ;;  %v4756_v16 = vld [vmem:[%s10507_s22 + $0x28] sm:$0xff] }
 0x8a6   : > { %5391 = vst.msk [vmem:[#allocation3 + $0x40] sm:$0xff] %vm1152_vm4, %v5300_v20  ;;  %v4775_v20 = vld [vmem:[%s10507_s22 + $0xc0] sm:$0xff] }
 0x8a7   : > { %5398 = vst.msk [vmem:[#allocation3 + $0xb0] sm:$0xff] %vm1152_vm4, %v5314_v51  ;;  %6694 = vmatpush.msrb.mxu3 %v4775_v20 }
 0x8aa   : > { %5509 = vrot.lane.b32.xlu0 %v10116_v18, %s11316_s21  ;;  %5899 = vrot.lane.b32.xlu1 %v9931_v35, %s7314_s10  ;;  %v6027_v18 = vld [vmem:[#allocation2 + $0x31] sm:$0xff] }
 0x8ab   : > { %5513 = vrot.lane.b32.xlu2 %v10114_v15, %s11316_s21 }
 0x8ac   : > { %v5298_v59 = vpop.permute.xlu0 %5297  ;;  %v5306_v43 = vpop.permute.xlu1 %5305 }
 0x8ad   : > { %5390 = vst.msk [vmem:[#allocation3 + $0x30] sm:$0xff] %vm1152_vm4, %v5298_v59  ;;  %v5320_v32 = vpop.permute.xlu2 %5319 }
 0x8ae   : > { %5394 = vst.msk [vmem:[#allocation3 + $0x70] sm:$0xff] %vm1152_vm4, %v5306_v43  ;;  %v4755_v43 = vld [vmem:[%s10507_s22 + $0x20] sm:$0xff] }
 0x8af   : > { %5401 = vst.msk [vmem:[#allocation3 + $0xe0] sm:$0xff] %vm1152_vm4, %v5320_v32 }
 0x8b2   : > { %5675 = vrot.lane.b32.xlu0 %v10214_v25, %s7313_s20  ;;  %5677 = vrot.lane.b32.xlu1 %v10200_v6, %s7313_s20 }
 0x8b3   : > { %6091 = vrot.lane.b32.xlu2 %v6027_v18, %s11317_s9  ;;  %v4774_v18 = vld [vmem:[%s10507_s22 + $0xb8] sm:$0xff] }
 0x8b4   : > { %v5304_v35 = vpop.permute.xlu0 %5303  ;;  %v5312_v15 = vpop.permute.xlu1 %5311  ;;  %6695 = vmatpush.msrb.mxu3 %v4774_v18 }
 0x8b5   : > { %5393 = vst.msk [vmem:[#allocation3 + $0x60] sm:$0xff] %vm1152_vm4, %v5304_v35  ;;  %v5326_v14 = vpop.permute.xlu2 %5325  ;;  %v11318_v35 = vld [vmem:[#allocation9_spill] sm:$0xff] }
 0x8b6   : > { %5397 = vst.msk [vmem:[#allocation3 + $0xa0] sm:$0xff] %vm1152_vm4, %v5312_v15  ;;  %v4753_v15 = vld [vmem:[%s10507_s22 + $0x10] sm:$0xff] }
 0x8b7   : > { %5404 = vst.msk [vmem:[#allocation3 + $0x110] sm:$0xff] %vm1152_vm4, %v5326_v14  ;;  %v4773_v14 = vld [vmem:[%s10507_s22 + $0xb0] sm:$0xff] }
 0x8b8   : > { %6696 = vmatpush.msrb.mxu3 %v4773_v14 }
 0x8ba   : > { %6283 = vrot.lane.b32.xlu0 %v10222_v56, %s11311_s17  ;;  %6285 = vrot.lane.b32.xlu1 %v10227_v46, %s11311_s17 }
 0x8bb   : > { %5901 = vrot.lane.b32.xlu2 %v9943_v55, %s7314_s10 }
 0x8bc   : > { %v5310_v6 = vpop.permute.xlu0 %5309  ;;  %v5318_v25 = vpop.permute.xlu1 %5317 }
 0x8bd   : > { %5396 = vst.msk [vmem:[#allocation3 + $0x90] sm:$0xff] %vm1152_vm4, %v5310_v6  ;;  %v5332_v36 = vpop.permute.xlu2 %5331 }
 0x8be   : > { %5400 = vst.msk [vmem:[#allocation3 + $0xd0] sm:$0xff] %vm1152_vm4, %v5318_v25 }
 0x8bf   : > { %5407 = vst.msk [vmem:[#allocation3 + $0x140] sm:$0xff] %vm1152_vm4, %v5332_v36  ;;  %v4752_v36 = vld [vmem:[%s10507_s22 + $0x8] sm:$0xff] }
 0x8c2   : > { %6093 = vrot.lane.b32.xlu0 %v6028_v50, %s11317_s9  ;;  %6095 = vrot.lane.b32.xlu1 %v6029_v23, %s11317_s9  ;;  %v4751_v50 = vld [vmem:[%s10507_s22] sm:$0xff] }
 0x8c3   : > { %5679 = vrot.lane.b32.xlu2 %v10222_v56, %s7313_s20  ;;  %v4771_v23 = vld [vmem:[%s10507_s22 + $0xa0] sm:$0xff] }
 0x8c4   : > { %v5316_v38 = vpop.permute.xlu0 %5315  ;;  %v5324_v55 = vpop.permute.xlu1 %5323 }
 0x8c5   : > { %5399 = vst.msk [vmem:[#allocation3 + $0xc0] sm:$0xff] %vm1152_vm4, %v5316_v38  ;;  %v5338_v26 = vpop.permute.xlu2 %5337  ;;  %v6036_v38 = vld [vmem:[#allocation2 + $0x99] sm:$0xff] }
 0x8c6   : > { %5403 = vst.msk [vmem:[#allocation3 + $0x100] sm:$0xff] %vm1152_vm4, %v5324_v55  ;;  %v4770_v55 = vld [vmem:[%s10507_s22 + $0x98] sm:$0xff] }
 0x8c7   : > { %5410 = vst.msk [vmem:[#allocation3 + $0x170] sm:$0xff] %vm1152_vm4, %v5338_v26 }
 0x8ca   : > { %5903 = vrot.lane.b32.xlu0 %v9957_v17, %s7314_s10  ;;  %5905 = vrot.lane.b32.xlu1 %v9971_v34, %s7314_s10  ;;  %v6030_v17 = vld [vmem:[#allocation2 + $0x51] sm:$0xff] }
 0x8cb   : > { %6287 = vrot.lane.b32.xlu2 %v10216_v10, %s11311_s17 }
 0x8cc   : > { %v5322_v27 = vpop.permute.xlu0 %5321  ;;  %v5330_v56 = vpop.permute.xlu1 %5329 }
 0x8cd   : > { %5402 = vst.msk [vmem:[#allocation3 + $0xf0] sm:$0xff] %vm1152_vm4, %v5322_v27  ;;  %v5344_v48 = vpop.permute.xlu2 %5343 }
 0x8ce   : > { %5406 = vst.msk [vmem:[#allocation3 + $0x130] sm:$0xff] %vm1152_vm4, %v5330_v56  ;;  %v4769_v56 = vld [vmem:[%s10507_s22 + $0x90] sm:$0xff] }
 0x8cf   : > { %5413 = vst.msk [vmem:[#allocation3 + $0x1a0] sm:$0xff] %vm1152_vm4, %v5344_v48 }
 0x8d2   : > { %5681 = vrot.lane.b32.xlu0 %v10227_v46, %s7313_s20  ;;  %5683 = vrot.lane.b32.xlu1 %v10216_v10, %s7313_s20 }
 0x8d3   : > { %6097 = vrot.lane.b32.xlu2 %v6030_v17, %s11317_s9  ;;  %v4768_v17 = vld [vmem:[%s10507_s22 + $0x88] sm:$0xff] }
 0x8d4   : > { %v5328_v34 = vpop.permute.xlu0 %5327  ;;  %v5336_v33 = vpop.permute.xlu1 %5335 }
 0x8d5   : > { %5405 = vst.msk [vmem:[#allocation3 + $0x120] sm:$0xff] %vm1152_vm4, %v5328_v34  ;;  %v5350_v62 = vpop.permute.xlu2 %5349  ;;  %v11319_v34 = vld [vmem:[#allocation10_spill] sm:$0xff] }
 0x8d6   : > { %5409 = vst.msk [vmem:[#allocation3 + $0x160] sm:$0xff] %vm1152_vm4, %v5336_v33  ;;  %v11320_v33 = vld [vmem:[#allocation7_spill] sm:$0xff] }
 0x8d7   : > { %5416 = vst.msk [vmem:[#allocation3 + $0x1d0] sm:$0xff] %vm1152_vm4, %v5350_v62 }
 0x8da   : > { %6289 = vrot.lane.b32.xlu0 %v10235_v60, %s11311_s17  ;;  %6291 = vrot.lane.b32.xlu1 %v10240_v3, %s11311_s17 }
 0x8db   : > { %5907 = vrot.lane.b32.xlu2 %v9985_v63, %s7314_s10 }
 0x8dc   : > { %v5334_v10 = vpop.permute.xlu0 %5333  ;;  %v5342_v46 = vpop.permute.xlu1 %5341 }
 0x8dd   : > { %5408 = vst.msk [vmem:[#allocation3 + $0x150] sm:$0xff] %vm1152_vm4, %v5334_v10  ;;  %v5484_v54 = vpop.permute.xlu2 %5483 }
 0x8de   : > { %5412 = vst.msk [vmem:[#allocation3 + $0x190] sm:$0xff] %vm1152_vm4, %v5342_v46 }
 0x8df   : > { %5579 = vst.msk [vmem:[#allocation3] sm:$0xff] %vm1345_vm5, %v5484_v54  ;;  %v6037_v54 = vld [vmem:[#allocation2 + $0xa9] sm:$0xff] }
 0x8e2   : > { %6099 = vrot.lane.b32.xlu0 %v6031_v8, %s11317_s9  ;;  %6101 = vrot.lane.b32.xlu1 %v6032_v13, %s11317_s9  ;;  %v6038_v8 = vld [vmem:[#allocation2 + $0xb1] sm:$0xff] }
 0x8e3   : > { %5685 = vrot.lane.b32.xlu2 %v10235_v60, %s7313_s20 }
 0x8e4   : > { %v5340_v63 = vpop.permute.xlu0 %5339  ;;  %v5348_v7 = vpop.permute.xlu1 %5347 }
 0x8e5   : > { %5411 = vst.msk [vmem:[#allocation3 + $0x180] sm:$0xff] %vm1152_vm4, %v5340_v63  ;;  %v5490_v41 = vpop.permute.xlu2 %5489 }
 0x8e6   : > { %5415 = vst.msk [vmem:[#allocation3 + $0x1c0] sm:$0xff] %vm1152_vm4, %v5348_v7  ;;  %v6230_v7 = vld [vmem:[#allocation2 + $0xb2] sm:$0xff] }
 0x8e7   : > { %5582 = vst.msk [vmem:[#allocation3 + $0x30] sm:$0xff] %vm1345_vm5, %v5490_v41 }
 0x8ea   : > { %5909 = vrot.lane.b32.xlu0 %v10003_v5, %s7314_s10  ;;  %5911 = vrot.lane.b32.xlu1 %v10023_v21, %s7314_s10  ;;  %v4766_v21 = vld [vmem:[%s10507_s22 + $0x78] sm:$0xff] }
 0x8eb   : > { %6293 = vrot.lane.b32.xlu2 %v10229_v0, %s11311_s17  ;;  %6574 = vmatpush.msrb.mxu1 %v4766_v21  ;;  %v5623_v21 = vld [vmem:[#allocation2 + $0xaa] sm:$0xff] }
 0x8ec   : > { %v5346_v60 = vpop.permute.xlu0 %5345  ;;  %v5354_v30 = vpop.permute.xlu1 %5353 }
 0x8ed   : > { %5414 = vst.msk [vmem:[#allocation3 + $0x1b0] sm:$0xff] %vm1152_vm4, %v5346_v60  ;;  %v5496_v5 = vpop.permute.xlu2 %5495  ;;  %6575 = vmatpush.msrb.mxu1 %v4765_v49 }
 0x8ee   : > { %5418 = vst.msk [vmem:[#allocation3 + $0x1f0] sm:$0xff] %vm1152_vm4, %v5354_v30 }
 0x8ef   : > { %5585 = vst.msk [vmem:[#allocation3 + $0x60] sm:$0xff] %vm1345_vm5, %v5496_v5  ;;  %6576 = vmatpush.msrb.mxu1 %v4764_v42 }
 0x8f1   : > { %6577 = vmatpush.msrb.mxu1 %v4763_v4 }
 0x8f2   : > { %5687 = vrot.lane.b32.xlu0 %v10240_v3, %s7313_s20  ;;  %5689 = vrot.lane.b32.xlu1 %v10229_v0, %s7313_s20  ;;  %v4761_v3 = vld [vmem:[%s10507_s22 + $0x50] sm:$0xff]  ;;  %v4760_v0 = vld [vmem:[%s10507_s22 + $0x48] sm:$0xff] }
 0x8f3   : > { %6103 = vrot.lane.b32.xlu2 %v6033_v31, %s11317_s9  ;;  %6578 = vmatpush.msrb.mxu1 %v4762_v45 }
 0x8f4   : > { %v5352_v39 = vpop.permute.xlu0 %5351  ;;  %v5488_v19 = vpop.permute.xlu1 %5487 }
 0x8f5   : > { %5417 = vst.msk [vmem:[#allocation3 + $0x1e0] sm:$0xff] %vm1152_vm4, %v5352_v39  ;;  %v5502_v40 = vpop.permute.xlu2 %5501  ;;  %6579 = vmatpush.msrb.mxu1 %v4761_v3  ;;  %v6231_v39 = vld [vmem:[#allocation2 + $0xc2] sm:$0xff] }
 0x8f6   : > { %5581 = vst.msk [vmem:[#allocation3 + $0x20] sm:$0xff] %vm1345_vm5, %v5488_v19  ;;  %v6232_v19 = vld [vmem:[#allocation2 + $0xca] sm:$0xff] }
 0x8f7   : > { %5588 = vst.msk [vmem:[#allocation3 + $0x90] sm:$0xff] %vm1345_vm5, %v5502_v40  ;;  %6580 = vmatpush.msrb.mxu1 %v4760_v0  ;;  %v5848_v40 = vld [vmem:[#allocation2 + $0xc8] sm:$0xff] }
 0x8f9   : > { %6581 = vmatpush.msrb.mxu1 %v4759_v44 }
 0x8fa   : > { %6295 = vrot.lane.b32.xlu0 %v10248_v29, %s11311_s17  ;;  %6297 = vrot.lane.b32.xlu1 %v10253_v22, %s11311_s17 }
 0x8fb   : > { %5913 = vrot.lane.b32.xlu2 %v10044_v47, %s7314_s10  ;;  %6582 = vmatpush.msrb.mxu1 %v4758_v61  ;;  %v4757_v47 = vld [vmem:[%s10507_s22 + $0x30] sm:$0xff] }
 0x8fc   : > { %v5486_v1 = vpop.permute.xlu0 %5485  ;;  %v5494_v12 = vpop.permute.xlu1 %5493 }
 0x8fd   : > { %5580 = vst.msk [vmem:[#allocation3 + $0x10] sm:$0xff] %vm1345_vm5, %v5486_v1  ;;  %v5508_v53 = vpop.permute.xlu2 %5507  ;;  %6583 = vmatpush.msrb.mxu1 %v4757_v47 }
 0x8fe   : > { %5584 = vst.msk [vmem:[#allocation3 + $0x50] sm:$0xff] %vm1345_vm5, %v5494_v12  ;;  %v6040_v12 = vld [vmem:[#allocation2 + $0xc9] sm:$0xff] }
 0x8ff   : > { %5591 = vst.msk [vmem:[#allocation3 + $0xc0] sm:$0xff] %vm1345_vm5, %v5508_v53  ;;  %6584 = vmatpush.msrb.mxu1 %v4756_v16  ;;  %v6041_v53 = vld [vmem:[#allocation2 + $0xd9] sm:$0xff] }
 0x900   : > { %v6233_v16 = vld [vmem:[#allocation2 + $0xda] sm:$0xff] }
 0x901   : > { %6585 = vmatpush.msrb.mxu1 %v4755_v43 }
 0x902   : > { %6105 = vrot.lane.b32.xlu0 %v6034_v24, %s11317_s9  ;;  %6107 = vrot.lane.b32.xlu1 %v6035_v58, %s11317_s9  ;;  %v5849_v58 = vld [vmem:[#allocation2 + $0xd8] sm:$0xff] }
 0x903   : > { %5691 = vrot.lane.b32.xlu2 %v10248_v29, %s7313_s20  ;;  %v4754_v29 = vld [vmem:[%s10507_s22 + $0x18] sm:$0xff] }
 0x904   : > { %v5492_v51 = vpop.permute.xlu0 %5491  ;;  %v5500_v59 = vpop.permute.xlu1 %5499  ;;  %6586 = vmatpush.msrb.mxu1 %v4754_v29 }
 0x905   : > { %5583 = vst.msk [vmem:[#allocation3 + $0x40] sm:$0xff] %vm1345_vm5, %v5492_v51  ;;  %v5514_v32 = vpop.permute.xlu2 %5513 }
 0x906   : > { %5587 = vst.msk [vmem:[#allocation3 + $0x80] sm:$0xff] %vm1345_vm5, %v5500_v59  ;;  %6587 = vmatpush.msrb.mxu1 %v4753_v15 }
 0x907   : > { %5594 = vst.msk [vmem:[#allocation3 + $0xf0] sm:$0xff] %vm1345_vm5, %v5514_v32  ;;  %v6042_v32 = vld [vmem:[#allocation2 + $0xe1] sm:$0xff] }
 0x908   : > { %6588 = vmatpush.msrb.mxu1 %v4752_v36  ;;  %v5851_v36 = vld [vmem:[#allocation2 + $0xf0] sm:$0xff] }
 0x90a   : > { %5915 = vrot.lane.b32.xlu0 %v10059_v37, %s7314_s10  ;;  %5917 = vrot.lane.b32.xlu1 %v10080_v57, %s7314_s10  ;;  %v4772_v57 = vld [vmem:[%s10507_s22 + $0xa8] sm:$0xff] }
 0x90b   : > { %6299 = vrot.lane.b32.xlu2 %v11318_v35, %s11311_s17  ;;  %6697 = vmatpush.msrb.mxu3 %v4772_v57 }
 0x90c   : > { %v5498_v6 = vpop.permute.xlu0 %5497  ;;  %v5506_v25 = vpop.permute.xlu1 %5505  ;;  %6589 = vmatpush.msrb.mxu1 %v4751_v50 }
 0x90d   : > { %5586 = vst.msk [vmem:[#allocation3 + $0x70] sm:$0xff] %vm1345_vm5, %v5498_v6  ;;  %v6092_v37 = vpop.permute.xlu2 %6091  ;;  %6698 = vmatpush.msrb.mxu3 %v4771_v23  ;;  %v6234_v6 = vld [vmem:[#allocation2 + $0xe2] sm:$0xff] }
 0x90e   : > { %5590 = vst.msk [vmem:[#allocation3 + $0xb0] sm:$0xff] %vm1345_vm5, %v5506_v25  ;;  %v6235_v25 = vld [vmem:[#allocation2 + $0xf2] sm:$0xff] }
 0x90f   : > { %6699 = vmatpush.msrb.mxu3 %v4770_v55  ;;  %v6043_v55 = vld [vmem:[#allocation2 + $0xf1] sm:$0xff] }
 0x911   : > { %6700 = vmatpush.msrb.mxu3 %v4769_v56 }
 0x912   : > { %5693 = vrot.lane.b32.xlu0 %v10253_v22, %s7313_s20  ;;  %5695 = vrot.lane.b32.xlu1 %v11318_v35, %s7313_s20  ;;  %v4767_v22 = vld [vmem:[%s10507_s22 + $0x80] sm:$0xff]  ;;  %s6995_s22 = sshll.u32 %s361_s13, 8 }
 0x913   : > { %6109 = vrot.lane.b32.xlu2 %v6036_v38, %s11317_s9  ;;  %6701 = vmatpush.msrb.mxu3 %v4768_v17  ;;  %s10752_s18 = scalar_lea.vmem [#allocation4], %s6995_s22 }
 0x914   : > { %v5504_v26 = vpop.permute.xlu0 %5503  ;;  %v5512_v27 = vpop.permute.xlu1 %5511 }
 0x915   : > { %5589 = vst.msk [vmem:[#allocation3 + $0xa0] sm:$0xff] %vm1345_vm5, %v5504_v26  ;;  %v5902_v48 = vpop.permute.xlu2 %5901  ;;  %6702 = vmatpush.msrb.mxu3 %v4767_v22  ;;  %v5852_v26 = vld [vmem:[#allocation2 + $0xf8] sm:$0xff] }
 0x916   : > { %5593 = vst.msk [vmem:[#allocation3 + $0xe0] sm:$0xff] %vm1345_vm5, %v5512_v27  ;;  %v6044_v22 = vld [vmem:[#allocation2 + $0xf9] sm:$0xff] }
 0x91a   : > { %6301 = vrot.lane.b32.xlu0 %v11319_v34, %s11311_s17  ;;  %6303 = vrot.lane.b32.xlu1 %v11320_v33, %s11311_s17 }
 0x91b   : > { %5919 = vrot.lane.b32.xlu2 %v10097_v11, %s7314_s10 }
 0x91c   : > { %v5510_v62 = vpop.permute.xlu0 %5509  ;;  %v5900_v10 = vpop.permute.xlu1 %5899 }
 0x91d   : > { %5592 = vst.msk [vmem:[#allocation3 + $0xd0] sm:$0xff] %vm1345_vm5, %v5510_v62  ;;  %v5680_v46 = vpop.permute.xlu2 %5679 }
 0x91e   : > { %5775 = vst.msk [vmem:[#allocation3 + $0x20] sm:$0xff] %vm1538_vm6, %v5680_v46 }
 0x91f   : > { %5776 = vst.msk [vmem:[#allocation3 + $0x28] sm:$0xff] %vm1540_vm7, %v5680_v46  ;;  %v6236_v46 = vld [vmem:[#allocation2 + $0xfa] sm:$0xff] }
 0x922   : > { %6111 = vrot.lane.b32.xlu0 %v6037_v54, %s11317_s9  ;;  %6113 = vrot.lane.b32.xlu1 %v6038_v8, %s11317_s9  ;;  %v6045_v54 = vld [vmem:[#allocation2 + $0x109] sm:$0xff] }
 0x923   : > { %5697 = vrot.lane.b32.xlu2 %v11319_v34, %s7313_s20 }
 0x924   : > { %v5676_v11 = vpop.permute.xlu0 %5675  ;;  %v5678_v13 = vpop.permute.xlu1 %5677 }
 0x925   : > { %5771 = vst.msk [vmem:[#allocation3] sm:$0xff] %vm1538_vm6, %v5676_v11  ;;  %v6288_v63 = vpop.permute.xlu2 %6287  ;;  %v6415_v0 = vld [vmem:[#allocation3 + $0x20] sm:$0xff] }
 0x926   : > { %5772 = vst.msk [vmem:[#allocation3 + $0x8] sm:$0xff] %vm1540_vm7, %v5676_v11 }
 0x927   : > { %5995 = vst.msk [vmem:[#allocation3 + $0x8] sm:$0xff] %vm1765_vm8, %v5900_v10 }
 0x928   : > { %6187 = vst.msk [vmem:[#allocation3 + $0x8] sm:$0xff] %vm1958_vm9, %v6092_v37 }
 0x929   : > { %5773 = vst.msk [vmem:[#allocation3 + $0x10] sm:$0xff] %vm1538_vm6, %v5678_v13 }
 0x92a   : > { %5774 = vst.msk [vmem:[#allocation3 + $0x18] sm:$0xff] %vm1540_vm7, %v5678_v13  ;;  %5921 = vrot.lane.b32.xlu0 %v10123_v2, %s7314_s10  ;;  %5923 = vrot.lane.b32.xlu1 %v10143_v28, %s7314_s10  ;;  %v6039_v2 = vld [vmem:[#allocation2 + $0xc1] sm:$0xff] }
 0x92b   : > { %5996 = vst.msk [vmem:[#allocation3 + $0x18] sm:$0xff] %vm1765_vm8, %v5902_v48  ;;  %6305 = vrot.lane.b32.xlu2 %v6230_v7, %s11311_s17 }
 0x92c   : > { %v6284_v41 = vpop.permute.xlu0 %6283  ;;  %v6286_v60 = vpop.permute.xlu1 %6285  ;;  %v6411_v30 = vld [vmem:[#allocation3] sm:$0xff] }
 0x92d   : > { %6379 = vst.msk [vmem:[#allocation3 + $0x8] sm:$0xff] %vm2151_vm10, %v6284_v41  ;;  %v6098_v5 = vpop.permute.xlu2 %6097  ;;  %6590 = vmatmul.f32.vlgmr.msrb.gmra.mxu1 %v6411_v30  ;;  %v5853_v41 = vld [vmem:[#allocation2 + $0x108] sm:$0xff] }
 0x930   : > { %v6413_v42 = vld [vmem:[#allocation3 + $0x10] sm:$0xff] }
 0x932   : > { %5699 = vrot.lane.b32.xlu0 %v5623_v21, %s7313_s20  ;;  %5701 = vrot.lane.b32.xlu1 %v6230_v7, %s7313_s20 }
 0x933   : > { %6115 = vrot.lane.b32.xlu2 %v6039_v2, %s11317_s9 }
 0x934   : > { %v6094_v28 = vpop.permute.xlu0 %6093  ;;  %v6096_v49 = vpop.permute.xlu1 %6095  ;;  %v6412_v31 = vld [vmem:[#allocation3 + $0x8] sm:$0xff] }
 0x935   : > { %6188 = vst.msk [vmem:[#allocation3 + $0x18] sm:$0xff] %vm1958_vm9, %v6094_v28  ;;  %v5908_v4 = vpop.permute.xlu2 %5907  ;;  %6593 = vmatmul.f32.gmra.mxu1 %v6413_v42  ;;  %7065 = vmatmul.msk.f32.vlgmr.msrb.gmra.mxu3 %vm2251_vm11, %v6412_v31  ;;  %v5854_v42 = vld [vmem:[#allocation2 + $0x110] sm:$0xff] }
 0x936   : > { %6380 = vst.msk [vmem:[#allocation3 + $0x18] sm:$0xff] %vm2151_vm10, %v6286_v60  ;;  %v6237_v60 = vld [vmem:[#allocation2 + $0x10a] sm:$0xff] }
 0x93a   : > { %6307 = vrot.lane.b32.xlu0 %v6231_v39, %s11311_s17  ;;  %6309 = vrot.lane.b32.xlu1 %v6232_v19, %s11311_s17 }
 0x93b   : > { %5925 = vrot.lane.b32.xlu2 %v5848_v40, %s7314_s10  ;;  %v6046_v40 = vld [vmem:[#allocation2 + $0x111] sm:$0xff] }
 0x93c   : > { %v5904_v45 = vpop.permute.xlu0 %5903  ;;  %v5906_v3 = vpop.permute.xlu1 %5905 }
 0x93d   : > { %5997 = vst.msk [vmem:[#allocation3 + $0x28] sm:$0xff] %vm1765_vm8, %v5904_v45  ;;  %v5686_v44 = vpop.permute.xlu2 %5685  ;;  %6596 = vmatmul.f32.gmra.mxu1 %v6415_v0  ;;  %v6414_v1 = vld [vmem:[#allocation3 + $0x18] sm:$0xff]  ;;  %v5855_v45 = vld [vmem:[#allocation2 + $0x120] sm:$0xff] }
 0x93e   : > { %6189 = vst.msk [vmem:[#allocation3 + $0x28] sm:$0xff] %vm1958_vm9, %v6096_v49  ;;  %7066 = vmatmul.msk.f32.gmra.mxu3 %vm2251_vm11, %v6414_v1  ;;  %v6238_v49 = vld [vmem:[#allocation2 + $0x112] sm:$0xff] }
 0x93f   : > { %6381 = vst.msk [vmem:[#allocation3 + $0x28] sm:$0xff] %vm2151_vm10, %v6288_v63 }
 0x940   : > { %5781 = vst.msk [vmem:[#allocation3 + $0x50] sm:$0xff] %vm1538_vm6, %v5686_v44 }
 0x941   : > { %5782 = vst.msk [vmem:[#allocation3 + $0x58] sm:$0xff] %vm1540_vm7, %v5686_v44 }
 0x942   : > { %6117 = vrot.lane.b32.xlu0 %v6040_v12, %s11317_s9  ;;  %6119 = vrot.lane.b32.xlu1 %v6041_v53, %s11317_s9  ;;  %v6047_v12 = vld [vmem:[#allocation2 + $0x121] sm:$0xff] }
 0x943   : > { %5703 = vrot.lane.b32.xlu2 %v6231_v39, %s7313_s20 }
 0x944   : > { %v5682_v61 = vpop.permute.xlu0 %5681  ;;  %v5684_v52 = vpop.permute.xlu1 %5683 }
 0x945   : > { %5777 = vst.msk [vmem:[#allocation3 + $0x30] sm:$0xff] %vm1538_vm6, %v5682_v61  ;;  %v6294_v47 = vpop.permute.xlu2 %6293 }
 0x946   : > { %5778 = vst.msk [vmem:[#allocation3 + $0x38] sm:$0xff] %vm1540_vm7, %v5682_v61  ;;  %v6416_v24 = vld [vmem:[#allocation3 + $0x28] sm:$0xff] }
 0x947   : > { %5998 = vst.msk [vmem:[#allocation3 + $0x38] sm:$0xff] %vm1765_vm8, %v5906_v3  ;;  %7067 = vmatmul.msk.f32.gmra.mxu3 %vm2251_vm11, %v6416_v24  ;;  %v6421_v50 = vld [vmem:[#allocation3 + $0x50] sm:$0xff] }
 0x948   : > { %6190 = vst.msk [vmem:[#allocation3 + $0x38] sm:$0xff] %vm1958_vm9, %v6098_v5 }
 0x949   : > { %5779 = vst.msk [vmem:[#allocation3 + $0x40] sm:$0xff] %vm1538_vm6, %v5684_v52 }
 0x94a   : > { %5780 = vst.msk [vmem:[#allocation3 + $0x48] sm:$0xff] %vm1540_vm7, %v5684_v52  ;;  %5927 = vrot.lane.b32.xlu0 %v5849_v58, %s7314_s10  ;;  %5929 = vrot.lane.b32.xlu1 %v5850_v9, %s7314_s10  ;;  %v6239_v58 = vld [vmem:[#allocation2 + $0x122] sm:$0xff] }
 0x94b   : > { %5999 = vst.msk [vmem:[#allocation3 + $0x48] sm:$0xff] %vm1765_vm8, %v5908_v4  ;;  %6311 = vrot.lane.b32.xlu2 %v6233_v16, %s11311_s17  ;;  %v10700_v9 = vld [vmem:[#allocation2 + $0x129] sm:$0xff] }
 0x94c   : > { %v6290_v20 = vpop.permute.xlu0 %6289  ;;  %v6292_v51 = vpop.permute.xlu1 %6291  ;;  %v6417_v59 = vld [vmem:[#allocation3 + $0x30] sm:$0xff] }
 0x94d   : > { %6382 = vst.msk [vmem:[#allocation3 + $0x38] sm:$0xff] %vm2151_vm10, %v6290_v20  ;;  %v6104_v43 = vpop.permute.xlu2 %6103  ;;  %6599 = vmatmul.f32.gmra.mxu1 %v6417_v59 }
 0x950   : > { %v6419_v35 = vld [vmem:[#allocation3 + $0x40] sm:$0xff] }
 0x952   : > { %5705 = vrot.lane.b32.xlu0 %v6232_v19, %s7313_s20  ;;  %5707 = vrot.lane.b32.xlu1 %v6233_v16, %s7313_s20 }
 0x953   : > { %6121 = vrot.lane.b32.xlu2 %v6042_v32, %s11317_s9 }
 0x954   : > { %v6100_v29 = vpop.permute.xlu0 %6099  ;;  %v6102_v18 = vpop.permute.xlu1 %6101  ;;  %v6418_v15 = vld [vmem:[#allocation3 + $0x38] sm:$0xff] }
 0x955   : > { %6191 = vst.msk [vmem:[#allocation3 + $0x48] sm:$0xff] %vm1958_vm9, %v6100_v29  ;;  %v5914_v14 = vpop.permute.xlu2 %5913  ;;  %6602 = vmatmul.f32.gmra.mxu1 %v6419_v35  ;;  %7068 = vmatmul.msk.f32.gmra.mxu3 %vm2251_vm11, %v6418_v15  ;;  %v6240_v29 = vld [vmem:[#allocation2 + $0x12a] sm:$0xff] }
 0x956   : > { %6383 = vst.msk [vmem:[#allocation3 + $0x48] sm:$0xff] %vm2151_vm10, %v6292_v51 }
 0x95a   : > { %6313 = vrot.lane.b32.xlu0 %v6234_v6, %s11311_s17  ;;  %6315 = vrot.lane.b32.xlu1 %v6235_v25, %s11311_s17 }
 0x95b   : > { %5931 = vrot.lane.b32.xlu2 %v5851_v36, %s7314_s10 }
 0x95c   : > { %v5910_v37 = vpop.permute.xlu0 %5909  ;;  %v5912_v57 = vpop.permute.xlu1 %5911 }
 0x95d   : > { %6000 = vst.msk [vmem:[#allocation3 + $0x58] sm:$0xff] %vm1765_vm8, %v5910_v37  ;;  %v5692_v23 = vpop.permute.xlu2 %5691  ;;  %6605 = vmatmul.f32.gmra.mxu1 %v6421_v50  ;;  %v6420_v38 = vld [vmem:[#allocation3 + $0x48] sm:$0xff] }
 0x95e   : > { %6192 = vst.msk [vmem:[#allocation3 + $0x58] sm:$0xff] %vm1958_vm9, %v6102_v18  ;;  %7069 = vmatmul.msk.f32.gmra.mxu3 %vm2251_vm11, %v6420_v38  ;;  %v10727_v38 = vld [vmem:[#allocation2 + $0x139] sm:$0xff] }
 0x95f   : > { %6384 = vst.msk [vmem:[#allocation3 + $0x58] sm:$0xff] %vm2151_vm10, %v6294_v47 }
 0x960   : > { %5787 = vst.msk [vmem:[#allocation3 + $0x80] sm:$0xff] %vm1538_vm6, %v5692_v23 }
 0x961   : > { %5788 = vst.msk [vmem:[#allocation3 + $0x88] sm:$0xff] %vm1540_vm7, %v5692_v23 }
 0x962   : > { %6123 = vrot.lane.b32.xlu0 %v6043_v55, %s11317_s9  ;;  %5933 = vrot.lane.b32.xlu1 %v5852_v26, %s7314_s10  ;;  %v10738_v26 = vld [vmem:[%s11321_s16] ss:$0 sm:$0xff]  ;;  %s6848_s16 = sshll.u32 %s10752_s18, 4  ;;  %s6849_s16 = int_to_ptr.vmem [resolvable:$true] %s6848_s16 }
 0x963   : > { %5515 = vrot.lane.b32.xlu2 %v6041_v53, %s11316_s21 }
 0x964   : > { %v5688_v27 = vpop.permute.xlu0 %5687  ;;  %v5690_v56 = vpop.permute.xlu1 %5689 }
 0x965   : > { %5783 = vst.msk [vmem:[#allocation3 + $0x60] sm:$0xff] %vm1538_vm6, %v5688_v27  ;;  %v6300_v48 = vpop.permute.xlu2 %6299 }
 0x966   : > { %5784 = vst.msk [vmem:[#allocation3 + $0x68] sm:$0xff] %vm1540_vm7, %v5688_v27  ;;  %v6422_v17 = vld [vmem:[#allocation3 + $0x58] sm:$0xff] }
 0x967   : > { %6001 = vst.msk [vmem:[#allocation3 + $0x68] sm:$0xff] %vm1765_vm8, %v5912_v57  ;;  %7070 = vmatmul.msk.f32.gmra.mxu3 %vm2251_vm11, %v6422_v17  ;;  %v6427_v21 = vld [vmem:[#allocation3 + $0x80] sm:$0xff] }
 0x968   : > { %6193 = vst.msk [vmem:[#allocation3 + $0x68] sm:$0xff] %vm1958_vm9, %v6104_v43 }
 0x969   : > { %5785 = vst.msk [vmem:[#allocation3 + $0x70] sm:$0xff] %vm1538_vm6, %v5690_v56 }
 0x96a   : > { %5786 = vst.msk [vmem:[#allocation3 + $0x78] sm:$0xff] %vm1540_vm7, %v5690_v56  ;;  %5709 = vrot.lane.b32.xlu0 %v6234_v6, %s7313_s20  ;;  %5517 = vrot.lane.b32.xlu1 %v6042_v32, %s11316_s21  ;;  %v5856_v32 = vld [vmem:[#allocation2 + $0x128] sm:$0xff]  ;;  %v6241_v6 = vld [vmem:[#allocation2 + $0x13a] sm:$0xff] }
 0x96b   : > { %6002 = vst.msk [vmem:[#allocation3 + $0x78] sm:$0xff] %vm1765_vm8, %v5914_v14  ;;  %6125 = vrot.lane.b32.xlu2 %v6044_v22, %s11317_s9 }
 0x96c   : > { %v6296_v34 = vpop.permute.xlu0 %6295  ;;  %v6298_v33 = vpop.permute.xlu1 %6297  ;;  %v6423_v62 = vld [vmem:[#allocation3 + $0x60] sm:$0xff] }
 0x96d   : > { %6385 = vst.msk [vmem:[#allocation3 + $0x68] sm:$0xff] %vm2151_vm10, %v6296_v34  ;;  %v6110_v10 = vpop.permute.xlu2 %6109  ;;  %6608 = vmatmul.f32.gmra.mxu1 %v6423_v62 }
 0x970   : > { %v6425_v13 = vld [vmem:[#allocation3 + $0x70] sm:$0xff] }
 0x972   : > { %6317 = vrot.lane.b32.xlu0 %v6236_v46, %s11311_s17  ;;  %6127 = vrot.lane.b32.xlu1 %v6045_v54, %s11317_s9 }
 0x973   : > { %5711 = vrot.lane.b32.xlu2 %v6235_v25, %s7313_s20  ;;  %v5857_v25 = vld [vmem:[#allocation2 + $0x138] sm:$0xff] }
 0x974   : > { %v6106_v8 = vpop.permute.xlu0 %6105  ;;  %v6108_v11 = vpop.permute.xlu1 %6107  ;;  %v6424_v63 = vld [vmem:[#allocation3 + $0x68] sm:$0xff] }
 0x975   : > { %6194 = vst.msk [vmem:[#allocation3 + $0x78] sm:$0xff] %vm1958_vm9, %v6106_v8  ;;  %v5920_v7 = vpop.permute.xlu2 %5919  ;;  %6611 = vmatmul.f32.gmra.mxu1 %v6425_v13  ;;  %7071 = vmatmul.msk.f32.gmra.mxu3 %vm2251_vm11, %v6424_v63 }
 0x976   : > { %6386 = vst.msk [vmem:[#allocation3 + $0x78] sm:$0xff] %vm2151_vm10, %v6298_v33 }
 0x97a   : > { %5935 = vrot.lane.b32.xlu0 %v5853_v41, %s7314_s10  ;;  %5713 = vrot.lane.b32.xlu1 %v6236_v46, %s7313_s20 }
 0x97b   : > { %6319 = vrot.lane.b32.xlu2 %v6237_v60, %s11311_s17 }
 0x97c   : > { %v5916_v30 = vpop.permute.xlu0 %5915  ;;  %v5918_v5 = vpop.permute.xlu1 %5917 }
 0x97d   : > { %6003 = vst.msk [vmem:[#allocation3 + $0x88] sm:$0xff] %vm1765_vm8, %v5916_v30  ;;  %v5698_v2 = vpop.permute.xlu2 %5697  ;;  %6614 = vmatmul.f32.gmra.mxu1 %v6427_v21  ;;  %v6426_v28 = vld [vmem:[#allocation3 + $0x78] sm:$0xff]  ;;  %v10764_v30 = vld [vmem:[#allocation2 + $0x151] sm:$0xff] }
 0x97e   : > { %6195 = vst.msk [vmem:[#allocation3 + $0x88] sm:$0xff] %vm1958_vm9, %v6108_v11  ;;  %7072 = vmatmul.msk.f32.gmra.mxu3 %vm2251_vm11, %v6426_v28 }
 0x97f   : > { %6387 = vst.msk [vmem:[#allocation3 + $0x88] sm:$0xff] %vm2151_vm10, %v6300_v48 }
 0x980   : > { %5793 = vst.msk [vmem:[#allocation3 + $0xb0] sm:$0xff] %vm1538_vm6, %v5698_v2 }
 0x981   : > { %5794 = vst.msk [vmem:[#allocation3 + $0xb8] sm:$0xff] %vm1540_vm7, %v5698_v2 }
 0x982   : > { %5519 = vrot.lane.b32.xlu0 %v6043_v55, %s11316_s21  ;;  %6321 = vrot.lane.b32.xlu1 %v6238_v49, %s11311_s17  ;;  %v5858_v55 = vld [vmem:[#allocation2 + $0x140] sm:$0xff] }
 0x983   : > { %5937 = vrot.lane.b32.xlu2 %v5854_v42, %s7314_s10 }
 0x984   : > { %v5694_v31 = vpop.permute.xlu0 %5693  ;;  %v5696_v4 = vpop.permute.xlu1 %5695 }
 0x985   : > { %5789 = vst.msk [vmem:[#allocation3 + $0x90] sm:$0xff] %vm1538_vm6, %v5694_v31  ;;  %v6306_v39 = vpop.permute.xlu2 %6305 }
 0x986   : > { %5790 = vst.msk [vmem:[#allocation3 + $0x98] sm:$0xff] %vm1540_vm7, %v5694_v31  ;;  %v6428_v19 = vld [vmem:[#allocation3 + $0x88] sm:$0xff] }
 0x987   : > { %6004 = vst.msk [vmem:[#allocation3 + $0x98] sm:$0xff] %vm1765_vm8, %v5918_v5  ;;  %7073 = vmatmul.msk.f32.gmra.mxu3 %vm2251_vm11, %v6428_v19  ;;  %v6433_v51 = vld [vmem:[#allocation3 + $0xb0] sm:$0xff] }
 0x988   : > { %6196 = vst.msk [vmem:[#allocation3 + $0x98] sm:$0xff] %vm1958_vm9, %v6110_v10  ;;  %v10750_v10 = vld [vmem:[#allocation2 + $0x141] sm:$0xff] }
 0x989   : > { %5791 = vst.msk [vmem:[#allocation3 + $0xa0] sm:$0xff] %vm1538_vm6, %v5696_v4 }
 0x98a   : > { %5792 = vst.msk [vmem:[#allocation3 + $0xa8] sm:$0xff] %vm1540_vm7, %v5696_v4  ;;  %6129 = vrot.lane.b32.xlu0 %v6046_v40, %s11317_s9  ;;  %5939 = vrot.lane.b32.xlu1 %v5855_v45, %s7314_s10  ;;  %v5859_v4 = vld [vmem:[#allocation2 + $0x150] sm:$0xff] }
 0x98b   : > { %6005 = vst.msk [vmem:[#allocation3 + $0xa8] sm:$0xff] %vm1765_vm8, %v5920_v7  ;;  %5521 = vrot.lane.b32.xlu2 %v6044_v22, %s11316_s21 }
 0x98c   : > { %v6302_v3 = vpop.permute.xlu0 %6301  ;;  %v6304_v0 = vpop.permute.xlu1 %6303  ;;  %v6429_v44 = vld [vmem:[#allocation3 + $0x90] sm:$0xff] }
 0x98d   : > { %6388 = vst.msk [vmem:[#allocation3 + $0x98] sm:$0xff] %vm2151_vm10, %v6302_v3  ;;  %v6116_v1 = vpop.permute.xlu2 %6115  ;;  %6617 = vmatmul.f32.gmra.mxu1 %v6429_v44 }
 0x990   : > { %v6431_v52 = vld [vmem:[#allocation3 + $0xa0] sm:$0xff] }
 0x992   : > { %5715 = vrot.lane.b32.xlu0 %v6237_v60, %s7313_s20  ;;  %5523 = vrot.lane.b32.xlu1 %v6045_v54, %s11316_s21  ;;  %v6242_v60 = vld [vmem:[#allocation2 + $0x142] sm:$0xff] }
 0x993   : > { %6131 = vrot.lane.b32.xlu2 %v6047_v12, %s11317_s9 }
 0x994   : > { %v6112_v53 = vpop.permute.xlu0 %6111  ;;  %v6114_v61 = vpop.permute.xlu1 %6113  ;;  %v6430_v47 = vld [vmem:[#allocation3 + $0x98] sm:$0xff] }
 0x995   : > { %6197 = vst.msk [vmem:[#allocation3 + $0xa8] sm:$0xff] %vm1958_vm9, %v6112_v53  ;;  %v5926_v24 = vpop.permute.xlu2 %5925  ;;  %6620 = vmatmul.f32.gmra.mxu1 %v6431_v52  ;;  %7074 = vmatmul.msk.f32.gmra.mxu3 %vm2251_vm11, %v6430_v47  ;;  %v5860_v53 = vld [vmem:[#allocation2 + $0x158] sm:$0xff] }
 0x996   : > { %6389 = vst.msk [vmem:[#allocation3 + $0xa8] sm:$0xff] %vm2151_vm10, %v6304_v0 }
 0x99a   : > { %6323 = vrot.lane.b32.xlu0 %v6239_v58, %s11311_s17  ;;  %6133 = vrot.lane.b32.xlu1 %v10700_v9, %s11317_s9 }
 0x99b   : > { %5717 = vrot.lane.b32.xlu2 %v6238_v49, %s7313_s20 }
 0x99c   : > { %v5922_v16 = vpop.permute.xlu0 %5921  ;;  %v5924_v20 = vpop.permute.xlu1 %5923 }
 0x99d   : > { %6006 = vst.msk [vmem:[#allocation3 + $0xb8] sm:$0xff] %vm1765_vm8, %v5922_v16  ;;  %v5704_v59 = vpop.permute.xlu2 %5703  ;;  %6623 = vmatmul.f32.gmra.mxu1 %v6433_v51  ;;  %v6432_v43 = vld [vmem:[#allocation3 + $0xa8] sm:$0xff] }
 0x99e   : > { %6198 = vst.msk [vmem:[#allocation3 + $0xb8] sm:$0xff] %vm1958_vm9, %v6114_v61  ;;  %7075 = vmatmul.msk.f32.gmra.mxu3 %vm2251_vm11, %v6432_v43  ;;  %v10799_v51 = vld [vmem:[#allocation2 + $0x159] sm:$0xff] }
 0x99f   : > { %6390 = vst.msk [vmem:[#allocation3 + $0xb8] sm:$0xff] %vm2151_vm10, %v6306_v39  ;;  %v6243_v39 = vld [vmem:[#allocation2 + $0x152] sm:$0xff] }
 0x9a0   : > { %5799 = vst.msk [vmem:[#allocation3 + $0xe0] sm:$0xff] %vm1538_vm6, %v5704_v59 }
 0x9a1   : > { %5800 = vst.msk [vmem:[#allocation3 + $0xe8] sm:$0xff] %vm1540_vm7, %v5704_v59  ;;  %v5861_v59 = vld [vmem:[#allocation2 + $0x168] sm:$0xff] }
 0x9a2   : > { %5941 = vrot.lane.b32.xlu0 %v5856_v32, %s7314_s10  ;;  %5719 = vrot.lane.b32.xlu1 %v6239_v58, %s7313_s20 }
 0x9a3   : > { %6325 = vrot.lane.b32.xlu2 %v6240_v29, %s11311_s17 }
 0x9a4   : > { %v5700_v18 = vpop.permute.xlu0 %5699  ;;  %v5702_v35 = vpop.permute.xlu1 %5701 }
 0x9a5   : > { %5795 = vst.msk [vmem:[#allocation3 + $0xc0] sm:$0xff] %vm1538_vm6, %v5700_v18  ;;  %v6312_v15 = vpop.permute.xlu2 %6311 }
 0x9a6   : > { %5796 = vst.msk [vmem:[#allocation3 + $0xc8] sm:$0xff] %vm1540_vm7, %v5700_v18  ;;  %v6434_v14 = vld [vmem:[#allocation3 + $0xb8] sm:$0xff] }
 0x9a7   : > { %6007 = vst.msk [vmem:[#allocation3 + $0xc8] sm:$0xff] %vm1765_vm8, %v5924_v20  ;;  %7076 = vmatmul.msk.f32.gmra.mxu3 %vm2251_vm11, %v6434_v14  ;;  %v6439_v11 = vld [vmem:[#allocation3 + $0xe0] sm:$0xff] }
 0x9a8   : > { %6199 = vst.msk [vmem:[#allocation3 + $0xc8] sm:$0xff] %vm1958_vm9, %v6116_v1 }
 0x9a9   : > { %5797 = vst.msk [vmem:[#allocation3 + $0xd0] sm:$0xff] %vm1538_vm6, %v5702_v35 }
 0x9aa   : > { %5798 = vst.msk [vmem:[#allocation3 + $0xd8] sm:$0xff] %vm1540_vm7, %v5702_v35  ;;  %5525 = vrot.lane.b32.xlu0 %v6046_v40, %s11316_s21  ;;  %6327 = vrot.lane.b32.xlu1 %v6241_v6, %s11311_s17  ;;  %v6591_v23 = vpop.f32.mrf.mxu1 }
 0x9ab   : > { %6008 = vst.msk [vmem:[#allocation3 + $0xd8] sm:$0xff] %vm1765_vm8, %v5926_v24  ;;  %5943 = vrot.lane.b32.xlu2 %v5857_v25, %s7314_s10  ;;  %v6592_v34 = vadd.f32 %v10738_v26, %v6591_v23  ;;  %v10818_v25 = vld [vmem:[#allocation2 + $0x169] sm:$0xff] }
 0x9ac   : > { %v6308_v36 = vpop.permute.xlu0 %6307  ;;  %v6310_v37 = vpop.permute.xlu1 %6309  ;;  %v6435_v57 = vld [vmem:[#allocation3 + $0xc0] sm:$0xff] }
 0x9ad   : > { %6391 = vst.msk [vmem:[#allocation3 + $0xc8] sm:$0xff] %vm2151_vm10, %v6308_v36  ;;  %v6122_v50 = vpop.permute.xlu2 %6121  ;;  %6626 = vmatmul.f32.gmra.mxu1 %v6435_v57 }
 0x9b0   : > { %v6437_v48 = vld [vmem:[#allocation3 + $0xd0] sm:$0xff] }
 0x9b2   : > { %6135 = vrot.lane.b32.xlu0 %v10727_v38, %s11317_s9  ;;  %5945 = vrot.lane.b32.xlu1 %v5858_v55, %s7314_s10  ;;  %v6594_v46 = vpop.f32.mrf.mxu1  ;;  %v6245_v55 = vld [vmem:[#allocation2 + $0x16a] sm:$0xff] }
 0x9b3   : > { %5527 = vrot.lane.b32.xlu2 %v6047_v12, %s11316_s21  ;;  %v6595_v7 = vadd.f32 %v10738_v26, %v6594_v46  ;;  %v6244_v12 = vld [vmem:[#allocation2 + $0x15a] sm:$0xff]  ;;  %v6246_v46 = vld [vmem:[#allocation2 + $0x172] sm:$0xff] }
 0x9b4   : > { %v6118_v27 = vpop.permute.xlu0 %6117  ;;  %v6120_v56 = vpop.permute.xlu1 %6119  ;;  %v6436_v17 = vld [vmem:[#allocation3 + $0xc8] sm:$0xff] }
 0x9b5   : > { %6200 = vst.msk [vmem:[#allocation3 + $0xd8] sm:$0xff] %vm1958_vm9, %v6118_v27  ;;  %v5932_v22 = vpop.permute.xlu2 %5931  ;;  %6629 = vmatmul.f32.gmra.mxu1 %v6437_v48  ;;  %7077 = vmatmul.msk.f32.gmra.mxu3 %vm2251_vm11, %v6436_v17  ;;  %v10827_v27 = vld [vmem:[#allocation2 + $0x171] sm:$0xff] }
 0x9b6   : > { %6392 = vst.msk [vmem:[#allocation3 + $0xd8] sm:$0xff] %vm2151_vm10, %v6310_v37 }
 0x9b8   : > { %v6704_v33 = vpop.f32.mrf.mxu3 }
 0x9b9   : > { %v6705_v62 = vadd.f32 %v6704_v33, %v6592_v34 }
 0x9ba   : > { %5721 = vrot.lane.b32.xlu0 %v6240_v29, %s7313_s20  ;;  %5529 = vrot.lane.b32.xlu1 %v10700_v9, %s11316_s21  ;;  %v6597_v49 = vpop.f32.mrf.mxu1 }
 0x9bb   : > { %6801 = vst.msk [vmem:[%s10752_s18] sm:$0xff] %vm6800_vm12, %v6705_v62  ;;  %6137 = vrot.lane.b32.xlu2 %v10750_v10, %s11317_s9  ;;  %v6598_v31 = vadd.f32 %v10738_v26, %v6597_v49 }
 0x9bc   : > { %v5928_v54 = vpop.permute.xlu0 %5927  ;;  %v5930_v8 = vpop.permute.xlu1 %5929 }
 0x9bd   : > { %6009 = vst.msk [vmem:[#allocation3 + $0xe8] sm:$0xff] %vm1765_vm8, %v5928_v54  ;;  %v5516_v13 = vpop.permute.xlu2 %5515  ;;  %6632 = vmatmul.f32.gmra.mxu1 %v6439_v11  ;;  %v6438_v63 = vld [vmem:[#allocation3 + $0xd8] sm:$0xff] }
 0x9be   : > { %6201 = vst.msk [vmem:[#allocation3 + $0xe8] sm:$0xff] %vm1958_vm9, %v6120_v56  ;;  %7078 = vmatmul.msk.f32.gmra.mxu3 %vm2251_vm11, %v6438_v63 }
 0x9bf   : > { %6393 = vst.msk [vmem:[#allocation3 + $0xe8] sm:$0xff] %vm2151_vm10, %v6312_v15 }
 0x9c0   : > { %5595 = vst.msk [vmem:[#allocation3 + $0x100] sm:$0xff] %vm1345_vm5, %v5516_v13 }
 0x9c1   : > { %v6707_v41 = vpop.f32.mrf.mxu3 }
 0x9c2   : > { %v6708_v5 = vadd.f32 %v6707_v41, %v6595_v7  ;;  %6329 = vrot.lane.b32.xlu0 %v6242_v60, %s11311_s17  ;;  %6139 = vrot.lane.b32.xlu1 %v10764_v30, %s11317_s9 }
 0x9c3   : > { %5723 = vrot.lane.b32.xlu2 %v6241_v6, %s7313_s20 }
 0x9c4   : > { %6802 = vst.msk [vmem:[%s10752_s18 + $0x8] sm:$0xff] %vm6800_vm12, %v6708_v5  ;;  %v5706_v21 = vpop.permute.xlu0 %5705  ;;  %v5708_v2 = vpop.permute.xlu1 %5707 }
 0x9c5   : > { %5801 = vst.msk [vmem:[#allocation3 + $0xf0] sm:$0xff] %vm1538_vm6, %v5706_v21  ;;  %v6126_v28 = vpop.permute.xlu2 %6125 }
 0x9c6   : > { %5802 = vst.msk [vmem:[#allocation3 + $0xf8] sm:$0xff] %vm1540_vm7, %v5706_v21  ;;  %v6440_v42 = vld [vmem:[#allocation3 + $0xe8] sm:$0xff] }
 0x9c7   : > { %6010 = vst.msk [vmem:[#allocation3 + $0xf8] sm:$0xff] %vm1765_vm8, %v5930_v8  ;;  %7079 = vmatmul.msk.f32.gmra.mxu3 %vm2251_vm11, %v6440_v42 }
 0x9c8   : > { %6202 = vst.msk [vmem:[#allocation3 + $0xf8] sm:$0xff] %vm1958_vm9, %v6122_v50 }
 0x9c9   : > { %5803 = vst.msk [vmem:[#allocation3 + $0x100] sm:$0xff] %vm1538_vm6, %v5708_v2 }
 0x9ca   : > { %5804 = vst.msk [vmem:[#allocation3 + $0x108] sm:$0xff] %vm1540_vm7, %v5708_v2  ;;  %5947 = vrot.lane.b32.xlu0 %v5859_v4, %s7314_s10  ;;  %5725 = vrot.lane.b32.xlu1 %v6242_v60, %s7313_s20  ;;  %v6710_v19 = vpop.f32.mrf.mxu3  ;;  %v6600_v1 = vpop.f32.mrf.mxu1  ;;  %v6247_v60 = vld [vmem:[#allocation2 + $0x182] sm:$0xff] }
 0x9cb   : > { %6011 = vst.msk [vmem:[#allocation3 + $0x108] sm:$0xff] %vm1765_vm8, %v5932_v22  ;;  %6331 = vrot.lane.b32.xlu2 %v6243_v39, %s11311_s17  ;;  %v6711_v40 = vadd.f32 %v6710_v19, %v6598_v31  ;;  %v6601_v9 = vadd.f32 %v10738_v26, %v6600_v1  ;;  %v10863_v4 = vld [vmem:[#allocation2 + $0x181] sm:$0xff] }
 0x9cc   : > { %v6314_v45 = vpop.permute.xlu0 %6313  ;;  %v6316_v3 = vpop.permute.xlu1 %6315  ;;  %v6441_v0 = vld [vmem:[#allocation3 + $0xf0] sm:$0xff] }
 0x9cd   : > { %6803 = vst.msk [vmem:[%s10752_s18 + $0x10] sm:$0xff] %vm6800_vm12, %v6711_v40  ;;  %v10786_v44 = vpop.permute.xlu2 %5711  ;;  %6635 = vmatmul.f32.gmra.mxu1 %v6441_v0 }
 0x9ce   : > { %6394 = vst.msk [vmem:[#allocation3 + $0xf8] sm:$0xff] %vm2151_vm10, %v6314_v45 }
 0x9cf   : > { %5808 = vst.msk [vmem:[#allocation3 + $0x128] sm:$0xff] %vm1540_vm7, %v10786_v44 }
 0x9d0   : > { %v6443_v47 = vld [vmem:[#allocation3 + $0x100] sm:$0xff] }
 0x9d2   : > { %5531 = vrot.lane.b32.xlu0 %v10727_v38, %s11316_s21  ;;  %6333 = vrot.lane.b32.xlu1 %v6244_v12, %s11311_s17  ;;  %v6603_v43 = vpop.f32.mrf.mxu1 }
 0x9d3   : > { %5949 = vrot.lane.b32.xlu2 %v5860_v53, %s7314_s10  ;;  %v6604_v15 = vadd.f32 %v10738_v26, %v6603_v43  ;;  %v10882_v53 = vld [vmem:[#allocation2 + $0x189] sm:$0xff] }
 0x9d4   : > { %v6124_v61 = vpop.permute.xlu0 %6123  ;;  %v5934_v52 = vpop.permute.xlu1 %5933 }
 0x9d5   : > { %6203 = vst.msk [vmem:[#allocation3 + $0x108] sm:$0xff] %vm1958_vm9, %v6124_v61  ;;  %v6320_v24 = vpop.permute.xlu2 %6319  ;;  %6638 = vmatmul.f32.gmra.mxu1 %v6443_v47  ;;  %v6442_v58 = vld [vmem:[#allocation3 + $0xf8] sm:$0xff] }
 0x9d6   : > { %6395 = vst.msk [vmem:[#allocation3 + $0x108] sm:$0xff] %vm2151_vm10, %v6316_v3  ;;  %7080 = vmatmul.msk.f32.gmra.mxu3 %vm2251_vm11, %v6442_v58 }
 0x9d8   : > { %v6713_v16 = vpop.f32.mrf.mxu3 }
 0x9d9   : > { %v6714_v20 = vadd.f32 %v6713_v16, %v6601_v9  ;;  %v6057_v9 = vld [vmem:[#allocation2 + $0x199] sm:$0xff] }
 0x9da   : > { %6141 = vrot.lane.b32.xlu0 %v10799_v51, %s11317_s9  ;;  %5951 = vrot.lane.b32.xlu1 %v5861_v59, %s7314_s10  ;;  %v6606_v50 = vpop.f32.mrf.mxu1 }
 0x9db   : > { %6804 = vst.msk [vmem:[%s10752_s18 + $0x18] sm:$0xff] %vm6800_vm12, %v6714_v20  ;;  %5533 = vrot.lane.b32.xlu2 %v10750_v10, %s11316_s21  ;;  %v6607_v38 = vadd.f32 %v10738_v26, %v6606_v50  ;;  %v5862_v10 = vld [vmem:[#allocation2 + $0x170] sm:$0xff] }
 0x9dc   : > { %v5710_v32 = vpop.permute.xlu0 %5709  ;;  %v5518_v29 = vpop.permute.xlu1 %5517 }
 0x9dd   : > { %5806 = vst.msk [vmem:[#allocation3 + $0x118] sm:$0xff] %vm1540_vm7, %v5710_v32  ;;  %v5938_v18 = vpop.permute.xlu2 %5937  ;;  %v6444_v35 = vld [vmem:[#allocation3 + $0x108] sm:$0xff] }
 0x9de   : > { %6012 = vst.msk [vmem:[#allocation3 + $0x118] sm:$0xff] %vm1765_vm8, %v5934_v52  ;;  %7081 = vmatmul.msk.f32.gmra.mxu3 %vm2251_vm11, %v6444_v35  ;;  %v5865_v35 = vld [vmem:[#allocation2 + $0x198] sm:$0xff] }
 0x9df   : > { %6204 = vst.msk [vmem:[#allocation3 + $0x118] sm:$0xff] %vm1958_vm9, %v6126_v28 }
 0x9e0   : > { %5596 = vst.msk [vmem:[#allocation3 + $0x110] sm:$0xff] %vm1345_vm5, %v5518_v29 }
 0x9e1   : > { %5805 = vst.msk [vmem:[#allocation3 + $0x110] sm:$0xff] %vm1538_vm6, %v5710_v32  ;;  %v6716_v14 = vpop.f32.mrf.mxu3 }
 0x9e2   : > { %v6717_v6 = vadd.f32 %v6716_v14, %v6604_v15  ;;  %5727 = vrot.lane.b32.xlu0 %v6243_v39, %s7313_s20  ;;  %5535 = vrot.lane.b32.xlu1 %v10764_v30, %s11316_s21  ;;  %v5863_v30 = vld [vmem:[#allocation2 + $0x180] sm:$0xff]  ;;  %v5864_v39 = vld [vmem:[#allocation2 + $0x188] sm:$0xff] }
 0x9e3   : > { %6143 = vrot.lane.b32.xlu2 %v10818_v25, %s11317_s9  ;;  %v6249_v14 = vld [vmem:[#allocation2 + $0x19a] sm:$0xff] }
 0x9e4   : > { %6805 = vst.msk [vmem:[%s10752_s18 + $0x20] sm:$0xff] %vm6800_vm12, %v6717_v6  ;;  %v6318_v36 = vpop.permute.xlu0 %6317  ;;  %v6128_v37 = vpop.permute.xlu1 %6127 }
 0x9e5   : > { %6396 = vst.msk [vmem:[#allocation3 + $0x118] sm:$0xff] %vm2151_vm10, %v6318_v36  ;;  %v5522_v57 = vpop.permute.xlu2 %5521 }
 0x9e6   : > { %5598 = vst.msk [vmem:[#allocation3 + $0x130] sm:$0xff] %vm1345_vm5, %v5522_v57 }
 0x9e8   : > { %v6445_v23 = vld [vmem:[#allocation3 + $0x110] sm:$0xff] }
 0x9e9   : > { %6641 = vmatmul.f32.gmra.mxu1 %v6445_v23  ;;  %v6250_v23 = vld [vmem:[#allocation2 + $0x1a2] sm:$0xff] }
 0x9ea   : > { %6335 = vrot.lane.b32.xlu0 %v6245_v55, %s11311_s17  ;;  %6145 = vrot.lane.b32.xlu1 %v10827_v27, %s11317_s9  ;;  %v6719_v56 = vpop.f32.mrf.mxu3  ;;  %v6609_v62 = vpop.f32.mrf.mxu1 }
 0x9eb   : > { %5729 = vrot.lane.b32.xlu2 %v6244_v12, %s7313_s20  ;;  %v6720_v48 = vadd.f32 %v6719_v56, %v6607_v38  ;;  %v6610_v13 = vadd.f32 %v10738_v26, %v6609_v62  ;;  %v6058_v62 = vld [vmem:[#allocation2 + $0x1a1] sm:$0xff] }
 0x9ec   : > { %v5936_v17 = vpop.permute.xlu0 %5935  ;;  %v5714_v22 = vpop.permute.xlu1 %5713  ;;  %v6446_v34 = vld [vmem:[#allocation3 + $0x118] sm:$0xff] }
 0x9ed   : > { %6806 = vst.msk [vmem:[%s10752_s18 + $0x28] sm:$0xff] %vm6800_vm12, %v6720_v48  ;;  %v6132_v33 = vpop.permute.xlu2 %6131  ;;  %7082 = vmatmul.msk.f32.gmra.mxu3 %vm2251_vm11, %v6446_v34 }
 0x9ee   : > { %6013 = vst.msk [vmem:[#allocation3 + $0x128] sm:$0xff] %vm1765_vm8, %v5936_v17 }
 0x9ef   : > { %6205 = vst.msk [vmem:[#allocation3 + $0x128] sm:$0xff] %vm1958_vm9, %v6128_v37 }
 0x9f0   : > { %6397 = vst.msk [vmem:[#allocation3 + $0x128] sm:$0xff] %vm2151_vm10, %v6320_v24 }
 0x9f1   : > { %5809 = vst.msk [vmem:[#allocation3 + $0x130] sm:$0xff] %vm1538_vm6, %v5714_v22 }
 0x9f2   : > { %5810 = vst.msk [vmem:[#allocation3 + $0x138] sm:$0xff] %vm1540_vm7, %v5714_v22  ;;  %5953 = vrot.lane.b32.xlu0 %v5862_v10, %s7314_s10  ;;  %5731 = vrot.lane.b32.xlu1 %v6245_v55, %s7313_s20  ;;  %v6612_v5 = vpop.f32.mrf.mxu1  ;;  %v5866_v55 = vld [vmem:[#allocation2 + $0x1a0] sm:$0xff] }
 0x9f3   : > { %6014 = vst.msk [vmem:[#allocation3 + $0x138] sm:$0xff] %vm1765_vm8, %v5938_v18  ;;  %6337 = vrot.lane.b32.xlu2 %v6246_v46, %s11311_s17  ;;  %v6613_v42 = vadd.f32 %v10738_v26, %v6612_v5 }
 0x9f4   : > { %v5520_v54 = vpop.permute.xlu0 %5519  ;;  %v6322_v8 = vpop.permute.xlu1 %6321 }
 0x9f5   : > { %5597 = vst.msk [vmem:[#allocation3 + $0x120] sm:$0xff] %vm1345_vm5, %v5520_v54  ;;  %v10846_v11 = vpop.permute.xlu2 %5717 }
 0x9f6   : > { %5807 = vst.msk [vmem:[#allocation3 + $0x120] sm:$0xff] %vm1538_vm6, %v10786_v44 }
 0x9f7   : > { %5814 = vst.msk [vmem:[#allocation3 + $0x158] sm:$0xff] %vm1540_vm7, %v10846_v11  ;;  %v6448_v63 = vld [vmem:[#allocation3 + $0x128] sm:$0xff] }
 0x9f8   : > { %7083 = vmatmul.msk.f32.gmra.mxu3 %vm2251_vm11, %v6448_v63  ;;  %v6722_v7 = vpop.f32.mrf.mxu3  ;;  %v6449_v0 = vld [vmem:[#allocation3 + $0x130] sm:$0xff] }
 0x9f9   : > { %v6723_v41 = vadd.f32 %v6722_v7, %v6610_v13 }
 0x9fa   : > { %5537 = vrot.lane.b32.xlu0 %v10799_v51, %s11316_s21  ;;  %6339 = vrot.lane.b32.xlu1 %v6247_v60, %s11311_s17  ;;  %v6615_v1 = vpop.f32.mrf.mxu1  ;;  %v6248_v51 = vld [vmem:[#allocation2 + $0x18a] sm:$0xff] }
 0x9fb   : > { %6807 = vst.msk [vmem:[%s10752_s18 + $0x30] sm:$0xff] %vm6800_vm12, %v6723_v41  ;;  %5955 = vrot.lane.b32.xlu2 %v5863_v30, %s7314_s10  ;;  %v6616_v12 = vadd.f32 %v10738_v26, %v6615_v1 }
 0x9fc   : > { %v6130_v21 = vpop.permute.xlu0 %6129  ;;  %v5940_v2 = vpop.permute.xlu1 %5939 }
 0x9fd   : > { %6206 = vst.msk [vmem:[#allocation3 + $0x138] sm:$0xff] %vm1958_vm9, %v6130_v21  ;;  %v6326_v28 = vpop.permute.xlu2 %6325  ;;  %v6447_v49 = vld [vmem:[#allocation3 + $0x120] sm:$0xff] }
 0x9fe   : > { %6398 = vst.msk [vmem:[#allocation3 + $0x138] sm:$0xff] %vm2151_vm10, %v6322_v8  ;;  %6644 = vmatmul.f32.gmra.mxu1 %v6447_v49 }
 0xa01   : > { %v6725_v31 = vpop.f32.mrf.mxu3 }
 0xa02   : > { %v6726_v19 = vadd.f32 %v6725_v31, %v6613_v42  ;;  %6147 = vrot.lane.b32.xlu0 %v10863_v4, %s11317_s9  ;;  %5957 = vrot.lane.b32.xlu1 %v5864_v39, %s7314_s10 }
 0xa03   : > { %5539 = vrot.lane.b32.xlu2 %v10818_v25, %s11316_s21 }
 0xa04   : > { %6808 = vst.msk [vmem:[%s10752_s18 + $0x38] sm:$0xff] %vm6800_vm12, %v6726_v19  ;;  %v5716_v40 = vpop.permute.xlu0 %5715  ;;  %v5524_v45 = vpop.permute.xlu1 %5523 }
 0xa05   : > { %5812 = vst.msk [vmem:[#allocation3 + $0x148] sm:$0xff] %vm1540_vm7, %v5716_v40  ;;  %v5944_v3 = vpop.permute.xlu2 %5943  ;;  %v6450_v44 = vld [vmem:[#allocation3 + $0x138] sm:$0xff] }
 0xa06   : > { %6015 = vst.msk [vmem:[#allocation3 + $0x148] sm:$0xff] %vm1765_vm8, %v5940_v2  ;;  %6647 = vmatmul.f32.gmra.mxu1 %v6449_v0  ;;  %7084 = vmatmul.msk.f32.gmra.mxu3 %vm2251_vm11, %v6450_v44 }
 0xa07   : > { %6207 = vst.msk [vmem:[#allocation3 + $0x148] sm:$0xff] %vm1958_vm9, %v6132_v33 }
 0xa08   : > { %5599 = vst.msk [vmem:[#allocation3 + $0x140] sm:$0xff] %vm1345_vm5, %v5524_v45 }
 0xa09   : > { %5811 = vst.msk [vmem:[#allocation3 + $0x140] sm:$0xff] %vm1538_vm6, %v5716_v40 }
 0xa0a   : > { %5733 = vrot.lane.b32.xlu0 %v6246_v46, %s7313_s20  ;;  %5541 = vrot.lane.b32.xlu1 %v10827_v27, %s11316_s21  ;;  %v6728_v61 = vpop.f32.mrf.mxu3  ;;  %v6618_v20 = vpop.f32.mrf.mxu1 }
 0xa0b   : > { %6149 = vrot.lane.b32.xlu2 %v10882_v53, %s11317_s9  ;;  %v6729_v52 = vadd.f32 %v6728_v61, %v6616_v12  ;;  %v6619_v18 = vadd.f32 %v10738_v26, %v6618_v20 }
 0xa0c   : > { %v6324_v47 = vpop.permute.xlu0 %6323  ;;  %v6134_v24 = vpop.permute.xlu1 %6133 }
 0xa0d   : > { %6809 = vst.msk [vmem:[%s10752_s18 + $0x40] sm:$0xff] %vm6800_vm12, %v6729_v52  ;;  %v5528_v58 = vpop.permute.xlu2 %5527 }
 0xa0e   : > { %6399 = vst.msk [vmem:[#allocation3 + $0x148] sm:$0xff] %vm2151_vm10, %v6324_v47 }
 0xa0f   : > { %5601 = vst.msk [vmem:[#allocation3 + $0x160] sm:$0xff] %vm1345_vm5, %v5528_v58 }
 0xa10   : > { %v6451_v16 = vld [vmem:[#allocation3 + $0x140] sm:$0xff] }
 0xa11   : > { %6650 = vmatmul.f32.gmra.mxu1 %v6451_v16 }
 0xa12   : > { %6341 = vrot.lane.b32.xlu0 %v6248_v51, %s11311_s17  ;;  %6151 = vrot.lane.b32.xlu1 %v6057_v9, %s11317_s9  ;;  %v6621_v25 = vpop.f32.mrf.mxu1 }
 0xa13   : > { %5735 = vrot.lane.b32.xlu2 %v6247_v60, %s7313_s20  ;;  %v6622_v38 = vadd.f32 %v10738_v26, %v6621_v25 }
 0xa14   : > { %v5942_v59 = vpop.permute.xlu0 %5941  ;;  %v5720_v43 = vpop.permute.xlu1 %5719 }
 0xa15   : > { %6016 = vst.msk [vmem:[#allocation3 + $0x158] sm:$0xff] %vm1765_vm8, %v5942_v59  ;;  %v6138_v32 = vpop.permute.xlu2 %6137  ;;  %v6452_v29 = vld [vmem:[#allocation3 + $0x148] sm:$0xff] }
 0xa16   : > { %6208 = vst.msk [vmem:[#allocation3 + $0x158] sm:$0xff] %vm1958_vm9, %v6134_v24  ;;  %7085 = vmatmul.msk.f32.gmra.mxu3 %vm2251_vm11, %v6452_v29 }
 0xa17   : > { %6400 = vst.msk [vmem:[#allocation3 + $0x158] sm:$0xff] %vm2151_vm10, %v6326_v28 }
 0xa18   : > { %5815 = vst.msk [vmem:[#allocation3 + $0x160] sm:$0xff] %vm1538_vm6, %v5720_v43  ;;  %v6731_v15 = vpop.f32.mrf.mxu3 }
 0xa19   : > { %5816 = vst.msk [vmem:[#allocation3 + $0x168] sm:$0xff] %vm1540_vm7, %v5720_v43  ;;  %v6732_v6 = vadd.f32 %v6731_v15, %v6619_v18 }
 0xa1a   : > { %6017 = vst.msk [vmem:[#allocation3 + $0x168] sm:$0xff] %vm1765_vm8, %v5944_v3  ;;  %5959 = vrot.lane.b32.xlu0 %v5865_v35, %s7314_s10  ;;  %5737 = vrot.lane.b32.xlu1 %v6248_v51, %s7313_s20  ;;  %v6624_v33 = vpop.f32.mrf.mxu1  ;;  %s7098_s20 = sshll.u32 %s7290_s27, 5  ;;  %s6834_s27 = scalar_lea.sflag [#allocation5], %s361_s13 }
 0xa1b   : > { %6810 = vst.msk [vmem:[%s10752_s18 + $0x48] sm:$0xff] %vm6800_vm12, %v6732_v6  ;;  %6343 = vrot.lane.b32.xlu2 %v6249_v14, %s11311_s17  ;;  %v6625_v10 = vadd.f32 %v10738_v26, %v6624_v33 }
 0xa1c   : > { %v5526_v36 = vpop.permute.xlu0 %5525  ;;  %v6328_v37 = vpop.permute.xlu1 %6327 }
 0xa1d   : > { %5600 = vst.msk [vmem:[#allocation3 + $0x150] sm:$0xff] %vm1345_vm5, %v5526_v36  ;;  %v10907_v57 = vpop.permute.xlu2 %5723 }
 0xa1e   : > { %5813 = vst.msk [vmem:[#allocation3 + $0x150] sm:$0xff] %vm1538_vm6, %v10846_v11  ;;  %v6454_v50 = vld [vmem:[#allocation3 + $0x158] sm:$0xff] }
 0xa1f   : > { %5820 = vst.msk [vmem:[#allocation3 + $0x188] sm:$0xff] %vm1540_vm7, %v10907_v57  ;;  %7086 = vmatmul.msk.f32.gmra.mxu3 %vm2251_vm11, %v6454_v50  ;;  %v6455_v63 = vld [vmem:[#allocation3 + $0x160] sm:$0xff] }
 0xa21   : > { %v6734_v27 = vpop.f32.mrf.mxu3 }
 0xa22   : > { %v6735_v56 = vadd.f32 %v6734_v27, %v6622_v38  ;;  %5543 = vrot.lane.b32.xlu0 %v10863_v4, %s11316_s21  ;;  %6345 = vrot.lane.b32.xlu1 %v6250_v23, %s11311_s17 }
 0xa23   : > { %5961 = vrot.lane.b32.xlu2 %v5866_v55, %s7314_s10  ;;  %s7099_s10 = sshll.u32 %s7294_s28, 6 }
 0xa24   : > { %6811 = vst.msk [vmem:[%s10752_s18 + $0x50] sm:$0xff] %vm6800_vm12, %v6735_v56  ;;  %v6136_v48 = vpop.permute.xlu0 %6135  ;;  %v5946_v17 = vpop.permute.xlu1 %5945  ;;  %s6845_s17 = sadd.s32 %s7099_s10, %s7098_s20 }
 0xa25   : > { %6209 = vst.msk [vmem:[#allocation3 + $0x168] sm:$0xff] %vm1958_vm9, %v6136_v48  ;;  %v6332_v22 = vpop.permute.xlu2 %6331  ;;  %v6453_v34 = vld [vmem:[#allocation3 + $0x150] sm:$0xff] }
 0xa26   : > { %6401 = vst.msk [vmem:[#allocation3 + $0x168] sm:$0xff] %vm2151_vm10, %v6328_v37  ;;  %6653 = vmatmul.f32.gmra.mxu1 %v6453_v34 }
 0xa2a   : > { %6153 = vrot.lane.b32.xlu0 %v6058_v62, %s11317_s9  ;;  %v6737_v46 = vpop.f32.mrf.mxu3  ;;  %v6627_v41 = vpop.f32.mrf.mxu1 }
 0xa2b   : > { %5545 = vrot.lane.b32.xlu2 %v10882_v53, %s11316_s21  ;;  %v6738_v54 = vadd.f32 %v6737_v46, %v6625_v10  ;;  %v6628_v21 = vadd.f32 %v10738_v26, %v6627_v41  ;;  %s7100_s21 = sshll.u32 %s6845_s17, 3 }
 0xa2c   : > { %v5722_v8 = vpop.permute.xlu0 %5721  ;;  %v5530_v11 = vpop.permute.xlu1 %5529  ;;  %s6847_s0 = scalar_lea.hbm %s11106_s7, %s7100_s21  ;;  %s7232_s21 = scalar_lea.hbm %s11106_s7, 1024 }
 0xa2d   : > { %6812 = vst.msk [vmem:[%s10752_s18 + $0x58] sm:$0xff] %vm6800_vm12, %v6738_v54  ;;  %v5950_v13 = vpop.permute.xlu2 %5949  ;;  %v6456_v7 = vld [vmem:[#allocation3 + $0x168] sm:$0xff]  ;;  %s6850_s22 = sshll.u32 %s6847_s0, 4  ;;  %s6851_s22 = int_to_ptr.hbm [resolvable:$true] %s6850_s22 }
 0xa2e   : > { %5818 = vst.msk [vmem:[#allocation3 + $0x178] sm:$0xff] %vm1540_vm7, %v5722_v8  ;;  %6656 = vmatmul.f32.gmra.mxu1 %v6455_v63  ;;  %7087 = vmatmul.msk.f32.gmra.mxu3 %vm2251_vm11, %v6456_v7  ;;  %s7226_s28 = sshra.s32 %s6851_s22, 4  ;;  %s7227_s28 = int_to_ptr.hbm [resolvable:$true] %s7226_s28 }
 0xa2f   : > { %6018 = vst.msk [vmem:[#allocation3 + $0x178] sm:$0xff] %vm1765_vm8, %v5946_v17  ;;  %s7228_s20 = scalar_lea.hbm %s7227_s28, 256  ;;  %p7233_p4 = scmp.lt.s32.totalorder %s7227_s28, %s11106_s7 }
 0xa30   : > { %6210 = vst.msk [vmem:[#allocation3 + $0x178] sm:$0xff] %vm1958_vm9, %v6138_v32  ;;  %p7229_p0 = scmp.ne.s32.totalorder %s7227_s28, %s7228_s20  ;;  %p7234_p5 = scmp.lt.s32.totalorder %s7232_s21, %s7228_s20 }
 0xa31   : > { %5602 = vst.msk [vmem:[#allocation3 + $0x170] sm:$0xff] %vm1345_vm5, %v5530_v11 }
 0xa32   : > { %5817 = vst.msk [vmem:[#allocation3 + $0x170] sm:$0xff] %vm1538_vm6, %v5722_v8  ;;  %v6630_v42 = vpop.f32.mrf.mxu1  ;;  %p7230_p1 = pnand %p7229_p0, %p7410_p3  ;;  %p7235_p6 = por %p7234_p5, %p7233_p4 }
 0xa33   : > { %v6631_v40 = vadd.f32 %v10738_v26, %v6630_v42 }
 0xa34   : > { %v6330_v60 = vpop.permute.xlu0 %6329  ;;  %v6140_v30 = vpop.permute.xlu1 %6139  ;;  %p7231_p2 = pneg %p7230_p1 }
 0xa35   : > { %6402 = vst.msk [vmem:[#allocation3 + $0x178] sm:$0xff] %vm2151_vm10, %v6330_v60  ;;  %v5534_v5 = vpop.permute.xlu2 %5533 }
 0xa36   : > { %5604 = vst.msk [vmem:[#allocation3 + $0x190] sm:$0xff] %vm1345_vm5, %v5534_v5  ;;  %p7236_p7 = pnand %p7235_p6, %p7231_p2 }
 0xa38   : > { %v6740_v2 = vpop.f32.mrf.mxu3 }
 0xa39   : > { %v6457_v28 = vld [vmem:[#allocation3 + $0x170] sm:$0xff]  ;;  %v6741_v49 = vadd.f32 %v6740_v2, %v6628_v21 }
 0xa3a   : > { %6659 = vmatmul.f32.gmra.mxu1 %v6457_v28  ;;  %v6633_v12 = vpop.f32.mrf.mxu1 }
 0xa3b   : > { %6813 = vst.msk [vmem:[%s10752_s18 + $0x60] sm:$0xff] %vm6800_vm12, %v6741_v49  ;;  %v6634_v61 = vadd.f32 %v10738_v26, %v6633_v12 }
 0xa3c   : > { %v5948_v31 = vpop.permute.xlu0 %5947  ;;  %v5726_v4 = vpop.permute.xlu1 %5725  ;;  %v6458_v39 = vld [vmem:[#allocation3 + $0x178] sm:$0xff] }
 0xa3d   : > { %6019 = vst.msk [vmem:[#allocation3 + $0x188] sm:$0xff] %vm1765_vm8, %v5948_v31  ;;  %v6144_v19 = vpop.permute.xlu2 %6143  ;;  %7088 = vmatmul.msk.f32.gmra.mxu3 %vm2251_vm11, %v6458_v39 }
 0xa3e   : > { %6211 = vst.msk [vmem:[#allocation3 + $0x188] sm:$0xff] %vm1958_vm9, %v6140_v30 }
 0xa3f   : > { %6403 = vst.msk [vmem:[#allocation3 + $0x188] sm:$0xff] %vm2151_vm10, %v6332_v22 }
 0xa40   : > { %5821 = vst.msk [vmem:[#allocation3 + $0x190] sm:$0xff] %vm1538_vm6, %v5726_v4 }
 0xa41   : > { %5822 = vst.msk [vmem:[#allocation3 + $0x198] sm:$0xff] %vm1540_vm7, %v5726_v4  ;;  %v6743_v45 = vpop.f32.mrf.mxu3 }
 0xa42   : > { %6020 = vst.msk [vmem:[#allocation3 + $0x198] sm:$0xff] %vm1765_vm8, %v5950_v13  ;;  %v6744_v3 = vadd.f32 %v6743_v45, %v6631_v40 }
 0xa44   : > { %6814 = vst.msk [vmem:[%s10752_s18 + $0x68] sm:$0xff] %vm6800_vm12, %v6744_v3  ;;  %v5532_v0 = vpop.permute.xlu0 %5531  ;;  %v6334_v44 = vpop.permute.xlu1 %6333 }
 0xa45   : > { %5603 = vst.msk [vmem:[#allocation3 + $0x180] sm:$0xff] %vm1345_vm5, %v5532_v0  ;;  %v5730_v1 = vpop.permute.xlu2 %5729 }
 0xa46   : > { %5819 = vst.msk [vmem:[#allocation3 + $0x180] sm:$0xff] %vm1538_vm6, %v10907_v57  ;;  %v6460_v53 = vld [vmem:[#allocation3 + $0x188] sm:$0xff] }
 0xa47   : > { %5826 = vst.msk [vmem:[#allocation3 + $0x1b8] sm:$0xff] %vm1540_vm7, %v5730_v1  ;;  %7089 = vmatmul.msk.f32.gmra.mxu3 %vm2251_vm11, %v6460_v53  ;;  %v6461_v32 = vld [vmem:[#allocation3 + $0x190] sm:$0xff] }
 0xa4a   : > { %v6746_v52 = vpop.f32.mrf.mxu3  ;;  %v6636_v20 = vpop.f32.mrf.mxu1 }
 0xa4b   : > { %v6747_v47 = vadd.f32 %v6746_v52, %v6634_v61  ;;  %v6637_v18 = vadd.f32 %v10738_v26, %v6636_v20 }
 0xa4c   : > { %v6142_v24 = vpop.permute.xlu0 %6141  ;;  %v5952_v58 = vpop.permute.xlu1 %5951 }
 0xa4d   : > { %6815 = vst.msk [vmem:[%s10752_s18 + $0x70] sm:$0xff] %vm6800_vm12, %v6747_v47  ;;  %v6338_v9 = vpop.permute.xlu2 %6337  ;;  %v6459_v16 = vld [vmem:[#allocation3 + $0x180] sm:$0xff] }
 0xa4e   : > { %6212 = vst.msk [vmem:[#allocation3 + $0x198] sm:$0xff] %vm1958_vm9, %v6142_v24  ;;  %6662 = vmatmul.f32.gmra.mxu1 %v6459_v16 }
 0xa4f   : > { %6404 = vst.msk [vmem:[#allocation3 + $0x198] sm:$0xff] %vm2151_vm10, %v6334_v44 }
 0xa52   : > { %v6639_v25 = vpop.f32.mrf.mxu1 }
 0xa53   : > { %v6640_v37 = vadd.f32 %v10738_v26, %v6639_v25 }
 0xa54   : > { %v5728_v51 = vpop.permute.xlu0 %5727  ;;  %v5536_v59 = vpop.permute.xlu1 %5535 }
 0xa55   : > { %5824 = vst.msk [vmem:[#allocation3 + $0x1a8] sm:$0xff] %vm1540_vm7, %v5728_v51  ;;  %v5956_v43 = vpop.permute.xlu2 %5955 }
 0xa56   : > { %6021 = vst.msk [vmem:[#allocation3 + $0x1a8] sm:$0xff] %vm1765_vm8, %v5952_v58  ;;  %6665 = vmatmul.f32.gmra.mxu1 %v6461_v32  ;;  %v6462_v29 = vld [vmem:[#allocation3 + $0x198] sm:$0xff] }
 0xa57   : > { %6213 = vst.msk [vmem:[#allocation3 + $0x1a8] sm:$0xff] %vm1958_vm9, %v6144_v19  ;;  %7090 = vmatmul.msk.f32.gmra.mxu3 %vm2251_vm11, %v6462_v29 }
 0xa58   : > { %5605 = vst.msk [vmem:[#allocation3 + $0x1a0] sm:$0xff] %vm1345_vm5, %v5536_v59 }
 0xa59   : > { %5823 = vst.msk [vmem:[#allocation3 + $0x1a0] sm:$0xff] %vm1538_vm6, %v5728_v51  ;;  %v6749_v35 = vpop.f32.mrf.mxu3 }
 0xa5a   : > { %v6750_v15 = vadd.f32 %v6749_v35, %v6637_v18 }
 0xa5c   : > { %6816 = vst.msk [vmem:[%s10752_s18 + $0x78] sm:$0xff] %vm6800_vm12, %v6750_v15  ;;  %v6336_v14 = vpop.permute.xlu0 %6335  ;;  %v6146_v6 = vpop.permute.xlu1 %6145 }
 0xa5d   : > { %6405 = vst.msk [vmem:[#allocation3 + $0x1a8] sm:$0xff] %vm2151_vm10, %v6336_v14  ;;  %v5540_v36 = vpop.permute.xlu2 %5539 }
 0xa5e   : > { %5607 = vst.msk [vmem:[#allocation3 + $0x1c0] sm:$0xff] %vm1345_vm5, %v5540_v36 }
 0xa60   : > { %v6463_v57 = vld [vmem:[#allocation3 + $0x1a0] sm:$0xff] }
 0xa61   : > { %6668 = vmatmul.f32.gmra.mxu1 %v6463_v57  ;;  %v6752_v50 = vpop.f32.mrf.mxu3 }
 0xa62   : > { %v6753_v23 = vadd.f32 %v6752_v50, %v6640_v37 }
 0xa64   : > { %6817 = vst.msk [vmem:[%s10752_s18 + $0x80] sm:$0xff] %vm6800_vm12, %v6753_v23  ;;  %v5954_v38 = vpop.permute.xlu0 %5953  ;;  %v5732_v55 = vpop.permute.xlu1 %5731  ;;  %v6464_v27 = vld [vmem:[#allocation3 + $0x1a8] sm:$0xff] }
 0xa65   : > { %6022 = vst.msk [vmem:[#allocation3 + $0x1b8] sm:$0xff] %vm1765_vm8, %v5954_v38  ;;  %v6150_v56 = vpop.permute.xlu2 %6149  ;;  %7091 = vmatmul.msk.f32.gmra.mxu3 %vm2251_vm11, %v6464_v27 }
 0xa66   : > { %6214 = vst.msk [vmem:[#allocation3 + $0x1b8] sm:$0xff] %vm1958_vm9, %v6146_v6  ;;  %v6642_v48 = vpop.f32.mrf.mxu1 }
 0xa67   : > { %6406 = vst.msk [vmem:[#allocation3 + $0x1b8] sm:$0xff] %vm2151_vm10, %v6338_v9  ;;  %v6643_v62 = vadd.f32 %v10738_v26, %v6642_v48 }
 0xa68   : > { %5827 = vst.msk [vmem:[#allocation3 + $0x1c0] sm:$0xff] %vm1538_vm6, %v5732_v55 }
 0xa69   : > { %5828 = vst.msk [vmem:[#allocation3 + $0x1c8] sm:$0xff] %vm1540_vm7, %v5732_v55 }
 0xa6a   : > { %6023 = vst.msk [vmem:[#allocation3 + $0x1c8] sm:$0xff] %vm1765_vm8, %v5956_v43 }
 0xa6c   : > { %v5538_v17 = vpop.permute.xlu0 %5537  ;;  %v6340_v22 = vpop.permute.xlu1 %6339 }
 0xa6d   : > { %5606 = vst.msk [vmem:[#allocation3 + $0x1b0] sm:$0xff] %vm1345_vm5, %v5538_v17  ;;  %v5736_v34 = vpop.permute.xlu2 %5735 }
 0xa6e   : > { %5825 = vst.msk [vmem:[#allocation3 + $0x1b0] sm:$0xff] %vm1538_vm6, %v5730_v1  ;;  %v6466_v33 = vld [vmem:[#allocation3 + $0x1b8] sm:$0xff] }
 0xa6f   : > { %5832 = vst.msk [vmem:[#allocation3 + $0x1e8] sm:$0xff] %vm1540_vm7, %v5736_v34  ;;  %7092 = vmatmul.msk.f32.gmra.mxu3 %vm2251_vm11, %v6466_v33  ;;  %v6467_v21 = vld [vmem:[#allocation3 + $0x1c0] sm:$0xff] }
 0xa70   : > { %v6755_v10 = vpop.f32.mrf.mxu3 }
 0xa71   : > { %v6756_v46 = vadd.f32 %v6755_v10, %v6643_v62 }
 0xa73   : > { %6818 = vst.msk [vmem:[%s10752_s18 + $0x88] sm:$0xff] %vm6800_vm12, %v6756_v46 }
 0xa74   : > { %v6148_v54 = vpop.permute.xlu0 %6147  ;;  %v5958_v8 = vpop.permute.xlu1 %5957 }
 0xa75   : > { %6215 = vst.msk [vmem:[#allocation3 + $0x1c8] sm:$0xff] %vm1958_vm9, %v6148_v54  ;;  %v6344_v11 = vpop.permute.xlu2 %6343  ;;  %v6465_v13 = vld [vmem:[#allocation3 + $0x1b0] sm:$0xff] }
 0xa76   : > { %6407 = vst.msk [vmem:[#allocation3 + $0x1c8] sm:$0xff] %vm2151_vm10, %v6340_v22  ;;  %6671 = vmatmul.f32.gmra.mxu1 %v6465_v13 }
 0xa7b   : > { %v6645_v63 = vpop.f32.mrf.mxu1  ;;  %v6758_v30 = vpop.f32.mrf.mxu3 }
 0xa7c   : > { %v6646_v7 = vadd.f32 %v10738_v26, %v6645_v63  ;;  %v5734_v41 = vpop.permute.xlu0 %5733  ;;  %v5542_v60 = vpop.permute.xlu1 %5541 }
 0xa7d   : > { %5830 = vst.msk [vmem:[#allocation3 + $0x1d8] sm:$0xff] %vm1540_vm7, %v5734_v41  ;;  %v5962_v5 = vpop.permute.xlu2 %5961  ;;  %v6468_v2 = vld [vmem:[#allocation3 + $0x1c8] sm:$0xff] }
 0xa7e   : > { %v6759_v28 = vadd.f32 %v6758_v30, %v6646_v7  ;;  %6024 = vst.msk [vmem:[#allocation3 + $0x1d8] sm:$0xff] %vm1765_vm8, %v5958_v8  ;;  %6674 = vmatmul.f32.gmra.mxu1 %v6467_v21  ;;  %7093 = vmatmul.msk.f32.gmra.mxu3 %vm2251_vm11, %v6468_v2 }
 0xa7f   : > { %6216 = vst.msk [vmem:[#allocation3 + $0x1d8] sm:$0xff] %vm1958_vm9, %v6150_v56 }
 0xa80   : > { %6819 = vst.msk [vmem:[%s10752_s18 + $0x90] sm:$0xff] %vm6800_vm12, %v6759_v28 }
 0xa81   : > { %5608 = vst.msk [vmem:[#allocation3 + $0x1d0] sm:$0xff] %vm1345_vm5, %v5542_v60 }
 0xa82   : > { %5829 = vst.msk [vmem:[#allocation3 + $0x1d0] sm:$0xff] %vm1538_vm6, %v5734_v41 }
 0xa83   : > { %v6648_v31 = vpop.f32.mrf.mxu1 }
 0xa84   : > { %v6342_v49 = vpop.permute.xlu0 %6341  ;;  %v6152_v42 = vpop.permute.xlu1 %6151  ;;  %v6649_v39 = vadd.f32 %v10738_v26, %v6648_v31 }
 0xa85   : > { %6408 = vst.msk [vmem:[#allocation3 + $0x1d8] sm:$0xff] %vm2151_vm10, %v6342_v49  ;;  %v5546_v4 = vpop.permute.xlu2 %5545 }
 0xa86   : > { %5610 = vst.msk [vmem:[#allocation3 + $0x1f0] sm:$0xff] %vm1345_vm5, %v5546_v4 }
 0xa89   : > { %v6469_v19 = vld [vmem:[#allocation3 + $0x1d0] sm:$0xff]  ;;  %v6761_v40 = vpop.f32.mrf.mxu3 }
 0xa8a   : > { %6677 = vmatmul.f32.gmra.mxu1 %v6469_v19  ;;  %v6762_v45 = vadd.f32 %v6761_v40, %v6649_v39 }
 0xa8c   : > { %6820 = vst.msk [vmem:[%s10752_s18 + $0x98] sm:$0xff] %vm6800_vm12, %v6762_v45  ;;  %v5960_v3 = vpop.permute.xlu0 %5959  ;;  %v6470_v0 = vld [vmem:[#allocation3 + $0x1d8] sm:$0xff]  ;;  %v5738_v44 = vpop.permute.xlu1 %5737 }
 0xa8d   : > { %6025 = vst.msk [vmem:[#allocation3 + $0x1e8] sm:$0xff] %vm1765_vm8, %v5960_v3  ;;  %7094 = vmatmul.msk.f32.gmra.mxu3 %vm2251_vm11, %v6470_v0 }
 0xa8e   : > { %6217 = vst.msk [vmem:[#allocation3 + $0x1e8] sm:$0xff] %vm1958_vm9, %v6152_v42  ;;  %v6651_v12 = vpop.f32.mrf.mxu1 }
 0xa8f   : > { %6409 = vst.msk [vmem:[#allocation3 + $0x1e8] sm:$0xff] %vm2151_vm10, %v6344_v11  ;;  %v6652_v61 = vadd.f32 %v10738_v26, %v6651_v12 }
 0xa90   : > { %5833 = vst.msk [vmem:[#allocation3 + $0x1f0] sm:$0xff] %vm1538_vm6, %v5738_v44 }
 0xa91   : > { %5834 = vst.msk [vmem:[#allocation3 + $0x1f8] sm:$0xff] %vm1540_vm7, %v5738_v44 }
 0xa92   : > { %6026 = vst.msk [vmem:[#allocation3 + $0x1f8] sm:$0xff] %vm1765_vm8, %v5962_v5 }
 0xa94   : > { %v5544_v1 = vpop.permute.xlu0 %5543  ;;  %v6346_v24 = vpop.permute.xlu1 %6345 }
 0xa95   : > { %5609 = vst.msk [vmem:[#allocation3 + $0x1e0] sm:$0xff] %vm1345_vm5, %v5544_v1 }
 0xa96   : > { %5831 = vst.msk [vmem:[#allocation3 + $0x1e0] sm:$0xff] %vm1538_vm6, %v5736_v34  ;;  %v6472_v53 = vld [vmem:[#allocation3 + $0x1e8] sm:$0xff] }
 0xa97   : > { %7095 = vmatmul.msk.f32.gmra.mxu3 %vm2251_vm11, %v6472_v53  ;;  %v6473_v59 = vld [vmem:[#allocation3 + $0x1f0] sm:$0xff] }
 0xa99   : > { %v6764_v52 = vpop.f32.mrf.mxu3 }
 0xa9a   : > { %v6765_v47 = vadd.f32 %v6764_v52, %v6652_v61 }
 0xa9c   : > { %6821 = vst.msk [vmem:[%s10752_s18 + $0xa0] sm:$0xff] %vm6800_vm12, %v6765_v47  ;;  %v6154_v58 = vpop.permute.xlu0 %6153 }
 0xa9d   : > { %6218 = vst.msk [vmem:[#allocation3 + $0x1f8] sm:$0xff] %vm1958_vm9, %v6154_v58  ;;  %v6471_v9 = vld [vmem:[#allocation3 + $0x1e0] sm:$0xff] }
 0xa9e   : > { %6410 = vst.msk [vmem:[#allocation3 + $0x1f8] sm:$0xff] %vm2151_vm10, %v6346_v24  ;;  %6680 = vmatmul.f32.gmra.mxu1 %v6471_v9 }
 0xaa2   : > { %v6767_v51 = vpop.f32.mrf.mxu3 }
 0xaa3   : > { %v6654_v16 = vpop.f32.mrf.mxu1 }
 0xaa4   : > { %v6655_v20 = vadd.f32 %v10738_v26, %v6654_v16 }
 0xaa5   : > { %v6474_v43 = vld [vmem:[#allocation3 + $0x1f8] sm:$0xff] }
 0xaa6   : > { %v6768_v32 = vadd.f32 %v6767_v51, %v6655_v20  ;;  %6683 = vmatmul.f32.gmra.mxu1 %v6473_v59  ;;  %7096 = vmatmul.msk.f32.gmra.mxu3 %vm2251_vm11, %v6474_v43 }
 0xaa8   : > { %6822 = vst.msk [vmem:[%s10752_s18 + $0xa8] sm:$0xff] %vm6800_vm12, %v6768_v32 }
 0xaab   : > { %v6657_v29 = vpop.f32.mrf.mxu1 }
 0xaac   : > { %v6658_v18 = vadd.f32 %v10738_v26, %v6657_v29 }
 0xab1   : > { %v6770_v35 = vpop.f32.mrf.mxu3 }
 0xab2   : > { %v6771_v15 = vadd.f32 %v6770_v35, %v6658_v18 }
 0xab4   : > { %6823 = vst.msk [vmem:[%s10752_s18 + $0xb0] sm:$0xff] %vm6800_vm12, %v6771_v15 }
 0xab7   : > { %v6660_v14 = vpop.f32.mrf.mxu1 }
 0xab8   : > { %v6661_v6 = vadd.f32 %v10738_v26, %v6660_v14 }
 0xac0   : > { %v6773_v25 = vpop.f32.mrf.mxu3 }
 0xac1   : > { %v6774_v36 = vadd.f32 %v6773_v25, %v6661_v6 }
 0xac3   : > { %6824 = vst.msk [vmem:[%s10752_s18 + $0xb8] sm:$0xff] %vm6800_vm12, %v6774_v36 }
 0xaca   : > { %v6776_v50 = vpop.f32.mrf.mxu3 }
 0xacb   : > { %v6663_v37 = vpop.f32.mrf.mxu1 }
 0xacc   : > { %v6664_v57 = vadd.f32 %v10738_v26, %v6663_v37 }
 0xace   : > { %v6777_v23 = vadd.f32 %v6776_v50, %v6664_v57 }
 0xad0   : > { %6825 = vst.msk [vmem:[%s10752_s18 + $0xc0] sm:$0xff] %vm6800_vm12, %v6777_v23 }
 0xad3   : > { %v6666_v38 = vpop.f32.mrf.mxu1 }
 0xad4   : > { %v6667_v55 = vadd.f32 %v10738_v26, %v6666_v38 }
 0xada   : > { %v6779_v27 = vpop.f32.mrf.mxu3 }
 0xadb   : > { %v6780_v56 = vadd.f32 %v6779_v27, %v6667_v55 }
 0xadd   : > { %6826 = vst.msk [vmem:[%s10752_s18 + $0xc8] sm:$0xff] %vm6800_vm12, %v6780_v56 }
 0xade   : > { %v6669_v48 = vpop.f32.mrf.mxu1 }
 0xadf   : > { %v6670_v17 = vadd.f32 %v10738_v26, %v6669_v48 }
 0xae8   : > { %v6782_v22 = vpop.f32.mrf.mxu3 }
 0xae9   : > { %v6783_v34 = vadd.f32 %v6782_v22, %v6670_v17 }
 0xaeb   : > { %6827 = vst.msk [vmem:[%s10752_s18 + $0xd0] sm:$0xff] %vm6800_vm12, %v6783_v34 }
 0xaf2   : > { %v6785_v10 = vpop.f32.mrf.mxu3 }
 0xaf3   : > { %v6672_v33 = vpop.f32.mrf.mxu1 }
 0xaf4   : > { %v6673_v62 = vadd.f32 %v10738_v26, %v6672_v33 }
 0xaf6   : > { %v6786_v46 = vadd.f32 %v6785_v10, %v6673_v62 }
 0xaf8   : > { %6828 = vst.msk [vmem:[%s10752_s18 + $0xd8] sm:$0xff] %vm6800_vm12, %v6786_v46 }
 0xafb   : > { %v6675_v54 = vpop.f32.mrf.mxu1 }
 0xafc   : > { %v6676_v8 = vadd.f32 %v10738_v26, %v6675_v54 }
 0xb01   : > { %v6788_v11 = vpop.f32.mrf.mxu3 }
 0xb02   : > { %v6789_v13 = vadd.f32 %v6788_v11, %v6676_v8 }
 0xb04   : > { %6829 = vst.msk [vmem:[%s10752_s18 + $0xe0] sm:$0xff] %vm6800_vm12, %v6789_v13 }
 0xb07   : > { %v6678_v63 = vpop.f32.mrf.mxu1 }
 0xb08   : > { %v6679_v7 = vadd.f32 %v10738_v26, %v6678_v63 }
 0xb10   : > { %v6791_v41 = vpop.f32.mrf.mxu3 }
 0xb11   : > { %v6792_v60 = vadd.f32 %v6791_v41, %v6679_v7 }
 0xb13   : > { %6830 = vst.msk [vmem:[%s10752_s18 + $0xe8] sm:$0xff] %vm6800_vm12, %v6792_v60 }
 0xb1a   : > { %v6794_v5 = vpop.f32.mrf.mxu3 }
 0xb1b   : > { %v6681_v30 = vpop.f32.mrf.mxu1 }
 0xb1c   : > { %v6682_v21 = vadd.f32 %v10738_v26, %v6681_v30 }
 0xb1e   : > { %v6795_v2 = vadd.f32 %v6794_v5, %v6682_v21 }
 0xb20   : > { %6831 = vst.msk [vmem:[%s10752_s18 + $0xf0] sm:$0xff] %vm6800_vm12, %v6795_v2 }
 0xb23   : > { %v6684_v28 = vpop.f32.mrf.mxu1 }
 0xb24   : > { %v6685_v49 = vadd.f32 %v10738_v26, %v6684_v28 }
 0xb29   : > { %v6797_v42 = vpop.f32.mrf.mxu3 }
 0xb2a   : > { %v6798_v31 = vadd.f32 %v6797_v42, %v6685_v49 }
 0xb2c   : > { %6832 = vst.msk [vmem:[%s10752_s18 + $0xf8] sm:$0xff] %vm6800_vm12, %v6798_v31 }
 0xb2d   : > { %7239 = shalt.err (!%p7236_p7)
}
 0xb2e   : > { %s7317_s13 = smov 128   ;;  %s7318_s18 = smov 8  }
 0xb2f   : > { %7127 = dma.vmem_to_hbm [thread:$0]  (%p7410_p3), %s6849_s16, 4096, %s6851_s22, %s6834_s27, %s7317_s13, %s7317_s13, %s7318_s18  }
 0xb30 PF: > { %p7133_p9 = scmp.ge.s32.totalorder %s7306_s8, 2  ;;  %s6865_s0 = sand.u32 1, %s7278_s24  }
 0xb31   : > { %s6866_s10 = scalar_lea.sflag [#allocation5], %s6865_s0 }
 0xb32   : > { %p7130_p10 = pnand %p7133_p9, %p7419_p8 }
 0xb34   : > { %p7131_p11 = pneg %p7130_p10 }
 0xb36   : > { %7273 = dma.done.wait (%p7131_p11), %s6866_s10, 4096  }
 0xb37   : > { %7275 = vsyncadd (%p7131_p11), %s6866_s10, 4294963200  ;;  %s20_s8 = sadd.s32 1, %s7306_s8   ;;  %s11322_s24 = smov %s7282_s25 }
 0xb38   : > { %p17_p12 = scmp.ge.s32.totalorder %s20_s8, 6   ;;  %s11323_s25 = smov %s7286_s26 }
 0xb39   : > { %s11324_s26 = smov %s7428_s19  ;;  %s11325_s27 = smov %s7298_s29 }
 0xb3a   : > { %s11326_s28 = smov %s7302_s30  ;;  %s11327_s29 = smov %s11330_s11 }
 0xb3b   : > { %s11328_s30 = smov %s11334_s12  ;;  %19 = sbr.rel (!%p17_p12) target bundleno = 7 (0x7), region = 103 }
 0xb40   :  { %6872 = vsyncpa [#allocation5], 1 }
 0xb41   :  { %6874 = vsyncpa [#allocation5 + $0x1], 1 }

</bundles_post_ra>
